<compile_context>
chip_gen: v6e
topology: v6e:2x2x1
jax: 0.10.0
libtpu: 0.0.40
codegen_flags: <defaults>
</compile_context>

<pallas_src>
import functools

import numpy as np
import jax
import jax.numpy as jnp
from jax.experimental import pallas as pl
from jax.experimental.pallas import tpu as pltpu


# ----------------------- fused ResidualBlockDown kernel -----------------------

_PADL = 8  # left zero-pad along W inside the scratch slab (sublane-aligned writes)


def _res_block_kernel(x_ref, w1_ref, b1_ref, w2_ref, b2_ref, w3_ref, b3_ref,
                      pool_ref, o_ref, xpad_ref, hpad_ref, *, H, W, Cin, Cout):
    """One ResidualBlockDown for one batch element, fully in VMEM.

    x_ref:   (1, H, W, Cin)  f32 input block
    w1_ref:  (Cin, Cout)     bf16 1x1 skip conv weight
    w2_ref:  (9, Cin, Cout)  bf16 3x3 conv weight (tap-major, HWIO)
    w3_ref:  (9, Cout, Cout) bf16 3x3 conv weight (tap-major, HWIO)
    b*_ref:  (1, Cout)       f32 biases
    pool_ref:(H/2*W/2, H*W)  f32 0/0.25 matrix: residual-add + 2x2 avgpool
    o_ref:   (1, H/2*W/2, Cout) f32 output block (flat spatial; reshaped outside)
    xpad_ref:(H+2, W+16, Cin)  f32 VMEM scratch, zero-padded relu(x)
    hpad_ref:(H+2, W+16, Cout) f32 VMEM scratch, zero-padded relu(conv2 out)
    """
    x = x_ref[0]                                              # (H, W, Cin) f32

    # --- pad relu(x) into VMEM scratch (interior write is sublane-aligned) ---
    xpad_ref[...] = jnp.zeros_like(xpad_ref)
    xpad_ref[1:H + 1, _PADL:_PADL + W, :] = jnp.maximum(x, 0.0)

    # --- conv2: 3x3, Cin->Cout, on relu(x): 9 shifted MXU accumulates ---
    acc = jnp.zeros((H * W, Cout), jnp.float32)
    for di in range(3):
        for dj in range(3):
            win = xpad_ref[di:di + H, _PADL - 1 + dj:_PADL - 1 + dj + W, :]
            win = win.reshape(H * W, Cin).astype(jnp.bfloat16)
            acc = acc + jnp.dot(win, w2_ref[di * 3 + dj],
                                preferred_element_type=jnp.float32)
    h = jnp.maximum(acc + b2_ref[...], 0.0)                   # bias + relu (pre-act)

    # --- pad relu(conv2) into VMEM scratch for conv3 ---
    hpad_ref[...] = jnp.zeros_like(hpad_ref)
    hpad_ref[1:H + 1, _PADL:_PADL + W, :] = h.reshape(H, W, Cout)

    # --- conv3: 3x3, Cout->Cout ---
    acc2 = jnp.zeros((H * W, Cout), jnp.float32)
    for di in range(3):
        for dj in range(3):
            win = hpad_ref[di:di + H, _PADL - 1 + dj:_PADL - 1 + dj + W, :]
            win = win.reshape(H * W, Cout).astype(jnp.bfloat16)
            acc2 = acc2 + jnp.dot(win, w3_ref[di * 3 + dj],
                                  preferred_element_type=jnp.float32)
    out = acc2 + b3_ref[...]                                  # (H*W, Cout)

    # --- skip path: 1x1 conv on x (no pre-ReLU) ---
    res = jnp.dot(x.reshape(H * W, Cin).astype(jnp.bfloat16), w1_ref[...],
                  preferred_element_type=jnp.float32) + b1_ref[...]

    # --- residual add + 2x2 average pool as one MXU matmul ---
    o_ref[0] = jnp.dot(pool_ref[...], out + res,
                       preferred_element_type=jnp.float32)    # (H/2*W/2, Cout)


@functools.lru_cache(maxsize=None)
def _pool_matrix(H, W):
    """(H/2*W/2, H*W) matrix: row (a*W/2+b) has 0.25 at the four 2x2-window pixels."""
    Hh, Wh = H // 2, W // 2
    P = np.zeros((Hh * Wh, H * W), np.float32)
    for a in range(Hh):
        for b in range(Wh):
            for p in range(2):
                for q in range(2):
                    P[a * Wh + b, (2 * a + p) * W + (2 * b + q)] = 0.25
    return P


def residual_block_down(x, p):
    """x: (B, H, W, Cin) NHWC f32 -> (B, H/2, W/2, Cout) NHWC f32 (one pallas_call)."""
    B, H, W, Cin = x.shape
    Cout = p["w1"].shape[-1]
    Hh, Wh = H // 2, W // 2
    pool = jnp.asarray(_pool_matrix(H, W))

    kernel = functools.partial(_res_block_kernel, H=H, W=W, Cin=Cin, Cout=Cout)
    out_flat = pl.pallas_call(
        kernel,
        out_shape=jax.ShapeDtypeStruct((B, Hh * Wh, Cout), jnp.float32),
        grid=(B,),
        in_specs=[
            pl.BlockSpec((1, H, W, Cin), lambda b: (b, 0, 0, 0)),
            pl.BlockSpec((Cin, Cout), lambda b: (0, 0)),
            pl.BlockSpec((1, Cout), lambda b: (0, 0)),
            pl.BlockSpec((9, Cin, Cout), lambda b: (0, 0, 0)),
            pl.BlockSpec((1, Cout), lambda b: (0, 0)),
            pl.BlockSpec((9, Cout, Cout), lambda b: (0, 0, 0)),
            pl.BlockSpec((1, Cout), lambda b: (0, 0)),
            pl.BlockSpec((Hh * Wh, H * W), lambda b: (0, 0)),
        ],
        out_specs=pl.BlockSpec((1, Hh * Wh, Cout), lambda b: (b, 0, 0)),
        scratch_shapes=[
            pltpu.VMEM((H + 2, W + 16, Cin), jnp.float32),
            pltpu.VMEM((H + 2, W + 16, Cout), jnp.float32),
        ],
        compiler_params=pltpu.CompilerParams(dimension_semantics=("parallel",)),
    )(x, p["w1"], p["b1"], p["w2"], p["b2"], p["w3"], p["b3"], pool)
    return out_flat.reshape(B, Hh, Wh, Cout)


# --------------------------------- head kernel --------------------------------

def _head_kernel(x_ref, ww_ref, w0_ref, b_ref, scores_ref):
    """adaptive_max_pool2d(.,1) -> relu -> <x, embedding + w0> + b."""
    x = x_ref[...]                                    # (B, H*W, E)
    pooled = jnp.max(x, axis=1)                       # (B, E)
    pooled = jnp.maximum(pooled, 0.0)                 # F.relu
    www = ww_ref[...] + w0_ref[...]                   # (B, E)
    s = jnp.sum(pooled * www, axis=1, keepdims=True)  # (B, 1)
    scores_ref[...] = s + b_ref[0]


def discriminator_head(x_nhwc, ww, w0, b_scalar):
    B, H, W, E = x_nhwc.shape
    x_flat = x_nhwc.reshape(B, H * W, E)
    scores = pl.pallas_call(
        _head_kernel,
        out_shape=jax.ShapeDtypeStruct((B, 1), jnp.float32),
        in_specs=[
            pl.BlockSpec(memory_space=pltpu.MemorySpace.VMEM),
            pl.BlockSpec(memory_space=pltpu.MemorySpace.VMEM),
            pl.BlockSpec(memory_space=pltpu.MemorySpace.VMEM),
            pl.BlockSpec(memory_space=pltpu.MemorySpace.SMEM),
        ],
        out_specs=pl.BlockSpec(memory_space=pltpu.MemorySpace.VMEM),
    )(x_flat, ww, w0, jnp.reshape(b_scalar, (1,)).astype(jnp.float32))
    return scores[:, 0]


# ------------------------------ parameters ----------------------------------

def _spectral_normalize(w):
    mat = w.reshape(w.shape[0], -1)
    sigma = np.linalg.svd(mat, compute_uv=False)[0]
    return w / max(sigma, 1e-12)


def make_discriminator_params(V_config, sample_count, embedding_dim, input_dim):
    rng = np.random.RandomState(0)

    def conv_w(cout, cin, k):
        fan_in = cin * k * k
        w = rng.standard_normal((cout, cin, k, k)).astype(np.float32) / np.sqrt(fan_in)
        return _spectral_normalize(w)

    def conv_b(cout):
        return jnp.asarray(
            (rng.standard_normal((cout,)).astype(np.float32) * 0.01).reshape(1, cout))

    blocks = []
    cin = input_dim
    for cout in V_config:
        w1 = conv_w(cout, cin, 1)     # (cout, cin, 1, 1) PyTorch layout
        w2 = conv_w(cout, cin, 3)     # (cout, cin, 3, 3)
        w3 = conv_w(cout, cout, 3)    # (cout, cout, 3, 3)
        blocks.append({
            # MXU-ready layouts prepared once at init; bf16 operands, f32 accum.
            "w1": jnp.asarray(w1.reshape(cout, cin).T, dtype=jnp.bfloat16),
            "w2": jnp.asarray(np.transpose(w2, (2, 3, 1, 0)).reshape(9, cin, cout),
                              dtype=jnp.bfloat16),
            "w3": jnp.asarray(np.transpose(w3, (2, 3, 1, 0)).reshape(9, cout, cout),
                              dtype=jnp.bfloat16),
            "b1": conv_b(cout), "b2": conv_b(cout), "b3": conv_b(cout),
        })
        cin = cout
    assert cin == embedding_dim, "last block channels must equal embedding_dim"

    params = {
        "blocks": blocks,
        "embedding": jnp.asarray(
            rng.standard_normal((sample_count, embedding_dim)).astype(np.float32) * 0.1),
        "w0": jnp.asarray(
            rng.standard_normal((1, embedding_dim)).astype(np.float32) * 0.1),
        "b": jnp.float32(0.0),
    }
    return params


# ------------------------------ forward pass ---------------------------------

def discriminator_forward(params, x_nchw, sample_idx):
    x = jnp.transpose(x_nchw, (0, 2, 3, 1)).astype(jnp.float32)  # NCHW -> NHWC once
    feats_nhwc = []
    for blk in params["blocks"]:
        x = residual_block_down(x, blk)                          # one pallas_call/block
        feats_nhwc.append(x)
    w = x.shape[2]                                               # spatial width (NHWC)
    assert w == 4
    ww = jnp.take(params["embedding"], sample_idx, axis=0)       # nn.Embedding lookup
    scores = discriminator_head(x, ww, params["w0"], params["b"])
    # NCHW feature views produced once, outside the compute chain (PyTorch layout).
    outputs = [jnp.transpose(f, (0, 3, 1, 2)) for f in feats_nhwc]
    outputs.append(scores)
    outputs.append(ww)
    return outputs


# ------------------------- pure-JAX reference forward -------------------------

def _reference_forward(params, x_nchw, sample_idx):
    x = jnp.transpose(x_nchw, (0, 2, 3, 1)).astype(jnp.float32)
    feats = []
    for blk in params["blocks"]:
        Cin, Cout = blk["w2"].shape[1], blk["w2"].shape[2]
        w1 = blk["w1"].astype(jnp.float32)                       # (Cin, Cout)
        w2 = blk["w2"].astype(jnp.float32).reshape(3, 3, Cin, Cout)
        w3 = blk["w3"].astype(jnp.float32).reshape(3, 3, Cout, Cout)

        def conv3(h, w_hwio, bias):
            y = jax.lax.conv_general_dilated(
                h, w_hwio, (1, 1), "SAME",
                dimension_numbers=("NHWC", "HWIO", "NHWC"))
            return y + bias.reshape(1, 1, 1, -1)

        h = jnp.maximum(x, 0.0)
        h = jnp.maximum(conv3(h, w2, blk["b2"][0]), 0.0)
        h = conv3(h, w3, blk["b3"][0])
        res = jnp.einsum("bhwc,cd->bhwd", x, w1) + blk["b1"][0].reshape(1, 1, 1, -1)
        y = h + res
        B, H, W, C = y.shape
        y = y.reshape(B, H // 2, 2, W // 2, 2, C).mean(axis=(2, 4))  # 2x2 avg pool
        feats.append(y)
        x = y
    pooled = jnp.maximum(jnp.max(x, axis=(1, 2)), 0.0)
    ww = jnp.take(params["embedding"], sample_idx, axis=0)
    scores = jnp.sum(pooled * (ww + params["w0"]), axis=1) + params["b"]
    outs = [jnp.transpose(f, (0, 3, 1, 2)) for f in feats]
    outs.append(scores)
    outs.append(ww)
    return outs


# ---------------------------------- main --------------------------------------

if __name__ == "__main__":
    # module hyper-params (small, consistent with the forward's w==4 assert)
    V_config = [32, 64]          # two ResidualBlockDown blocks: 16x16 -> 8x8 -> 4x4
    sample_count = 10
    embedding_dim = 64
    input_dim = 6

    params = make_discriminator_params(V_config, sample_count, embedding_dim, input_dim)

    key = jax.random.PRNGKey(0)
    kx, _ = jax.random.split(key)
    x = jax.random.normal(kx, (2, input_dim, 16, 16), dtype=jnp.float32)  # NCHW input
    sample_idx = jnp.array([3, 7], dtype=jnp.int32)

    fwd = jax.jit(discriminator_forward)
    outs = fwd(params, x, sample_idx)
    outs = jax.block_until_ready(outs)

    # sanity on shapes implied by the PyTorch forward
    assert outs[0].shape == (2, 32, 8, 8)
    assert outs[1].shape == (2, 64, 4, 4)
    assert outs[2].shape == (2,)            # scores
    assert outs[3].shape == (2, 64)         # ww (embedding rows)

    # numerical check against a pure-JAX reference (bf16 activation casts in the
    # kernel vs f32 reference -> loose tolerance)
    refs = jax.block_until_ready(_reference_forward(params, x, sample_idx))
    for got, ref in zip(outs, refs):
        np.testing.assert_allclose(np.asarray(got), np.asarray(ref),
                                   rtol=5e-2, atol=5e-2)

    print("KERNEL_OK")
</pallas_src>

<mosaic_0001>
module attributes {stable_mosaic.version = 11 : i64} {
  func.func @_res_block_kernel(%arg0: i32, %arg1: memref<1x8x8x32xf32, #tpu.memory_space<vmem>>, %arg2: memref<32x64xbf16, #tpu.memory_space<vmem>>, %arg3: memref<1x64xf32, #tpu.memory_space<vmem>>, %arg4: memref<9x32x64xbf16, #tpu.memory_space<vmem>>, %arg5: memref<1x64xf32, #tpu.memory_space<vmem>>, %arg6: memref<9x64x64xbf16, #tpu.memory_space<vmem>>, %arg7: memref<1x64xf32, #tpu.memory_space<vmem>>, %arg8: memref<16x64xf32, #tpu.memory_space<vmem>>, %arg9: memref<1x16x64xf32, #tpu.memory_space<vmem>>, %arg10: memref<10x24x32xf32, #tpu.memory_space<vmem>>, %arg11: memref<10x24x64xf32, #tpu.memory_space<vmem>>) attributes {dimension_semantics = [#tpu.dimension_semantics<parallel>], iteration_bounds = array<i64: 2>, scalar_prefetch = 0 : i64, scratch_operands = 2 : i64, tpu.core_type = #tpu.core_type<tc>, window_params = [{transform_indices = @transform_0, window_bounds = array<i64: 1, 8, 8, 32>}, {pipeline_mode = #tpu.pipeline_mode<synchronous>, transform_indices = @transform_1, window_bounds = array<i64: 32, 64>}, {pipeline_mode = #tpu.pipeline_mode<synchronous>, transform_indices = @transform_2, window_bounds = array<i64: 1, 64>}, {pipeline_mode = #tpu.pipeline_mode<synchronous>, transform_indices = @transform_3, window_bounds = array<i64: 9, 32, 64>}, {pipeline_mode = #tpu.pipeline_mode<synchronous>, transform_indices = @transform_4, window_bounds = array<i64: 1, 64>}, {pipeline_mode = #tpu.pipeline_mode<synchronous>, transform_indices = @transform_5, window_bounds = array<i64: 9, 64, 64>}, {pipeline_mode = #tpu.pipeline_mode<synchronous>, transform_indices = @transform_6, window_bounds = array<i64: 1, 64>}, {pipeline_mode = #tpu.pipeline_mode<synchronous>, transform_indices = @transform_7, window_bounds = array<i64: 16, 64>}, {transform_indices = @transform_8, window_bounds = array<i64: 1, 16, 64>}]} {
    %c0 = arith.constant 0 : index
    %c0_0 = arith.constant 0 : index
    %c0_1 = arith.constant 0 : index
    %c0_2 = arith.constant 0 : index
    %0 = vector.load %arg1[%c0, %c0_0, %c0_1, %c0_2] : memref<1x8x8x32xf32, #tpu.memory_space<vmem>>, vector<1x8x8x32xf32>
    %1 = vector.shape_cast %0 : vector<1x8x8x32xf32> to vector<8x8x32xf32>
    %cst = arith.constant 0.000000e+00 : f32
    %2 = vector.broadcast %cst : f32 to vector<10x24x32xf32>
    %c0_3 = arith.constant 0 : index
    %c0_4 = arith.constant 0 : index
    %c0_5 = arith.constant 0 : index
    %3 = vector.load %arg10[%c0_3, %c0_4, %c0_5] : memref<10x24x32xf32, #tpu.memory_space<vmem>>, vector<10x24x32xf32>
    tpu.vector_store %arg10[%c0_3, %c0_4, %c0_5], %2 {strides = array<i32>} : memref<10x24x32xf32, #tpu.memory_space<vmem>>, vector<10x24x32xf32>,
    %cst_6 = arith.constant 0.000000e+00 : f32
    %4 = vector.broadcast %cst_6 : f32 to vector<8x8x32xf32>
    %5 = arith.maximumf %1, %4 : vector<8x8x32xf32>
    %c1 = arith.constant 1 : index
    %c8 = arith.constant 8 : index
    %c0_7 = arith.constant 0 : index
    %6 = vector.load %arg10[%c1, %c8, %c0_7] : memref<10x24x32xf32, #tpu.memory_space<vmem>>, vector<8x8x32xf32>
    tpu.vector_store %arg10[%c1, %c8, %c0_7], %5 {strides = array<i32>} : memref<10x24x32xf32, #tpu.memory_space<vmem>>, vector<8x8x32xf32>,
    %cst_8 = arith.constant 0.000000e+00 : f32
    %7 = vector.broadcast %cst_8 : f32 to vector<64x64xf32>
    %c0_9 = arith.constant 0 : index
    %c7 = arith.constant 7 : index
    %c0_10 = arith.constant 0 : index
    %8 = vector.load %arg10[%c0_9, %c7, %c0_10] : memref<10x24x32xf32, #tpu.memory_space<vmem>>, vector<8x8x32xf32>
    %9 = vector.shape_cast %8 : vector<8x8x32xf32> to vector<64x32xf32>
    %10 = arith.truncf %9 : vector<64x32xf32> to vector<64x32xbf16>
    %c0_11 = arith.constant 0 : index
    %c0_12 = arith.constant 0 : index
    %c0_13 = arith.constant 0 : index
    %11 = vector.load %arg4[%c0_11, %c0_12, %c0_13] : memref<9x32x64xbf16, #tpu.memory_space<vmem>>, vector<1x32x64xbf16>
    %12 = vector.shape_cast %11 : vector<1x32x64xbf16> to vector<32x64xbf16>
    %cst_14 = arith.constant dense<0.000000e+00> : vector<64x64xf32>
    %13 = tpu.matmul %10, %12, %cst_14 {dimension_numbers = #tpu.dot_dimension_numbers<[1], [0], [0], [1], [0, 0, 1, 1], [], []>} : vector<64x32xbf16>, vector<32x64xbf16>, vector<64x64xf32> -> vector<64x64xf32>
    %14 = arith.addf %7, %13 : vector<64x64xf32>
    %c0_15 = arith.constant 0 : index
    %c8_16 = arith.constant 8 : index
    %c0_17 = arith.constant 0 : index
    %15 = vector.load %arg10[%c0_15, %c8_16, %c0_17] : memref<10x24x32xf32, #tpu.memory_space<vmem>>, vector<8x8x32xf32>
    %16 = vector.shape_cast %15 : vector<8x8x32xf32> to vector<64x32xf32>
    %17 = arith.truncf %16 : vector<64x32xf32> to vector<64x32xbf16>
    %c1_18 = arith.constant 1 : index
    %c0_19 = arith.constant 0 : index
    %c0_20 = arith.constant 0 : index
    %18 = vector.load %arg4[%c1_18, %c0_19, %c0_20] : memref<9x32x64xbf16, #tpu.memory_space<vmem>>, vector<1x32x64xbf16>
    %19 = vector.shape_cast %18 : vector<1x32x64xbf16> to vector<32x64xbf16>
    %cst_21 = arith.constant dense<0.000000e+00> : vector<64x64xf32>
    %20 = tpu.matmul %17, %19, %cst_21 {dimension_numbers = #tpu.dot_dimension_numbers<[1], [0], [0], [1], [0, 0, 1, 1], [], []>} : vector<64x32xbf16>, vector<32x64xbf16>, vector<64x64xf32> -> vector<64x64xf32>
    %21 = arith.addf %14, %20 : vector<64x64xf32>
    %c0_22 = arith.constant 0 : index
    %c9 = arith.constant 9 : index
    %c0_23 = arith.constant 0 : index
    %22 = vector.load %arg10[%c0_22, %c9, %c0_23] : memref<10x24x32xf32, #tpu.memory_space<vmem>>, vector<8x8x32xf32>
    %23 = vector.shape_cast %22 : vector<8x8x32xf32> to vector<64x32xf32>
    %24 = arith.truncf %23 : vector<64x32xf32> to vector<64x32xbf16>
    %c2 = arith.constant 2 : index
    %c0_24 = arith.constant 0 : index
    %c0_25 = arith.constant 0 : index
    %25 = vector.load %arg4[%c2, %c0_24, %c0_25] : memref<9x32x64xbf16, #tpu.memory_space<vmem>>, vector<1x32x64xbf16>
    %26 = vector.shape_cast %25 : vector<1x32x64xbf16> to vector<32x64xbf16>
    %cst_26 = arith.constant dense<0.000000e+00> : vector<64x64xf32>
    %27 = tpu.matmul %24, %26, %cst_26 {dimension_numbers = #tpu.dot_dimension_numbers<[1], [0], [0], [1], [0, 0, 1, 1], [], []>} : vector<64x32xbf16>, vector<32x64xbf16>, vector<64x64xf32> -> vector<64x64xf32>
    %28 = arith.addf %21, %27 : vector<64x64xf32>
    %c1_27 = arith.constant 1 : index
    %c7_28 = arith.constant 7 : index
    %c0_29 = arith.constant 0 : index
    %29 = vector.load %arg10[%c1_27, %c7_28, %c0_29] : memref<10x24x32xf32, #tpu.memory_space<vmem>>, vector<8x8x32xf32>
    %30 = vector.shape_cast %29 : vector<8x8x32xf32> to vector<64x32xf32>
    %31 = arith.truncf %30 : vector<64x32xf32> to vector<64x32xbf16>
    %c3 = arith.constant 3 : index
    %c0_30 = arith.constant 0 : index
    %c0_31 = arith.constant 0 : index
    %32 = vector.load %arg4[%c3, %c0_30, %c0_31] : memref<9x32x64xbf16, #tpu.memory_space<vmem>>, vector<1x32x64xbf16>
    %33 = vector.shape_cast %32 : vector<1x32x64xbf16> to vector<32x64xbf16>
    %cst_32 = arith.constant dense<0.000000e+00> : vector<64x64xf32>
    %34 = tpu.matmul %31, %33, %cst_32 {dimension_numbers = #tpu.dot_dimension_numbers<[1], [0], [0], [1], [0, 0, 1, 1], [], []>} : vector<64x32xbf16>, vector<32x64xbf16>, vector<64x64xf32> -> vector<64x64xf32>
    %35 = arith.addf %28, %34 : vector<64x64xf32>
    %c1_33 = arith.constant 1 : index
    %c8_34 = arith.constant 8 : index
    %c0_35 = arith.constant 0 : index
    %36 = vector.load %arg10[%c1_33, %c8_34, %c0_35] : memref<10x24x32xf32, #tpu.memory_space<vmem>>, vector<8x8x32xf32>
    %37 = vector.shape_cast %36 : vector<8x8x32xf32> to vector<64x32xf32>
    %38 = arith.truncf %37 : vector<64x32xf32> to vector<64x32xbf16>
    %c4 = arith.constant 4 : index
    %c0_36 = arith.constant 0 : index
    %c0_37 = arith.constant 0 : index
    %39 = vector.load %arg4[%c4, %c0_36, %c0_37] : memref<9x32x64xbf16, #tpu.memory_space<vmem>>, vector<1x32x64xbf16>
    %40 = vector.shape_cast %39 : vector<1x32x64xbf16> to vector<32x64xbf16>
    %cst_38 = arith.constant dense<0.000000e+00> : vector<64x64xf32>
    %41 = tpu.matmul %38, %40, %cst_38 {dimension_numbers = #tpu.dot_dimension_numbers<[1], [0], [0], [1], [0, 0, 1, 1], [], []>} : vector<64x32xbf16>, vector<32x64xbf16>, vector<64x64xf32> -> vector<64x64xf32>
    %42 = arith.addf %35, %41 : vector<64x64xf32>
    %c1_39 = arith.constant 1 : index
    %c9_40 = arith.constant 9 : index
    %c0_41 = arith.constant 0 : index
    %43 = vector.load %arg10[%c1_39, %c9_40, %c0_41] : memref<10x24x32xf32, #tpu.memory_space<vmem>>, vector<8x8x32xf32>
    %44 = vector.shape_cast %43 : vector<8x8x32xf32> to vector<64x32xf32>
    %45 = arith.truncf %44 : vector<64x32xf32> to vector<64x32xbf16>
    %c5 = arith.constant 5 : index
    %c0_42 = arith.constant 0 : index
    %c0_43 = arith.constant 0 : index
    %46 = vector.load %arg4[%c5, %c0_42, %c0_43] : memref<9x32x64xbf16, #tpu.memory_space<vmem>>, vector<1x32x64xbf16>
    %47 = vector.shape_cast %46 : vector<1x32x64xbf16> to vector<32x64xbf16>
    %cst_44 = arith.constant dense<0.000000e+00> : vector<64x64xf32>
    %48 = tpu.matmul %45, %47, %cst_44 {dimension_numbers = #tpu.dot_dimension_numbers<[1], [0], [0], [1], [0, 0, 1, 1], [], []>} : vector<64x32xbf16>, vector<32x64xbf16>, vector<64x64xf32> -> vector<64x64xf32>
    %49 = arith.addf %42, %48 : vector<64x64xf32>
    %c2_45 = arith.constant 2 : index
    %c7_46 = arith.constant 7 : index
    %c0_47 = arith.constant 0 : index
    %50 = vector.load %arg10[%c2_45, %c7_46, %c0_47] : memref<10x24x32xf32, #tpu.memory_space<vmem>>, vector<8x8x32xf32>
    %51 = vector.shape_cast %50 : vector<8x8x32xf32> to vector<64x32xf32>
    %52 = arith.truncf %51 : vector<64x32xf32> to vector<64x32xbf16>
    %c6 = arith.constant 6 : index
    %c0_48 = arith.constant 0 : index
    %c0_49 = arith.constant 0 : index
    %53 = vector.load %arg4[%c6, %c0_48, %c0_49] : memref<9x32x64xbf16, #tpu.memory_space<vmem>>, vector<1x32x64xbf16>
    %54 = vector.shape_cast %53 : vector<1x32x64xbf16> to vector<32x64xbf16>
    %cst_50 = arith.constant dense<0.000000e+00> : vector<64x64xf32>
    %55 = tpu.matmul %52, %54, %cst_50 {dimension_numbers = #tpu.dot_dimension_numbers<[1], [0], [0], [1], [0, 0, 1, 1], [], []>} : vector<64x32xbf16>, vector<32x64xbf16>, vector<64x64xf32> -> vector<64x64xf32>
    %56 = arith.addf %49, %55 : vector<64x64xf32>
    %c2_51 = arith.constant 2 : index
    %c8_52 = arith.constant 8 : index
    %c0_53 = arith.constant 0 : index
    %57 = vector.load %arg10[%c2_51, %c8_52, %c0_53] : memref<10x24x32xf32, #tpu.memory_space<vmem>>, vector<8x8x32xf32>
    %58 = vector.shape_cast %57 : vector<8x8x32xf32> to vector<64x32xf32>
    %59 = arith.truncf %58 : vector<64x32xf32> to vector<64x32xbf16>
    %c7_54 = arith.constant 7 : index
    %c0_55 = arith.constant 0 : index
    %c0_56 = arith.constant 0 : index
    %60 = vector.load %arg4[%c7_54, %c0_55, %c0_56] : memref<9x32x64xbf16, #tpu.memory_space<vmem>>, vector<1x32x64xbf16>
    %61 = vector.shape_cast %60 : vector<1x32x64xbf16> to vector<32x64xbf16>
    %cst_57 = arith.constant dense<0.000000e+00> : vector<64x64xf32>
    %62 = tpu.matmul %59, %61, %cst_57 {dimension_numbers = #tpu.dot_dimension_numbers<[1], [0], [0], [1], [0, 0, 1, 1], [], []>} : vector<64x32xbf16>, vector<32x64xbf16>, vector<64x64xf32> -> vector<64x64xf32>
    %63 = arith.addf %56, %62 : vector<64x64xf32>
    %c2_58 = arith.constant 2 : index
    %c9_59 = arith.constant 9 : index
    %c0_60 = arith.constant 0 : index
    %64 = vector.load %arg10[%c2_58, %c9_59, %c0_60] : memref<10x24x32xf32, #tpu.memory_space<vmem>>, vector<8x8x32xf32>
    %65 = vector.shape_cast %64 : vector<8x8x32xf32> to vector<64x32xf32>
    %66 = arith.truncf %65 : vector<64x32xf32> to vector<64x32xbf16>
    %c8_61 = arith.constant 8 : index
    %c0_62 = arith.constant 0 : index
    %c0_63 = arith.constant 0 : index
    %67 = vector.load %arg4[%c8_61, %c0_62, %c0_63] : memref<9x32x64xbf16, #tpu.memory_space<vmem>>, vector<1x32x64xbf16>
    %68 = vector.shape_cast %67 : vector<1x32x64xbf16> to vector<32x64xbf16>
    %cst_64 = arith.constant dense<0.000000e+00> : vector<64x64xf32>
    %69 = tpu.matmul %66, %68, %cst_64 {dimension_numbers = #tpu.dot_dimension_numbers<[1], [0], [0], [1], [0, 0, 1, 1], [], []>} : vector<64x32xbf16>, vector<32x64xbf16>, vector<64x64xf32> -> vector<64x64xf32>
    %70 = arith.addf %63, %69 : vector<64x64xf32>
    %c0_65 = arith.constant 0 : index
    %c0_66 = arith.constant 0 : index
    %71 = vector.load %arg5[%c0_65, %c0_66] : memref<1x64xf32, #tpu.memory_space<vmem>>, vector<1x64xf32>
    %72 = vector.broadcast %71 : vector<1x64xf32> to vector<64x64xf32>
    %73 = arith.addf %70, %72 : vector<64x64xf32>
    %cst_67 = arith.constant 0.000000e+00 : f32
    %74 = vector.broadcast %cst_67 : f32 to vector<64x64xf32>
    %75 = arith.maximumf %73, %74 : vector<64x64xf32>
    %cst_68 = arith.constant 0.000000e+00 : f32
    %76 = vector.broadcast %cst_68 : f32 to vector<10x24x64xf32>
    %c0_69 = arith.constant 0 : index
    %c0_70 = arith.constant 0 : index
    %c0_71 = arith.constant 0 : index
    %77 = vector.load %arg11[%c0_69, %c0_70, %c0_71] : memref<10x24x64xf32, #tpu.memory_space<vmem>>, vector<10x24x64xf32>
    tpu.vector_store %arg11[%c0_69, %c0_70, %c0_71], %76 {strides = array<i32>} : memref<10x24x64xf32, #tpu.memory_space<vmem>>, vector<10x24x64xf32>,
    %78 = vector.shape_cast %75 : vector<64x64xf32> to vector<8x8x64xf32>
    %c1_72 = arith.constant 1 : index
    %c8_73 = arith.constant 8 : index
    %c0_74 = arith.constant 0 : index
    %79 = vector.load %arg11[%c1_72, %c8_73, %c0_74] : memref<10x24x64xf32, #tpu.memory_space<vmem>>, vector<8x8x64xf32>
    tpu.vector_store %arg11[%c1_72, %c8_73, %c0_74], %78 {strides = array<i32>} : memref<10x24x64xf32, #tpu.memory_space<vmem>>, vector<8x8x64xf32>,
    %cst_75 = arith.constant 0.000000e+00 : f32
    %80 = vector.broadcast %cst_75 : f32 to vector<64x64xf32>
    %c0_76 = arith.constant 0 : index
    %c7_77 = arith.constant 7 : index
    %c0_78 = arith.constant 0 : index
    %81 = vector.load %arg11[%c0_76, %c7_77, %c0_78] : memref<10x24x64xf32, #tpu.memory_space<vmem>>, vector<8x8x64xf32>
    %82 = vector.shape_cast %81 : vector<8x8x64xf32> to vector<64x64xf32>
    %83 = arith.truncf %82 : vector<64x64xf32> to vector<64x64xbf16>
    %c0_79 = arith.constant 0 : index
    %c0_80 = arith.constant 0 : index
    %c0_81 = arith.constant 0 : index
    %84 = vector.load %arg6[%c0_79, %c0_80, %c0_81] : memref<9x64x64xbf16, #tpu.memory_space<vmem>>, vector<1x64x64xbf16>
    %85 = vector.shape_cast %84 : vector<1x64x64xbf16> to vector<64x64xbf16>
    %cst_82 = arith.constant dense<0.000000e+00> : vector<64x64xf32>
    %86 = tpu.matmul %83, %85, %cst_82 {dimension_numbers = #tpu.dot_dimension_numbers<[1], [0], [0], [1], [0, 0, 1, 1], [], []>} : vector<64x64xbf16>, vector<64x64xbf16>, vector<64x64xf32> -> vector<64x64xf32>
    %87 = arith.addf %80, %86 : vector<64x64xf32>
    %c0_83 = arith.constant 0 : index
    %c8_84 = arith.constant 8 : index
    %c0_85 = arith.constant 0 : index
    %88 = vector.load %arg11[%c0_83, %c8_84, %c0_85] : memref<10x24x64xf32, #tpu.memory_space<vmem>>, vector<8x8x64xf32>
    %89 = vector.shape_cast %88 : vector<8x8x64xf32> to vector<64x64xf32>
    %90 = arith.truncf %89 : vector<64x64xf32> to vector<64x64xbf16>
    %c1_86 = arith.constant 1 : index
    %c0_87 = arith.constant 0 : index
    %c0_88 = arith.constant 0 : index
    %91 = vector.load %arg6[%c1_86, %c0_87, %c0_88] : memref<9x64x64xbf16, #tpu.memory_space<vmem>>, vector<1x64x64xbf16>
    %92 = vector.shape_cast %91 : vector<1x64x64xbf16> to vector<64x64xbf16>
    %cst_89 = arith.constant dense<0.000000e+00> : vector<64x64xf32>
    %93 = tpu.matmul %90, %92, %cst_89 {dimension_numbers = #tpu.dot_dimension_numbers<[1], [0], [0], [1], [0, 0, 1, 1], [], []>} : vector<64x64xbf16>, vector<64x64xbf16>, vector<64x64xf32> -> vector<64x64xf32>
    %94 = arith.addf %87, %93 : vector<64x64xf32>
    %c0_90 = arith.constant 0 : index
    %c9_91 = arith.constant 9 : index
    %c0_92 = arith.constant 0 : index
    %95 = vector.load %arg11[%c0_90, %c9_91, %c0_92] : memref<10x24x64xf32, #tpu.memory_space<vmem>>, vector<8x8x64xf32>
    %96 = vector.shape_cast %95 : vector<8x8x64xf32> to vector<64x64xf32>
    %97 = arith.truncf %96 : vector<64x64xf32> to vector<64x64xbf16>
    %c2_93 = arith.constant 2 : index
    %c0_94 = arith.constant 0 : index
    %c0_95 = arith.constant 0 : index
    %98 = vector.load %arg6[%c2_93, %c0_94, %c0_95] : memref<9x64x64xbf16, #tpu.memory_space<vmem>>, vector<1x64x64xbf16>
    %99 = vector.shape_cast %98 : vector<1x64x64xbf16> to vector<64x64xbf16>
    %cst_96 = arith.constant dense<0.000000e+00> : vector<64x64xf32>
    %100 = tpu.matmul %97, %99, %cst_96 {dimension_numbers = #tpu.dot_dimension_numbers<[1], [0], [0], [1], [0, 0, 1, 1], [], []>} : vector<64x64xbf16>, vector<64x64xbf16>, vector<64x64xf32> -> vector<64x64xf32>
    %101 = arith.addf %94, %100 : vector<64x64xf32>
    %c1_97 = arith.constant 1 : index
    %c7_98 = arith.constant 7 : index
    %c0_99 = arith.constant 0 : index
    %102 = vector.load %arg11[%c1_97, %c7_98, %c0_99] : memref<10x24x64xf32, #tpu.memory_space<vmem>>, vector<8x8x64xf32>
    %103 = vector.shape_cast %102 : vector<8x8x64xf32> to vector<64x64xf32>
    %104 = arith.truncf %103 : vector<64x64xf32> to vector<64x64xbf16>
    %c3_100 = arith.constant 3 : index
    %c0_101 = arith.constant 0 : index
    %c0_102 = arith.constant 0 : index
    %105 = vector.load %arg6[%c3_100, %c0_101, %c0_102] : memref<9x64x64xbf16, #tpu.memory_space<vmem>>, vector<1x64x64xbf16>
    %106 = vector.shape_cast %105 : vector<1x64x64xbf16> to vector<64x64xbf16>
    %cst_103 = arith.constant dense<0.000000e+00> : vector<64x64xf32>
    %107 = tpu.matmul %104, %106, %cst_103 {dimension_numbers = #tpu.dot_dimension_numbers<[1], [0], [0], [1], [0, 0, 1, 1], [], []>} : vector<64x64xbf16>, vector<64x64xbf16>, vector<64x64xf32> -> vector<64x64xf32>
    %108 = arith.addf %101, %107 : vector<64x64xf32>
    %c1_104 = arith.constant 1 : index
    %c8_105 = arith.constant 8 : index
    %c0_106 = arith.constant 0 : index
    %109 = vector.load %arg11[%c1_104, %c8_105, %c0_106] : memref<10x24x64xf32, #tpu.memory_space<vmem>>, vector<8x8x64xf32>
    %110 = vector.shape_cast %109 : vector<8x8x64xf32> to vector<64x64xf32>
    %111 = arith.truncf %110 : vector<64x64xf32> to vector<64x64xbf16>
    %c4_107 = arith.constant 4 : index
    %c0_108 = arith.constant 0 : index
    %c0_109 = arith.constant 0 : index
    %112 = vector.load %arg6[%c4_107, %c0_108, %c0_109] : memref<9x64x64xbf16, #tpu.memory_space<vmem>>, vector<1x64x64xbf16>
    %113 = vector.shape_cast %112 : vector<1x64x64xbf16> to vector<64x64xbf16>
    %cst_110 = arith.constant dense<0.000000e+00> : vector<64x64xf32>
    %114 = tpu.matmul %111, %113, %cst_110 {dimension_numbers = #tpu.dot_dimension_numbers<[1], [0], [0], [1], [0, 0, 1, 1], [], []>} : vector<64x64xbf16>, vector<64x64xbf16>, vector<64x64xf32> -> vector<64x64xf32>
    %115 = arith.addf %108, %114 : vector<64x64xf32>
    %c1_111 = arith.constant 1 : index
    %c9_112 = arith.constant 9 : index
    %c0_113 = arith.constant 0 : index
    %116 = vector.load %arg11[%c1_111, %c9_112, %c0_113] : memref<10x24x64xf32, #tpu.memory_space<vmem>>, vector<8x8x64xf32>
    %117 = vector.shape_cast %116 : vector<8x8x64xf32> to vector<64x64xf32>
    %118 = arith.truncf %117 : vector<64x64xf32> to vector<64x64xbf16>
    %c5_114 = arith.constant 5 : index
    %c0_115 = arith.constant 0 : index
    %c0_116 = arith.constant 0 : index
    %119 = vector.load %arg6[%c5_114, %c0_115, %c0_116] : memref<9x64x64xbf16, #tpu.memory_space<vmem>>, vector<1x64x64xbf16>
    %120 = vector.shape_cast %119 : vector<1x64x64xbf16> to vector<64x64xbf16>
    %cst_117 = arith.constant dense<0.000000e+00> : vector<64x64xf32>
    %121 = tpu.matmul %118, %120, %cst_117 {dimension_numbers = #tpu.dot_dimension_numbers<[1], [0], [0], [1], [0, 0, 1, 1], [], []>} : vector<64x64xbf16>, vector<64x64xbf16>, vector<64x64xf32> -> vector<64x64xf32>
    %122 = arith.addf %115, %121 : vector<64x64xf32>
    %c2_118 = arith.constant 2 : index
    %c7_119 = arith.constant 7 : index
    %c0_120 = arith.constant 0 : index
    %123 = vector.load %arg11[%c2_118, %c7_119, %c0_120] : memref<10x24x64xf32, #tpu.memory_space<vmem>>, vector<8x8x64xf32>
    %124 = vector.shape_cast %123 : vector<8x8x64xf32> to vector<64x64xf32>
    %125 = arith.truncf %124 : vector<64x64xf32> to vector<64x64xbf16>
    %c6_121 = arith.constant 6 : index
    %c0_122 = arith.constant 0 : index
    %c0_123 = arith.constant 0 : index
    %126 = vector.load %arg6[%c6_121, %c0_122, %c0_123] : memref<9x64x64xbf16, #tpu.memory_space<vmem>>, vector<1x64x64xbf16>
    %127 = vector.shape_cast %126 : vector<1x64x64xbf16> to vector<64x64xbf16>
    %cst_124 = arith.constant dense<0.000000e+00> : vector<64x64xf32>
    %128 = tpu.matmul %125, %127, %cst_124 {dimension_numbers = #tpu.dot_dimension_numbers<[1], [0], [0], [1], [0, 0, 1, 1], [], []>} : vector<64x64xbf16>, vector<64x64xbf16>, vector<64x64xf32> -> vector<64x64xf32>
    %129 = arith.addf %122, %128 : vector<64x64xf32>
    %c2_125 = arith.constant 2 : index
    %c8_126 = arith.constant 8 : index
    %c0_127 = arith.constant 0 : index
    %130 = vector.load %arg11[%c2_125, %c8_126, %c0_127] : memref<10x24x64xf32, #tpu.memory_space<vmem>>, vector<8x8x64xf32>
    %131 = vector.shape_cast %130 : vector<8x8x64xf32> to vector<64x64xf32>
    %132 = arith.truncf %131 : vector<64x64xf32> to vector<64x64xbf16>
    %c7_128 = arith.constant 7 : index
    %c0_129 = arith.constant 0 : index
    %c0_130 = arith.constant 0 : index
    %133 = vector.load %arg6[%c7_128, %c0_129, %c0_130] : memref<9x64x64xbf16, #tpu.memory_space<vmem>>, vector<1x64x64xbf16>
    %134 = vector.shape_cast %133 : vector<1x64x64xbf16> to vector<64x64xbf16>
    %cst_131 = arith.constant dense<0.000000e+00> : vector<64x64xf32>
    %135 = tpu.matmul %132, %134, %cst_131 {dimension_numbers = #tpu.dot_dimension_numbers<[1], [0], [0], [1], [0, 0, 1, 1], [], []>} : vector<64x64xbf16>, vector<64x64xbf16>, vector<64x64xf32> -> vector<64x64xf32>
    %136 = arith.addf %129, %135 : vector<64x64xf32>
    %c2_132 = arith.constant 2 : index
    %c9_133 = arith.constant 9 : index
    %c0_134 = arith.constant 0 : index
    %137 = vector.load %arg11[%c2_132, %c9_133, %c0_134] : memref<10x24x64xf32, #tpu.memory_space<vmem>>, vector<8x8x64xf32>
    %138 = vector.shape_cast %137 : vector<8x8x64xf32> to vector<64x64xf32>
    %139 = arith.truncf %138 : vector<64x64xf32> to vector<64x64xbf16>
    %c8_135 = arith.constant 8 : index
    %c0_136 = arith.constant 0 : index
    %c0_137 = arith.constant 0 : index
    %140 = vector.load %arg6[%c8_135, %c0_136, %c0_137] : memref<9x64x64xbf16, #tpu.memory_space<vmem>>, vector<1x64x64xbf16>
    %141 = vector.shape_cast %140 : vector<1x64x64xbf16> to vector<64x64xbf16>
    %cst_138 = arith.constant dense<0.000000e+00> : vector<64x64xf32>
    %142 = tpu.matmul %139, %141, %cst_138 {dimension_numbers = #tpu.dot_dimension_numbers<[1], [0], [0], [1], [0, 0, 1, 1], [], []>} : vector<64x64xbf16>, vector<64x64xbf16>, vector<64x64xf32> -> vector<64x64xf32>
    %143 = arith.addf %136, %142 : vector<64x64xf32>
    %c0_139 = arith.constant 0 : index
    %c0_140 = arith.constant 0 : index
    %144 = vector.load %arg7[%c0_139, %c0_140] : memref<1x64xf32, #tpu.memory_space<vmem>>, vector<1x64xf32>
    %145 = vector.broadcast %144 : vector<1x64xf32> to vector<64x64xf32>
    %146 = arith.addf %143, %145 : vector<64x64xf32>
    %147 = vector.shape_cast %1 : vector<8x8x32xf32> to vector<64x32xf32>
    %148 = arith.truncf %147 : vector<64x32xf32> to vector<64x32xbf16>
    %c0_141 = arith.constant 0 : index
    %c0_142 = arith.constant 0 : index
    %149 = vector.load %arg2[%c0_141, %c0_142] : memref<32x64xbf16, #tpu.memory_space<vmem>>, vector<32x64xbf16>
    %cst_143 = arith.constant dense<0.000000e+00> : vector<64x64xf32>
    %150 = tpu.matmul %148, %149, %cst_143 {dimension_numbers = #tpu.dot_dimension_numbers<[1], [0], [0], [1], [0, 0, 1, 1], [], []>} : vector<64x32xbf16>, vector<32x64xbf16>, vector<64x64xf32> -> vector<64x64xf32>
    %c0_144 = arith.constant 0 : index
    %c0_145 = arith.constant 0 : index
    %151 = vector.load %arg3[%c0_144, %c0_145] : memref<1x64xf32, #tpu.memory_space<vmem>>, vector<1x64xf32>
    %152 = vector.broadcast %151 : vector<1x64xf32> to vector<64x64xf32>
    %153 = arith.addf %150, %152 : vector<64x64xf32>
    %c0_146 = arith.constant 0 : index
    %c0_147 = arith.constant 0 : index
    %154 = vector.load %arg8[%c0_146, %c0_147] : memref<16x64xf32, #tpu.memory_space<vmem>>, vector<16x64xf32>
    %155 = arith.addf %146, %153 : vector<64x64xf32>
    %cst_148 = arith.constant dense<0.000000e+00> : vector<16x64xf32>
    %156 = tpu.matmul %154, %155, %cst_148 {dimension_numbers = #tpu.dot_dimension_numbers<[1], [0], [0], [1], [0, 0, 1, 1], [], []>} : vector<16x64xf32>, vector<64x64xf32>, vector<16x64xf32> -> vector<16x64xf32>
    %c0_149 = arith.constant 0 : index
    %c0_150 = arith.constant 0 : index
    %c0_151 = arith.constant 0 : index
    %157 = vector.load %arg9[%c0_149, %c0_150, %c0_151] : memref<1x16x64xf32, #tpu.memory_space<vmem>>, vector<1x16x64xf32>
    %158 = vector.shape_cast %157 : vector<1x16x64xf32> to vector<16x64xf32>
    %159 = vector.shape_cast %156 : vector<16x64xf32> to vector<1x16x64xf32>
    tpu.vector_store %arg9[%c0_149, %c0_150, %c0_151], %159 {strides = array<i32>} : memref<1x16x64xf32, #tpu.memory_space<vmem>>, vector<1x16x64xf32>,
    return
  }
  func.func @transform_0(%arg0: i32) -> (i32, i32, i32, i32) {
    %c0_i32 = arith.constant 0 : i32
    %c0_i32_0 = arith.constant 0 : i32
    %c0_i32_1 = arith.constant 0 : i32
    %c0_i32_2 = arith.constant 0 : i32
    return %arg0, %c0_i32, %c0_i32_0, %c0_i32_1 : i32, i32, i32, i32
  }
  func.func @transform_1(%arg0: i32) -> (i32, i32) {
    %c0_i32 = arith.constant 0 : i32
    %c0_i32_0 = arith.constant 0 : i32
    %c0_i32_1 = arith.constant 0 : i32
    return %c0_i32, %c0_i32_0 : i32, i32
  }
  func.func @transform_2(%arg0: i32) -> (i32, i32) {
    %c0_i32 = arith.constant 0 : i32
    %c0_i32_0 = arith.constant 0 : i32
    %c0_i32_1 = arith.constant 0 : i32
    return %c0_i32, %c0_i32_0 : i32, i32
  }
  func.func @transform_3(%arg0: i32) -> (i32, i32, i32) {
    %c0_i32 = arith.constant 0 : i32
    %c0_i32_0 = arith.constant 0 : i32
    %c0_i32_1 = arith.constant 0 : i32
    %c0_i32_2 = arith.constant 0 : i32
    return %c0_i32, %c0_i32_0, %c0_i32_1 : i32, i32, i32
  }
  func.func @transform_4(%arg0: i32) -> (i32, i32) {
    %c0_i32 = arith.constant 0 : i32
    %c0_i32_0 = arith.constant 0 : i32
    %c0_i32_1 = arith.constant 0 : i32
    return %c0_i32, %c0_i32_0 : i32, i32
  }
  func.func @transform_5(%arg0: i32) -> (i32, i32, i32) {
    %c0_i32 = arith.constant 0 : i32
    %c0_i32_0 = arith.constant 0 : i32
    %c0_i32_1 = arith.constant 0 : i32
    %c0_i32_2 = arith.constant 0 : i32
    return %c0_i32, %c0_i32_0, %c0_i32_1 : i32, i32, i32
  }
  func.func @transform_6(%arg0: i32) -> (i32, i32) {
    %c0_i32 = arith.constant 0 : i32
    %c0_i32_0 = arith.constant 0 : i32
    %c0_i32_1 = arith.constant 0 : i32
    return %c0_i32, %c0_i32_0 : i32, i32
  }
  func.func @transform_7(%arg0: i32) -> (i32, i32) {
    %c0_i32 = arith.constant 0 : i32
    %c0_i32_0 = arith.constant 0 : i32
    %c0_i32_1 = arith.constant 0 : i32
    return %c0_i32, %c0_i32_0 : i32, i32
  }
  func.func @transform_8(%arg0: i32) -> (i32, i32, i32) {
    %c0_i32 = arith.constant 0 : i32
    %c0_i32_0 = arith.constant 0 : i32
    %c0_i32_1 = arith.constant 0 : i32
    return %arg0, %c0_i32, %c0_i32_0 : i32, i32, i32
  }
}

module attributes {stable_mosaic.version = 11 : i64} {
  func.func @_res_block_kernel(%arg0: i32, %arg1: memref<1x16x16x6xf32, #tpu.memory_space<vmem>>, %arg2: memref<6x32xbf16, #tpu.memory_space<vmem>>, %arg3: memref<1x32xf32, #tpu.memory_space<vmem>>, %arg4: memref<9x6x32xbf16, #tpu.memory_space<vmem>>, %arg5: memref<1x32xf32, #tpu.memory_space<vmem>>, %arg6: memref<9x32x32xbf16, #tpu.memory_space<vmem>>, %arg7: memref<1x32xf32, #tpu.memory_space<vmem>>, %arg8: memref<64x256xf32, #tpu.memory_space<vmem>>, %arg9: memref<1x64x32xf32, #tpu.memory_space<vmem>>, %arg10: memref<18x32x6xf32, #tpu.memory_space<vmem>>, %arg11: memref<18x32x32xf32, #tpu.memory_space<vmem>>) attributes {dimension_semantics = [#tpu.dimension_semantics<parallel>], iteration_bounds = array<i64: 2>, scalar_prefetch = 0 : i64, scratch_operands = 2 : i64, tpu.core_type = #tpu.core_type<tc>, window_params = [{transform_indices = @transform_0, window_bounds = array<i64: 1, 16, 16, 6>}, {pipeline_mode = #tpu.pipeline_mode<synchronous>, transform_indices = @transform_1, window_bounds = array<i64: 6, 32>}, {pipeline_mode = #tpu.pipeline_mode<synchronous>, transform_indices = @transform_2, window_bounds = array<i64: 1, 32>}, {pipeline_mode = #tpu.pipeline_mode<synchronous>, transform_indices = @transform_3, window_bounds = array<i64: 9, 6, 32>}, {pipeline_mode = #tpu.pipeline_mode<synchronous>, transform_indices = @transform_4, window_bounds = array<i64: 1, 32>}, {pipeline_mode = #tpu.pipeline_mode<synchronous>, transform_indices = @transform_5, window_bounds = array<i64: 9, 32, 32>}, {pipeline_mode = #tpu.pipeline_mode<synchronous>, transform_indices = @transform_6, window_bounds = array<i64: 1, 32>}, {pipeline_mode = #tpu.pipeline_mode<synchronous>, transform_indices = @transform_7, window_bounds = array<i64: 64, 256>}, {transform_indices = @transform_8, window_bounds = array<i64: 1, 64, 32>}]} {
    %c0 = arith.constant 0 : index
    %c0_0 = arith.constant 0 : index
    %c0_1 = arith.constant 0 : index
    %c0_2 = arith.constant 0 : index
    %0 = vector.load %arg1[%c0, %c0_0, %c0_1, %c0_2] : memref<1x16x16x6xf32, #tpu.memory_space<vmem>>, vector<1x16x16x6xf32>
    %1 = vector.shape_cast %0 : vector<1x16x16x6xf32> to vector<16x16x6xf32>
    %cst = arith.constant 0.000000e+00 : f32
    %2 = vector.broadcast %cst : f32 to vector<18x32x6xf32>
    %c0_3 = arith.constant 0 : index
    %c0_4 = arith.constant 0 : index
    %c0_5 = arith.constant 0 : index
    %3 = vector.load %arg10[%c0_3, %c0_4, %c0_5] : memref<18x32x6xf32, #tpu.memory_space<vmem>>, vector<18x32x6xf32>
    tpu.vector_store %arg10[%c0_3, %c0_4, %c0_5], %2 {strides = array<i32>} : memref<18x32x6xf32, #tpu.memory_space<vmem>>, vector<18x32x6xf32>,
    %cst_6 = arith.constant 0.000000e+00 : f32
    %4 = vector.broadcast %cst_6 : f32 to vector<16x16x6xf32>
    %5 = arith.maximumf %1, %4 : vector<16x16x6xf32>
    %c1 = arith.constant 1 : index
    %c8 = arith.constant 8 : index
    %c0_7 = arith.constant 0 : index
    %6 = vector.load %arg10[%c1, %c8, %c0_7] : memref<18x32x6xf32, #tpu.memory_space<vmem>>, vector<16x16x6xf32>
    tpu.vector_store %arg10[%c1, %c8, %c0_7], %5 {strides = array<i32>} : memref<18x32x6xf32, #tpu.memory_space<vmem>>, vector<16x16x6xf32>,
    %cst_8 = arith.constant 0.000000e+00 : f32
    %7 = vector.broadcast %cst_8 : f32 to vector<256x32xf32>
    %c0_9 = arith.constant 0 : index
    %c7 = arith.constant 7 : index
    %c0_10 = arith.constant 0 : index
    %8 = vector.load %arg10[%c0_9, %c7, %c0_10] : memref<18x32x6xf32, #tpu.memory_space<vmem>>, vector<16x16x6xf32>
    %9 = vector.shape_cast %8 : vector<16x16x6xf32> to vector<256x6xf32>
    %10 = arith.truncf %9 : vector<256x6xf32> to vector<256x6xbf16>
    %c0_11 = arith.constant 0 : index
    %c0_12 = arith.constant 0 : index
    %c0_13 = arith.constant 0 : index
    %11 = vector.load %arg4[%c0_11, %c0_12, %c0_13] : memref<9x6x32xbf16, #tpu.memory_space<vmem>>, vector<1x6x32xbf16>
    %12 = vector.shape_cast %11 : vector<1x6x32xbf16> to vector<6x32xbf16>
    %cst_14 = arith.constant dense<0.000000e+00> : vector<256x32xf32>
    %13 = tpu.matmul %10, %12, %cst_14 {dimension_numbers = #tpu.dot_dimension_numbers<[1], [0], [0], [1], [0, 0, 1, 1], [], []>} : vector<256x6xbf16>, vector<6x32xbf16>, vector<256x32xf32> -> vector<256x32xf32>
    %14 = arith.addf %7, %13 : vector<256x32xf32>
    %c0_15 = arith.constant 0 : index
    %c8_16 = arith.constant 8 : index
    %c0_17 = arith.constant 0 : index
    %15 = vector.load %arg10[%c0_15, %c8_16, %c0_17] : memref<18x32x6xf32, #tpu.memory_space<vmem>>, vector<16x16x6xf32>
    %16 = vector.shape_cast %15 : vector<16x16x6xf32> to vector<256x6xf32>
    %17 = arith.truncf %16 : vector<256x6xf32> to vector<256x6xbf16>
    %c1_18 = arith.constant 1 : index
    %c0_19 = arith.constant 0 : index
    %c0_20 = arith.constant 0 : index
    %18 = vector.load %arg4[%c1_18, %c0_19, %c0_20] : memref<9x6x32xbf16, #tpu.memory_space<vmem>>, vector<1x6x32xbf16>
    %19 = vector.shape_cast %18 : vector<1x6x32xbf16> to vector<6x32xbf16>
    %cst_21 = arith.constant dense<0.000000e+00> : vector<256x32xf32>
    %20 = tpu.matmul %17, %19, %cst_21 {dimension_numbers = #tpu.dot_dimension_numbers<[1], [0], [0], [1], [0, 0, 1, 1], [], []>} : vector<256x6xbf16>, vector<6x32xbf16>, vector<256x32xf32> -> vector<256x32xf32>
    %21 = arith.addf %14, %20 : vector<256x32xf32>
    %c0_22 = arith.constant 0 : index
    %c9 = arith.constant 9 : index
    %c0_23 = arith.constant 0 : index
    %22 = vector.load %arg10[%c0_22, %c9, %c0_23] : memref<18x32x6xf32, #tpu.memory_space<vmem>>, vector<16x16x6xf32>
    %23 = vector.shape_cast %22 : vector<16x16x6xf32> to vector<256x6xf32>
    %24 = arith.truncf %23 : vector<256x6xf32> to vector<256x6xbf16>
    %c2 = arith.constant 2 : index
    %c0_24 = arith.constant 0 : index
    %c0_25 = arith.constant 0 : index
    %25 = vector.load %arg4[%c2, %c0_24, %c0_25] : memref<9x6x32xbf16, #tpu.memory_space<vmem>>, vector<1x6x32xbf16>
    %26 = vector.shape_cast %25 : vector<1x6x32xbf16> to vector<6x32xbf16>
    %cst_26 = arith.constant dense<0.000000e+00> : vector<256x32xf32>
    %27 = tpu.matmul %24, %26, %cst_26 {dimension_numbers = #tpu.dot_dimension_numbers<[1], [0], [0], [1], [0, 0, 1, 1], [], []>} : vector<256x6xbf16>, vector<6x32xbf16>, vector<256x32xf32> -> vector<256x32xf32>
    %28 = arith.addf %21, %27 : vector<256x32xf32>
    %c1_27 = arith.constant 1 : index
    %c7_28 = arith.constant 7 : index
    %c0_29 = arith.constant 0 : index
    %29 = vector.load %arg10[%c1_27, %c7_28, %c0_29] : memref<18x32x6xf32, #tpu.memory_space<vmem>>, vector<16x16x6xf32>
    %30 = vector.shape_cast %29 : vector<16x16x6xf32> to vector<256x6xf32>
    %31 = arith.truncf %30 : vector<256x6xf32> to vector<256x6xbf16>
    %c3 = arith.constant 3 : index
    %c0_30 = arith.constant 0 : index
    %c0_31 = arith.constant 0 : index
    %32 = vector.load %arg4[%c3, %c0_30, %c0_31] : memref<9x6x32xbf16, #tpu.memory_space<vmem>>, vector<1x6x32xbf16>
    %33 = vector.shape_cast %32 : vector<1x6x32xbf16> to vector<6x32xbf16>
    %cst_32 = arith.constant dense<0.000000e+00> : vector<256x32xf32>
    %34 = tpu.matmul %31, %33, %cst_32 {dimension_numbers = #tpu.dot_dimension_numbers<[1], [0], [0], [1], [0, 0, 1, 1], [], []>} : vector<256x6xbf16>, vector<6x32xbf16>, vector<256x32xf32> -> vector<256x32xf32>
    %35 = arith.addf %28, %34 : vector<256x32xf32>
    %c1_33 = arith.constant 1 : index
    %c8_34 = arith.constant 8 : index
    %c0_35 = arith.constant 0 : index
    %36 = vector.load %arg10[%c1_33, %c8_34, %c0_35] : memref<18x32x6xf32, #tpu.memory_space<vmem>>, vector<16x16x6xf32>
    %37 = vector.shape_cast %36 : vector<16x16x6xf32> to vector<256x6xf32>
    %38 = arith.truncf %37 : vector<256x6xf32> to vector<256x6xbf16>
    %c4 = arith.constant 4 : index
    %c0_36 = arith.constant 0 : index
    %c0_37 = arith.constant 0 : index
    %39 = vector.load %arg4[%c4, %c0_36, %c0_37] : memref<9x6x32xbf16, #tpu.memory_space<vmem>>, vector<1x6x32xbf16>
    %40 = vector.shape_cast %39 : vector<1x6x32xbf16> to vector<6x32xbf16>
    %cst_38 = arith.constant dense<0.000000e+00> : vector<256x32xf32>
    %41 = tpu.matmul %38, %40, %cst_38 {dimension_numbers = #tpu.dot_dimension_numbers<[1], [0], [0], [1], [0, 0, 1, 1], [], []>} : vector<256x6xbf16>, vector<6x32xbf16>, vector<256x32xf32> -> vector<256x32xf32>
    %42 = arith.addf %35, %41 : vector<256x32xf32>
    %c1_39 = arith.constant 1 : index
    %c9_40 = arith.constant 9 : index
    %c0_41 = arith.constant 0 : index
    %43 = vector.load %arg10[%c1_39, %c9_40, %c0_41] : memref<18x32x6xf32, #tpu.memory_space<vmem>>, vector<16x16x6xf32>
    %44 = vector.shape_cast %43 : vector<16x16x6xf32> to vector<256x6xf32>
    %45 = arith.truncf %44 : vector<256x6xf32> to vector<256x6xbf16>
    %c5 = arith.constant 5 : index
    %c0_42 = arith.constant 0 : index
    %c0_43 = arith.constant 0 : index
    %46 = vector.load %arg4[%c5, %c0_42, %c0_43] : memref<9x6x32xbf16, #tpu.memory_space<vmem>>, vector<1x6x32xbf16>
    %47 = vector.shape_cast %46 : vector<1x6x32xbf16> to vector<6x32xbf16>
    %cst_44 = arith.constant dense<0.000000e+00> : vector<256x32xf32>
    %48 = tpu.matmul %45, %47, %cst_44 {dimension_numbers = #tpu.dot_dimension_numbers<[1], [0], [0], [1], [0, 0, 1, 1], [], []>} : vector<256x6xbf16>, vector<6x32xbf16>, vector<256x32xf32> -> vector<256x32xf32>
    %49 = arith.addf %42, %48 : vector<256x32xf32>
    %c2_45 = arith.constant 2 : index
    %c7_46 = arith.constant 7 : index
    %c0_47 = arith.constant 0 : index
    %50 = vector.load %arg10[%c2_45, %c7_46, %c0_47] : memref<18x32x6xf32, #tpu.memory_space<vmem>>, vector<16x16x6xf32>
    %51 = vector.shape_cast %50 : vector<16x16x6xf32> to vector<256x6xf32>
    %52 = arith.truncf %51 : vector<256x6xf32> to vector<256x6xbf16>
    %c6 = arith.constant 6 : index
    %c0_48 = arith.constant 0 : index
    %c0_49 = arith.constant 0 : index
    %53 = vector.load %arg4[%c6, %c0_48, %c0_49] : memref<9x6x32xbf16, #tpu.memory_space<vmem>>, vector<1x6x32xbf16>
    %54 = vector.shape_cast %53 : vector<1x6x32xbf16> to vector<6x32xbf16>
    %cst_50 = arith.constant dense<0.000000e+00> : vector<256x32xf32>
    %55 = tpu.matmul %52, %54, %cst_50 {dimension_numbers = #tpu.dot_dimension_numbers<[1], [0], [0], [1], [0, 0, 1, 1], [], []>} : vector<256x6xbf16>, vector<6x32xbf16>, vector<256x32xf32> -> vector<256x32xf32>
    %56 = arith.addf %49, %55 : vector<256x32xf32>
    %c2_51 = arith.constant 2 : index
    %c8_52 = arith.constant 8 : index
    %c0_53 = arith.constant 0 : index
    %57 = vector.load %arg10[%c2_51, %c8_52, %c0_53] : memref<18x32x6xf32, #tpu.memory_space<vmem>>, vector<16x16x6xf32>
    %58 = vector.shape_cast %57 : vector<16x16x6xf32> to vector<256x6xf32>
    %59 = arith.truncf %58 : vector<256x6xf32> to vector<256x6xbf16>
    %c7_54 = arith.constant 7 : index
    %c0_55 = arith.constant 0 : index
    %c0_56 = arith.constant 0 : index
    %60 = vector.load %arg4[%c7_54, %c0_55, %c0_56] : memref<9x6x32xbf16, #tpu.memory_space<vmem>>, vector<1x6x32xbf16>
    %61 = vector.shape_cast %60 : vector<1x6x32xbf16> to vector<6x32xbf16>
    %cst_57 = arith.constant dense<0.000000e+00> : vector<256x32xf32>
    %62 = tpu.matmul %59, %61, %cst_57 {dimension_numbers = #tpu.dot_dimension_numbers<[1], [0], [0], [1], [0, 0, 1, 1], [], []>} : vector<256x6xbf16>, vector<6x32xbf16>, vector<256x32xf32> -> vector<256x32xf32>
    %63 = arith.addf %56, %62 : vector<256x32xf32>
    %c2_58 = arith.constant 2 : index
    %c9_59 = arith.constant 9 : index
    %c0_60 = arith.constant 0 : index
    %64 = vector.load %arg10[%c2_58, %c9_59, %c0_60] : memref<18x32x6xf32, #tpu.memory_space<vmem>>, vector<16x16x6xf32>
    %65 = vector.shape_cast %64 : vector<16x16x6xf32> to vector<256x6xf32>
    %66 = arith.truncf %65 : vector<256x6xf32> to vector<256x6xbf16>
    %c8_61 = arith.constant 8 : index
    %c0_62 = arith.constant 0 : index
    %c0_63 = arith.constant 0 : index
    %67 = vector.load %arg4[%c8_61, %c0_62, %c0_63] : memref<9x6x32xbf16, #tpu.memory_space<vmem>>, vector<1x6x32xbf16>
    %68 = vector.shape_cast %67 : vector<1x6x32xbf16> to vector<6x32xbf16>
    %cst_64 = arith.constant dense<0.000000e+00> : vector<256x32xf32>
    %69 = tpu.matmul %66, %68, %cst_64 {dimension_numbers = #tpu.dot_dimension_numbers<[1], [0], [0], [1], [0, 0, 1, 1], [], []>} : vector<256x6xbf16>, vector<6x32xbf16>, vector<256x32xf32> -> vector<256x32xf32>
    %70 = arith.addf %63, %69 : vector<256x32xf32>
    %c0_65 = arith.constant 0 : index
    %c0_66 = arith.constant 0 : index
    %71 = vector.load %arg5[%c0_65, %c0_66] : memref<1x32xf32, #tpu.memory_space<vmem>>, vector<1x32xf32>
    %72 = vector.broadcast %71 : vector<1x32xf32> to vector<256x32xf32>
    %73 = arith.addf %70, %72 : vector<256x32xf32>
    %cst_67 = arith.constant 0.000000e+00 : f32
    %74 = vector.broadcast %cst_67 : f32 to vector<256x32xf32>
    %75 = arith.maximumf %73, %74 : vector<256x32xf32>
    %cst_68 = arith.constant 0.000000e+00 : f32
    %76 = vector.broadcast %cst_68 : f32 to vector<18x32x32xf32>
    %c0_69 = arith.constant 0 : index
    %c0_70 = arith.constant 0 : index
    %c0_71 = arith.constant 0 : index
    %77 = vector.load %arg11[%c0_69, %c0_70, %c0_71] : memref<18x32x32xf32, #tpu.memory_space<vmem>>, vector<18x32x32xf32>
    tpu.vector_store %arg11[%c0_69, %c0_70, %c0_71], %76 {strides = array<i32>} : memref<18x32x32xf32, #tpu.memory_space<vmem>>, vector<18x32x32xf32>,
    %78 = vector.shape_cast %75 : vector<256x32xf32> to vector<16x16x32xf32>
    %c1_72 = arith.constant 1 : index
    %c8_73 = arith.constant 8 : index
    %c0_74 = arith.constant 0 : index
    %79 = vector.load %arg11[%c1_72, %c8_73, %c0_74] : memref<18x32x32xf32, #tpu.memory_space<vmem>>, vector<16x16x32xf32>
    tpu.vector_store %arg11[%c1_72, %c8_73, %c0_74], %78 {strides = array<i32>} : memref<18x32x32xf32, #tpu.memory_space<vmem>>, vector<16x16x32xf32>,
    %cst_75 = arith.constant 0.000000e+00 : f32
    %80 = vector.broadcast %cst_75 : f32 to vector<256x32xf32>
    %c0_76 = arith.constant 0 : index
    %c7_77 = arith.constant 7 : index
    %c0_78 = arith.constant 0 : index
    %81 = vector.load %arg11[%c0_76, %c7_77, %c0_78] : memref<18x32x32xf32, #tpu.memory_space<vmem>>, vector<16x16x32xf32>
    %82 = vector.shape_cast %81 : vector<16x16x32xf32> to vector<256x32xf32>
    %83 = arith.truncf %82 : vector<256x32xf32> to vector<256x32xbf16>
    %c0_79 = arith.constant 0 : index
    %c0_80 = arith.constant 0 : index
    %c0_81 = arith.constant 0 : index
    %84 = vector.load %arg6[%c0_79, %c0_80, %c0_81] : memref<9x32x32xbf16, #tpu.memory_space<vmem>>, vector<1x32x32xbf16>
    %85 = vector.shape_cast %84 : vector<1x32x32xbf16> to vector<32x32xbf16>
    %cst_82 = arith.constant dense<0.000000e+00> : vector<256x32xf32>
    %86 = tpu.matmul %83, %85, %cst_82 {dimension_numbers = #tpu.dot_dimension_numbers<[1], [0], [0], [1], [0, 0, 1, 1], [], []>} : vector<256x32xbf16>, vector<32x32xbf16>, vector<256x32xf32> -> vector<256x32xf32>
    %87 = arith.addf %80, %86 : vector<256x32xf32>
    %c0_83 = arith.constant 0 : index
    %c8_84 = arith.constant 8 : index
    %c0_85 = arith.constant 0 : index
    %88 = vector.load %arg11[%c0_83, %c8_84, %c0_85] : memref<18x32x32xf32, #tpu.memory_space<vmem>>, vector<16x16x32xf32>
    %89 = vector.shape_cast %88 : vector<16x16x32xf32> to vector<256x32xf32>
    %90 = arith.truncf %89 : vector<256x32xf32> to vector<256x32xbf16>
    %c1_86 = arith.constant 1 : index
    %c0_87 = arith.constant 0 : index
    %c0_88 = arith.constant 0 : index
    %91 = vector.load %arg6[%c1_86, %c0_87, %c0_88] : memref<9x32x32xbf16, #tpu.memory_space<vmem>>, vector<1x32x32xbf16>
    %92 = vector.shape_cast %91 : vector<1x32x32xbf16> to vector<32x32xbf16>
    %cst_89 = arith.constant dense<0.000000e+00> : vector<256x32xf32>
    %93 = tpu.matmul %90, %92, %cst_89 {dimension_numbers = #tpu.dot_dimension_numbers<[1], [0], [0], [1], [0, 0, 1, 1], [], []>} : vector<256x32xbf16>, vector<32x32xbf16>, vector<256x32xf32> -> vector<256x32xf32>
    %94 = arith.addf %87, %93 : vector<256x32xf32>
    %c0_90 = arith.constant 0 : index
    %c9_91 = arith.constant 9 : index
    %c0_92 = arith.constant 0 : index
    %95 = vector.load %arg11[%c0_90, %c9_91, %c0_92] : memref<18x32x32xf32, #tpu.memory_space<vmem>>, vector<16x16x32xf32>
    %96 = vector.shape_cast %95 : vector<16x16x32xf32> to vector<256x32xf32>
    %97 = arith.truncf %96 : vector<256x32xf32> to vector<256x32xbf16>
    %c2_93 = arith.constant 2 : index
    %c0_94 = arith.constant 0 : index
    %c0_95 = arith.constant 0 : index
    %98 = vector.load %arg6[%c2_93, %c0_94, %c0_95] : memref<9x32x32xbf16, #tpu.memory_space<vmem>>, vector<1x32x32xbf16>
    %99 = vector.shape_cast %98 : vector<1x32x32xbf16> to vector<32x32xbf16>
    %cst_96 = arith.constant dense<0.000000e+00> : vector<256x32xf32>
    %100 = tpu.matmul %97, %99, %cst_96 {dimension_numbers = #tpu.dot_dimension_numbers<[1], [0], [0], [1], [0, 0, 1, 1], [], []>} : vector<256x32xbf16>, vector<32x32xbf16>, vector<256x32xf32> -> vector<256x32xf32>
    %101 = arith.addf %94, %100 : vector<256x32xf32>
    %c1_97 = arith.constant 1 : index
    %c7_98 = arith.constant 7 : index
    %c0_99 = arith.constant 0 : index
    %102 = vector.load %arg11[%c1_97, %c7_98, %c0_99] : memref<18x32x32xf32, #tpu.memory_space<vmem>>, vector<16x16x32xf32>
    %103 = vector.shape_cast %102 : vector<16x16x32xf32> to vector<256x32xf32>
    %104 = arith.truncf %103 : vector<256x32xf32> to vector<256x32xbf16>
    %c3_100 = arith.constant 3 : index
    %c0_101 = arith.constant 0 : index
    %c0_102 = arith.constant 0 : index
    %105 = vector.load %arg6[%c3_100, %c0_101, %c0_102] : memref<9x32x32xbf16, #tpu.memory_space<vmem>>, vector<1x32x32xbf16>
    %106 = vector.shape_cast %105 : vector<1x32x32xbf16> to vector<32x32xbf16>
    %cst_103 = arith.constant dense<0.000000e+00> : vector<256x32xf32>
    %107 = tpu.matmul %104, %106, %cst_103 {dimension_numbers = #tpu.dot_dimension_numbers<[1], [0], [0], [1], [0, 0, 1, 1], [], []>} : vector<256x32xbf16>, vector<32x32xbf16>, vector<256x32xf32> -> vector<256x32xf32>
    %108 = arith.addf %101, %107 : vector<256x32xf32>
    %c1_104 = arith.constant 1 : index
    %c8_105 = arith.constant 8 : index
    %c0_106 = arith.constant 0 : index
    %109 = vector.load %arg11[%c1_104, %c8_105, %c0_106] : memref<18x32x32xf32, #tpu.memory_space<vmem>>, vector<16x16x32xf32>
    %110 = vector.shape_cast %109 : vector<16x16x32xf32> to vector<256x32xf32>
    %111 = arith.truncf %110 : vector<256x32xf32> to vector<256x32xbf16>
    %c4_107 = arith.constant 4 : index
    %c0_108 = arith.constant 0 : index
    %c0_109 = arith.constant 0 : index
    %112 = vector.load %arg6[%c4_107, %c0_108, %c0_109] : memref<9x32x32xbf16, #tpu.memory_space<vmem>>, vector<1x32x32xbf16>
    %113 = vector.shape_cast %112 : vector<1x32x32xbf16> to vector<32x32xbf16>
    %cst_110 = arith.constant dense<0.000000e+00> : vector<256x32xf32>
    %114 = tpu.matmul %111, %113, %cst_110 {dimension_numbers = #tpu.dot_dimension_numbers<[1], [0], [0], [1], [0, 0, 1, 1], [], []>} : vector<256x32xbf16>, vector<32x32xbf16>, vector<256x32xf32> -> vector<256x32xf32>
    %115 = arith.addf %108, %114 : vector<256x32xf32>
    %c1_111 = arith.constant 1 : index
    %c9_112 = arith.constant 9 : index
    %c0_113 = arith.constant 0 : index
    %116 = vector.load %arg11[%c1_111, %c9_112, %c0_113] : memref<18x32x32xf32, #tpu.memory_space<vmem>>, vector<16x16x32xf32>
    %117 = vector.shape_cast %116 : vector<16x16x32xf32> to vector<256x32xf32>
    %118 = arith.truncf %117 : vector<256x32xf32> to vector<256x32xbf16>
    %c5_114 = arith.constant 5 : index
    %c0_115 = arith.constant 0 : index
    %c0_116 = arith.constant 0 : index
    %119 = vector.load %arg6[%c5_114, %c0_115, %c0_116] : memref<9x32x32xbf16, #tpu.memory_space<vmem>>, vector<1x32x32xbf16>
    %120 = vector.shape_cast %119 : vector<1x32x32xbf16> to vector<32x32xbf16>
    %cst_117 = arith.constant dense<0.000000e+00> : vector<256x32xf32>
    %121 = tpu.matmul %118, %120, %cst_117 {dimension_numbers = #tpu.dot_dimension_numbers<[1], [0], [0], [1], [0, 0, 1, 1], [], []>} : vector<256x32xbf16>, vector<32x32xbf16>, vector<256x32xf32> -> vector<256x32xf32>
    %122 = arith.addf %115, %121 : vector<256x32xf32>
    %c2_118 = arith.constant 2 : index
    %c7_119 = arith.constant 7 : index
    %c0_120 = arith.constant 0 : index
    %123 = vector.load %arg11[%c2_118, %c7_119, %c0_120] : memref<18x32x32xf32, #tpu.memory_space<vmem>>, vector<16x16x32xf32>
    %124 = vector.shape_cast %123 : vector<16x16x32xf32> to vector<256x32xf32>
    %125 = arith.truncf %124 : vector<256x32xf32> to vector<256x32xbf16>
    %c6_121 = arith.constant 6 : index
    %c0_122 = arith.constant 0 : index
    %c0_123 = arith.constant 0 : index
    %126 = vector.load %arg6[%c6_121, %c0_122, %c0_123] : memref<9x32x32xbf16, #tpu.memory_space<vmem>>, vector<1x32x32xbf16>
    %127 = vector.shape_cast %126 : vector<1x32x32xbf16> to vector<32x32xbf16>
    %cst_124 = arith.constant dense<0.000000e+00> : vector<256x32xf32>
    %128 = tpu.matmul %125, %127, %cst_124 {dimension_numbers = #tpu.dot_dimension_numbers<[1], [0], [0], [1], [0, 0, 1, 1], [], []>} : vector<256x32xbf16>, vector<32x32xbf16>, vector<256x32xf32> -> vector<256x32xf32>
    %129 = arith.addf %122, %128 : vector<256x32xf32>
    %c2_125 = arith.constant 2 : index
    %c8_126 = arith.constant 8 : index
    %c0_127 = arith.constant 0 : index
    %130 = vector.load %arg11[%c2_125, %c8_126, %c0_127] : memref<18x32x32xf32, #tpu.memory_space<vmem>>, vector<16x16x32xf32>
    %131 = vector.shape_cast %130 : vector<16x16x32xf32> to vector<256x32xf32>
    %132 = arith.truncf %131 : vector<256x32xf32> to vector<256x32xbf16>
    %c7_128 = arith.constant 7 : index
    %c0_129 = arith.constant 0 : index
    %c0_130 = arith.constant 0 : index
    %133 = vector.load %arg6[%c7_128, %c0_129, %c0_130] : memref<9x32x32xbf16, #tpu.memory_space<vmem>>, vector<1x32x32xbf16>
    %134 = vector.shape_cast %133 : vector<1x32x32xbf16> to vector<32x32xbf16>
    %cst_131 = arith.constant dense<0.000000e+00> : vector<256x32xf32>
    %135 = tpu.matmul %132, %134, %cst_131 {dimension_numbers = #tpu.dot_dimension_numbers<[1], [0], [0], [1], [0, 0, 1, 1], [], []>} : vector<256x32xbf16>, vector<32x32xbf16>, vector<256x32xf32> -> vector<256x32xf32>
    %136 = arith.addf %129, %135 : vector<256x32xf32>
    %c2_132 = arith.constant 2 : index
    %c9_133 = arith.constant 9 : index
    %c0_134 = arith.constant 0 : index
    %137 = vector.load %arg11[%c2_132, %c9_133, %c0_134] : memref<18x32x32xf32, #tpu.memory_space<vmem>>, vector<16x16x32xf32>
    %138 = vector.shape_cast %137 : vector<16x16x32xf32> to vector<256x32xf32>
    %139 = arith.truncf %138 : vector<256x32xf32> to vector<256x32xbf16>
    %c8_135 = arith.constant 8 : index
    %c0_136 = arith.constant 0 : index
    %c0_137 = arith.constant 0 : index
    %140 = vector.load %arg6[%c8_135, %c0_136, %c0_137] : memref<9x32x32xbf16, #tpu.memory_space<vmem>>, vector<1x32x32xbf16>
    %141 = vector.shape_cast %140 : vector<1x32x32xbf16> to vector<32x32xbf16>
    %cst_138 = arith.constant dense<0.000000e+00> : vector<256x32xf32>
    %142 = tpu.matmul %139, %141, %cst_138 {dimension_numbers = #tpu.dot_dimension_numbers<[1], [0], [0], [1], [0, 0, 1, 1], [], []>} : vector<256x32xbf16>, vector<32x32xbf16>, vector<256x32xf32> -> vector<256x32xf32>
    %143 = arith.addf %136, %142 : vector<256x32xf32>
    %c0_139 = arith.constant 0 : index
    %c0_140 = arith.constant 0 : index
    %144 = vector.load %arg7[%c0_139, %c0_140] : memref<1x32xf32, #tpu.memory_space<vmem>>, vector<1x32xf32>
    %145 = vector.broadcast %144 : vector<1x32xf32> to vector<256x32xf32>
    %146 = arith.addf %143, %145 : vector<256x32xf32>
    %147 = vector.shape_cast %1 : vector<16x16x6xf32> to vector<256x6xf32>
    %148 = arith.truncf %147 : vector<256x6xf32> to vector<256x6xbf16>
    %c0_141 = arith.constant 0 : index
    %c0_142 = arith.constant 0 : index
    %149 = vector.load %arg2[%c0_141, %c0_142] : memref<6x32xbf16, #tpu.memory_space<vmem>>, vector<6x32xbf16>
    %cst_143 = arith.constant dense<0.000000e+00> : vector<256x32xf32>
    %150 = tpu.matmul %148, %149, %cst_143 {dimension_numbers = #tpu.dot_dimension_numbers<[1], [0], [0], [1], [0, 0, 1, 1], [], []>} : vector<256x6xbf16>, vector<6x32xbf16>, vector<256x32xf32> -> vector<256x32xf32>
    %c0_144 = arith.constant 0 : index
    %c0_145 = arith.constant 0 : index
    %151 = vector.load %arg3[%c0_144, %c0_145] : memref<1x32xf32, #tpu.memory_space<vmem>>, vector<1x32xf32>
    %152 = vector.broadcast %151 : vector<1x32xf32> to vector<256x32xf32>
    %153 = arith.addf %150, %152 : vector<256x32xf32>
    %c0_146 = arith.constant 0 : index
    %c0_147 = arith.constant 0 : index
    %154 = vector.load %arg8[%c0_146, %c0_147] : memref<64x256xf32, #tpu.memory_space<vmem>>, vector<64x256xf32>
    %155 = arith.addf %146, %153 : vector<256x32xf32>
    %cst_148 = arith.constant dense<0.000000e+00> : vector<64x32xf32>
    %156 = tpu.matmul %154, %155, %cst_148 {dimension_numbers = #tpu.dot_dimension_numbers<[1], [0], [0], [1], [0, 0, 1, 1], [], []>} : vector<64x256xf32>, vector<256x32xf32>, vector<64x32xf32> -> vector<64x32xf32>
    %c0_149 = arith.constant 0 : index
    %c0_150 = arith.constant 0 : index
    %c0_151 = arith.constant 0 : index
    %157 = vector.load %arg9[%c0_149, %c0_150, %c0_151] : memref<1x64x32xf32, #tpu.memory_space<vmem>>, vector<1x64x32xf32>
    %158 = vector.shape_cast %157 : vector<1x64x32xf32> to vector<64x32xf32>
    %159 = vector.shape_cast %156 : vector<64x32xf32> to vector<1x64x32xf32>
    tpu.vector_store %arg9[%c0_149, %c0_150, %c0_151], %159 {strides = array<i32>} : memref<1x64x32xf32, #tpu.memory_space<vmem>>, vector<1x64x32xf32>,
    return
  }
  func.func @transform_0(%arg0: i32) -> (i32, i32, i32, i32) {
    %c0_i32 = arith.constant 0 : i32
    %c0_i32_0 = arith.constant 0 : i32
    %c0_i32_1 = arith.constant 0 : i32
    %c0_i32_2 = arith.constant 0 : i32
    return %arg0, %c0_i32, %c0_i32_0, %c0_i32_1 : i32, i32, i32, i32
  }
  func.func @transform_1(%arg0: i32) -> (i32, i32) {
    %c0_i32 = arith.constant 0 : i32
    %c0_i32_0 = arith.constant 0 : i32
    %c0_i32_1 = arith.constant 0 : i32
    return %c0_i32, %c0_i32_0 : i32, i32
  }
  func.func @transform_2(%arg0: i32) -> (i32, i32) {
    %c0_i32 = arith.constant 0 : i32
    %c0_i32_0 = arith.constant 0 : i32
    %c0_i32_1 = arith.constant 0 : i32
    return %c0_i32, %c0_i32_0 : i32, i32
  }
  func.func @transform_3(%arg0: i32) -> (i32, i32, i32) {
    %c0_i32 = arith.constant 0 : i32
    %c0_i32_0 = arith.constant 0 : i32
    %c0_i32_1 = arith.constant 0 : i32
    %c0_i32_2 = arith.constant 0 : i32
    return %c0_i32, %c0_i32_0, %c0_i32_1 : i32, i32, i32
  }
  func.func @transform_4(%arg0: i32) -> (i32, i32) {
    %c0_i32 = arith.constant 0 : i32
    %c0_i32_0 = arith.constant 0 : i32
    %c0_i32_1 = arith.constant 0 : i32
    return %c0_i32, %c0_i32_0 : i32, i32
  }
  func.func @transform_5(%arg0: i32) -> (i32, i32, i32) {
    %c0_i32 = arith.constant 0 : i32
    %c0_i32_0 = arith.constant 0 : i32
    %c0_i32_1 = arith.constant 0 : i32
    %c0_i32_2 = arith.constant 0 : i32
    return %c0_i32, %c0_i32_0, %c0_i32_1 : i32, i32, i32
  }
  func.func @transform_6(%arg0: i32) -> (i32, i32) {
    %c0_i32 = arith.constant 0 : i32
    %c0_i32_0 = arith.constant 0 : i32
    %c0_i32_1 = arith.constant 0 : i32
    return %c0_i32, %c0_i32_0 : i32, i32
  }
  func.func @transform_7(%arg0: i32) -> (i32, i32) {
    %c0_i32 = arith.constant 0 : i32
    %c0_i32_0 = arith.constant 0 : i32
    %c0_i32_1 = arith.constant 0 : i32
    return %c0_i32, %c0_i32_0 : i32, i32
  }
  func.func @transform_8(%arg0: i32) -> (i32, i32, i32) {
    %c0_i32 = arith.constant 0 : i32
    %c0_i32_0 = arith.constant 0 : i32
    %c0_i32_1 = arith.constant 0 : i32
    return %arg0, %c0_i32, %c0_i32_0 : i32, i32, i32
  }
}

module attributes {stable_mosaic.version = 11 : i64} {
  func.func @_head_kernel(%arg0: memref<2x16x64xf32, #tpu.memory_space<vmem>>, %arg1: memref<2x64xf32, #tpu.memory_space<vmem>>, %arg2: memref<1x64xf32, #tpu.memory_space<vmem>>, %arg3: memref<1xf32, #tpu.memory_space<smem>>, %arg4: memref<2x1xf32, #tpu.memory_space<vmem>>) attributes {dimension_semantics = [], scalar_prefetch = 0 : i64, scratch_operands = 0 : i64, tpu.core_type = #tpu.core_type<tc>} {
    %c0 = arith.constant 0 : index
    %c0_0 = arith.constant 0 : index
    %c0_1 = arith.constant 0 : index
    %0 = vector.load %arg0[%c0, %c0_0, %c0_1] : memref<2x16x64xf32, #tpu.memory_space<vmem>>, vector<2x16x64xf32>
    %cst = arith.constant dense<0xFF800000> : vector<2x64xf32>
    %1 = vector.multi_reduction <maximumf>, %0, %cst [1] : vector<2x16x64xf32> to vector<2x64xf32>
    %cst_2 = arith.constant 0.000000e+00 : f32
    %2 = vector.broadcast %cst_2 : f32 to vector<2x64xf32>
    %3 = arith.maximumf %1, %2 : vector<2x64xf32>
    %c0_3 = arith.constant 0 : index
    %c0_4 = arith.constant 0 : index
    %4 = vector.load %arg1[%c0_3, %c0_4] : memref<2x64xf32, #tpu.memory_space<vmem>>, vector<2x64xf32>
    %c0_5 = arith.constant 0 : index
    %c0_6 = arith.constant 0 : index
    %5 = vector.load %arg2[%c0_5, %c0_6] : memref<1x64xf32, #tpu.memory_space<vmem>>, vector<1x64xf32>
    %6 = vector.broadcast %5 : vector<1x64xf32> to vector<2x64xf32>
    %7 = arith.addf %4, %6 : vector<2x64xf32>
    %8 = arith.mulf %3, %7 : vector<2x64xf32>
    %cst_7 = arith.constant dense<0.000000e+00> : vector<2xf32>
    %9 = vector.multi_reduction <add>, %8, %cst_7 [1] : vector<2x64xf32> to vector<2xf32>
    %10 = vector.shape_cast %9 : vector<2xf32> to vector<2x1xf32>
    %c0_8 = arith.constant 0 : index
    %11 = memref.load %arg3[%c0_8] : memref<1xf32, #tpu.memory_space<smem>>
    %12 = vector.broadcast %11 : f32 to vector<2x1xf32>
    %13 = arith.addf %10, %12 : vector<2x1xf32>
    %c0_9 = arith.constant 0 : index
    %c0_10 = arith.constant 0 : index
    %14 = vector.load %arg4[%c0_9, %c0_10] : memref<2x1xf32, #tpu.memory_space<vmem>>, vector<2x1xf32>
    tpu.vector_store %arg4[%c0_9, %c0_10], %13 {strides = array<i32>} : memref<2x1xf32, #tpu.memory_space<vmem>>, vector<2x1xf32>,
    return
  }
}

</mosaic_0001>

<bundles_post_ra>
// kernel: discriminator_forward.5
= control target key start
LH: loop header
LB: loop body
LE: loop exit
PB: predicated region body
PF: predicated region fallthrough
CT: control target
= control target key end

     0   :  { %vm22_vm0 = vcmask 523264   ;;  %vm61_vm1 = vcmask 1041409   ;;  %vm64_vm2 = vcmask 517120   ;;  %vm71_vm3 = vcmask 1024   ;;  %s127_s0 = inlined_call_operand.vmem [shape: f32[2,16,64], index: 0, kind: input, shape index: {}]   ;;  %s128_s1 = inlined_call_operand.vmem [shape: f32[2,64], index: 1, kind: input, shape index: {}]   ;;  %s129_s2 = inlined_call_operand.vmem [shape: f32[1,64], index: 2, kind: input, shape index: {}]   ;;  %s130_s3 = inlined_call_operand.<no memory space> [shape: f32[1], index: 3, kind: input, shape index: {}]   ;;  %s131_s4 = inlined_call_operand.vmem [shape: f32[2,1], index: 4, kind: output, shape index: {}]  }
   0x1   :  { %v18_v0 = vld [vmem:[%s127_s0] sm:$0xff]  ;;  %v19_v1 = vld [vmem:[%s127_s0 + $0x8] sm:$0xff]  ;;  %v20_v2 = vld [vmem:[%s127_s0 + $0x10] sm:$0xff]  ;;  %v69_v33 = vstv %s130_s3 }
   0x2   :  { %v21_v3 = vld [vmem:[%s127_s0 + $0x18] sm:$0xff]  ;;  %v23_v4 = vsel %vm22_vm0, %v18_v0, -inf  ;;  %v24_v5 = vsel %vm22_vm0, %v19_v1, -inf  ;;  %v32_v6 = vsel %vm22_vm0, %v20_v2, -inf  ;;  %v43_v15 = vld [vmem:[%s128_s1] sm:$0x3] }
   0x3   :  { %v25_v7 = vmax.f32 %v23_v4, %v24_v5  ;;  %v33_v8 = vsel %vm22_vm0, %v21_v3, -inf  ;;  %v77_v16 = vld [vmem:[%s129_s2] ss:$0 sm:$0xff] }
   0x4   :  { %v34_v9 = vmax.f32 %v32_v6, %v33_v8  ;;  %v51_v20 = vadd.f32 %v77_v16, %v43_v15 }
   0x5   :  { %v26_v10 = vrot.slane %v25_v7, 4 }
   0x6   :  { %v35_v11 = vrot.slane %v34_v9, 4  ;;  %v53_v25 = vrot.slane %v51_v20, 1 }
   0x7   :  { %v27_v12 = vmax.f32 %v25_v7, %v26_v10 }
   0x8   :  { %v36_v13 = vmax.f32 %v34_v9, %v35_v11 }
   0x9   :  { %v28_v14 = vrot.slane %v27_v12, 2 }
   0xa   :  { %v37_v17 = vrot.slane %v36_v13, 2 }
   0xb   :  { %v29_v18 = vmax.f32 %v27_v12, %v28_v14 }
   0xc   :  { %v38_v19 = vmax.f32 %v36_v13, %v37_v17 }
   0xd   :  { %v30_v21 = vrot.slane %v29_v18, 1 }
   0xe   :  { %v39_v22 = vrot.slane %v38_v19, 1 }
   0xf   :  { %v31_v23 = vmax.f32 %v29_v18, %v30_v21 }
  0x10   :  { %v40_v24 = vmax.f32 %v38_v19, %v39_v22 }
  0x11   :  { %v41_v26 = vmax.f32 %v31_v23, 0.0 }
  0x12   :  { %v42_v27 = vmax.f32 %v40_v24, 0.0 }
  0x13   :  { %v56_v28 = vmul.f32 %v51_v20, %v41_v26 }
  0x14   :  { %v57_v29 = vmul.f32 %v53_v25, %v42_v27 }
  0x16   :  { %v60_v30 = vrot.slane %v57_v29, 7 }
  0x18   :  { %v62_v31 = vsel %vm61_vm1, %v60_v30, %v56_v28 }
  0x19   :  { %v65_v32 = vsel %vm64_vm2, %v62_v31, 0.0 }
  0x1a   :  { %66 = vadd.xlane.f32.xlu0 %v65_v32 }
  0xa3   :  { %v67_v34 = vpop.xlane.xlu0 %66 }
  0xa4   :  { %v70_v35 = vadd.f32 %v69_v33, %v67_v34 }
  0xa6   :  { %72 = vst.msk [vmem:[%s131_s4] sm:$0x3] %vm71_vm3, %v70_v35 }

// kernel: discriminator_forward.4
= control target key start
LH: loop header
LB: loop body
LE: loop exit
PB: predicated region body
PF: predicated region fallthrough
CT: control target
= control target key end

     0   :  { %s3659_s27 = smov 0   ;;  %s4383_s0 = inlined_call_operand.vmem [shape: f32[2,8,8,32], index: 0, kind: input, shape index: {}]   ;;  %s4384_s1 = inlined_call_operand.vmem [shape: bf16[32,64], index: 1, kind: input, shape index: {}]   ;;  %s4385_s2 = inlined_call_operand.vmem [shape: f32[1,64], index: 2, kind: input, shape index: {}]   ;;  %s4386_s3 = inlined_call_operand.vmem [shape: bf16[9,32,64], index: 3, kind: input, shape index: {}]   ;;  %s4387_s4 = inlined_call_operand.vmem [shape: f32[1,64], index: 4, kind: input, shape index: {}]   ;;  %s4388_s5 = inlined_call_operand.vmem [shape: bf16[9,64,64], index: 5, kind: input, shape index: {}]   ;;  %s4389_s6 = inlined_call_operand.vmem [shape: f32[1,64], index: 6, kind: input, shape index: {}]   ;;  %s4390_s7 = inlined_call_operand.vmem [shape: f32[16,64], index: 7, kind: input, shape index: {}]   ;;  %s4391_s8 = inlined_call_operand.vmem [shape: f32[2,16,64], index: 8, kind: output, shape index: {}]  }
   0x1 LB: > { %s2857_s28 = sadd.s32 4294967295, %s3611_s27   ;;  %p2861_p0 = scmp.ge.s32.totalorder %s3611_s27, 1  ;;  %s3611_s27 = sphi %s3659_s27, %s18_s27  }
   0x2   : > { %p262_p1 = scmp.lt.s32.totalorder %s3611_s27, 3 }
   0x4   : > { %p263_p2 = pnand %p2861_p0, %p262_p1 }
   0x6   : > { %266 = sbr.rel (%p263_p2) target bundleno = 803 (0x323), region = 52 }
   0xb   : > { %v3541_v0 = vld [vmem:[%s4386_s3 + $0x18] sm:$0xff]   ;;  %p296_p3 = scmp.lt.s32.totalorder %s2857_s28, 1  ;;  %v3542_v1 = vld [vmem:[%s4386_s3 + $0x10] sm:$0xff]   ;;  %vm315_vm0 = vcmask 261120   ;;  %v3613_v2 = vmov 0.0   ;;  %v3738_v3 = vld [vmem:[%s4386_s3 + $0x8] sm:$0xff]  }
   0xc   : > { %3245 = vmatprep.subr.bf16.mxu0 %v3541_v0  ;;  %3528 = vmatprep.subr.bf16.mxu1 %v3541_v0  ;;  %317 = vst.msk [vmem:[#allocation2 + $0x8] sm:$0xff] %vm315_vm0, %v3613_v2  ;;  %320 = vst.msk [vmem:[#allocation2 + $0x20] sm:$0xff] %vm315_vm0, %v3613_v2  ;;  %v3544_v4 = vld [vmem:[%s4386_s3 + $0x28] sm:$0xff]   ;;  %v3546_v26 = vld [vmem:[%s4386_s3 + $0x20] sm:$0xff]   ;;  %vm1396_vm1 = vcmask 523264  }
   0xd   : > { %s4407_s28 = smov (!%p296_p3, %s2857_s28), 1  ;;  %3246 = vmatpush3.bf16.msra.mxu0 %v3541_v0  ;;  %3530 = vmatpush3.bf16.msra.mxu1 %v3541_v0  ;;  %316 = vst.msk [vmem:[#allocation2] sm:$0xff] %vm315_vm0, %v3613_v2  ;;  %318 = vst.msk [vmem:[#allocation2 + $0x10] sm:$0xff] %vm315_vm0, %v3613_v2  ;;  %v3545_v38 = vld [vmem:[%s4386_s3] sm:$0xff]   ;;  %v3548_v41 = vld [vmem:[%s4386_s3 + $0x48] sm:$0xff]  }
   0xe   : > { %319 = vst.msk [vmem:[#allocation2 + $0x18] sm:$0xff] %vm315_vm0, %v3613_v2  ;;  %321 = vst.msk [vmem:[#allocation2 + $0x28] sm:$0xff] %vm315_vm0, %v3613_v2  ;;  %3247 = vmatprep.subr.bf16.mxu0 %v3542_v1  ;;  %3529 = vmatprep.subr.bf16.mxu1 %v3542_v1  ;;  %s3101_s13 = sshll.u32 %s4407_s28, 6  ;;  %v3547_v45 = vld [vmem:[%s4386_s3 + $0x38] sm:$0xff]   ;;  %v3549_v55 = vld [vmem:[%s4386_s3 + $0x30] sm:$0xff]   ;;  %s3102_s17 = sshll.u32 %s4407_s28, 4 }
   0xf   : > { %322 = vst.msk [vmem:[#allocation2 + $0x30] sm:$0xff] %vm315_vm0, %v3613_v2  ;;  %323 = vst.msk [vmem:[#allocation2 + $0x38] sm:$0xff] %vm315_vm0, %v3613_v2  ;;  %s3747_s18 = scalar_lea.vmem %s4383_s0, %s3101_s13  ;;  %v3550_v56 = vld [vmem:[%s4386_s3 + $0x40] sm:$0xff]   ;;  %v3551_v59 = vld [vmem:[%s4386_s3 + $0x58] sm:$0xff]   ;;  %s305_s21 = scalar_lea.vmem %s4391_s8, %s3102_s17 }
  0x10   : > { %324 = vst.msk [vmem:[#allocation2 + $0x40] sm:$0xff] %vm315_vm0, %v3613_v2  ;;  %325 = vst.msk [vmem:[#allocation2 + $0x48] sm:$0xff] %vm315_vm0, %v3613_v2  ;;  %v307_v5 = vld [vmem:[%s3747_s18] sm:$0xff]  ;;  %v310_v6 = vld [vmem:[%s3747_s18 + $0x18] sm:$0xff] }
  0x11   : > { %326 = vst.msk [vmem:[#allocation2 + $0x50] sm:$0xff] %vm315_vm0, %v3613_v2  ;;  %327 = vst.msk [vmem:[#allocation2 + $0x58] sm:$0xff] %vm315_vm0, %v3613_v2  ;;  %v311_v7 = vld [vmem:[%s3747_s18 + $0x20] sm:$0xff]  ;;  %3248 = vmatpush3.bf16.msra.mxu0 %v3542_v1  ;;  %3531 = vmatpush3.bf16.msra.mxu1 %v3542_v1  ;;  %v346_v8 = vmax.f32 %v307_v5, 0.0  ;;  %v349_v9 = vmax.f32 %v310_v6, 0.0  ;;  %v308_v11 = vld [vmem:[%s3747_s18 + $0x8] sm:$0xff] }
  0x12   : > { %328 = vst.msk [vmem:[#allocation2 + $0x60] sm:$0xff] %vm315_vm0, %v3613_v2  ;;  %329 = vst.msk [vmem:[#allocation2 + $0x68] sm:$0xff] %vm315_vm0, %v3613_v2  ;;  %v350_v10 = vmax.f32 %v311_v7, 0.0  ;;  %v309_v12 = vld [vmem:[%s3747_s18 + $0x10] sm:$0xff]  ;;  %v312_v13 = vld [vmem:[%s3747_s18 + $0x28] sm:$0xff]  ;;  %v347_v14 = vmax.f32 %v308_v11, 0.0  ;;  %3257 = vmatprep.subr.bf16.mxu1 %v3738_v3  ;;  %3269 = vmatprep.subr.bf16.mxu0 %v3544_v4 }
  0x13   : > { %330 = vst.msk [vmem:[#allocation2 + $0x70] sm:$0xff] %vm315_vm0, %v3613_v2  ;;  %331 = vst.msk [vmem:[#allocation2 + $0x78] sm:$0xff] %vm315_vm0, %v3613_v2  ;;  %v348_v15 = vmax.f32 %v309_v12, 0.0  ;;  %v313_v16 = vld [vmem:[%s3747_s18 + $0x30] sm:$0xff]  ;;  %v351_v17 = vmax.f32 %v312_v13, 0.0  ;;  %v379_v19 = vld [vmem:[#allocation2 + $0x8] sm:$0xff] }
  0x14   : > { %332 = vst.msk [vmem:[#allocation2 + $0x80] sm:$0xff] %vm315_vm0, %v3613_v2  ;;  %333 = vst.msk [vmem:[#allocation2 + $0x88] sm:$0xff] %vm315_vm0, %v3613_v2  ;;  %v352_v18 = vmax.f32 %v313_v16, 0.0  ;;  %v363_v20 = vld [vmem:[#allocation2 + $0x7] sm:$0xff]  ;;  %v314_v22 = vld [vmem:[%s3747_s18 + $0x38] sm:$0xff] }
  0x15   : > { %334 = vst.msk [vmem:[#allocation2 + $0x90] sm:$0xff] %vm315_vm0, %v3613_v2  ;;  %335 = vst.msk [vmem:[#allocation2 + $0x98] sm:$0xff] %vm315_vm0, %v3613_v2  ;;  %v574_v21 = vld [vmem:[#allocation2 + $0x9] sm:$0xff]  ;;  %v353_v27 = vmax.f32 %v314_v22, 0.0  ;;  %v3555_v13 = vld [vmem:[%s4386_s3 + $0x78] sm:$0xff]  }
  0x16   : > { %336 = vst.msk [vmem:[#allocation2 + $0xa0] sm:$0xff] %vm315_vm0, %v3613_v2  ;;  %337 = vst.msk [vmem:[#allocation2 + $0xa8] sm:$0xff] %vm315_vm0, %v3613_v2  ;;  %v3552_v62 = vld [vmem:[%s4386_s3 + $0x68] sm:$0xff]   ;;  %v3553_v6 = vld [vmem:[%s4386_s3 + $0x50] sm:$0xff]  }
  0x17   : > { %338 = vst.msk [vmem:[#allocation2 + $0xb0] sm:$0xff] %vm315_vm0, %v3613_v2  ;;  %339 = vst.msk [vmem:[#allocation2 + $0xb8] sm:$0xff] %vm315_vm0, %v3613_v2  ;;  %v3556_v12 = vld [vmem:[%s4386_s3 + $0x88] sm:$0xff]  }
  0x18   : > { %340 = vst.msk [vmem:[#allocation2 + $0xc0] sm:$0xff] %vm315_vm0, %v3613_v2  ;;  %341 = vst.msk [vmem:[#allocation2 + $0xc8] sm:$0xff] %vm315_vm0, %v3613_v2 }
  0x19   : > { %342 = vst.msk [vmem:[#allocation2 + $0xd0] sm:$0xff] %vm315_vm0, %v3613_v2  ;;  %343 = vst.msk [vmem:[#allocation2 + $0xd8] sm:$0xff] %vm315_vm0, %v3613_v2 }
  0x1a   : > { %344 = vst.msk [vmem:[#allocation2 + $0xe0] sm:$0xff] %vm315_vm0, %v3613_v2  ;;  %345 = vst.msk [vmem:[#allocation2 + $0xe8] sm:$0xff] %vm315_vm0, %v3613_v2 }
  0x1b   : > { %355 = vst.msk [vmem:[#allocation2 + $0x20] sm:$0xff] %vm315_vm0, %v346_v8  ;;  %358 = vst.msk [vmem:[#allocation2 + $0x68] sm:$0xff] %vm315_vm0, %v349_v9  ;;  %v3554_v8 = vld [vmem:[%s4386_s3 + $0x60] sm:$0xff]  }
  0x1c   : > { %359 = vst.msk [vmem:[#allocation2 + $0x80] sm:$0xff] %vm315_vm0, %v350_v10  ;;  %356 = vst.msk [vmem:[#allocation2 + $0x38] sm:$0xff] %vm315_vm0, %v347_v14 }
  0x1d   : > { %357 = vst.msk [vmem:[#allocation2 + $0x50] sm:$0xff] %vm315_vm0, %v348_v15  ;;  %360 = vst.msk [vmem:[#allocation2 + $0x98] sm:$0xff] %vm315_vm0, %v351_v17 }
  0x1e   : > { %361 = vst.msk [vmem:[#allocation2 + $0xb0] sm:$0xff] %vm315_vm0, %v352_v18  ;;  %362 = vst.msk [vmem:[#allocation2 + $0xc8] sm:$0xff] %vm315_vm0, %v353_v27 }
  0x1f   : > { %1407 = vst.msk [vmem:[#allocation3 + $0x50] sm:$0xff] %vm1396_vm1, %v3613_v2  ;;  %1397 = vst.msk [vmem:[#allocation3] sm:$0xff] %vm1396_vm1, %v3613_v2 }
  0x20   : > { %1398 = vst.msk [vmem:[#allocation3 + $0x8] sm:$0xff] %vm1396_vm1, %v3613_v2  ;;  %1399 = vst.msk [vmem:[#allocation3 + $0x10] sm:$0xff] %vm1396_vm1, %v3613_v2 }
  0x21   : > { %1400 = vst.msk [vmem:[#allocation3 + $0x18] sm:$0xff] %vm1396_vm1, %v3613_v2  ;;  %1401 = vst.msk [vmem:[#allocation3 + $0x20] sm:$0xff] %vm1396_vm1, %v3613_v2 }
  0x22   : > { %v3765_v23 = vld [vmem:[#allocation2 + $0x20] sm:$0xff]  ;;  %v3767_v24 = vld [vmem:[#allocation2 + $0x68] sm:$0xff]  ;;  %1402 = vst.msk [vmem:[#allocation3 + $0x28] sm:$0xff] %vm1396_vm1, %v3613_v2  ;;  %1403 = vst.msk [vmem:[#allocation3 + $0x30] sm:$0xff] %vm1396_vm1, %v3613_v2 }
  0x23   : > { %v3769_v25 = vld [vmem:[#allocation2 + $0x80] sm:$0xff]  ;;  %v387_v28 = vpack.c.bf16 %v3765_v23, %v379_v19  ;;  %v3779_v30 = vld [vmem:[#allocation2 + $0x38] sm:$0xff]  ;;  %v3824_v49 = vld [vmem:[#allocation2 + $0x69] sm:$0xff]  ;;  %1404 = vst.msk [vmem:[#allocation3 + $0x38] sm:$0xff] %vm1396_vm1, %v3613_v2 }
  0x24   : > { %v3777_v29 = vpack.c.bf16 %v3769_v25, %v3767_v24  ;;  %v3781_v31 = vld [vmem:[#allocation2 + $0x50] sm:$0xff]  ;;  %v3783_v32 = vld [vmem:[#allocation2 + $0x98] sm:$0xff]  ;;  %v3793_v36 = vld [vmem:[#allocation2 + $0x21] sm:$0xff]  ;;  %v810_v1 = vpack.c.bf16 %v3779_v30, %v3765_v23  ;;  %1405 = vst.msk [vmem:[#allocation3 + $0x40] sm:$0xff] %vm1396_vm1, %v3613_v2 }
  0x25   : > { %v3787_v33 = vpack.c.bf16 %v3781_v31, %v3779_v30  ;;  %v3789_v34 = vld [vmem:[#allocation2 + $0xb0] sm:$0xff]  ;;  %v3791_v35 = vld [vmem:[#allocation2 + $0x1f] sm:$0xff]  ;;  %3249 = vmatprep.mubr.msk.bf16.mxu0 %vm315_vm0, %v387_v28  ;;  %v582_v40 = vpack.c.bf16 %v3793_v36, %v574_v21  ;;  %v367_v47 = vld [vmem:[#allocation2 + $0x67] sm:$0xff]  ;;  %v812_v9 = vpack.c.bf16 %v3783_v32, %v3769_v25  ;;  %1406 = vst.msk [vmem:[#allocation3 + $0x48] sm:$0xff] %vm1396_vm1, %v3613_v2 }
  0x26   : > { %3253 = vmatprep.mubr.msk.bf16.mxu1 %vm315_vm0, %v3777_v29  ;;  %v3801_v37 = vpack.c.bf16 %v3789_v34, %v3783_v32  ;;  %v371_v39 = vpack.c.bf16 %v3791_v35, %v363_v20  ;;  %v365_v42 = vld [vmem:[#allocation2 + $0x37] sm:$0xff]  ;;  %v366_v46 = vld [vmem:[#allocation2 + $0x4f] sm:$0xff]  ;;  %v368_v48 = vld [vmem:[#allocation2 + $0x7f] sm:$0xff]  ;;  %1408 = vst.msk [vmem:[#allocation3 + $0x58] sm:$0xff] %vm1396_vm1, %v3613_v2 }
  0x27   : > { %3250 = vmatmul.mubr.msk.bf16.vlgmr.msra.gmra.mxu0 %vm315_vm0, %v3787_v33  ;;  %v3815_v43 = vld [vmem:[#allocation2 + $0x39] sm:$0xff]  ;;  %v3817_v44 = vld [vmem:[#allocation2 + $0x51] sm:$0xff]  ;;  %v3831_v51 = vld [vmem:[#allocation2 + $0x81] sm:$0xff]  ;;  %v372_v52 = vpack.c.bf16 %v366_v46, %v365_v42  ;;  %v3833_v53 = vpack.c.bf16 %v368_v48, %v367_v47  ;;  %v697_v5 = vpack.c.bf16 %v367_v47, %v366_v46  ;;  %1409 = vst.msk [vmem:[#allocation3 + $0x60] sm:$0xff] %vm1396_vm1, %v3613_v2 }
  0x28   : > { %3254 = vmatmul.mubr.msk.bf16.vlgmr.msra.gmra.mxu1 %vm315_vm0, %v3801_v37  ;;  %3270 = vmatpush3.bf16.msra.mxu0 %v3544_v4  ;;  %v3829_v50 = vpack.c.bf16 %v3817_v44, %v3815_v43  ;;  %v3837_v54 = vpack.c.bf16 %v3831_v51, %v3824_v49  ;;  %v3847_v57 = vld [vmem:[#allocation2 + $0x99] sm:$0xff]  ;;  %v3850_v58 = vld [vmem:[#allocation2 + $0xb1] sm:$0xff]  ;;  %v811_v4 = vpack.c.bf16 %v3767_v24, %v3781_v31  ;;  %v809_v10 = vld [vmem:[#allocation2 + $0xc8] sm:$0xff] }
  0x29   : > { %3258 = vmatpush3.bf16.msra.mxu1 %v3738_v3  ;;  %3271 = vmatprep.subr.bf16.mxu0 %v3546_v26  ;;  %v369_v60 = vld [vmem:[#allocation2 + $0x97] sm:$0xff]  ;;  %v370_v61 = vld [vmem:[#allocation2 + $0xaf] sm:$0xff]  ;;  %v3864_v63 = vpack.c.bf16 %v3850_v58, %v3847_v57  ;;  %v696_v3 = vpack.c.bf16 %v365_v42, %v3791_v35  ;;  %v695_v11 = vld [vmem:[#allocation2 + $0xc7] sm:$0xff]  ;;  %v813_v14 = vpack.c.bf16 %v809_v10, %v3789_v34 }
  0x2a   : > { %3259 = vmatprep.subr.bf16.mxu1 %v3545_v38  ;;  %3261 = vmatprep.mubr.msk.bf16.mxu1 %vm315_vm0, %v371_v39  ;;  %v374_v0 = vpack.c.bf16 %v370_v61, %v369_v60  ;;  %v698_v7 = vpack.c.bf16 %v369_v60, %v368_v48  ;;  %v699_v15 = vpack.c.bf16 %v695_v11, %v370_v61  ;;  %v3557_v19 = vld [vmem:[%s4386_s3 + $0x70] sm:$0xff]   ;;  %v3558_v20 = vld [vmem:[%s4386_s3 + $0x80] sm:$0xff]   ;;  %v3559_v30 = vld [vmem:[%s4388_s5 + $0x38] sm:$0xff]  }
  0x2b   : > { %3273 = vmatprep.mubr.msk.bf16.mxu0 %vm315_vm0, %v582_v40  ;;  %v924_v16 = vpack.c.bf16 %v3815_v43, %v3793_v36  ;;  %v925_v17 = vpack.c.bf16 %v3824_v49, %v3817_v44  ;;  %v926_v18 = vpack.c.bf16 %v3847_v57, %v3831_v51  ;;  %v1038_v21 = vld [vmem:[#allocation2 + $0xdf] sm:$0xff]  ;;  %v923_v22 = vld [vmem:[#allocation2 + $0xc9] sm:$0xff]  ;;  %1410 = vst.msk [vmem:[#allocation3 + $0x68] sm:$0xff] %vm1396_vm1, %v3613_v2  ;;  %1411 = vst.msk [vmem:[#allocation3 + $0x70] sm:$0xff] %vm1396_vm1, %v3613_v2 }
  0x2c   : > { %3272 = vmatpush3.bf16.msra.mxu0 %v3546_v26  ;;  %v1042_v23 = vpack.c.bf16 %v1038_v21, %v695_v11  ;;  %v927_v24 = vpack.c.bf16 %v923_v22, %v3850_v58  ;;  %v1266_v25 = vld [vmem:[#allocation2 + $0xe1] sm:$0xff]  ;;  %1412 = vst.msk [vmem:[#allocation3 + $0x78] sm:$0xff] %vm1396_vm1, %v3613_v2  ;;  %1413 = vst.msk [vmem:[#allocation3 + $0x80] sm:$0xff] %vm1396_vm1, %v3613_v2  ;;  %v3561_v31 = vld [vmem:[%s4388_s5 + $0x30] sm:$0xff]  }
  0x2d   : > { %3260 = vmatpush3.bf16.msra.mxu1 %v3545_v38  ;;  %3293 = vmatprep.subr.bf16.mxu0 %v3548_v41  ;;  %v1152_v26 = vld [vmem:[#allocation2 + $0xe0] sm:$0xff]  ;;  %v1270_v27 = vpack.c.bf16 %v1266_v25, %v923_v22  ;;  %1414 = vst.msk [vmem:[#allocation3 + $0x88] sm:$0xff] %vm1396_vm1, %v3613_v2  ;;  %1415 = vst.msk [vmem:[#allocation3 + $0x90] sm:$0xff] %vm1396_vm1, %v3613_v2  ;;  %v3562_v32 = vld [vmem:[%s4388_s5 + $0x10] sm:$0xff]  }
  0x2e   : > { %3281 = vmatprep.subr.bf16.mxu1 %v3547_v45  ;;  %v1156_v28 = vpack.c.bf16 %v1152_v26, %v809_v10  ;;  %1416 = vst.msk [vmem:[#allocation3 + $0x98] sm:$0xff] %vm1396_vm1, %v3613_v2  ;;  %1417 = vst.msk [vmem:[#allocation3 + $0xa0] sm:$0xff] %vm1396_vm1, %v3613_v2  ;;  %v3565_v34 = vld [vmem:[%s4388_s5 + $0x20] sm:$0xff]   ;;  %v4020_v36 = vld [vmem:[%s4388_s5 + $0x58] sm:$0xff]  }
  0x2f   : > { %3274 = vmatmul.mubr.msk.bf16.vlgmr.msra.gmra.mxu0 %vm315_vm0, %v3829_v50  ;;  %1418 = vst.msk [vmem:[#allocation3 + $0xa8] sm:$0xff] %vm1396_vm1, %v3613_v2  ;;  %1419 = vst.msk [vmem:[#allocation3 + $0xb0] sm:$0xff] %vm1396_vm1, %v3613_v2  ;;  %v3566_v35 = vld [vmem:[%s4388_s5] sm:$0xff]  }
  0x30   : > { %3262 = vmatmul.mubr.msk.bf16.vlgmr.msra.gmra.mxu1 %vm315_vm0, %v372_v52  ;;  %3294 = vmatpush3.bf16.msra.mxu0 %v3548_v41  ;;  %1420 = vst.msk [vmem:[#allocation3 + $0xb8] sm:$0xff] %vm1396_vm1, %v3613_v2  ;;  %1421 = vst.msk [vmem:[#allocation3 + $0xc0] sm:$0xff] %vm1396_vm1, %v3613_v2 }
  0x31   : > { %3282 = vmatpush3.bf16.msra.mxu1 %v3547_v45  ;;  %3265 = vmatprep.mubr.msk.bf16.mxu1 %vm315_vm0, %v3833_v53  ;;  %1422 = vst.msk [vmem:[#allocation3 + $0xc8] sm:$0xff] %vm1396_vm1, %v3613_v2  ;;  %1423 = vst.msk [vmem:[#allocation3 + $0xd0] sm:$0xff] %vm1396_vm1, %v3613_v2 }
  0x32   : > { %3277 = vmatprep.mubr.msk.bf16.mxu0 %vm315_vm0, %v3837_v54  ;;  %3283 = vmatprep.subr.bf16.mxu1 %v3549_v55  ;;  %1424 = vst.msk [vmem:[#allocation3 + $0xd8] sm:$0xff] %vm1396_vm1, %v3613_v2  ;;  %1425 = vst.msk [vmem:[#allocation3 + $0xe0] sm:$0xff] %vm1396_vm1, %v3613_v2 }
  0x33   : > { %3295 = vmatprep.subr.bf16.mxu0 %v3550_v56  ;;  %1426 = vst.msk [vmem:[#allocation3 + $0xe8] sm:$0xff] %vm1396_vm1, %v3613_v2  ;;  %v3563_v2 = vld [vmem:[%s4388_s5 + $0x28] sm:$0xff]  }
  0x34   : > { %3296 = vmatpush3.bf16.msra.mxu0 %v3550_v56 }
  0x35   : > { %3284 = vmatpush3.bf16.msra.mxu1 %v3549_v55  ;;  %3317 = vmatprep.subr.bf16.mxu0 %v3552_v62 }
  0x36   : > { %3305 = vmatprep.subr.bf16.mxu1 %v3551_v59 }
  0x37   : > { %3278 = vmatmul.mubr.msk.bf16.gmra.mxu0 %vm315_vm0, %v3864_v63 }
  0x38   : > { %3266 = vmatmul.mubr.msk.bf16.gmra.mxu1 %vm315_vm0, %v374_v0  ;;  %3297 = vmatprep.mubr.msk.bf16.mxu0 %vm315_vm0, %v810_v1 }
  0x39   : > { %3285 = vmatprep.mubr.msk.bf16.mxu1 %vm315_vm0, %v696_v3 }
  0x3f   : > { %3298 = vmatmul.mubr.msk.bf16.vlgmr.msra.gmra.mxu0 %vm315_vm0, %v811_v4 }
  0x40   : > { %3286 = vmatmul.mubr.msk.bf16.vlgmr.msra.gmra.mxu1 %vm315_vm0, %v697_v5  ;;  %3318 = vmatpush3.bf16.msra.mxu0 %v3552_v62 }
  0x41   : > { %3306 = vmatpush3.bf16.msra.mxu1 %v3551_v59  ;;  %3289 = vmatprep.mubr.msk.bf16.mxu1 %vm315_vm0, %v698_v7 }
  0x42   : > { %3301 = vmatprep.mubr.msk.bf16.mxu0 %vm315_vm0, %v812_v9  ;;  %3307 = vmatprep.subr.bf16.mxu1 %v3553_v6 }
  0x43   : > { %3319 = vmatprep.subr.bf16.mxu0 %v3554_v8 }
  0x44   : > { %3320 = vmatpush3.bf16.msra.mxu0 %v3554_v8 }
  0x45   : > { %3308 = vmatpush3.bf16.msra.mxu1 %v3553_v6  ;;  %3341 = vmatprep.subr.bf16.mxu0 %v3556_v12 }
  0x46   : > { %3329 = vmatprep.subr.bf16.mxu1 %v3555_v13 }
  0x47   : > { %3302 = vmatmul.mubr.msk.bf16.gmra.mxu0 %vm315_vm0, %v813_v14 }
  0x48   : > { %3290 = vmatmul.mubr.msk.bf16.gmra.mxu1 %vm315_vm0, %v699_v15  ;;  %3321 = vmatprep.mubr.msk.bf16.mxu0 %vm315_vm0, %v372_v52 }
  0x49   : > { %3309 = vmatprep.mubr.msk.bf16.mxu1 %vm315_vm0, %v924_v16 }
  0x4f   : > { %3322 = vmatmul.mubr.msk.bf16.vlgmr.msra.gmra.mxu0 %vm315_vm0, %v3833_v53 }
  0x50   : > { %3310 = vmatmul.mubr.msk.bf16.vlgmr.msra.gmra.mxu1 %vm315_vm0, %v925_v17  ;;  %3342 = vmatpush3.bf16.msra.mxu0 %v3556_v12 }
  0x51   : > { %3330 = vmatpush3.bf16.msra.mxu1 %v3555_v13  ;;  %3313 = vmatprep.mubr.msk.bf16.mxu1 %vm315_vm0, %v926_v18 }
  0x52   : > { %3325 = vmatprep.mubr.msk.bf16.mxu0 %vm315_vm0, %v374_v0  ;;  %3331 = vmatprep.subr.bf16.mxu1 %v3557_v19 }
  0x53   : > { %3343 = vmatprep.subr.bf16.mxu0 %v3558_v20 }
  0x54   : > { %3344 = vmatpush3.bf16.msra.mxu0 %v3558_v20 }
  0x55   : > { %3332 = vmatpush3.bf16.msra.mxu1 %v3557_v19 }
  0x56   : > { %3353 = vmatprep.subr.bf16.mxu1 %v3559_v30 }
  0x57   : > { %3326 = vmatmul.mubr.msk.bf16.gmra.mxu0 %vm315_vm0, %v1042_v23 }
  0x58   : > { %3314 = vmatmul.mubr.msk.bf16.gmra.mxu1 %vm315_vm0, %v927_v24  ;;  %3345 = vmatprep.mubr.msk.bf16.mxu0 %vm315_vm0, %v3829_v50 }
  0x59   : > { %3333 = vmatprep.mubr.msk.bf16.mxu1 %vm315_vm0, %v3787_v33  ;;  %v3564_v33 = vld [vmem:[%s4388_s5 + $0x8] sm:$0xff]  }
  0x5f   : > { %3346 = vmatmul.mubr.msk.bf16.vlgmr.msra.gmra.mxu0 %vm315_vm0, %v3837_v54 }
  0x60   : > { %3334 = vmatmul.mubr.msk.bf16.vlgmr.msra.gmra.mxu1 %vm315_vm0, %v3777_v29  ;;  %3349 = vmatprep.mubr.msk.bf16.mxu0 %vm315_vm0, %v3864_v63  ;;  %v3560_v29 = vld [vmem:[%s4388_s5 + $0x18] sm:$0xff]  }
  0x61   : > { %3337 = vmatprep.mubr.msk.bf16.mxu1 %vm315_vm0, %v3801_v37  ;;  %3369 = vmatprep.subr.bf16.mxu0 %v3560_v29  ;;  %v4025_v37 = vld [vmem:[%s4388_s5 + $0x78] sm:$0xff]  }
  0x62   : > { %3354 = vmatpush3.bf16.msra.mxu1 %v3559_v30  ;;  %3370 = vmatpush3.bf16.msra.mxu0 %v3560_v29 }
  0x63   : > { %3355 = vmatprep.subr.bf16.mxu1 %v3561_v31  ;;  %3371 = vmatprep.subr.bf16.mxu0 %v3562_v32 }
  0x66   : > { %3356 = vmatpush3.bf16.msra.mxu1 %v3561_v31  ;;  %3372 = vmatpush3.bf16.msra.mxu0 %v3562_v32 }
  0x67   : > { %3350 = vmatmul.mubr.msk.bf16.gmra.mxu0 %vm315_vm0, %v1270_v27  ;;  %3357 = vmatprep.subr.bf16.mxu1 %v3563_v2 }
  0x68   : > { %3338 = vmatmul.mubr.msk.bf16.gmra.mxu1 %vm315_vm0, %v1156_v28  ;;  %3373 = vmatprep.subr.bf16.mxu0 %v3564_v33 }
  0x6a   : > { %3358 = vmatpush3.bf16.msra.mxu1 %v3563_v2  ;;  %3374 = vmatpush3.bf16.msra.mxu0 %v3564_v33 }
  0x6b   : > { %3359 = vmatprep.subr.bf16.mxu1 %v3565_v34  ;;  %3375 = vmatprep.subr.bf16.mxu0 %v3566_v35 }
  0x6e   : > { %3360 = vmatpush3.bf16.msra.mxu1 %v3565_v34  ;;  %3376 = vmatpush3.bf16.msra.mxu0 %v3566_v35 }
  0x6f   : > { %3385 = vmatprep.subr.bf16.mxu1 %v4020_v36  ;;  %3401 = vmatprep.subr.bf16.mxu0 %v4025_v37 }
  0xe7   : > { %v3251_v38 = vpop.f32.mrf.mxu0 }
  0xe8   : > { %v3255_v39 = vpop.f32.mrf.mxu1 }
  0xe9   : > { %v454_v40 = vpop.f32.mrf.mxu0 }
  0xea   : > { %v470_v41 = vpop.f32.mrf.mxu1 }
  0xeb   : > { %v3252_v42 = vpop.f32.mrf.mxu0 }
  0xec   : > { %v3256_v43 = vpop.f32.mrf.mxu1 }
  0xed   : > { %v457_v44 = vpop.f32.mrf.mxu0 }
  0xee   : > { %v4029_v45 = vpop.f32.mrf.mxu1 }
  0xef   : > { %v3275_v46 = vpop.f32.mrf.mxu0 }
  0xf0   : > { %v3263_v47 = vpop.f32.mrf.mxu1 }
  0xf1   : > { %v649_v48 = vpop.f32.mrf.mxu0  ;;  %v552_v15 = vadd.f32 %v3263_v47, %v3251_v38 }
  0xf2   : > { %v543_v49 = vpop.f32.mrf.mxu1 }
  0xf3   : > { %v3276_v50 = vpop.f32.mrf.mxu0  ;;  %v544_v18 = vadd.f32 %v543_v49, %v454_v40  ;;  %v682_v21 = vadd.f32 %v3275_v46, %v552_v15 }
  0xf4   : > { %v3264_v51 = vpop.f32.mrf.mxu1 }
  0xf5   : > { %v652_v52 = vpop.f32.mrf.mxu0  ;;  %v555_v22 = vadd.f32 %v3264_v51, %v3252_v42  ;;  %v680_v25 = vadd.f32 %v649_v48, %v544_v18 }
  0xf6   : > { %v546_v53 = vpop.f32.mrf.mxu1 }
  0xf7   : > { %v3279_v54 = vpop.f32.mrf.mxu0  ;;  %v547_v26 = vadd.f32 %v546_v53, %v457_v44  ;;  %v683_v31 = vadd.f32 %v3276_v50, %v555_v22 }
  0xf8   : > { %v3267_v55 = vpop.f32.mrf.mxu1 }
  0xf9   : > { %v665_v56 = vpop.f32.mrf.mxu0  ;;  %v568_v30 = vadd.f32 %v3267_v55, %v3255_v39  ;;  %v681_v35 = vadd.f32 %v652_v52, %v547_v26 }
  0xfa   : > { %v559_v57 = vpop.f32.mrf.mxu1 }
  0xfb   : > { %v3280_v58 = vpop.f32.mrf.mxu0  ;;  %v560_v33 = vadd.f32 %v559_v57, %v470_v41  ;;  %v686_v49 = vadd.f32 %v3279_v54, %v568_v30 }
  0xfc   : > { %v3268_v59 = vpop.f32.mrf.mxu1 }
  0xfd   : > { %v4031_v60 = vpop.f32.mrf.mxu0  ;;  %v571_v46 = vadd.f32 %v3268_v59, %v3256_v43  ;;  %v684_v53 = vadd.f32 %v665_v56, %v560_v33 }
  0xfe   : > { %v562_v61 = vpop.f32.mrf.mxu1 }
  0xff   : > { %v3299_v62 = vpop.f32.mrf.mxu0  ;;  %v563_v39 = vadd.f32 %v562_v61, %v4029_v45  ;;  %v687_v57 = vadd.f32 %v3280_v58, %v571_v46  ;;  %v4042_v58 = vld [vmem:[%s4387_s4] ss:$0 sm:$0xff] }
 0x100   : > { %v3287_v63 = vpop.f32.mrf.mxu1 }
 0x101   : > { %v877_v0 = vpop.f32.mrf.mxu0  ;;  %v796_v27 = vadd.f32 %v3287_v63, %v682_v21  ;;  %v685_v59 = vadd.f32 %v4031_v60, %v563_v39 }
 0x102   : > { %v763_v1 = vpop.f32.mrf.mxu1 }
 0x103   : > { %v3300_v3 = vpop.f32.mrf.mxu0  ;;  %v794_v32 = vadd.f32 %v763_v1, %v680_v25  ;;  %v910_v38 = vadd.f32 %v3299_v62, %v796_v27 }
 0x104   : > { %v3288_v4 = vpop.f32.mrf.mxu1 }
 0x105   : > { %v880_v5 = vpop.f32.mrf.mxu0  ;;  %v797_v40 = vadd.f32 %v3288_v4, %v683_v31  ;;  %v908_v51 = vadd.f32 %v877_v0, %v794_v32 }
 0x106   : > { %v766_v6 = vpop.f32.mrf.mxu1 }
 0x107   : > { %v3303_v7 = vpop.f32.mrf.mxu0  ;;  %v795_v15 = vadd.f32 %v766_v6, %v681_v35  ;;  %v911_v63 = vadd.f32 %v3300_v3, %v797_v40 }
 0x108   : > { %v3291_v8 = vpop.f32.mrf.mxu1 }
 0x109   : > { %v893_v9 = vpop.f32.mrf.mxu0  ;;  %v800_v55 = vadd.f32 %v3291_v8, %v686_v49  ;;  %v909_v4 = vadd.f32 %v880_v5, %v795_v15 }
 0x10a   : > { %v779_v10 = vpop.f32.mrf.mxu1 }
 0x10b   : > { %v4033_v11 = vpop.f32.mrf.mxu0  ;;  %v798_v52 = vadd.f32 %v779_v10, %v684_v53  ;;  %v914_v0 = vadd.f32 %v3303_v7, %v800_v55 }
 0x10c   : > { %v3292_v12 = vpop.f32.mrf.mxu1 }
 0x10d   : > { %v4035_v13 = vpop.f32.mrf.mxu0  ;;  %v801_v6 = vadd.f32 %v3292_v12, %v687_v57  ;;  %v912_v8 = vadd.f32 %v893_v9, %v798_v52 }
 0x10e   : > { %v782_v14 = vpop.f32.mrf.mxu1 }
 0x10f   : > { %v3323_v16 = vpop.f32.mrf.mxu0  ;;  %v799_v3 = vadd.f32 %v782_v14, %v685_v59  ;;  %v915_v7 = vadd.f32 %v4033_v11, %v801_v6  ;;  %v1456_v59 = vld [vmem:[#allocation3 + $0x8] sm:$0xff] }
 0x110   : > { %v3311_v17 = vpop.f32.mrf.mxu1 }
 0x111   : > { %v1106_v19 = vpop.f32.mrf.mxu0  ;;  %v1024_v48 = vadd.f32 %v3311_v17, %v910_v38  ;;  %v913_v27 = vadd.f32 %v4035_v13, %v799_v3 }
 0x112   : > { %v991_v20 = vpop.f32.mrf.mxu1 }
 0x113   : > { %v3324_v23 = vpop.f32.mrf.mxu0  ;;  %v1022_v1 = vadd.f32 %v991_v20, %v908_v51  ;;  %v1139_v18 = vadd.f32 %v3323_v16, %v1024_v48 }
 0x114   : > { %v3312_v24 = vpop.f32.mrf.mxu1 }
 0x115   : > { %v1109_v28 = vpop.f32.mrf.mxu0  ;;  %v1025_v54 = vadd.f32 %v3312_v24, %v911_v63  ;;  %v1137_v56 = vadd.f32 %v1106_v19, %v1022_v1 }
 0x116   : > { %v994_v29 = vpop.f32.mrf.mxu1 }
 0x117   : > { %v3327_v2 = vpop.f32.mrf.mxu0  ;;  %v1023_v21 = vadd.f32 %v994_v29, %v909_v4  ;;  %v1140_v10 = vadd.f32 %v3324_v23, %v1025_v54 }
 0x118   : > { %v3315_v34 = vpop.f32.mrf.mxu1 }
 0x119   : > { %v1122_v47 = vpop.f32.mrf.mxu0  ;;  %v1028_v20 = vadd.f32 %v3315_v34, %v914_v0  ;;  %v1138_v24 = vadd.f32 %v1109_v28, %v1023_v21 }
 0x11a   : > { %v1007_v42 = vpop.f32.mrf.mxu1 }
 0x11b   : > { %v3328_v44 = vpop.f32.mrf.mxu0  ;;  %v1026_v12 = vadd.f32 %v1007_v42, %v912_v8  ;;  %v1143_v30 = vadd.f32 %v3327_v2, %v1028_v20 }
 0x11c   : > { %v3316_v50 = vpop.f32.mrf.mxu1 }
 0x11d   : > { %v1125_v41 = vpop.f32.mrf.mxu0  ;;  %v1029_v29 = vadd.f32 %v3316_v50, %v915_v7  ;;  %v1141_v11 = vadd.f32 %v1122_v47, %v1026_v12  ;;  %v3569_v7 = vld [vmem:[%s4388_s5 + $0x50] sm:$0xff]  }
 0x11e   : > { %v1010_v62 = vpop.f32.mrf.mxu1  ;;  %v3570_v12 = vld [vmem:[%s4388_s5 + $0x70] sm:$0xff]  }
 0x11f   : > { %v3347_v43 = vpop.f32.mrf.mxu0  ;;  %v1027_v38 = vadd.f32 %v1010_v62, %v913_v27  ;;  %v1144_v2 = vadd.f32 %v3328_v44, %v1029_v29  ;;  %v3571_v27 = vld [vmem:[%s4388_s5 + $0x48] sm:$0xff]  }
 0x120   : > { %v3335_v17 = vpop.f32.mrf.mxu1 }
 0x121   : > { %v1253_v45 = vadd.f32 %v3335_v17, %v1139_v18  ;;  %v1334_v61 = vpop.f32.mrf.mxu0  ;;  %v1142_v47 = vadd.f32 %v1125_v41, %v1027_v38  ;;  %v1436_v41 = vld [vmem:[#allocation3 + $0x7] sm:$0xff]  ;;  %v3574_v38 = vld [vmem:[%s4388_s5 + $0x60] sm:$0xff]  }
 0x122   : > { %v1220_v5 = vpop.f32.mrf.mxu1 }
 0x123   : > { %v1367_v16 = vadd.f32 %v3347_v43, %v1253_v45  ;;  %v1251_v22 = vadd.f32 %v1220_v5, %v1137_v56  ;;  %v3348_v60 = vpop.f32.mrf.mxu0 }
 0x124   : > { %v3336_v19 = vpop.f32.mrf.mxu1 }
 0x125   : > { %v1382_v25 = vadd.f32 %v4042_v58, %v1367_v16  ;;  %v1365_v9 = vadd.f32 %v1334_v61, %v1251_v22  ;;  %v1254_v14 = vadd.f32 %v3336_v19, %v1140_v10  ;;  %v1337_v26 = vpop.f32.mrf.mxu0 }
 0x126   : > { %v1223_v31 = vpop.f32.mrf.mxu1 }
 0x127   : > { %v1390_v32 = vmax.f32 %v1382_v25, 0.0  ;;  %v1380_v23 = vadd.f32 %v4042_v58, %v1365_v9  ;;  %v1368_v33 = vadd.f32 %v3348_v60, %v1254_v14  ;;  %v1252_v34 = vadd.f32 %v1223_v31, %v1138_v24  ;;  %v3351_v35 = vpop.f32.mrf.mxu0 }
 0x128   : > { %v3339_v40 = vpop.f32.mrf.mxu1 }
 0x129   : > { %1430 = vst.msk [vmem:[#allocation3 + $0x50] sm:$0xff] %vm1396_vm1, %v1390_v32  ;;  %v1388_v28 = vmax.f32 %v1380_v23, 0.0  ;;  %v1383_v49 = vadd.f32 %v4042_v58, %v1368_v33  ;;  %v1366_v46 = vadd.f32 %v1337_v26, %v1252_v34  ;;  %v1257_v42 = vadd.f32 %v3339_v40, %v1143_v30  ;;  %v1350_v13 = vpop.f32.mrf.mxu0  ;;  %v1679_v30 = vld [vmem:[#allocation3 + $0x9] sm:$0xff] }
 0x12a   : > { %v1236_v51 = vpop.f32.mrf.mxu1 }
 0x12b   : > { %1428 = vst.msk [vmem:[#allocation3 + $0x20] sm:$0xff] %vm1396_vm1, %v1388_v28  ;;  %v1391_v15 = vmax.f32 %v1383_v49, 0.0  ;;  %v1381_v48 = vadd.f32 %v4042_v58, %v1366_v46  ;;  %v1371_v53 = vadd.f32 %v3351_v35, %v1257_v42  ;;  %v1255_v39 = vadd.f32 %v1236_v51, %v1141_v11  ;;  %v3352_v50 = vpop.f32.mrf.mxu0  ;;  %v3573_v11 = vld [vmem:[%s4388_s5 + $0x40] sm:$0xff]   ;;  %v3575_v28 = vld [vmem:[%s4388_s5 + $0x98] sm:$0xff]  }
 0x12c   : > { %v3340_v55 = vpop.f32.mrf.mxu1  ;;  %v3576_v46 = vld [vmem:[%s4388_s5 + $0xb8] sm:$0xff]  }
 0x12d   : > { %1431 = vst.msk [vmem:[#allocation3 + $0x68] sm:$0xff] %vm1396_vm1, %v1391_v15  ;;  %v1389_v63 = vmax.f32 %v1381_v48, 0.0  ;;  %v1386_v1 = vadd.f32 %v4042_v58, %v1371_v53  ;;  %v1369_v57 = vadd.f32 %v1350_v13, %v1255_v39  ;;  %v1258_v52 = vadd.f32 %v3340_v55, %v1144_v2  ;;  %v1353_v43 = vpop.f32.mrf.mxu0  ;;  %v3577_v53 = vld [vmem:[%s4388_s5 + $0x90] sm:$0xff]  }
 0x12e   : > { %v1239_v62 = vpop.f32.mrf.mxu1 }
 0x12f   : > { %1429 = vst.msk [vmem:[#allocation3 + $0x38] sm:$0xff] %vm1396_vm1, %v1389_v63  ;;  %v1394_v44 = vmax.f32 %v1386_v1, 0.0  ;;  %v1384_v4 = vadd.f32 %v4042_v58, %v1369_v57  ;;  %v1372_v18 = vadd.f32 %v3352_v50, %v1258_v52  ;;  %v1256_v54 = vadd.f32 %v1239_v62, %v1142_v47  ;;  %v3578_v47 = vld [vmem:[%s4388_s5 + $0xb0] sm:$0xff]   ;;  %v3579_v50 = vld [vmem:[%s4388_s5 + $0x88] sm:$0xff]  }
 0x130   : > { %v4066_v5 = vld [vmem:[#allocation3 + $0x50] sm:$0xff]  ;;  %v3580_v1 = vld [vmem:[%s4388_s5 + $0xa8] sm:$0xff]  }
 0x131   : > { %1434 = vst.msk [vmem:[#allocation3 + $0xb0] sm:$0xff] %vm1396_vm1, %v1394_v44  ;;  %v1392_v0 = vmax.f32 %v1384_v4, 0.0  ;;  %v1387_v6 = vadd.f32 %v4042_v58, %v1372_v18  ;;  %v1370_v17 = vadd.f32 %v1353_v43, %v1256_v54  ;;  %v4070_v22 = vld [vmem:[#allocation3 + $0x4f] sm:$0xff] }
 0x132   : > { %v4058_v56 = vld [vmem:[#allocation3 + $0x20] sm:$0xff]  ;;  %v1682_v13 = vld [vmem:[#allocation3 + $0x51] sm:$0xff]  ;;  %v3583_v43 = vld [vmem:[%s4388_s5 + $0xd8] sm:$0xff]  }
 0x133   : > { %v1437_v21 = vld [vmem:[#allocation3 + $0x1f] sm:$0xff]  ;;  %1432 = vst.msk [vmem:[#allocation3 + $0x80] sm:$0xff] %vm1396_vm1, %v1392_v0  ;;  %v1395_v45 = vmax.f32 %v1387_v6, 0.0  ;;  %v1385_v61 = vadd.f32 %v4042_v58, %v1370_v17  ;;  %v1464_v8 = vpack.c.bf16 %v4058_v56, %v1456_v59  ;;  %v3581_v4 = vld [vmem:[%s4388_s5 + $0x80] sm:$0xff]   ;;  %v3584_v59 = vld [vmem:[%s4388_s5 + $0xf8] sm:$0xff]  }
 0x134   : > { %v1444_v3 = vpack.c.bf16 %v1437_v21, %v1436_v41  ;;  %v4090_v19 = vld [vmem:[#allocation3 + $0x68] sm:$0xff]  ;;  %v3582_v54 = vld [vmem:[%s4388_s5 + $0xa0] sm:$0xff]   ;;  %v3585_v17 = vld [vmem:[%s4388_s5 + $0xd0] sm:$0xff]  }
 0x135   : > { %1435 = vst.msk [vmem:[#allocation3 + $0xc8] sm:$0xff] %vm1396_vm1, %v1395_v45  ;;  %v1393_v20 = vmax.f32 %v1385_v61, 0.0  ;;  %3361 = vmatprep.mubr.msk.bf16.mxu1 %vm1396_vm1, %v1464_v8  ;;  %v1440_v25 = vld [vmem:[#allocation3 + $0x67] sm:$0xff]  ;;  %v1948_v41 = vpack.c.bf16 %v4090_v19, %v4066_v5  ;;  %v3587_v61 = vld [vmem:[%s4388_s5 + $0xc8] sm:$0xff]  }
 0x136   : > { %3377 = vmatprep.mubr.msk.bf16.mxu0 %vm1396_vm1, %v1444_v3  ;;  %v4068_v10 = vld [vmem:[#allocation3 + $0x38] sm:$0xff]  ;;  %v4114_v29 = vld [vmem:[#allocation3 + $0x21] sm:$0xff]  ;;  %v1683_v51 = vld [vmem:[#allocation3 + $0x69] sm:$0xff]  ;;  %v1818_v15 = vpack.c.bf16 %v1440_v25, %v4070_v22 }
 0x137   : > { %v1438_v16 = vld [vmem:[#allocation3 + $0x37] sm:$0xff]  ;;  %1433 = vst.msk [vmem:[#allocation3 + $0x98] sm:$0xff] %vm1396_vm1, %v1393_v20  ;;  %v4075_v58 = vpack.c.bf16 %v4066_v5, %v4068_v10  ;;  %v1687_v35 = vpack.c.bf16 %v4114_v29, %v1679_v30  ;;  %v1947_v44 = vpack.c.bf16 %v4068_v10, %v4058_v56  ;;  %v2078_v0 = vpack.c.bf16 %v1683_v51, %v1682_v13  ;;  %v3600_v30 = vld [vmem:[%s3747_s18 + $0x10] sm:$0xff] }
 0x138   : > { %v4078_v60 = vpack.c.bf16 %v4070_v22, %v1438_v16  ;;  %v1443_v23 = vld [vmem:[#allocation3 + $0xaf] sm:$0xff]  ;;  %v1817_v40 = vpack.c.bf16 %v1438_v16, %v1437_v21  ;;  %v1681_v49 = vld [vmem:[#allocation3 + $0x39] sm:$0xff] }
 0x139   : > { %3362 = vmatmul.mubr.msk.bf16.vlgmr.msra.gmra.mxu1 %vm1396_vm1, %v4075_v58  ;;  %v4143_v2 = vpack.c.bf16 %v1682_v13, %v1681_v49  ;;  %v1686_v57 = vld [vmem:[#allocation3 + $0xb1] sm:$0xff]  ;;  %v2077_v18 = vpack.c.bf16 %v1681_v49, %v4114_v29  ;;  %v3586_v21 = vld [vmem:[%s4388_s5 + $0xf0] sm:$0xff]   ;;  %v3591_v22 = vld [vmem:[%s4388_s5 + $0x118] sm:$0xff]  }
 0x13a   : > { %3378 = vmatmul.mubr.msk.bf16.vlgmr.msra.gmra.mxu0 %vm1396_vm1, %v4078_v60  ;;  %3386 = vmatpush3.bf16.msra.mxu1 %v4020_v36  ;;  %v4094_v24 = vld [vmem:[#allocation3 + $0x80] sm:$0xff]  ;;  %v3572_v36 = vld [vmem:[%s4388_s5 + $0x68] sm:$0xff]   ;;  %v3589_v10 = vld [vmem:[%s4388_s5 + $0xc0] sm:$0xff]  }
 0x13b   : > { %3402 = vmatpush3.bf16.msra.mxu0 %v4025_v37  ;;  %v1441_v9 = vld [vmem:[#allocation3 + $0x7f] sm:$0xff]  ;;  %v4098_v14 = vpack.c.bf16 %v4094_v24, %v4090_v19  ;;  %3387 = vmatprep.subr.bf16.mxu1 %v3569_v7  ;;  %v4112_v37 = vld [vmem:[#allocation3 + $0xb0] sm:$0xff] }
 0x13c   : > { %v4100_v26 = vpack.c.bf16 %v1441_v9, %v1440_v25  ;;  %3403 = vmatprep.subr.bf16.mxu0 %v3570_v12  ;;  %v1684_v42 = vld [vmem:[#allocation3 + $0x81] sm:$0xff]  ;;  %v4208_v8 = vld [vmem:[#allocation3 + $0xc9] sm:$0xff]  ;;  %v3588_v3 = vld [vmem:[%s4388_s5 + $0xe8] sm:$0xff]  }
 0x13d   : > { %3365 = vmatprep.mubr.msk.bf16.mxu1 %vm1396_vm1, %v4098_v14  ;;  %v4146_v48 = vpack.c.bf16 %v1684_v42, %v1683_v51  ;;  %v4163_v63 = vld [vmem:[#allocation3 + $0xc7] sm:$0xff]  ;;  %v2080_v5 = vpack.c.bf16 %v4208_v8, %v1686_v57  ;;  %v3590_v16 = vld [vmem:[%s4388_s5 + $0xe0] sm:$0xff]   ;;  %v3594_v19 = vld [vmem:[%s4388_s5 + $0x108] sm:$0xff]  }
 0x13e   : > { %3381 = vmatprep.mubr.msk.bf16.mxu0 %vm1396_vm1, %v4100_v26  ;;  %3388 = vmatpush3.bf16.msra.mxu1 %v3569_v7  ;;  %v4116_v31 = vld [vmem:[#allocation3 + $0x98] sm:$0xff]  ;;  %v1820_v62 = vpack.c.bf16 %v4163_v63, %v1443_v23  ;;  %v1946_v45 = vld [vmem:[#allocation3 + $0xc8] sm:$0xff] }
 0x13f   : > { %3404 = vmatpush3.bf16.msra.mxu0 %v3570_v12  ;;  %v1442_v32 = vld [vmem:[#allocation3 + $0x97] sm:$0xff]  ;;  %v4120_v33 = vpack.c.bf16 %v4112_v37, %v4116_v31  ;;  %3389 = vmatprep.subr.bf16.mxu1 %v3571_v27  ;;  %v1949_v6 = vpack.c.bf16 %v4116_v31, %v4094_v24  ;;  %v1950_v20 = vpack.c.bf16 %v1946_v45, %v4112_v37  ;;  %v2207_v12 = vld [vmem:[#allocation3 + $0xdf] sm:$0xff]  ;;  %v3599_v37 = vld [vmem:[%s3747_s18 + $0x18] sm:$0xff] }
 0x140   : > { %v4122_v34 = vpack.c.bf16 %v1443_v23, %v1442_v32  ;;  %3405 = vmatprep.subr.bf16.mxu0 %v3572_v36  ;;  %v1819_v39 = vpack.c.bf16 %v1442_v32, %v1441_v9  ;;  %v1685_v55 = vld [vmem:[#allocation3 + $0x99] sm:$0xff]  ;;  %v2211_v25 = vpack.c.bf16 %v2207_v12, %v4163_v63  ;;  %v3597_v9 = vld [vmem:[%s3747_s18] sm:$0xff]  ;;  %v2606_v29 = vpack.c.bf16 %v3599_v37, %v3600_v30 }
 0x141   : > { %3366 = vmatmul.mubr.msk.bf16.gmra.mxu1 %vm1396_vm1, %v4120_v33  ;;  %v4168_v52 = vpack.c.bf16 %v1686_v57, %v1685_v55  ;;  %v2079_v56 = vpack.c.bf16 %v1685_v55, %v1684_v42  ;;  %v3592_v7 = vld [vmem:[%s4384_s1 + $0x8] sm:$0xff]   ;;  %v2337_v24 = vld [vmem:[#allocation3 + $0xe0] sm:$0xff]  ;;  %v3601_v31 = vld [vmem:[%s3747_s18 + $0x20] sm:$0xff] }
 0x142   : > { %3382 = vmatmul.mubr.msk.bf16.gmra.mxu0 %vm1396_vm1, %v4122_v34  ;;  %3390 = vmatpush3.bf16.msra.mxu1 %v3571_v27  ;;  %v2341_v27 = vpack.c.bf16 %v2337_v24, %v1946_v45  ;;  %v3602_v32 = vld [vmem:[%s3747_s18 + $0x28] sm:$0xff] }
 0x143   : > { %3393 = vmatprep.mubr.msk.bf16.mxu1 %vm1396_vm1, %v1687_v35  ;;  %3406 = vmatpush3.bf16.msra.mxu0 %v3572_v36  ;;  %v3596_v36 = vld [vmem:[%s4388_s5 + $0x100] sm:$0xff]   ;;  %v2607_v23 = vpack.c.bf16 %v3602_v32, %v3601_v31  ;;  %v3604_v35 = vld [vmem:[%s3747_s18 + $0x38] sm:$0xff] }
 0x144   : > { %3409 = vmatprep.mubr.msk.bf16.mxu0 %vm1396_vm1, %v1817_v40  ;;  %3391 = vmatprep.subr.bf16.mxu1 %v3573_v11  ;;  %v2709_v40 = vld [vmem:[%s4390_s7] sm:$0xff] }
 0x145   : > { %3407 = vmatprep.subr.bf16.mxu0 %v3574_v38 }
 0x146   : > { %3392 = vmatpush3.bf16.msra.mxu1 %v3573_v11 }
 0x147   : > { %3408 = vmatpush3.bf16.msra.mxu0 %v3574_v38  ;;  %3417 = vmatprep.subr.bf16.mxu1 %v3575_v28 }
 0x148   : > { %3433 = vmatprep.subr.bf16.mxu0 %v3576_v46 }
 0x149   : > { %3394 = vmatmul.mubr.msk.bf16.vlgmr.msra.gmra.mxu1 %vm1396_vm1, %v4143_v2 }
 0x14a   : > { %3410 = vmatmul.mubr.msk.bf16.vlgmr.msra.gmra.mxu0 %vm1396_vm1, %v1818_v15  ;;  %3397 = vmatprep.mubr.msk.bf16.mxu1 %vm1396_vm1, %v4146_v48 }
 0x14b   : > { %3413 = vmatprep.mubr.msk.bf16.mxu0 %vm1396_vm1, %v1819_v39  ;;  %3418 = vmatpush3.bf16.msra.mxu1 %v3575_v28 }
 0x14c   : > { %3434 = vmatpush3.bf16.msra.mxu0 %v3576_v46  ;;  %3419 = vmatprep.subr.bf16.mxu1 %v3577_v53 }
 0x14d   : > { %3435 = vmatprep.subr.bf16.mxu0 %v3578_v47 }
 0x14f   : > { %3420 = vmatpush3.bf16.msra.mxu1 %v3577_v53 }
 0x150   : > { %3436 = vmatpush3.bf16.msra.mxu0 %v3578_v47  ;;  %3421 = vmatprep.subr.bf16.mxu1 %v3579_v50 }
 0x151   : > { %3398 = vmatmul.mubr.msk.bf16.gmra.mxu1 %vm1396_vm1, %v4168_v52  ;;  %3437 = vmatprep.subr.bf16.mxu0 %v3580_v1 }
 0x152   : > { %3414 = vmatmul.mubr.msk.bf16.gmra.mxu0 %vm1396_vm1, %v1820_v62  ;;  %3425 = vmatprep.mubr.msk.bf16.mxu1 %vm1396_vm1, %v1947_v44 }
 0x153   : > { %3422 = vmatpush3.bf16.msra.mxu1 %v3579_v50  ;;  %3441 = vmatprep.mubr.msk.bf16.mxu0 %vm1396_vm1, %v2077_v18 }
 0x154   : > { %3438 = vmatpush3.bf16.msra.mxu0 %v3580_v1  ;;  %3423 = vmatprep.subr.bf16.mxu1 %v3581_v4 }
 0x155   : > { %3439 = vmatprep.subr.bf16.mxu0 %v3582_v54 }
 0x157   : > { %3424 = vmatpush3.bf16.msra.mxu1 %v3581_v4 }
 0x158   : > { %3440 = vmatpush3.bf16.msra.mxu0 %v3582_v54  ;;  %3449 = vmatprep.subr.bf16.mxu1 %v3583_v43 }
 0x159   : > { %3465 = vmatprep.subr.bf16.mxu0 %v3584_v59 }
 0x15a   : > { %3426 = vmatmul.mubr.msk.bf16.vlgmr.msra.gmra.mxu1 %vm1396_vm1, %v1948_v41 }
 0x15b   : > { %3442 = vmatmul.mubr.msk.bf16.vlgmr.msra.gmra.mxu0 %vm1396_vm1, %v2078_v0  ;;  %3429 = vmatprep.mubr.msk.bf16.mxu1 %vm1396_vm1, %v1949_v6 }
 0x15c   : > { %3445 = vmatprep.mubr.msk.bf16.mxu0 %vm1396_vm1, %v2079_v56  ;;  %3450 = vmatpush3.bf16.msra.mxu1 %v3583_v43 }
 0x15d   : > { %3466 = vmatpush3.bf16.msra.mxu0 %v3584_v59  ;;  %3451 = vmatprep.subr.bf16.mxu1 %v3585_v17 }
 0x15e   : > { %3467 = vmatprep.subr.bf16.mxu0 %v3586_v21 }
 0x160   : > { %3452 = vmatpush3.bf16.msra.mxu1 %v3585_v17 }
 0x161   : > { %3468 = vmatpush3.bf16.msra.mxu0 %v3586_v21  ;;  %3453 = vmatprep.subr.bf16.mxu1 %v3587_v61 }
 0x162   : > { %3430 = vmatmul.mubr.msk.bf16.gmra.mxu1 %vm1396_vm1, %v1950_v20  ;;  %3469 = vmatprep.subr.bf16.mxu0 %v3588_v3 }
 0x163   : > { %3446 = vmatmul.mubr.msk.bf16.gmra.mxu0 %vm1396_vm1, %v2080_v5  ;;  %3457 = vmatprep.mubr.msk.bf16.mxu1 %vm1396_vm1, %v4078_v60  ;;  %v3595_v60 = vld [vmem:[%s4384_s1] sm:$0xff]  }
 0x164   : > { %3454 = vmatpush3.bf16.msra.mxu1 %v3587_v61  ;;  %3473 = vmatprep.mubr.msk.bf16.mxu0 %vm1396_vm1, %v4075_v58  ;;  %v3593_v58 = vld [vmem:[%s4388_s5 + $0x110] sm:$0xff]  }
 0x165   : > { %3470 = vmatpush3.bf16.msra.mxu0 %v3588_v3  ;;  %3455 = vmatprep.subr.bf16.mxu1 %v3589_v10 }
 0x166   : > { %3471 = vmatprep.subr.bf16.mxu0 %v3590_v16 }
 0x168   : > { %3456 = vmatpush3.bf16.msra.mxu1 %v3589_v10 }
 0x169   : > { %3472 = vmatpush3.bf16.msra.mxu0 %v3590_v16  ;;  %3481 = vmatprep.subr.bf16.mxu1 %v3591_v22 }
 0x16a   : > { %3497 = vmatprep.subr.bf16.mxu0 %v3592_v7 }
 0x16b   : > { %3458 = vmatmul.mubr.msk.bf16.vlgmr.msra.gmra.mxu1 %vm1396_vm1, %v4100_v26 }
 0x16c   : > { %3474 = vmatmul.mubr.msk.bf16.vlgmr.msra.gmra.mxu0 %vm1396_vm1, %v4098_v14  ;;  %3461 = vmatprep.mubr.msk.bf16.mxu1 %vm1396_vm1, %v4122_v34  ;;  %v3598_v14 = vld [vmem:[%s3747_s18 + $0x8] sm:$0xff]  ;;  %v3603_v34 = vld [vmem:[%s3747_s18 + $0x30] sm:$0xff] }
 0x16d   : > { %3477 = vmatprep.mubr.msk.bf16.mxu0 %vm1396_vm1, %v4120_v33  ;;  %3482 = vmatpush3.bf16.msra.mxu1 %v3591_v22  ;;  %v2605_v26 = vpack.c.bf16 %v3598_v14, %v3597_v9  ;;  %v2467_v33 = vld [vmem:[#allocation3 + $0xe1] sm:$0xff]  ;;  %v2608_v11 = vpack.c.bf16 %v3604_v35, %v3603_v34 }
 0x16e   : > { %3498 = vmatpush3.bf16.msra.mxu0 %v3592_v7  ;;  %3483 = vmatprep.subr.bf16.mxu1 %v3593_v58  ;;  %v2471_v38 = vpack.c.bf16 %v2467_v33, %v4208_v8 }
 0x16f   : > { %3499 = vmatprep.subr.bf16.mxu0 %v3595_v60 }
 0x171   : > { %3484 = vmatpush3.bf16.msra.mxu1 %v3593_v58 }
 0x172   : > { %3485 = vmatprep.subr.bf16.mxu1 %v3594_v19  ;;  %3500 = vmatpush3.bf16.msra.mxu0 %v3595_v60 }
 0x173   : > { %3462 = vmatmul.mubr.msk.bf16.gmra.mxu1 %vm1396_vm1, %v2211_v25 }
 0x174   : > { %3478 = vmatmul.mubr.msk.bf16.gmra.mxu0 %vm1396_vm1, %v2341_v27  ;;  %3489 = vmatprep.mubr.msk.bf16.mxu1 %vm1396_vm1, %v4143_v2 }
 0x175   : > { %3486 = vmatpush3.bf16.msra.mxu1 %v3594_v19  ;;  %3501 = vmatprep.mubr.msk.bf16.mxu0 %vm315_vm0, %v2605_v26 }
 0x176   : > { %3487 = vmatprep.subr.bf16.mxu1 %v3596_v36 }
 0x179   : > { %3488 = vmatpush3.bf16.msra.mxu1 %v3596_v36 }
 0x17c   : > { %3490 = vmatmul.mubr.msk.bf16.vlgmr.msra.gmra.mxu1 %vm1396_vm1, %v4146_v48  ;;  %3502 = vmatmul.mubr.msk.bf16.vlgmr.msra.gmra.mxu0 %vm315_vm0, %v2606_v29 }
 0x17d   : > { %3493 = vmatprep.mubr.msk.bf16.mxu1 %vm1396_vm1, %v4168_v52  ;;  %3505 = vmatprep.mubr.msk.bf16.mxu0 %vm315_vm0, %v2607_v23 }
 0x184   : > { %3494 = vmatmul.mubr.msk.bf16.gmra.mxu1 %vm1396_vm1, %v2471_v38  ;;  %3506 = vmatmul.mubr.msk.bf16.gmra.mxu0 %vm315_vm0, %v2608_v11 }
 0x185   : > { %3525 = vmatprep.mubr.msk.f32.mxu1 %vm1396_vm1, %v2709_v40 }
 0x1f9   : > { %v3363_v28 = vpop.f32.mrf.mxu1 }
 0x1fa   : > { %v3379_v49 = vpop.f32.mrf.mxu0 }
 0x1fb   : > { %v4280_v46 = vadd.f32 %v3379_v49, %v3363_v28  ;;  %v1547_v42 = vpop.f32.mrf.mxu1 }
 0x1fc   : > { %v1648_v13 = vpop.f32.mrf.mxu0 }
 0x1fd   : > { %v4282_v2 = vadd.f32 %v1648_v13, %v1547_v42  ;;  %v3364_v51 = vpop.f32.mrf.mxu1 }
 0x1fe   : > { %v3380_v15 = vpop.f32.mrf.mxu0 }
 0x1ff   : > { %v4284_v48 = vadd.f32 %v3380_v15, %v3364_v51  ;;  %v1550_v53 = vpop.f32.mrf.mxu1 }
 0x200   : > { %v1651_v39 = vpop.f32.mrf.mxu0 }
 0x201   : > { %v4286_v47 = vadd.f32 %v1651_v39, %v1550_v53  ;;  %v3367_v55 = vpop.f32.mrf.mxu1 }
 0x202   : > { %v3383_v50 = vpop.f32.mrf.mxu0 }
 0x203   : > { %v1563_v63 = vpop.f32.mrf.mxu1  ;;  %v1673_v34 = vadd.f32 %v3383_v50, %v3367_v55 }
 0x204   : > { %v1664_v1 = vpop.f32.mrf.mxu0 }
 0x205   : > { %v3368_v57 = vpop.f32.mrf.mxu1  ;;  %v1665_v13 = vadd.f32 %v1664_v1, %v1563_v63 }
 0x206   : > { %v3384_v52 = vpop.f32.mrf.mxu0 }
 0x207   : > { %v1566_v62 = vpop.f32.mrf.mxu1  ;;  %v1676_v28 = vadd.f32 %v3384_v52, %v3368_v57 }
 0x208   : > { %v1667_v44 = vpop.f32.mrf.mxu0 }
 0x209   : > { %v3395_v4 = vpop.f32.mrf.mxu1  ;;  %v1668_v51 = vadd.f32 %v1667_v44, %v1566_v62 }
 0x20a   : > { %v4288_v18 = vpop.f32.mrf.mxu0  ;;  %v1803_v57 = vadd.f32 %v3395_v4, %v4280_v46 }
 0x20b   : > { %v4290_v54 = vpop.f32.mrf.mxu1 }
 0x20c   : > { %v4292_v43 = vpop.f32.mrf.mxu0  ;;  %v1801_v62 = vadd.f32 %v4290_v54, %v4282_v2  ;;  %v1933_v4 = vadd.f32 %v4288_v18, %v1803_v57 }
 0x20d   : > { %v3396_v59 = vpop.f32.mrf.mxu1 }
 0x20e   : > { %v3412_v41 = vpop.f32.mrf.mxu0  ;;  %v1931_v2 = vadd.f32 %v4292_v43, %v1801_v62 }
 0x20f   : > { %v1773_v0 = vpop.f32.mrf.mxu1 }
 0x210   : > { %v4294_v6 = vpop.f32.mrf.mxu0 }
 0x211   : > { %v3399_v17 = vpop.f32.mrf.mxu1 }
 0x212   : > { %v3415_v56 = vpop.f32.mrf.mxu0  ;;  %v1807_v38 = vadd.f32 %v3399_v17, %v1673_v34 }
 0x213   : > { %v1786_v21 = vpop.f32.mrf.mxu1 }
 0x214   : > { %v1916_v45 = vpop.f32.mrf.mxu0  ;;  %v1937_v39 = vadd.f32 %v3415_v56, %v1807_v38  ;;  %v1802_v56 = vadd.f32 %v1773_v0, %v4286_v47 }
 0x215   : > { %v3400_v61 = vpop.f32.mrf.mxu1 }
 0x216   : > { %v3416_v8 = vpop.f32.mrf.mxu0  ;;  %v1808_v15 = vadd.f32 %v3400_v61, %v1676_v28  ;;  %v1932_v54 = vadd.f32 %v4294_v6, %v1802_v56 }
 0x217   : > { %v1789_v3 = vpop.f32.mrf.mxu1 }
 0x218   : > { %v1919_v20 = vpop.f32.mrf.mxu0 }
 0x21a   : > { %v4296_v5 = vpop.f32.mrf.mxu1 }
 0x21b   : > { %v4298_v10 = vpop.f32.mrf.mxu0  ;;  %v2063_v0 = vadd.f32 %v4296_v5, %v1933_v4 }
 0x21c   : > { %v4300_v16 = vpop.f32.mrf.mxu1 }
 0x21d   : > { %v4302_v22 = vpop.f32.mrf.mxu0  ;;  %v2193_v5 = vadd.f32 %v4298_v10, %v2063_v0 }
 0x21e   : > { %v3428_v7 = vpop.f32.mrf.mxu1 }
 0x21f   : > { %v4304_v58 = vpop.f32.mrf.mxu0 }
 0x220   : > { %v4306_v60 = vpop.f32.mrf.mxu1 }
 0x221   : > { %v4308_v12 = vpop.f32.mrf.mxu0 }
 0x222   : > { %v3431_v19 = vpop.f32.mrf.mxu1 }
 0x223   : > { %v3447_v24 = vpop.f32.mrf.mxu0  ;;  %v2067_v55 = vadd.f32 %v3431_v19, %v1937_v39 }
 0x224   : > { %v2046_v25 = vpop.f32.mrf.mxu1 }
 0x225   : > { %v2176_v9 = vpop.f32.mrf.mxu0 }
 0x226   : > { %v3432_v14 = vpop.f32.mrf.mxu1 }
 0x227   : > { %v3448_v26 = vpop.f32.mrf.mxu0 }
 0x228   : > { %v2049_v27 = vpop.f32.mrf.mxu1 }
 0x229   : > { %v2179_v36 = vpop.f32.mrf.mxu0 }
 0x22b   : > { %v4310_v37 = vpop.f32.mrf.mxu1 }
 0x22c   : > { %4392 = vst [vmem:[#allocation4_spill] sm:$0xff] %v4310_v37  ;;  %v4312_v30 = vpop.f32.mrf.mxu0 }
 0x22d   : > { %4393 = vst [vmem:[#allocation5_spill] sm:$0xff] %v4312_v30  ;;  %v4314_v29 = vpop.f32.mrf.mxu1  ;;  %v1805_v30 = vadd.f32 %v1786_v21, %v1665_v13  ;;  %v2197_v21 = vadd.f32 %v3447_v24, %v2067_v55 }
 0x22e   : > { %4394 = vst [vmem:[#allocation6_spill] sm:$0xff] %v4314_v29  ;;  %v4316_v31 = vpop.f32.mrf.mxu0  ;;  %v1806_v29 = vadd.f32 %v1789_v3, %v1668_v51 }
 0x22f   : > { %4395 = vst [vmem:[#allocation7_spill] sm:$0xff] %v4316_v31  ;;  %v3460_v32 = vpop.f32.mrf.mxu1  ;;  %v1935_v63 = vadd.f32 %v1916_v45, %v1805_v30 }
 0x230   : > { %v4318_v23 = vpop.f32.mrf.mxu0  ;;  %v1936_v1 = vadd.f32 %v1919_v20, %v1806_v29 }
 0x231   : > { %4396 = vst [vmem:[#allocation8_spill] sm:$0xff] %v4318_v23  ;;  %v4320_v33 = vpop.f32.mrf.mxu1  ;;  %v2065_v61 = vadd.f32 %v2046_v25, %v1935_v63 }
 0x232   : > { %4397 = vst [vmem:[#allocation9_spill] sm:$0xff] %v4320_v33  ;;  %v4322_v35 = vpop.f32.mrf.mxu0  ;;  %v1804_v33 = vadd.f32 %v3396_v59, %v4284_v48 }
 0x233   : > { %4398 = vst [vmem:[#allocation10_spill] sm:$0xff] %v4322_v35  ;;  %v3463_v11 = vpop.f32.mrf.mxu1  ;;  %v1938_v35 = vadd.f32 %v3416_v8, %v1808_v15  ;;  %v2066_v8 = vadd.f32 %v2049_v27, %v1936_v1  ;;  %v2195_v20 = vadd.f32 %v2176_v9, %v2065_v61  ;;  %v2062_v27 = vadd.f32 %v4306_v60, %v1932_v54  ;;  %v4399_v28 = vld [vmem:[#allocation4_spill] sm:$0xff] }
 0x234   : > { %v3479_v40 = vpop.f32.mrf.mxu0  ;;  %v1934_v44 = vadd.f32 %v3412_v41, %v1804_v33  ;;  %v2328_v19 = vadd.f32 %v3463_v11, %v2197_v21  ;;  %v2324_v60 = vadd.f32 %v4399_v28, %v2193_v5 }
 0x235   : > { %v2307_v49 = vpop.f32.mrf.mxu1  ;;  %v2068_v52 = vadd.f32 %v3432_v14, %v1938_v35  ;;  %v2196_v24 = vadd.f32 %v2179_v36, %v2066_v8  ;;  %v4402_v57 = vld [vmem:[#allocation6_spill] sm:$0xff] }
 0x236   : > { %v2437_v42 = vpop.f32.mrf.mxu0  ;;  %v2064_v3 = vadd.f32 %v3428_v7, %v1934_v44  ;;  %v2061_v7 = vadd.f32 %v4300_v16, %v1931_v2  ;;  %v2458_v18 = vadd.f32 %v3479_v40, %v2328_v19  ;;  %v2326_v43 = vadd.f32 %v2307_v49, %v2195_v20  ;;  %v4405_v2 = vld [vmem:[#allocation7_spill] sm:$0xff] }
 0x237   : > { %v3464_v53 = vpop.f32.mrf.mxu1  ;;  %v2198_v45 = vadd.f32 %v3448_v26, %v2068_v52  ;;  %v2192_v16 = vadd.f32 %v4308_v12, %v2062_v27  ;;  %v4403_v52 = vld [vmem:[#allocation5_spill] sm:$0xff] }
 0x238   : > { %v3480_v31 = vpop.f32.mrf.mxu0  ;;  %v2194_v14 = vadd.f32 %v4304_v58, %v2064_v3  ;;  %v2191_v36 = vadd.f32 %v4302_v22, %v2061_v7  ;;  %v2456_v40 = vadd.f32 %v2437_v42, %v2326_v43  ;;  %v2454_v62 = vadd.f32 %v4403_v52, %v2324_v60 }
 0x239   : > { %v2310_v23 = vpop.f32.mrf.mxu1  ;;  %v2329_v25 = vadd.f32 %v3464_v53, %v2198_v45  ;;  %v4401_v22 = vld [vmem:[#allocation9_spill] sm:$0xff] }
 0x23a   : > { %v2440_v50 = vpop.f32.mrf.mxu0  ;;  %v2327_v29 = vadd.f32 %v2310_v23, %v2196_v24  ;;  %v2325_v6 = vadd.f32 %v3460_v32, %v2194_v14  ;;  %v3089_v32 = vld [vmem:[%s4389_s6] ss:$0 sm:$0xff]  ;;  %v2323_v51 = vadd.f32 %v4401_v22, %v2192_v16  ;;  %v2322_v63 = vadd.f32 %v4402_v57, %v2191_v36  ;;  %v4404_v61 = vld [vmem:[#allocation10_spill] sm:$0xff] }
 0x23b   : > { %v2459_v9 = vadd.f32 %v3480_v31, %v2329_v25  ;;  %v3090_v23 = vld [vmem:[%s4385_s2] ss:$0 sm:$0xff] }
 0x23c   : > { %v4325_v37 = vpop.f32.mrf.mxu1  ;;  %v4327_v17 = vpop.f32.mrf.mxu0  ;;  %v2457_v13 = vadd.f32 %v2440_v50, %v2327_v29  ;;  %v4400_v31 = vld [vmem:[#allocation8_spill] sm:$0xff]  ;;  %v2453_v8 = vadd.f32 %v4404_v61, %v2323_v51  ;;  %v2452_v54 = vadd.f32 %v4405_v2, %v2322_v63 }
 0x23d   : > { %v2455_v49 = vadd.f32 %v4400_v31, %v2325_v6  ;;  %v2584_v3 = vadd.f32 %v4325_v37, %v2454_v62 }
 0x23e   : > { %v4333_v48 = vpop.f32.mrf.mxu1  ;;  %v4335_v59 = vpop.f32.mrf.mxu0 }
 0x23f   : > { %v2599_v7 = vadd.f32 %v3089_v32, %v2584_v3  ;;  %v2582_v14 = vadd.f32 %v4333_v48, %v2452_v54 }
 0x240   : > { %v3492_v34 = vpop.f32.mrf.mxu1  ;;  %v4337_v46 = vpop.f32.mrf.mxu0 }
 0x241   : > { %v2585_v44 = vadd.f32 %v3492_v34, %v2455_v49  ;;  %v2687_v34 = vadd.f32 %v4327_v17, %v3090_v23  ;;  %v2690_v37 = vadd.f32 %v4337_v46, %v3090_v23  ;;  %v2679_v17 = vadd.f32 %v3090_v23, %v4335_v59  ;;  %v2710_v46 = vld [vmem:[%s4390_s7 + $0x8] sm:$0xff] }
 0x242   : > { %v2554_v47 = vpop.f32.mrf.mxu1  ;;  %v4342_v41 = vpop.f32.mrf.mxu0 }
 0x243   : > { %v2600_v0 = vadd.f32 %v3089_v32, %v2585_v44  ;;  %v2583_v20 = vadd.f32 %v2554_v47, %v2453_v8  ;;  %v2597_v47 = vadd.f32 %v3089_v32, %v2582_v14  ;;  %v2682_v43 = vadd.f32 %v3090_v23, %v4342_v41 }
 0x244   : > { %v3495_v26 = vpop.f32.mrf.mxu1  ;;  %v3507_v30 = vpop.f32.mrf.mxu0 }
 0x245   : > { %v2588_v33 = vadd.f32 %v3495_v26, %v2458_v18  ;;  %v2703_v15 = vadd.f32 %v3507_v30, %v3090_v23  ;;  %v2714_v18 = vadd.f32 %v2690_v37, %v2600_v0  ;;  %v2598_v26 = vadd.f32 %v3089_v32, %v2583_v20 }
 0x246   : > { %v2567_v35 = vpop.f32.mrf.mxu1  ;;  %v2694_v11 = vpop.f32.mrf.mxu0  ;;  %v2713_v30 = vadd.f32 %v2687_v34, %v2599_v7  ;;  %v2711_v48 = vadd.f32 %v2679_v17, %v2597_v47 }
 0x247   : > { %v2603_v12 = vadd.f32 %v3089_v32, %v2588_v33  ;;  %v2586_v39 = vadd.f32 %v2567_v35, %v2456_v40  ;;  %v2695_v24 = vadd.f32 %v3090_v23, %v2694_v11  ;;  %v2712_v29 = vadd.f32 %v2682_v43, %v2598_v26 }
 0x248   : > { %v3496_v38 = vpop.f32.mrf.mxu1  ;;  %v3508_v58 = vpop.f32.mrf.mxu0 }
 0x249   : > { %v2589_v10 = vadd.f32 %v3496_v38, %v2459_v9  ;;  %v2706_v42 = vadd.f32 %v3508_v58, %v3090_v23  ;;  %v2717_v19 = vadd.f32 %v2703_v15, %v2603_v12  ;;  %v2601_v4 = vadd.f32 %v3089_v32, %v2586_v39 }
 0x24a   : > { %v2570_v53 = vpop.f32.mrf.mxu1  ;;  %v2697_v1 = vpop.f32.mrf.mxu0 }
 0x24b   : > { %v2604_v55 = vadd.f32 %v3089_v32, %v2589_v10  ;;  %v2587_v50 = vadd.f32 %v2570_v53, %v2457_v13  ;;  %v2698_v45 = vadd.f32 %v3090_v23, %v2697_v1  ;;  %v2715_v27 = vadd.f32 %v2695_v24, %v2601_v4 }
 0x24d   : > { %v2718_v56 = vadd.f32 %v2706_v42, %v2604_v55  ;;  %v2602_v21 = vadd.f32 %v3089_v32, %v2587_v50 }
 0x24f   : > { %3509 = vmatprep.subr.mxu1 %v2718_v56  ;;  %v2716_v25 = vadd.f32 %v2698_v45, %v2602_v21 }
 0x250   : > { %3510 = vmatpush3.msra.mxu1 %v2718_v56 }
 0x251   : > { %3511 = vmatprep.subr.mxu1 %v2717_v19 }
 0x252   : > { %3512 = vmatpush3.msra.mxu1 %v2717_v19 }
 0x253   : > { %3513 = vmatprep.subr.mxu1 %v2716_v25 }
 0x254   : > { %3514 = vmatpush3.msra.mxu1 %v2716_v25 }
 0x255   : > { %3515 = vmatprep.subr.mxu1 %v2715_v27 }
 0x256   : > { %3516 = vmatpush3.msra.mxu1 %v2715_v27 }
 0x257   : > { %3517 = vmatprep.subr.mxu1 %v2714_v18 }
 0x258   : > { %3518 = vmatpush3.msra.mxu1 %v2714_v18 }
 0x259   : > { %3519 = vmatprep.subr.mxu1 %v2713_v30 }
 0x25a   : > { %3520 = vmatpush3.msra.mxu1 %v2713_v30 }
 0x25b   : > { %3521 = vmatprep.subr.mxu1 %v2712_v29 }
 0x25c   : > { %3522 = vmatpush3.msra.mxu1 %v2712_v29 }
 0x25d   : > { %3523 = vmatprep.subr.mxu1 %v2711_v48 }
 0x25e   : > { %3524 = vmatpush3.msra.mxu1 %v2711_v48 }
 0x25f   : > { %3526 = vmatmul.mubr.msk.f32.vlgmr.msra.gmra.mxu1 %vm1396_vm1, %v2710_v46 }
 0x31f   : > { %v3527_v59 = vpop.f32.mrf.mxu1 }
 0x320   : > { %2801 = vst.msk [vmem:[%s305_s21 + $0x8] sm:$0xff] %vm1396_vm1, %v3527_v59 }
 0x321   : > { %v2791_v41 = vpop.f32.mrf.mxu1 }
 0x322   : > { %2800 = vst.msk [vmem:[%s305_s21] sm:$0xff] %vm1396_vm1, %v2791_v41 }
 0x323 PF: > { %s18_s27 = sadd.s32 1, %s3611_s27  }
 0x324   : > { %p15_p4 = scmp.ge.s32.totalorder %s18_s27, 4  }
 0x326   :  { %17 = sbr.rel (!%p15_p4) target bundleno = 1 (0x1), region = 102 }

// kernel: discriminator_forward.3
= control target key start
LH: loop header
LB: loop body
LE: loop exit
PB: predicated region body
PF: predicated region fallthrough
CT: control target
= control target key end

     0   :  { %s7974_s27 = smov 0   ;;  %s10641_s0 = inlined_call_operand.vmem [shape: f32[2,16,16,6], index: 0, kind: input, shape index: {}]   ;;  %s10642_s1 = inlined_call_operand.vmem [shape: bf16[6,32], index: 1, kind: input, shape index: {}]   ;;  %s10643_s2 = inlined_call_operand.vmem [shape: f32[1,32], index: 2, kind: input, shape index: {}]   ;;  %s10644_s3 = inlined_call_operand.vmem [shape: bf16[9,6,32], index: 3, kind: input, shape index: {}]   ;;  %s10645_s4 = inlined_call_operand.vmem [shape: f32[1,32], index: 4, kind: input, shape index: {}]   ;;  %s10646_s5 = inlined_call_operand.vmem [shape: bf16[9,32,32], index: 5, kind: input, shape index: {}]   ;;  %s10647_s6 = inlined_call_operand.vmem [shape: f32[1,32], index: 6, kind: input, shape index: {}]   ;;  %s10648_s7 = inlined_call_operand.vmem [shape: f32[64,256], index: 7, kind: input, shape index: {}]   ;;  %s10649_s8 = inlined_call_operand.vmem [shape: f32[2,64,32], index: 8, kind: output, shape index: {}]  }
   0x1 LB: > { %s6418_s28 = sadd.s32 4294967295, %s7926_s27   ;;  %p6422_p0 = scmp.ge.s32.totalorder %s7926_s27, 1  ;;  %s7926_s27 = sphi %s7974_s27, %s18_s27  }
   0x2   : > { %p262_p1 = scmp.lt.s32.totalorder %s7926_s27, 3 }
   0x4   : > { %p263_p2 = pnand %p6422_p0, %p262_p1 }
   0x6   : > { %266 = sbr.rel (%p263_p2) target bundleno = 1287 (0x507), region = 52 }
   0xb   : > { %v6427_v0 = vld [vmem:[%s10644_s3 + $0x4] sm:$0x7]  ;;  %vm624_vm0 = vcmask 1042432   ;;  %vm339_vm1 = vcmask 48128   ;;  %p7987_p3 = scmp.lt.s32.totalorder %s6418_s28, 1  ;;  %v7928_v2 = vmov 0.0  }
   0xc   : > { %7850 = vmatprep.subr.msk.bf16.mxu0 %vm624_vm0, %v6427_v0  ;;  %7851 = vmatprep.subr.msk.bf16.mxu1 %vm624_vm0, %v6427_v0  ;;  %v7994_v1 = vsel %vm624_vm0, %v6427_v0, 0  ;;  %341 = vst.msk [vmem:[#allocation2 + $0x8] sm:$0xff] %vm339_vm1, %v7928_v2  ;;  %342 = vst.msk [vmem:[#allocation2 + $0x10] sm:$0xff] %vm339_vm1, %v7928_v2  ;;  %v8143_v3 = vld [vmem:[%s10644_s3] sm:$0x7]  ;;  %vm3131_vm2 = vcmask 261120  }
   0xd   : > { %340 = vst.msk [vmem:[#allocation2] sm:$0xff] %vm339_vm1, %v7928_v2  ;;  %343 = vst.msk [vmem:[#allocation2 + $0x18] sm:$0xff] %vm339_vm1, %v7928_v2  ;;  %v8148_v4 = vld [vmem:[%s10644_s3 + $0x8] sm:$0x7]  ;;  %7185 = vmatpush3.bf16.msra.mxu0 %v7994_v1  ;;  %7849 = vmatpush3.bf16.msra.mxu1 %v7994_v1  ;;  %s10870_s28 = smov (!%p7987_p3, %s6418_s28), 1 }
   0xe   : > { %344 = vst.msk [vmem:[#allocation2 + $0x20] sm:$0xff] %vm339_vm1, %v7928_v2  ;;  %345 = vst.msk [vmem:[#allocation2 + $0x28] sm:$0xff] %vm339_vm1, %v7928_v2  ;;  %7852 = vmatprep.subr.msk.bf16.mxu1 %vm624_vm0, %v8143_v3  ;;  %7853 = vmatprep.subr.msk.bf16.mxu0 %vm624_vm0, %v8148_v4  ;;  %s6794_s14 = sshll.u32 %s10870_s28, 8  ;;  %s6795_s30 = sshll.u32 %s10870_s28, 6 }
   0xf   : > { %346 = vst.msk [vmem:[#allocation2 + $0x30] sm:$0xff] %vm339_vm1, %v7928_v2  ;;  %347 = vst.msk [vmem:[#allocation2 + $0x38] sm:$0xff] %vm339_vm1, %v7928_v2  ;;  %s8166_s17 = scalar_lea.vmem %s10641_s0, %s6794_s14  ;;  %s10620_s11 = scalar_lea.vmem %s10649_s8, %s6795_s30 }
  0x10   : > { %348 = vst.msk [vmem:[#allocation2 + $0x40] sm:$0xff] %vm339_vm1, %v7928_v2  ;;  %349 = vst.msk [vmem:[#allocation2 + $0x48] sm:$0xff] %vm339_vm1, %v7928_v2  ;;  %v307_v5 = vld [vmem:[%s8166_s17] sm:$0xff]  ;;  %v308_v6 = vld [vmem:[%s8166_s17 + $0x8] sm:$0xff] }
  0x11   : > { %350 = vst.msk [vmem:[#allocation2 + $0x50] sm:$0xff] %vm339_vm1, %v7928_v2  ;;  %351 = vst.msk [vmem:[#allocation2 + $0x58] sm:$0xff] %vm339_vm1, %v7928_v2  ;;  %v329_v7 = vld [vmem:[%s8166_s17 + $0xb0] sm:$0xff]  ;;  %v412_v8 = vmax.f32 %v307_v5, 0.0  ;;  %v413_v9 = vmax.f32 %v308_v6, 0.0  ;;  %v330_v10 = vld [vmem:[%s8166_s17 + $0xb8] sm:$0xff] }
  0x12   : > { %352 = vst.msk [vmem:[#allocation2 + $0x60] sm:$0xff] %vm339_vm1, %v7928_v2  ;;  %353 = vst.msk [vmem:[#allocation2 + $0x68] sm:$0xff] %vm339_vm1, %v7928_v2  ;;  %v434_v11 = vmax.f32 %v329_v7, 0.0  ;;  %v331_v12 = vld [vmem:[%s8166_s17 + $0xc0] sm:$0xff]  ;;  %v332_v13 = vld [vmem:[%s8166_s17 + $0xc8] sm:$0xff]  ;;  %v435_v16 = vmax.f32 %v330_v10, 0.0 }
  0x13   : > { %354 = vst.msk [vmem:[#allocation2 + $0x70] sm:$0xff] %vm339_vm1, %v7928_v2  ;;  %355 = vst.msk [vmem:[#allocation2 + $0x78] sm:$0xff] %vm339_vm1, %v7928_v2  ;;  %v526_v14 = vld [vmem:[#allocation2 + $0x8] sm:$0xff]  ;;  %v527_v15 = vld [vmem:[#allocation2 + $0x10] sm:$0xff]  ;;  %v436_v17 = vmax.f32 %v331_v12, 0.0  ;;  %v437_v18 = vmax.f32 %v332_v13, 0.0 }
  0x14   : > { %356 = vst.msk [vmem:[#allocation2 + $0x80] sm:$0xff] %vm339_vm1, %v7928_v2  ;;  %357 = vst.msk [vmem:[#allocation2 + $0x88] sm:$0xff] %vm339_vm1, %v7928_v2  ;;  %v309_v19 = vld [vmem:[%s8166_s17 + $0x10] sm:$0xff]  ;;  %v558_v20 = vpack.c.bf16 %v527_v15, %v526_v14  ;;  %v310_v21 = vld [vmem:[%s8166_s17 + $0x18] sm:$0xff]  ;;  %v1100_v6 = vsel %vm624_vm0, %v8148_v4, 0  ;;  %v838_v12 = vsel %vm624_vm0, %v8143_v3, 0 }
  0x15   : > { %358 = vst.msk [vmem:[#allocation2 + $0x90] sm:$0xff] %vm339_vm1, %v7928_v2  ;;  %359 = vst.msk [vmem:[#allocation2 + $0x98] sm:$0xff] %vm339_vm1, %v7928_v2  ;;  %v414_v22 = vmax.f32 %v309_v19, 0.0  ;;  %v311_v23 = vld [vmem:[%s8166_s17 + $0x20] sm:$0xff]  ;;  %v312_v24 = vld [vmem:[%s8166_s17 + $0x28] sm:$0xff]  ;;  %v415_v25 = vmax.f32 %v310_v21, 0.0 }
  0x16   : > { %360 = vst.msk [vmem:[#allocation2 + $0xa0] sm:$0xff] %vm339_vm1, %v7928_v2  ;;  %361 = vst.msk [vmem:[#allocation2 + $0xa8] sm:$0xff] %vm339_vm1, %v7928_v2  ;;  %v416_v26 = vmax.f32 %v311_v23, 0.0  ;;  %v417_v27 = vmax.f32 %v312_v24, 0.0  ;;  %v333_v28 = vld [vmem:[%s8166_s17 + $0xd0] sm:$0xff]  ;;  %v334_v29 = vld [vmem:[%s8166_s17 + $0xd8] sm:$0xff]  ;;  %7186 = vmatprep.mubr.msk.bf16.mxu0 %vm339_vm1, %v558_v20 }
  0x17   : > { %362 = vst.msk [vmem:[#allocation2 + $0xb0] sm:$0xff] %vm339_vm1, %v7928_v2  ;;  %363 = vst.msk [vmem:[#allocation2 + $0xb8] sm:$0xff] %vm339_vm1, %v7928_v2  ;;  %v335_v30 = vld [vmem:[%s8166_s17 + $0xe0] sm:$0xff]  ;;  %v438_v31 = vmax.f32 %v333_v28, 0.0  ;;  %v439_v32 = vmax.f32 %v334_v29, 0.0  ;;  %v336_v33 = vld [vmem:[%s8166_s17 + $0xe8] sm:$0xff] }
  0x18   : > { %364 = vst.msk [vmem:[#allocation2 + $0xc0] sm:$0xff] %vm339_vm1, %v7928_v2  ;;  %365 = vst.msk [vmem:[#allocation2 + $0xc8] sm:$0xff] %vm339_vm1, %v7928_v2  ;;  %v440_v34 = vmax.f32 %v335_v30, 0.0  ;;  %v313_v35 = vld [vmem:[%s8166_s17 + $0x30] sm:$0xff]  ;;  %v314_v36 = vld [vmem:[%s8166_s17 + $0x38] sm:$0xff]  ;;  %v441_v37 = vmax.f32 %v336_v33, 0.0 }
  0x19   : > { %366 = vst.msk [vmem:[#allocation2 + $0xd0] sm:$0xff] %vm339_vm1, %v7928_v2  ;;  %367 = vst.msk [vmem:[#allocation2 + $0xd8] sm:$0xff] %vm339_vm1, %v7928_v2  ;;  %v418_v38 = vmax.f32 %v313_v35, 0.0  ;;  %v419_v39 = vmax.f32 %v314_v36, 0.0  ;;  %v315_v40 = vld [vmem:[%s8166_s17 + $0x40] sm:$0xff]  ;;  %v316_v41 = vld [vmem:[%s8166_s17 + $0x48] sm:$0xff] }
  0x1a   : > { %368 = vst.msk [vmem:[#allocation2 + $0xe0] sm:$0xff] %vm339_vm1, %v7928_v2  ;;  %369 = vst.msk [vmem:[#allocation2 + $0xe8] sm:$0xff] %vm339_vm1, %v7928_v2  ;;  %v420_v42 = vmax.f32 %v315_v40, 0.0  ;;  %v421_v43 = vmax.f32 %v316_v41, 0.0  ;;  %v317_v44 = vld [vmem:[%s8166_s17 + $0x50] sm:$0xff]  ;;  %v318_v45 = vld [vmem:[%s8166_s17 + $0x58] sm:$0xff] }
  0x1b   : > { %370 = vst.msk [vmem:[#allocation2 + $0xf0] sm:$0xff] %vm339_vm1, %v7928_v2  ;;  %371 = vst.msk [vmem:[#allocation2 + $0xf8] sm:$0xff] %vm339_vm1, %v7928_v2  ;;  %v422_v46 = vmax.f32 %v317_v44, 0.0  ;;  %v423_v47 = vmax.f32 %v318_v45, 0.0  ;;  %v319_v48 = vld [vmem:[%s8166_s17 + $0x60] sm:$0xff]  ;;  %v320_v49 = vld [vmem:[%s8166_s17 + $0x68] sm:$0xff] }
  0x1c   : > { %372 = vst.msk [vmem:[#allocation2 + $0x100] sm:$0xff] %vm339_vm1, %v7928_v2  ;;  %373 = vst.msk [vmem:[#allocation2 + $0x108] sm:$0xff] %vm339_vm1, %v7928_v2  ;;  %v321_v50 = vld [vmem:[%s8166_s17 + $0x70] sm:$0xff]  ;;  %v424_v51 = vmax.f32 %v319_v48, 0.0  ;;  %v425_v52 = vmax.f32 %v320_v49, 0.0  ;;  %v322_v53 = vld [vmem:[%s8166_s17 + $0x78] sm:$0xff] }
  0x1d   : > { %374 = vst.msk [vmem:[#allocation2 + $0x110] sm:$0xff] %vm339_vm1, %v7928_v2  ;;  %375 = vst.msk [vmem:[#allocation2 + $0x118] sm:$0xff] %vm339_vm1, %v7928_v2  ;;  %v426_v54 = vmax.f32 %v321_v50, 0.0  ;;  %v323_v55 = vld [vmem:[%s8166_s17 + $0x80] sm:$0xff]  ;;  %v324_v56 = vld [vmem:[%s8166_s17 + $0x88] sm:$0xff]  ;;  %v427_v60 = vmax.f32 %v322_v53, 0.0 }
  0x1e   : > { %376 = vst.msk [vmem:[#allocation2 + $0x120] sm:$0xff] %vm339_vm1, %v7928_v2  ;;  %377 = vst.msk [vmem:[#allocation2 + $0x128] sm:$0xff] %vm339_vm1, %v7928_v2  ;;  %v428_v61 = vmax.f32 %v323_v55, 0.0  ;;  %v429_v62 = vmax.f32 %v324_v56, 0.0  ;;  %v8232_v10 = vld [vmem:[%s10644_s3 + $0x10] sm:$0x7] }
  0x1f   : > { %378 = vst.msk [vmem:[#allocation2 + $0x130] sm:$0xff] %vm339_vm1, %v7928_v2  ;;  %379 = vst.msk [vmem:[#allocation2 + $0x138] sm:$0xff] %vm339_vm1, %v7928_v2  ;;  %v6477_v13 = vld [vmem:[%s10644_s3 + $0xc] sm:$0x7]  ;;  %v478_v24 = vld [vmem:[#allocation2 + $0xf] sm:$0xff] }
  0x20   : > { %380 = vst.msk [vmem:[#allocation2 + $0x140] sm:$0xff] %vm339_vm1, %v7928_v2  ;;  %381 = vst.msk [vmem:[#allocation2 + $0x148] sm:$0xff] %vm339_vm1, %v7928_v2  ;;  %v477_v23 = vld [vmem:[#allocation2 + $0x7] sm:$0xff]  ;;  %v325_v30 = vld [vmem:[%s8166_s17 + $0x90] sm:$0xff]  ;;  %v1394_v48 = vsel %vm624_vm0, %v6477_v13, 0 }
  0x21   : > { %382 = vst.msk [vmem:[#allocation2 + $0x150] sm:$0xff] %vm339_vm1, %v7928_v2  ;;  %383 = vst.msk [vmem:[#allocation2 + $0x158] sm:$0xff] %vm339_vm1, %v7928_v2  ;;  %v430_v35 = vmax.f32 %v325_v30, 0.0 }
  0x22   : > { %384 = vst.msk [vmem:[#allocation2 + $0x160] sm:$0xff] %vm339_vm1, %v7928_v2  ;;  %385 = vst.msk [vmem:[#allocation2 + $0x168] sm:$0xff] %vm339_vm1, %v7928_v2 }
  0x23   : > { %386 = vst.msk [vmem:[#allocation2 + $0x170] sm:$0xff] %vm339_vm1, %v7928_v2  ;;  %387 = vst.msk [vmem:[#allocation2 + $0x178] sm:$0xff] %vm339_vm1, %v7928_v2 }
  0x24   : > { %388 = vst.msk [vmem:[#allocation2 + $0x180] sm:$0xff] %vm339_vm1, %v7928_v2  ;;  %389 = vst.msk [vmem:[#allocation2 + $0x188] sm:$0xff] %vm339_vm1, %v7928_v2 }
  0x25   : > { %390 = vst.msk [vmem:[#allocation2 + $0x190] sm:$0xff] %vm339_vm1, %v7928_v2  ;;  %391 = vst.msk [vmem:[#allocation2 + $0x198] sm:$0xff] %vm339_vm1, %v7928_v2 }
  0x26   : > { %392 = vst.msk [vmem:[#allocation2 + $0x1a0] sm:$0xff] %vm339_vm1, %v7928_v2  ;;  %393 = vst.msk [vmem:[#allocation2 + $0x1a8] sm:$0xff] %vm339_vm1, %v7928_v2 }
  0x27   : > { %394 = vst.msk [vmem:[#allocation2 + $0x1b0] sm:$0xff] %vm339_vm1, %v7928_v2  ;;  %395 = vst.msk [vmem:[#allocation2 + $0x1b8] sm:$0xff] %vm339_vm1, %v7928_v2 }
  0x28   : > { %396 = vst.msk [vmem:[#allocation2 + $0x1c0] sm:$0xff] %vm339_vm1, %v7928_v2  ;;  %397 = vst.msk [vmem:[#allocation2 + $0x1c8] sm:$0xff] %vm339_vm1, %v7928_v2 }
  0x29   : > { %398 = vst.msk [vmem:[#allocation2 + $0x1d0] sm:$0xff] %vm339_vm1, %v7928_v2  ;;  %399 = vst.msk [vmem:[#allocation2 + $0x1d8] sm:$0xff] %vm339_vm1, %v7928_v2 }
  0x2a   : > { %400 = vst.msk [vmem:[#allocation2 + $0x1e0] sm:$0xff] %vm339_vm1, %v7928_v2  ;;  %401 = vst.msk [vmem:[#allocation2 + $0x1e8] sm:$0xff] %vm339_vm1, %v7928_v2 }
  0x2b   : > { %402 = vst.msk [vmem:[#allocation2 + $0x1f0] sm:$0xff] %vm339_vm1, %v7928_v2  ;;  %403 = vst.msk [vmem:[#allocation2 + $0x1f8] sm:$0xff] %vm339_vm1, %v7928_v2 }
  0x2c   : > { %404 = vst.msk [vmem:[#allocation2 + $0x200] sm:$0xff] %vm339_vm1, %v7928_v2  ;;  %405 = vst.msk [vmem:[#allocation2 + $0x208] sm:$0xff] %vm339_vm1, %v7928_v2 }
  0x2d   : > { %406 = vst.msk [vmem:[#allocation2 + $0x210] sm:$0xff] %vm339_vm1, %v7928_v2  ;;  %407 = vst.msk [vmem:[#allocation2 + $0x218] sm:$0xff] %vm339_vm1, %v7928_v2 }
  0x2e   : > { %408 = vst.msk [vmem:[#allocation2 + $0x220] sm:$0xff] %vm339_vm1, %v7928_v2  ;;  %409 = vst.msk [vmem:[#allocation2 + $0x228] sm:$0xff] %vm339_vm1, %v7928_v2 }
  0x2f   : > { %410 = vst.msk [vmem:[#allocation2 + $0x230] sm:$0xff] %vm339_vm1, %v7928_v2  ;;  %411 = vst.msk [vmem:[#allocation2 + $0x238] sm:$0xff] %vm339_vm1, %v7928_v2 }
  0x30   : > { %445 = vst.msk [vmem:[#allocation2 + $0x28] sm:$0xff] %vm339_vm1, %v412_v8  ;;  %446 = vst.msk [vmem:[#allocation2 + $0x30] sm:$0xff] %vm339_vm1, %v413_v9 }
  0x31   : > { %467 = vst.msk [vmem:[#allocation2 + $0x188] sm:$0xff] %vm339_vm1, %v434_v11  ;;  %468 = vst.msk [vmem:[#allocation2 + $0x190] sm:$0xff] %vm339_vm1, %v435_v16 }
  0x32   : > { %469 = vst.msk [vmem:[#allocation2 + $0x1a8] sm:$0xff] %vm339_vm1, %v436_v17  ;;  %470 = vst.msk [vmem:[#allocation2 + $0x1b0] sm:$0xff] %vm339_vm1, %v437_v18 }
  0x33   : > { %447 = vst.msk [vmem:[#allocation2 + $0x48] sm:$0xff] %vm339_vm1, %v414_v22  ;;  %448 = vst.msk [vmem:[#allocation2 + $0x50] sm:$0xff] %vm339_vm1, %v415_v25 }
  0x34   : > { %449 = vst.msk [vmem:[#allocation2 + $0x68] sm:$0xff] %vm339_vm1, %v416_v26  ;;  %450 = vst.msk [vmem:[#allocation2 + $0x70] sm:$0xff] %vm339_vm1, %v417_v27  ;;  %v509_v27 = vpack.c.bf16 %v478_v24, %v477_v23  ;;  %v1001_v24 = vld [vmem:[#allocation2 + $0x9] sm:$0xff] }
  0x35   : > { %471 = vst.msk [vmem:[#allocation2 + $0x1c8] sm:$0xff] %vm339_vm1, %v438_v31  ;;  %472 = vst.msk [vmem:[#allocation2 + $0x1d0] sm:$0xff] %vm339_vm1, %v439_v32  ;;  %v326_v31 = vld [vmem:[%s8166_s17 + $0x98] sm:$0xff]  ;;  %v327_v32 = vld [vmem:[%s8166_s17 + $0xa0] sm:$0xff] }
  0x36   : > { %473 = vst.msk [vmem:[#allocation2 + $0x1e8] sm:$0xff] %vm339_vm1, %v440_v34  ;;  %474 = vst.msk [vmem:[#allocation2 + $0x1f0] sm:$0xff] %vm339_vm1, %v441_v37  ;;  %v431_v36 = vmax.f32 %v326_v31, 0.0  ;;  %v328_v37 = vld [vmem:[%s8166_s17 + $0xa8] sm:$0xff] }
  0x37   : > { %451 = vst.msk [vmem:[#allocation2 + $0x88] sm:$0xff] %vm339_vm1, %v418_v38  ;;  %452 = vst.msk [vmem:[#allocation2 + $0x90] sm:$0xff] %vm339_vm1, %v419_v39  ;;  %v528_v57 = vld [vmem:[#allocation2 + $0x28] sm:$0xff]  ;;  %v529_v58 = vld [vmem:[#allocation2 + $0x30] sm:$0xff]  ;;  %v432_v38 = vmax.f32 %v327_v32, 0.0  ;;  %v433_v41 = vmax.f32 %v328_v37, 0.0 }
  0x38   : > { %453 = vst.msk [vmem:[#allocation2 + $0xa8] sm:$0xff] %vm339_vm1, %v420_v42  ;;  %454 = vst.msk [vmem:[#allocation2 + $0xb0] sm:$0xff] %vm339_vm1, %v421_v43  ;;  %v550_v59 = vld [vmem:[#allocation2 + $0x188] sm:$0xff]  ;;  %v8215_v63 = vpack.c.bf16 %v529_v58, %v528_v57  ;;  %v551_v0 = vld [vmem:[#allocation2 + $0x190] sm:$0xff] }
  0x39   : > { %455 = vst.msk [vmem:[#allocation2 + $0xc8] sm:$0xff] %vm339_vm1, %v422_v46  ;;  %456 = vst.msk [vmem:[#allocation2 + $0xd0] sm:$0xff] %vm339_vm1, %v423_v47  ;;  %v552_v1 = vld [vmem:[#allocation2 + $0x1a8] sm:$0xff]  ;;  %v553_v5 = vld [vmem:[#allocation2 + $0x1b0] sm:$0xff]  ;;  %v8222_v7 = vpack.c.bf16 %v551_v0, %v550_v59 }
  0x3a   : > { %457 = vst.msk [vmem:[#allocation2 + $0xe8] sm:$0xff] %vm339_vm1, %v424_v51  ;;  %458 = vst.msk [vmem:[#allocation2 + $0xf0] sm:$0xff] %vm339_vm1, %v425_v52  ;;  %v8224_v8 = vpack.c.bf16 %v553_v5, %v552_v1  ;;  %v530_v9 = vld [vmem:[#allocation2 + $0x48] sm:$0xff]  ;;  %7187 = vmatmul.mubr.msk.bf16.vlgmr.msra.gmra.mxu0 %vm339_vm1, %v8215_v63  ;;  %v531_v4 = vld [vmem:[#allocation2 + $0x50] sm:$0xff] }
  0x3b   : > { %459 = vst.msk [vmem:[#allocation2 + $0x108] sm:$0xff] %vm339_vm1, %v426_v54  ;;  %460 = vst.msk [vmem:[#allocation2 + $0x110] sm:$0xff] %vm339_vm1, %v427_v60  ;;  %v532_v11 = vld [vmem:[#allocation2 + $0x68] sm:$0xff]  ;;  %7210 = vmatprep.mubr.msk.bf16.mxu1 %vm339_vm1, %v8222_v7  ;;  %v8243_v14 = vpack.c.bf16 %v531_v4, %v530_v9  ;;  %v533_v15 = vld [vmem:[#allocation2 + $0x70] sm:$0xff]  ;;  %7253 = vmatpush3.bf16.msra.mxu0 %v1100_v6 }
  0x3c   : > { %461 = vst.msk [vmem:[#allocation2 + $0x128] sm:$0xff] %vm339_vm1, %v428_v61  ;;  %462 = vst.msk [vmem:[#allocation2 + $0x130] sm:$0xff] %vm339_vm1, %v429_v62  ;;  %v554_v16 = vld [vmem:[#allocation2 + $0x1c8] sm:$0xff]  ;;  %v555_v17 = vld [vmem:[#allocation2 + $0x1d0] sm:$0xff]  ;;  %7211 = vmatmul.mubr.msk.bf16.vlgmr.msra.gmra.mxu1 %vm339_vm1, %v8224_v8  ;;  %7855 = vmatprep.subr.msk.bf16.mxu0 %vm624_vm0, %v8232_v10  ;;  %v8253_v22 = vpack.c.bf16 %v533_v15, %v532_v11 }
  0x3d   : > { %v8247_v18 = vpack.c.bf16 %v555_v17, %v554_v16  ;;  %7190 = vmatprep.mubr.msk.bf16.mxu0 %vm339_vm1, %v8243_v14  ;;  %v556_v20 = vld [vmem:[#allocation2 + $0x1e8] sm:$0xff]  ;;  %v557_v21 = vld [vmem:[#allocation2 + $0x1f0] sm:$0xff]  ;;  %7219 = vmatpush3.bf16.msra.mxu1 %v838_v12  ;;  %463 = vst.msk [vmem:[#allocation2 + $0x148] sm:$0xff] %vm339_vm1, %v430_v35  ;;  %464 = vst.msk [vmem:[#allocation2 + $0x150] sm:$0xff] %vm339_vm1, %v431_v36 }
  0x3e   : > { %v534_v19 = vld [vmem:[#allocation2 + $0x88] sm:$0xff]  ;;  %v535_v3 = vld [vmem:[#allocation2 + $0x90] sm:$0xff]  ;;  %7854 = vmatprep.subr.msk.bf16.mxu1 %vm624_vm0, %v6477_v13  ;;  %v8260_v26 = vpack.c.bf16 %v557_v21, %v556_v20  ;;  %465 = vst.msk [vmem:[#allocation2 + $0x168] sm:$0xff] %vm339_vm1, %v432_v38  ;;  %466 = vst.msk [vmem:[#allocation2 + $0x170] sm:$0xff] %vm339_vm1, %v433_v41 }
  0x3f   : > { %7214 = vmatprep.mubr.msk.bf16.mxu1 %vm339_vm1, %v8247_v18  ;;  %v8258_v25 = vpack.c.bf16 %v535_v3, %v534_v19  ;;  %v536_v28 = vld [vmem:[#allocation2 + $0xa8] sm:$0xff]  ;;  %v537_v29 = vld [vmem:[#allocation2 + $0xb0] sm:$0xff]  ;;  %v338_v15 = vld [vmem:[%s8166_s17 + $0xf8] sm:$0xff]  ;;  %3141 = vst.msk [vmem:[#allocation3 + $0x48] sm:$0xff] %vm3131_vm2, %v7928_v2 }
  0x40   : > { %v538_v33 = vld [vmem:[#allocation2 + $0xc8] sm:$0xff]  ;;  %v539_v34 = vld [vmem:[#allocation2 + $0xd0] sm:$0xff]  ;;  %v8273_v42 = vpack.c.bf16 %v537_v29, %v536_v28  ;;  %v443_v3 = vmax.f32 %v338_v15, 0.0  ;;  %3132 = vst.msk [vmem:[#allocation3] sm:$0xff] %vm3131_vm2, %v7928_v2  ;;  %3133 = vst.msk [vmem:[#allocation3 + $0x8] sm:$0xff] %vm3131_vm2, %v7928_v2 }
  0x41   : > { %v479_v39 = vld [vmem:[#allocation2 + $0x27] sm:$0xff]  ;;  %v480_v40 = vld [vmem:[#allocation2 + $0x2f] sm:$0xff]  ;;  %v8278_v45 = vpack.c.bf16 %v539_v34, %v538_v33  ;;  %3134 = vst.msk [vmem:[#allocation3 + $0x10] sm:$0xff] %vm3131_vm2, %v7928_v2  ;;  %3135 = vst.msk [vmem:[#allocation3 + $0x18] sm:$0xff] %vm3131_vm2, %v7928_v2 }
  0x42   : > { %7191 = vmatmul.mubr.msk.bf16.gmra.mxu0 %vm339_vm1, %v8253_v22  ;;  %v481_v43 = vld [vmem:[#allocation2 + $0x47] sm:$0xff]  ;;  %v482_v44 = vld [vmem:[#allocation2 + $0x4f] sm:$0xff]  ;;  %v8281_v46 = vpack.c.bf16 %v480_v40, %v479_v39  ;;  %476 = vst.msk [vmem:[#allocation2 + $0x210] sm:$0xff] %vm339_vm1, %v443_v3 }
  0x43   : > { %7194 = vmatprep.mubr.msk.bf16.mxu0 %vm339_vm1, %v8258_v25  ;;  %v8283_v47 = vpack.c.bf16 %v482_v44, %v481_v43  ;;  %v540_v49 = vld [vmem:[#allocation2 + $0xe8] sm:$0xff]  ;;  %v541_v50 = vld [vmem:[#allocation2 + $0xf0] sm:$0xff]  ;;  %3136 = vst.msk [vmem:[#allocation3 + $0x20] sm:$0xff] %vm3131_vm2, %v7928_v2  ;;  %3137 = vst.msk [vmem:[#allocation3 + $0x28] sm:$0xff] %vm3131_vm2, %v7928_v2 }
  0x44   : > { %7215 = vmatmul.mubr.msk.bf16.gmra.mxu1 %vm339_vm1, %v8260_v26  ;;  %v542_v51 = vld [vmem:[#allocation2 + $0x108] sm:$0xff]  ;;  %v543_v52 = vld [vmem:[#allocation2 + $0x110] sm:$0xff]  ;;  %v8294_v55 = vpack.c.bf16 %v541_v50, %v540_v49  ;;  %3138 = vst.msk [vmem:[#allocation3 + $0x30] sm:$0xff] %vm3131_vm2, %v7928_v2  ;;  %3139 = vst.msk [vmem:[#allocation3 + $0x38] sm:$0xff] %vm3131_vm2, %v7928_v2 }
  0x45   : > { %7220 = vmatprep.mubr.msk.bf16.mxu1 %vm339_vm1, %v509_v27  ;;  %v483_v53 = vld [vmem:[#allocation2 + $0x67] sm:$0xff]  ;;  %v484_v54 = vld [vmem:[#allocation2 + $0x6f] sm:$0xff]  ;;  %v8296_v58 = vpack.c.bf16 %v543_v52, %v542_v51  ;;  %v1688_v51 = vsel %vm624_vm0, %v8232_v10, 0  ;;  %3140 = vst.msk [vmem:[#allocation3 + $0x40] sm:$0xff] %vm3131_vm2, %v7928_v2  ;;  %3142 = vst.msk [vmem:[#allocation3 + $0x50] sm:$0xff] %vm3131_vm2, %v7928_v2 }
  0x46   : > { %v485_v56 = vld [vmem:[#allocation2 + $0x87] sm:$0xff]  ;;  %v486_v57 = vld [vmem:[#allocation2 + $0x8f] sm:$0xff]  ;;  %v8298_v59 = vpack.c.bf16 %v484_v54, %v483_v53  ;;  %v8363_v53 = vld [vmem:[%s10644_s3 + $0x18] sm:$0x7]  ;;  %3143 = vst.msk [vmem:[#allocation3 + $0x58] sm:$0xff] %vm3131_vm2, %v7928_v2 }
  0x47   : > { %v8300_v60 = vpack.c.bf16 %v486_v57, %v485_v56  ;;  %v544_v61 = vld [vmem:[#allocation2 + $0x128] sm:$0xff]  ;;  %v545_v62 = vld [vmem:[#allocation2 + $0x130] sm:$0xff]  ;;  %3144 = vst.msk [vmem:[#allocation3 + $0x60] sm:$0xff] %vm3131_vm2, %v7928_v2  ;;  %3145 = vst.msk [vmem:[#allocation3 + $0x68] sm:$0xff] %vm3131_vm2, %v7928_v2 }
  0x48   : > { %v546_v0 = vld [vmem:[#allocation2 + $0x148] sm:$0xff]  ;;  %v547_v1 = vld [vmem:[#allocation2 + $0x150] sm:$0xff]  ;;  %v8310_v9 = vpack.c.bf16 %v545_v62, %v544_v61  ;;  %3146 = vst.msk [vmem:[#allocation3 + $0x70] sm:$0xff] %vm3131_vm2, %v7928_v2  ;;  %3147 = vst.msk [vmem:[#allocation3 + $0x78] sm:$0xff] %vm3131_vm2, %v7928_v2 }
  0x49   : > { %v487_v5 = vld [vmem:[#allocation2 + $0xa7] sm:$0xff]  ;;  %v488_v6 = vld [vmem:[#allocation2 + $0xaf] sm:$0xff]  ;;  %v8312_v12 = vpack.c.bf16 %v547_v1, %v546_v0  ;;  %3148 = vst.msk [vmem:[#allocation3 + $0x80] sm:$0xff] %vm3131_vm2, %v7928_v2  ;;  %3149 = vst.msk [vmem:[#allocation3 + $0x88] sm:$0xff] %vm3131_vm2, %v7928_v2 }
  0x4a   : > { %7195 = vmatmul.mubr.msk.bf16.gmra.mxu0 %vm339_vm1, %v8273_v42  ;;  %v489_v4 = vld [vmem:[#allocation2 + $0xc7] sm:$0xff]  ;;  %v490_v11 = vld [vmem:[#allocation2 + $0xcf] sm:$0xff]  ;;  %v8321_v17 = vpack.c.bf16 %v488_v6, %v487_v5  ;;  %3150 = vst.msk [vmem:[#allocation3 + $0x90] sm:$0xff] %vm3131_vm2, %v7928_v2  ;;  %3151 = vst.msk [vmem:[#allocation3 + $0x98] sm:$0xff] %vm3131_vm2, %v7928_v2 }
  0x4b   : > { %7198 = vmatprep.mubr.msk.bf16.mxu0 %vm339_vm1, %v8278_v45  ;;  %v337_v13 = vld [vmem:[%s8166_s17 + $0xf0] sm:$0xff]  ;;  %v548_v20 = vld [vmem:[#allocation2 + $0x168] sm:$0xff]  ;;  %v8325_v23 = vpack.c.bf16 %v490_v11, %v489_v4  ;;  %3152 = vst.msk [vmem:[#allocation3 + $0xa0] sm:$0xff] %vm3131_vm2, %v7928_v2  ;;  %3153 = vst.msk [vmem:[#allocation3 + $0xa8] sm:$0xff] %vm3131_vm2, %v7928_v2 }
  0x4c   : > { %7221 = vmatmul.mubr.msk.bf16.vlgmr.msra.gmra.mxu1 %vm339_vm1, %v8281_v46  ;;  %v8319_v16 = vld [vmem:[%s10644_s3 + $0x14] sm:$0x7]  ;;  %v442_v19 = vmax.f32 %v337_v13, 0.0  ;;  %v491_v28 = vld [vmem:[#allocation2 + $0xe7] sm:$0xff]  ;;  %3154 = vst.msk [vmem:[#allocation3 + $0xb0] sm:$0xff] %vm3131_vm2, %v7928_v2  ;;  %3155 = vst.msk [vmem:[#allocation3 + $0xb8] sm:$0xff] %vm3131_vm2, %v7928_v2 }
  0x4d   : > { %7224 = vmatprep.mubr.msk.bf16.mxu1 %vm339_vm1, %v8283_v47  ;;  %7287 = vmatpush3.bf16.msra.mxu1 %v1394_v48  ;;  %v549_v21 = vld [vmem:[#allocation2 + $0x170] sm:$0xff]  ;;  %v493_v30 = vld [vmem:[#allocation2 + $0x107] sm:$0xff]  ;;  %3156 = vst.msk [vmem:[#allocation3 + $0xc0] sm:$0xff] %vm3131_vm2, %v7928_v2  ;;  %3157 = vst.msk [vmem:[#allocation3 + $0xc8] sm:$0xff] %vm3131_vm2, %v7928_v2 }
  0x4e   : > { %7856 = vmatprep.subr.msk.bf16.mxu1 %vm624_vm0, %v8319_v16  ;;  %v1002_v27 = vld [vmem:[#allocation2 + $0x11] sm:$0xff]  ;;  %475 = vst.msk [vmem:[#allocation2 + $0x208] sm:$0xff] %vm339_vm1, %v442_v19  ;;  %v8337_v32 = vpack.c.bf16 %v549_v21, %v548_v20  ;;  %v1003_v36 = vld [vmem:[#allocation2 + $0x29] sm:$0xff] }
  0x4f   : > { %v492_v29 = vld [vmem:[#allocation2 + $0xef] sm:$0xff]  ;;  %v1033_v33 = vpack.c.bf16 %v1002_v27, %v1001_v24  ;;  %v495_v40 = vld [vmem:[#allocation2 + $0x127] sm:$0xff]  ;;  %3158 = vst.msk [vmem:[#allocation3 + $0xd0] sm:$0xff] %vm3131_vm2, %v7928_v2  ;;  %3159 = vst.msk [vmem:[#allocation3 + $0xd8] sm:$0xff] %vm3131_vm2, %v7928_v2 }
  0x50   : > { %v494_v31 = vld [vmem:[#allocation2 + $0x10f] sm:$0xff]  ;;  %v8339_v34 = vpack.c.bf16 %v492_v29, %v491_v28  ;;  %v497_v44 = vld [vmem:[#allocation2 + $0x147] sm:$0xff]  ;;  %3160 = vst.msk [vmem:[#allocation3 + $0xe0] sm:$0xff] %vm3131_vm2, %v7928_v2  ;;  %3161 = vst.msk [vmem:[#allocation3 + $0xe8] sm:$0xff] %vm3131_vm2, %v7928_v2 }
  0x51   : > { %v8341_v35 = vpack.c.bf16 %v494_v31, %v493_v30  ;;  %v1004_v37 = vld [vmem:[#allocation2 + $0x31] sm:$0xff]  ;;  %v1005_v38 = vld [vmem:[#allocation2 + $0x49] sm:$0xff]  ;;  %3162 = vst.msk [vmem:[#allocation3 + $0xf0] sm:$0xff] %vm3131_vm2, %v7928_v2  ;;  %3163 = vst.msk [vmem:[#allocation3 + $0xf8] sm:$0xff] %vm3131_vm2, %v7928_v2 }
  0x52   : > { %7199 = vmatmul.mubr.msk.bf16.gmra.mxu0 %vm339_vm1, %v8294_v55  ;;  %v1006_v39 = vld [vmem:[#allocation2 + $0x51] sm:$0xff]  ;;  %v8350_v43 = vpack.c.bf16 %v1004_v37, %v1003_v36  ;;  %v1007_v54 = vld [vmem:[#allocation2 + $0x69] sm:$0xff]  ;;  %3164 = vst.msk [vmem:[#allocation3 + $0x100] sm:$0xff] %vm3131_vm2, %v7928_v2  ;;  %3165 = vst.msk [vmem:[#allocation3 + $0x108] sm:$0xff] %vm3131_vm2, %v7928_v2 }
  0x53   : > { %7202 = vmatprep.mubr.msk.bf16.mxu0 %vm339_vm1, %v8296_v58  ;;  %v496_v41 = vld [vmem:[#allocation2 + $0x12f] sm:$0xff]  ;;  %v8352_v49 = vpack.c.bf16 %v1006_v39, %v1005_v38  ;;  %v499_v61 = vld [vmem:[#allocation2 + $0x167] sm:$0xff]  ;;  %3166 = vst.msk [vmem:[#allocation3 + $0x110] sm:$0xff] %vm3131_vm2, %v7928_v2  ;;  %3167 = vst.msk [vmem:[#allocation3 + $0x118] sm:$0xff] %vm3131_vm2, %v7928_v2 }
  0x54   : > { %7225 = vmatmul.mubr.msk.bf16.gmra.mxu1 %vm339_vm1, %v8298_v59  ;;  %v498_v48 = vld [vmem:[#allocation2 + $0x14f] sm:$0xff]  ;;  %v8354_v50 = vpack.c.bf16 %v496_v41, %v495_v40  ;;  %v501_v1 = vld [vmem:[#allocation2 + $0x187] sm:$0xff]  ;;  %3168 = vst.msk [vmem:[#allocation3 + $0x120] sm:$0xff] %vm3131_vm2, %v7928_v2  ;;  %3169 = vst.msk [vmem:[#allocation3 + $0x128] sm:$0xff] %vm3131_vm2, %v7928_v2 }
  0x55   : > { %7228 = vmatprep.mubr.msk.bf16.mxu1 %vm339_vm1, %v8300_v60  ;;  %v8358_v52 = vpack.c.bf16 %v498_v48, %v497_v44  ;;  %v1008_v56 = vld [vmem:[#allocation2 + $0x71] sm:$0xff]  ;;  %v1009_v10 = vld [vmem:[#allocation2 + $0x89] sm:$0xff]  ;;  %3170 = vst.msk [vmem:[#allocation3 + $0x130] sm:$0xff] %vm3131_vm2, %v7928_v2  ;;  %3171 = vst.msk [vmem:[#allocation3 + $0x138] sm:$0xff] %vm3131_vm2, %v7928_v2 }
  0x56   : > { %v1010_v57 = vld [vmem:[#allocation2 + $0x91] sm:$0xff]  ;;  %v8375_v0 = vpack.c.bf16 %v1008_v56, %v1007_v54  ;;  %v1011_v13 = vld [vmem:[#allocation2 + $0xa9] sm:$0xff]  ;;  %3172 = vst.msk [vmem:[#allocation3 + $0x140] sm:$0xff] %vm3131_vm2, %v7928_v2  ;;  %3173 = vst.msk [vmem:[#allocation3 + $0x148] sm:$0xff] %vm3131_vm2, %v7928_v2 }
  0x57   : > { %v500_v62 = vld [vmem:[#allocation2 + $0x16f] sm:$0xff]  ;;  %v8377_v6 = vpack.c.bf16 %v1010_v57, %v1009_v10  ;;  %v503_v20 = vld [vmem:[#allocation2 + $0x1a7] sm:$0xff]  ;;  %3174 = vst.msk [vmem:[#allocation3 + $0x150] sm:$0xff] %vm3131_vm2, %v7928_v2  ;;  %3175 = vst.msk [vmem:[#allocation3 + $0x158] sm:$0xff] %vm3131_vm2, %v7928_v2 }
  0x58   : > { %v502_v5 = vld [vmem:[#allocation2 + $0x18f] sm:$0xff]  ;;  %v8379_v4 = vpack.c.bf16 %v500_v62, %v499_v61  ;;  %v505_v27 = vld [vmem:[#allocation2 + $0x1c7] sm:$0xff]  ;;  %v1982_v62 = vsel %vm624_vm0, %v8319_v16, 0  ;;  %3176 = vst.msk [vmem:[#allocation3 + $0x160] sm:$0xff] %vm3131_vm2, %v7928_v2  ;;  %3177 = vst.msk [vmem:[#allocation3 + $0x168] sm:$0xff] %vm3131_vm2, %v7928_v2 }
  0x59   : > { %v8381_v11 = vpack.c.bf16 %v502_v5, %v501_v1  ;;  %v1012_v15 = vld [vmem:[#allocation2 + $0xb1] sm:$0xff]  ;;  %v1013_v19 = vld [vmem:[#allocation2 + $0xc9] sm:$0xff]  ;;  %3178 = vst.msk [vmem:[#allocation3 + $0x170] sm:$0xff] %vm3131_vm2, %v7928_v2  ;;  %3179 = vst.msk [vmem:[#allocation3 + $0x178] sm:$0xff] %vm3131_vm2, %v7928_v2 }
  0x5a   : > { %7203 = vmatmul.mubr.msk.bf16.gmra.mxu0 %vm339_vm1, %v8310_v9  ;;  %v1014_v3 = vld [vmem:[#allocation2 + $0xd1] sm:$0xff]  ;;  %v8391_v24 = vpack.c.bf16 %v1012_v15, %v1011_v13  ;;  %v1017_v37 = vld [vmem:[#allocation2 + $0x109] sm:$0xff]  ;;  %v6545_v13 = vld [vmem:[%s10644_s3 + $0x1c] sm:$0x7]  ;;  %3180 = vst.msk [vmem:[#allocation3 + $0x180] sm:$0xff] %vm3131_vm2, %v7928_v2 }
  0x5b   : > { %7206 = vmatprep.mubr.msk.bf16.mxu0 %vm339_vm1, %v8312_v12  ;;  %v504_v21 = vld [vmem:[#allocation2 + $0x1af] sm:$0xff]  ;;  %v8393_v29 = vpack.c.bf16 %v1014_v3, %v1013_v19  ;;  %v507_v39 = vld [vmem:[#allocation2 + $0x1e7] sm:$0xff]  ;;  %3181 = vst.msk [vmem:[#allocation3 + $0x188] sm:$0xff] %vm3131_vm2, %v7928_v2  ;;  %3182 = vst.msk [vmem:[#allocation3 + $0x190] sm:$0xff] %vm3131_vm2, %v7928_v2 }
  0x5c   : > { %7229 = vmatmul.mubr.msk.bf16.gmra.mxu1 %vm339_vm1, %v8321_v17  ;;  %v506_v28 = vld [vmem:[#allocation2 + $0x1cf] sm:$0xff]  ;;  %v8395_v30 = vpack.c.bf16 %v504_v21, %v503_v20  ;;  %3183 = vst.msk [vmem:[#allocation3 + $0x198] sm:$0xff] %vm3131_vm2, %v7928_v2  ;;  %3184 = vst.msk [vmem:[#allocation3 + $0x1a0] sm:$0xff] %vm3131_vm2, %v7928_v2 }
  0x5d   : > { %7232 = vmatprep.mubr.msk.bf16.mxu1 %vm339_vm1, %v8325_v23  ;;  %v8397_v31 = vpack.c.bf16 %v506_v28, %v505_v27  ;;  %v1016_v36 = vld [vmem:[#allocation2 + $0xf1] sm:$0xff]  ;;  %v1021_v56 = vld [vmem:[#allocation2 + $0x149] sm:$0xff]  ;;  %3185 = vst.msk [vmem:[#allocation3 + $0x1a8] sm:$0xff] %vm3131_vm2, %v7928_v2  ;;  %3186 = vst.msk [vmem:[#allocation3 + $0x1b0] sm:$0xff] %vm3131_vm2, %v7928_v2 }
  0x5e   : > { %v1018_v38 = vld [vmem:[#allocation2 + $0x111] sm:$0xff]  ;;  %v1023_v1 = vld [vmem:[#allocation2 + $0x169] sm:$0xff]  ;;  %3187 = vst.msk [vmem:[#allocation3 + $0x1b8] sm:$0xff] %vm3131_vm2, %v7928_v2  ;;  %3188 = vst.msk [vmem:[#allocation3 + $0x1c0] sm:$0xff] %vm3131_vm2, %v7928_v2 }
  0x5f   : > { %v508_v40 = vld [vmem:[#allocation2 + $0x1ef] sm:$0xff]  ;;  %v8409_v44 = vpack.c.bf16 %v1018_v38, %v1017_v37  ;;  %3189 = vst.msk [vmem:[#allocation3 + $0x1c8] sm:$0xff] %vm3131_vm2, %v7928_v2  ;;  %3190 = vst.msk [vmem:[#allocation3 + $0x1d0] sm:$0xff] %vm3131_vm2, %v7928_v2 }
  0x60   : > { %v8411_v48 = vpack.c.bf16 %v508_v40, %v507_v39  ;;  %v1020_v54 = vld [vmem:[#allocation2 + $0x131] sm:$0xff]  ;;  %v1027_v3 = vld [vmem:[#allocation2 + $0x1a9] sm:$0xff]  ;;  %v2277_v39 = vsel %vm624_vm0, %v8363_v53, 0  ;;  %v6562_v40 = vld [vmem:[%s10644_s3 + $0x20] sm:$0x7]  ;;  %3191 = vst.msk [vmem:[#allocation3 + $0x1d8] sm:$0xff] %vm3131_vm2, %v7928_v2 }
  0x61   : > { %v1022_v10 = vld [vmem:[#allocation2 + $0x151] sm:$0xff]  ;;  %v1029_v21 = vld [vmem:[#allocation2 + $0x1c9] sm:$0xff]  ;;  %3192 = vst.msk [vmem:[#allocation3 + $0x1e0] sm:$0xff] %vm3131_vm2, %v7928_v2  ;;  %3193 = vst.msk [vmem:[#allocation3 + $0x1e8] sm:$0xff] %vm3131_vm2, %v7928_v2 }
  0x62   : > { %7207 = vmatmul.mubr.msk.bf16.gmra.mxu0 %vm339_vm1, %v8337_v32  ;;  %v8423_v61 = vpack.c.bf16 %v1022_v10, %v1021_v56  ;;  %v1024_v5 = vld [vmem:[#allocation2 + $0x171] sm:$0xff]  ;;  %3194 = vst.msk [vmem:[#allocation3 + $0x1f0] sm:$0xff] %vm3131_vm2, %v7928_v2  ;;  %3195 = vst.msk [vmem:[#allocation3 + $0x1f8] sm:$0xff] %vm3131_vm2, %v7928_v2 }
  0x63   : > { %7254 = vmatprep.mubr.msk.bf16.mxu0 %vm339_vm1, %v1033_v33  ;;  %v1015_v33 = vld [vmem:[#allocation2 + $0xe9] sm:$0xff]  ;;  %v1026_v15 = vld [vmem:[#allocation2 + $0x191] sm:$0xff]  ;;  %v8438_v19 = vpack.c.bf16 %v1024_v5, %v1023_v1  ;;  %3196 = vst.msk [vmem:[#allocation3 + $0x200] sm:$0xff] %vm3131_vm2, %v7928_v2  ;;  %3197 = vst.msk [vmem:[#allocation3 + $0x208] sm:$0xff] %vm3131_vm2, %v7928_v2 }
  0x64   : > { %7233 = vmatmul.mubr.msk.bf16.gmra.mxu1 %vm339_vm1, %v8339_v34  ;;  %v8407_v41 = vpack.c.bf16 %v1016_v36, %v1015_v33  ;;  %v1028_v20 = vld [vmem:[#allocation2 + $0x1b1] sm:$0xff]  ;;  %v1031_v36 = vld [vmem:[#allocation2 + $0x1e9] sm:$0xff]  ;;  %3198 = vst.msk [vmem:[#allocation3 + $0x210] sm:$0xff] %vm3131_vm2, %v7928_v2  ;;  %3199 = vst.msk [vmem:[#allocation3 + $0x218] sm:$0xff] %vm3131_vm2, %v7928_v2 }
  0x65   : > { %7236 = vmatprep.mubr.msk.bf16.mxu1 %vm339_vm1, %v8341_v35  ;;  %v1030_v27 = vld [vmem:[#allocation2 + $0x1d1] sm:$0xff]  ;;  %v8451_v28 = vpack.c.bf16 %v1028_v20, %v1027_v3  ;;  %v2474_v1 = vld [vmem:[#allocation2 + $0x68] sm:$0xff]  ;;  %3200 = vst.msk [vmem:[#allocation3 + $0x220] sm:$0xff] %vm3131_vm2, %v7928_v2  ;;  %3201 = vst.msk [vmem:[#allocation3 + $0x228] sm:$0xff] %vm3131_vm2, %v7928_v2 }
  0x66   : > { %v8453_v33 = vpack.c.bf16 %v1030_v27, %v1029_v21  ;;  %v1032_v37 = vld [vmem:[#allocation2 + $0x1f1] sm:$0xff]  ;;  %3202 = vst.msk [vmem:[#allocation3 + $0x230] sm:$0xff] %vm3131_vm2, %v7928_v2  ;;  %3203 = vst.msk [vmem:[#allocation3 + $0x238] sm:$0xff] %vm3131_vm2, %v7928_v2 }
  0x67   : > { %v8463_v38 = vpack.c.bf16 %v1032_v37, %v1031_v36  ;;  %v2475_v5 = vld [vmem:[#allocation2 + $0x70] sm:$0xff] }
  0x68   : > { %v2505_v3 = vpack.c.bf16 %v2475_v5, %v2474_v1 }
  0x6a   : > { %7255 = vmatmul.mubr.msk.bf16.vlgmr.msra.gmra.mxu0 %vm339_vm1, %v8350_v43 }
  0x6b   : > { %7258 = vmatprep.mubr.msk.bf16.mxu0 %vm339_vm1, %v8352_v49  ;;  %7321 = vmatpush3.bf16.msra.mxu0 %v1688_v51  ;;  %v1019_v51 = vld [vmem:[#allocation2 + $0x129] sm:$0xff] }
  0x6c   : > { %7237 = vmatmul.mubr.msk.bf16.gmra.mxu1 %vm339_vm1, %v8354_v50  ;;  %7857 = vmatprep.subr.msk.bf16.mxu0 %vm624_vm0, %v8363_v53  ;;  %v8421_v57 = vpack.c.bf16 %v1020_v54, %v1019_v51  ;;  %v2473_v53 = vld [vmem:[#allocation2 + $0x50] sm:$0xff] }
  0x6d   : > { %7240 = vmatprep.mubr.msk.bf16.mxu1 %vm339_vm1, %v8358_v52 }
  0x72   : > { %7259 = vmatmul.mubr.msk.bf16.gmra.mxu0 %vm339_vm1, %v8375_v0 }
  0x73   : > { %7262 = vmatprep.mubr.msk.bf16.mxu0 %vm339_vm1, %v8377_v6 }
  0x74   : > { %7241 = vmatmul.mubr.msk.bf16.gmra.mxu1 %vm339_vm1, %v8379_v4 }
  0x75   : > { %7244 = vmatprep.mubr.msk.bf16.mxu1 %vm339_vm1, %v8381_v11 }
  0x7a   : > { %7263 = vmatmul.mubr.msk.bf16.gmra.mxu0 %vm339_vm1, %v8391_v24 }
  0x7b   : > { %7266 = vmatprep.mubr.msk.bf16.mxu0 %vm339_vm1, %v8393_v29 }
  0x7c   : > { %7245 = vmatmul.mubr.msk.bf16.gmra.mxu1 %vm339_vm1, %v8395_v30 }
  0x7d   : > { %7248 = vmatprep.mubr.msk.bf16.mxu1 %vm339_vm1, %v8397_v31 }
  0x82   : > { %7267 = vmatmul.mubr.msk.bf16.gmra.mxu0 %vm339_vm1, %v8407_v41 }
  0x83   : > { %7270 = vmatprep.mubr.msk.bf16.mxu0 %vm339_vm1, %v8409_v44 }
  0x84   : > { %7249 = vmatmul.mubr.msk.bf16.gmra.mxu1 %vm339_vm1, %v8411_v48 }
  0x85   : > { %7288 = vmatprep.mubr.msk.bf16.mxu1 %vm339_vm1, %v8281_v46  ;;  %v1025_v46 = vld [vmem:[#allocation2 + $0x189] sm:$0xff] }
  0x86   : > { %v8441_v16 = vpack.c.bf16 %v1026_v15, %v1025_v46  ;;  %v2476_v15 = vld [vmem:[#allocation2 + $0x88] sm:$0xff] }
  0x8a   : > { %7271 = vmatmul.mubr.msk.bf16.gmra.mxu0 %vm339_vm1, %v8421_v57 }
  0x8b   : > { %7274 = vmatprep.mubr.msk.bf16.mxu0 %vm339_vm1, %v8423_v61 }
  0x8c   : > { %7289 = vmatmul.mubr.msk.bf16.vlgmr.msra.gmra.mxu1 %vm339_vm1, %v8283_v47 }
  0x8d   : > { %7292 = vmatprep.mubr.msk.bf16.mxu1 %vm339_vm1, %v8298_v59  ;;  %7355 = vmatpush3.bf16.msra.mxu1 %v1982_v62 }
  0x8e   : > { %7858 = vmatprep.subr.msk.bf16.mxu1 %vm624_vm0, %v6545_v13 }
  0x92   : > { %7275 = vmatmul.mubr.msk.bf16.gmra.mxu0 %vm339_vm1, %v8438_v19 }
  0x93   : > { %7278 = vmatprep.mubr.msk.bf16.mxu0 %vm339_vm1, %v8441_v16 }
  0x94   : > { %7293 = vmatmul.mubr.msk.bf16.gmra.mxu1 %vm339_vm1, %v8300_v60 }
  0x95   : > { %7296 = vmatprep.mubr.msk.bf16.mxu1 %vm339_vm1, %v8321_v17 }
  0x9a   : > { %7279 = vmatmul.mubr.msk.bf16.gmra.mxu0 %vm339_vm1, %v8451_v28 }
  0x9b   : > { %7282 = vmatprep.mubr.msk.bf16.mxu0 %vm339_vm1, %v8453_v33 }
  0x9c   : > { %7297 = vmatmul.mubr.msk.bf16.gmra.mxu1 %vm339_vm1, %v8325_v23 }
  0x9d   : > { %7300 = vmatprep.mubr.msk.bf16.mxu1 %vm339_vm1, %v8339_v34 }
  0xa2   : > { %7283 = vmatmul.mubr.msk.bf16.gmra.mxu0 %vm339_vm1, %v8463_v38 }
  0xa3   : > { %7322 = vmatprep.mubr.msk.bf16.mxu0 %vm339_vm1, %v8215_v63  ;;  %v1325_v63 = vld [vmem:[#allocation2 + $0x207] sm:$0xff] }
  0xa4   : > { %7301 = vmatmul.mubr.msk.bf16.gmra.mxu1 %vm339_vm1, %v8341_v35 }
  0xa5   : > { %7304 = vmatprep.mubr.msk.bf16.mxu1 %vm339_vm1, %v8354_v50 }
  0xaa   : > { %7323 = vmatmul.mubr.msk.bf16.vlgmr.msra.gmra.mxu0 %vm339_vm1, %v8243_v14  ;;  %v1326_v14 = vld [vmem:[#allocation2 + $0x20f] sm:$0xff] }
  0xab   : > { %7326 = vmatprep.mubr.msk.bf16.mxu0 %vm339_vm1, %v8253_v22  ;;  %7389 = vmatpush3.bf16.msra.mxu0 %v2277_v39  ;;  %v8503_v22 = vpack.c.bf16 %v1326_v14, %v1325_v63  ;;  %v2481_v39 = vld [vmem:[#allocation2 + $0xd0] sm:$0xff] }
  0xac   : > { %7305 = vmatmul.mubr.msk.bf16.gmra.mxu1 %vm339_vm1, %v8358_v52  ;;  %7859 = vmatprep.subr.msk.bf16.mxu0 %vm624_vm0, %v6562_v40 }
  0xad   : > { %7308 = vmatprep.mubr.msk.bf16.mxu1 %vm339_vm1, %v8379_v4 }
  0xb2   : > { %7327 = vmatmul.mubr.msk.bf16.gmra.mxu0 %vm339_vm1, %v8258_v25  ;;  %v2571_v25 = vsel %vm624_vm0, %v6545_v13, 0 }
  0xb3   : > { %7330 = vmatprep.mubr.msk.bf16.mxu0 %vm339_vm1, %v8273_v42 }
  0xb4   : > { %7309 = vmatmul.mubr.msk.bf16.gmra.mxu1 %vm339_vm1, %v8381_v11 }
  0xb5   : > { %7312 = vmatprep.mubr.msk.bf16.mxu1 %vm339_vm1, %v8395_v30 }
  0xba   : > { %7331 = vmatmul.mubr.msk.bf16.gmra.mxu0 %vm339_vm1, %v8278_v45  ;;  %v1619_v45 = vld [vmem:[#allocation2 + $0x208] sm:$0xff] }
  0xbb   : > { %7334 = vmatprep.mubr.msk.bf16.mxu0 %vm339_vm1, %v8294_v55 }
  0xbc   : > { %7313 = vmatmul.mubr.msk.bf16.gmra.mxu1 %vm339_vm1, %v8397_v31 }
  0xbd   : > { %7316 = vmatprep.mubr.msk.bf16.mxu1 %vm339_vm1, %v8411_v48 }
  0xc2   : > { %7335 = vmatmul.mubr.msk.bf16.gmra.mxu0 %vm339_vm1, %v8296_v58  ;;  %v1620_v58 = vld [vmem:[#allocation2 + $0x210] sm:$0xff] }
  0xc3   : > { %7338 = vmatprep.mubr.msk.bf16.mxu0 %vm339_vm1, %v8310_v9 }
  0xc4   : > { %7317 = vmatmul.mubr.msk.bf16.gmra.mxu1 %vm339_vm1, %v8503_v22 }
  0xc5   : > { %7356 = vmatprep.mubr.msk.bf16.mxu1 %vm339_vm1, %v8350_v43  ;;  %v2472_v43 = vld [vmem:[#allocation2 + $0x48] sm:$0xff] }
  0xc6   : > { %v2504_v54 = vpack.c.bf16 %v2473_v53, %v2472_v43  ;;  %v2485_v43 = vld [vmem:[#allocation2 + $0x110] sm:$0xff] }
  0xca   : > { %7339 = vmatmul.mubr.msk.bf16.gmra.mxu0 %vm339_vm1, %v8312_v12 }
  0xcb   : > { %7342 = vmatprep.mubr.msk.bf16.mxu0 %vm339_vm1, %v8337_v32 }
  0xcc   : > { %7357 = vmatmul.mubr.msk.bf16.vlgmr.msra.gmra.mxu1 %vm339_vm1, %v8352_v49 }
  0xcd   : > { %7360 = vmatprep.mubr.msk.bf16.mxu1 %vm339_vm1, %v8375_v0  ;;  %7423 = vmatpush3.bf16.msra.mxu1 %v2571_v25 }
  0xd2   : > { %7343 = vmatmul.mubr.msk.bf16.gmra.mxu0 %vm339_vm1, %v8222_v7  ;;  %v8538_v7 = vpack.c.bf16 %v1620_v58, %v1619_v45 }
  0xd3   : > { %7346 = vmatprep.mubr.msk.bf16.mxu0 %vm339_vm1, %v8224_v8  ;;  %v2865_v8 = vsel %vm624_vm0, %v6562_v40, 0 }
  0xd4   : > { %7361 = vmatmul.mubr.msk.bf16.gmra.mxu1 %vm339_vm1, %v8377_v6 }
  0xd5   : > { %7364 = vmatprep.mubr.msk.bf16.mxu1 %vm339_vm1, %v8391_v24 }
  0xda   : > { %7347 = vmatmul.mubr.msk.bf16.gmra.mxu0 %vm339_vm1, %v8247_v18 }
  0xdb   : > { %7350 = vmatprep.mubr.msk.bf16.mxu0 %vm339_vm1, %v8260_v26 }
  0xdc   : > { %7365 = vmatmul.mubr.msk.bf16.gmra.mxu1 %vm339_vm1, %v8393_v29 }
  0xdd   : > { %7368 = vmatprep.mubr.msk.bf16.mxu1 %vm339_vm1, %v8407_v41 }
  0xe2   : > { %7351 = vmatmul.mubr.msk.bf16.gmra.mxu0 %vm339_vm1, %v8538_v7 }
  0xe3   : > { %7390 = vmatprep.mubr.msk.bf16.mxu0 %vm339_vm1, %v8283_v47 }
  0xe4   : > { %7369 = vmatmul.mubr.msk.bf16.gmra.mxu1 %vm339_vm1, %v8409_v44 }
  0xe5   : > { %7372 = vmatprep.mubr.msk.bf16.mxu1 %vm339_vm1, %v8421_v57 }
  0xea   : > { %7391 = vmatmul.mubr.msk.bf16.vlgmr.msra.gmra.mxu0 %vm339_vm1, %v8298_v59  ;;  %v1913_v59 = vld [vmem:[#allocation2 + $0x209] sm:$0xff] }
  0xeb   : > { %7394 = vmatprep.mubr.msk.bf16.mxu0 %vm339_vm1, %v8300_v60  ;;  %7457 = vmatpush3.bf16.msra.mxu0 %v2865_v8  ;;  %v1914_v60 = vld [vmem:[#allocation2 + $0x211] sm:$0xff] }
  0xec   : > { %7373 = vmatmul.mubr.msk.bf16.gmra.mxu1 %vm339_vm1, %v8423_v61 }
  0xed   : > { %7376 = vmatprep.mubr.msk.bf16.mxu1 %vm339_vm1, %v8438_v19  ;;  %v2477_v19 = vld [vmem:[#allocation2 + $0x90] sm:$0xff] }
  0xf2   : > { %7395 = vmatmul.mubr.msk.bf16.gmra.mxu0 %vm339_vm1, %v8321_v17 }
  0xf3   : > { %7398 = vmatprep.mubr.msk.bf16.mxu0 %vm339_vm1, %v8325_v23 }
  0xf4   : > { %7377 = vmatmul.mubr.msk.bf16.gmra.mxu1 %vm339_vm1, %v8441_v16 }
  0xf5   : > { %7380 = vmatprep.mubr.msk.bf16.mxu1 %vm339_vm1, %v8451_v28 }
  0xfa   : > { %v7188_v18 = vpop.f32.mrf.mxu0  ;;  %7399 = vmatmul.mubr.msk.bf16.gmra.mxu0 %vm339_vm1, %v8339_v34 }
  0xfb   : > { %7402 = vmatprep.mubr.msk.bf16.mxu0 %vm339_vm1, %v8341_v35  ;;  %v8579_v35 = vpack.c.bf16 %v1914_v60, %v1913_v59 }
  0xfc   : > { %v8569_v26 = vpop.f32.mrf.mxu1  ;;  %7381 = vmatmul.mubr.msk.bf16.gmra.mxu1 %vm339_vm1, %v8453_v33  ;;  %v662_v47 = vpop.f32.mrf.mxu0 }
  0xfd   : > { %7384 = vmatprep.mubr.msk.bf16.mxu1 %vm339_vm1, %v8463_v38  ;;  %v2480_v38 = vld [vmem:[#allocation2 + $0xc8] sm:$0xff] }
  0xfe   : > { %v8575_v17 = vpop.f32.mrf.mxu1  ;;  %v7189_v23 = vpop.f32.mrf.mxu0  ;;  %v2508_v25 = vpack.c.bf16 %v2481_v39, %v2480_v38 }
 0x100   : > { %v8577_v34 = vpop.f32.mrf.mxu1  ;;  %v665_v51 = vpop.f32.mrf.mxu0 }
 0x102   : > { %v8581_v56 = vpop.f32.mrf.mxu1  ;;  %v7192_v10 = vpop.f32.mrf.mxu0  ;;  %7403 = vmatmul.mubr.msk.bf16.gmra.mxu0 %vm339_vm1, %v8354_v50 }
 0x103   : > { %7406 = vmatprep.mubr.msk.bf16.mxu0 %vm339_vm1, %v8358_v52  ;;  %v2506_v52 = vpack.c.bf16 %v2477_v19, %v2476_v15  ;;  %v2209_v15 = vld [vmem:[#allocation2 + $0x22f] sm:$0xff] }
 0x104   : > { %v8587_v61 = vpop.f32.mrf.mxu1  ;;  %7385 = vmatmul.mubr.msk.bf16.gmra.mxu1 %vm339_vm1, %v8579_v35  ;;  %v678_v62 = vpop.f32.mrf.mxu0 }
 0x105   : > { %7424 = vmatprep.mubr.msk.bf16.mxu1 %vm339_vm1, %v2504_v54 }
 0x106   : > { %v8592_v13 = vpop.f32.mrf.mxu1  ;;  %v7193_v46 = vpop.f32.mrf.mxu0 }
 0x108   : > { %v8594_v16 = vpop.f32.mrf.mxu1  ;;  %v681_v50 = vpop.f32.mrf.mxu0 }
 0x10a   : > { %v8596_v20 = vpop.f32.mrf.mxu1  ;;  %v7196_v21 = vpop.f32.mrf.mxu0  ;;  %7407 = vmatmul.mubr.msk.bf16.gmra.mxu0 %vm339_vm1, %v8379_v4 }
 0x10b   : > { %7410 = vmatprep.mubr.msk.bf16.mxu0 %vm339_vm1, %v8381_v11 }
 0x10c   : > { %v7222_v27 = vpop.f32.mrf.mxu1  ;;  %7425 = vmatmul.mubr.msk.bf16.vlgmr.msra.gmra.mxu1 %vm339_vm1, %v2505_v3  ;;  %v694_v28 = vpop.f32.mrf.mxu0 }
 0x10d   : > { %v8603_v33 = vadd.f32 %v7222_v27, %v7188_v18  ;;  %7428 = vmatprep.mubr.msk.bf16.mxu1 %vm339_vm1, %v2506_v52 }
 0x10e   : > { %v874_v36 = vpop.f32.mrf.mxu1  ;;  %v7197_v37 = vpop.f32.mrf.mxu0 }
 0x10f   : > { %v8606_v40 = vadd.f32 %v874_v36, %v662_v47 }
 0x110   : > { %v7223_v63 = vpop.f32.mrf.mxu1  ;;  %v697_v14 = vpop.f32.mrf.mxu0 }
 0x111   : > { %v8608_v4 = vadd.f32 %v7223_v63, %v7189_v23  ;;  %v2484_v23 = vld [vmem:[#allocation2 + $0x108] sm:$0xff] }
 0x112   : > { %v877_v11 = vpop.f32.mrf.mxu1  ;;  %v7200_v45 = vpop.f32.mrf.mxu0  ;;  %7411 = vmatmul.mubr.msk.bf16.gmra.mxu0 %vm339_vm1, %v8395_v30 }
 0x113   : > { %v8612_v58 = vadd.f32 %v877_v11, %v665_v51  ;;  %7414 = vmatprep.mubr.msk.bf16.mxu0 %vm339_vm1, %v8397_v31  ;;  %v2510_v31 = vpack.c.bf16 %v2485_v43, %v2484_v23  ;;  %v2492_v11 = vld [vmem:[#allocation2 + $0x188] sm:$0xff] }
 0x114   : > { %v7226_v8 = vpop.f32.mrf.mxu1  ;;  %7429 = vmatmul.mubr.msk.bf16.gmra.mxu1 %vm339_vm1, %v8273_v42  ;;  %v710_v18 = vpop.f32.mrf.mxu0 }
 0x115   : > { %v8618_v47 = vadd.f32 %v7226_v8, %v7192_v10  ;;  %7432 = vmatprep.mubr.msk.bf16.mxu1 %vm339_vm1, %v2508_v25  ;;  %v2208_v10 = vld [vmem:[#allocation2 + $0x227] sm:$0xff]  ;;  %v2493_v8 = vld [vmem:[#allocation2 + $0x190] sm:$0xff] }
 0x116   : > { %v890_v59 = vpop.f32.mrf.mxu1  ;;  %v7201_v60 = vpop.f32.mrf.mxu0  ;;  %v2225_v27 = vpack.c.bf16 %v2209_v15, %v2208_v10  ;;  %v2514_v43 = vpack.c.bf16 %v2493_v8, %v2492_v11  ;;  %v2496_v15 = vld [vmem:[#allocation2 + $0x1c8] sm:$0xff] }
 0x117   : > { %v8621_v53 = vadd.f32 %v890_v59, %v678_v62  ;;  %v2498_v8 = vld [vmem:[#allocation2 + $0x1e8] sm:$0xff] }
 0x118   : > { %v7227_v30 = vpop.f32.mrf.mxu1  ;;  %v713_v51 = vpop.f32.mrf.mxu0 }
 0x119   : > { %v8623_v54 = vadd.f32 %v7227_v30, %v7193_v46 }
 0x11a   : > { %v893_v1 = vpop.f32.mrf.mxu1  ;;  %v7204_v5 = vpop.f32.mrf.mxu0  ;;  %7415 = vmatmul.mubr.msk.bf16.gmra.mxu0 %vm339_vm1, %v8411_v48 }
 0x11b   : > { %v8627_v42 = vadd.f32 %v893_v1, %v681_v50  ;;  %7418 = vmatprep.mubr.msk.bf16.mxu0 %vm339_vm1, %v8503_v22 }
 0x11c   : > { %v7230_v19 = vpop.f32.mrf.mxu1  ;;  %7433 = vmatmul.mubr.msk.bf16.gmra.mxu1 %vm339_vm1, %v8294_v55  ;;  %v726_v62 = vpop.f32.mrf.mxu0 }
 0x11d   : > { %v8633_v46 = vadd.f32 %v7230_v19, %v7196_v21  ;;  %7436 = vmatprep.mubr.msk.bf16.mxu1 %vm339_vm1, %v2510_v31  ;;  %v2497_v19 = vld [vmem:[#allocation2 + $0x1d0] sm:$0xff] }
 0x11e   : > { %v906_v3 = vpop.f32.mrf.mxu1  ;;  %v7205_v52 = vpop.f32.mrf.mxu0 }
 0x11f   : > { %v8636_v48 = vadd.f32 %v906_v3, %v694_v28 }
 0x120   : > { %v7231_v50 = vpop.f32.mrf.mxu1  ;;  %v8638_v36 = vpop.f32.mrf.mxu0 }
 0x121   : > { %v8640_v22 = vadd.f32 %v7231_v50, %v7197_v37 }
 0x122   : > { %v909_v38 = vpop.f32.mrf.mxu1  ;;  %v7208_v39 = vpop.f32.mrf.mxu0  ;;  %7419 = vmatmul.mubr.msk.bf16.gmra.mxu0 %vm339_vm1, %v2225_v27 }
 0x123   : > { %v8643_v55 = vadd.f32 %v909_v38, %v697_v14  ;;  %7458 = vmatprep.mubr.msk.bf16.mxu0 %vm339_vm1, %v8352_v49  ;;  %v2516_v38 = vpack.c.bf16 %v2497_v19, %v2496_v15 }
 0x124   : > { %v7234_v21 = vpop.f32.mrf.mxu1  ;;  %7437 = vmatmul.mubr.msk.bf16.gmra.mxu1 %vm339_vm1, %v8310_v9  ;;  %v742_v28 = vpop.f32.mrf.mxu0 }
 0x125   : > { %v8649_v63 = vadd.f32 %v7234_v21, %v7200_v45  ;;  %7440 = vmatprep.mubr.msk.bf16.mxu1 %vm339_vm1, %v8312_v12 }
 0x126   : > { %v922_v37 = vpop.f32.mrf.mxu1  ;;  %v7209_v25 = vpop.f32.mrf.mxu0 }
 0x127   : > { %v8653_v59 = vadd.f32 %v922_v37, %v710_v18 }
 0x128   : > { %v7235_v14 = vpop.f32.mrf.mxu1  ;;  %v8655_v23 = vpop.f32.mrf.mxu0 }
 0x129   : > { %v8657_v49 = vadd.f32 %v7235_v14, %v7201_v60  ;;  %v2499_v14 = vld [vmem:[#allocation2 + $0x1f0] sm:$0xff] }
 0x12a   : > { %v925_v30 = vpop.f32.mrf.mxu1  ;;  %v7256_v9 = vpop.f32.mrf.mxu0  ;;  %7459 = vmatmul.mubr.msk.bf16.vlgmr.msra.gmra.mxu0 %vm339_vm1, %v8375_v0  ;;  %v2494_v0 = vld [vmem:[#allocation2 + $0x1a8] sm:$0xff] }
 0x12b   : > { %v8661_v45 = vadd.f32 %v925_v30, %v713_v51  ;;  %v8664_v12 = vadd.f32 %v7256_v9, %v8603_v33  ;;  %7462 = vmatprep.mubr.msk.bf16.mxu0 %vm339_vm1, %v8377_v6  ;;  %v2495_v51 = vld [vmem:[#allocation2 + $0x1b0] sm:$0xff] }
 0x12c   : > { %v7238_v18 = vpop.f32.mrf.mxu1  ;;  %7441 = vmatmul.mubr.msk.bf16.gmra.mxu1 %vm339_vm1, %v8337_v32  ;;  %v1136_v60 = vpop.f32.mrf.mxu0 }
 0x12d   : > { %v8670_v31 = vadd.f32 %v7238_v18, %v7204_v5  ;;  %v8673_v1 = vadd.f32 %v1136_v60, %v8606_v40  ;;  %7444 = vmatprep.mubr.msk.bf16.mxu1 %vm339_vm1, %v2514_v43  ;;  %v2515_v5 = vpack.c.bf16 %v2495_v51, %v2494_v0  ;;  %v2517_v18 = vpack.c.bf16 %v2499_v14, %v2498_v8  ;;  %v2782_v51 = vld [vmem:[#allocation2 + $0x149] sm:$0xff] }
 0x12e   : > { %v938_v10 = vpop.f32.mrf.mxu1  ;;  %v7257_v33 = vpop.f32.mrf.mxu0  ;;  %v2786_v14 = vld [vmem:[#allocation2 + $0x189] sm:$0xff] }
 0x12f   : > { %v8676_v3 = vadd.f32 %v938_v10, %v726_v62  ;;  %v8679_v6 = vadd.f32 %v7257_v33, %v8608_v4  ;;  %v2783_v10 = vld [vmem:[#allocation2 + $0x151] sm:$0xff] }
 0x130   : > { %v7239_v32 = vpop.f32.mrf.mxu1  ;;  %v1139_v27 = vpop.f32.mrf.mxu0 }
 0x131   : > { %v8681_v50 = vadd.f32 %v7239_v32, %v7205_v52  ;;  %v8684_v40 = vadd.f32 %v1139_v27, %v8612_v58  ;;  %v2806_v27 = vpack.c.bf16 %v2783_v10, %v2782_v51 }
 0x132   : > { %v8686_v21 = vpop.f32.mrf.mxu1  ;;  %v7260_v37 = vpop.f32.mrf.mxu0  ;;  %7463 = vmatmul.mubr.msk.bf16.gmra.mxu0 %vm339_vm1, %v8391_v24 }
 0x133   : > { %v8691_v62 = vadd.f32 %v7260_v37, %v8618_v47  ;;  %7466 = vmatprep.mubr.msk.bf16.mxu0 %vm339_vm1, %v8393_v29 }
 0x134   : > { %v7242_v4 = vpop.f32.mrf.mxu1  ;;  %7445 = vmatmul.mubr.msk.bf16.gmra.mxu1 %vm339_vm1, %v2515_v5  ;;  %v1152_v52 = vpop.f32.mrf.mxu0 }
 0x135   : > { %v8696_v11 = vadd.f32 %v7242_v4, %v7208_v39  ;;  %v8699_v58 = vadd.f32 %v1152_v52, %v8621_v53  ;;  %7448 = vmatprep.mubr.msk.bf16.mxu1 %vm339_vm1, %v2516_v38  ;;  %v2785_v52 = vld [vmem:[#allocation2 + $0x171] sm:$0xff] }
 0x136   : > { %v954_v24 = vpop.f32.mrf.mxu1  ;;  %v7261_v43 = vpop.f32.mrf.mxu0 }
 0x137   : > { %v8702_v47 = vadd.f32 %v954_v24, %v742_v28  ;;  %v8705_v30 = vadd.f32 %v7261_v43, %v8623_v54 }
 0x138   : > { %v7243_v29 = vpop.f32.mrf.mxu1  ;;  %v1155_v9 = vpop.f32.mrf.mxu0 }
 0x139   : > { %v8707_v60 = vadd.f32 %v7243_v29, %v7209_v25  ;;  %v8710_v39 = vadd.f32 %v1155_v9, %v8627_v42 }
 0x13a   : > { %v8712_v53 = vpop.f32.mrf.mxu1  ;;  %v7264_v0 = vpop.f32.mrf.mxu0  ;;  %7467 = vmatmul.mubr.msk.bf16.gmra.mxu0 %vm339_vm1, %v8407_v41  ;;  %v2502_v41 = vld [vmem:[#allocation2 + $0x228] sm:$0xff] }
 0x13b   : > { %v8717_v28 = vadd.f32 %v7264_v0, %v8633_v46  ;;  %7470 = vmatprep.mubr.msk.bf16.mxu0 %vm339_vm1, %v8409_v44  ;;  %v2503_v46 = vld [vmem:[#allocation2 + $0x230] sm:$0xff] }
 0x13c   : > { %v7246_v54 = vpop.f32.mrf.mxu1  ;;  %7449 = vmatmul.mubr.msk.bf16.gmra.mxu1 %vm339_vm1, %v2517_v18  ;;  %v1168_v25 = vpop.f32.mrf.mxu0  ;;  %v2519_v38 = vpack.c.bf16 %v2503_v46, %v2502_v41  ;;  %v2789_v41 = vld [vmem:[#allocation2 + $0x1b1] sm:$0xff] }
 0x13d   : > { %v8723_v42 = vadd.f32 %v7246_v54, %v8569_v26  ;;  %v8726_v33 = vadd.f32 %v1168_v25, %v8636_v48  ;;  %7452 = vmatprep.mubr.msk.bf16.mxu1 %vm339_vm1, %v8538_v7 }
 0x13e   : > { %v970_v15 = vpop.f32.mrf.mxu1  ;;  %v7265_v19 = vpop.f32.mrf.mxu0 }
 0x13f   : > { %v8731_v44 = vadd.f32 %v970_v15, %v8575_v17  ;;  %v8734_v32 = vadd.f32 %v7265_v19, %v8640_v22  ;;  %v2784_v22 = vld [vmem:[#allocation2 + $0x169] sm:$0xff] }
 0x140   : > { %v7247_v5 = vpop.f32.mrf.mxu1  ;;  %v1171_v26 = vpop.f32.mrf.mxu0  ;;  %v2790_v19 = vld [vmem:[#allocation2 + $0x1c9] sm:$0xff] }
 0x141   : > { %v8737_v48 = vadd.f32 %v7247_v5, %v8577_v34  ;;  %v8740_v37 = vadd.f32 %v1171_v26, %v8643_v55  ;;  %v2787_v55 = vld [vmem:[#allocation2 + $0x191] sm:$0xff] }
 0x142   : > { %v8742_v7 = vpop.f32.mrf.mxu1  ;;  %v7268_v4 = vpop.f32.mrf.mxu0  ;;  %7471 = vmatmul.mubr.msk.bf16.gmra.mxu0 %vm339_vm1, %v8421_v57  ;;  %v2808_v0 = vpack.c.bf16 %v2787_v55, %v2786_v14 }
 0x143   : > { %v8747_v17 = vadd.f32 %v7268_v4, %v8649_v63  ;;  %7474 = vmatprep.mubr.msk.bf16.mxu0 %vm339_vm1, %v2806_v27  ;;  %v2807_v63 = vpack.c.bf16 %v2785_v52, %v2784_v22 }
 0x144   : > { %v7250_v8 = vpop.f32.mrf.mxu1  ;;  %7453 = vmatmul.mubr.msk.bf16.gmra.mxu1 %vm339_vm1, %v2519_v38  ;;  %v1184_v34 = vpop.f32.mrf.mxu0 }
 0x145   : > { %v8752_v24 = vadd.f32 %v7250_v8, %v8587_v61  ;;  %v8755_v43 = vadd.f32 %v1184_v34, %v8653_v59 }
 0x146   : > { %v986_v57 = vpop.f32.mrf.mxu1  ;;  %v7269_v29 = vpop.f32.mrf.mxu0 }
 0x147   : > { %v8758_v9 = vadd.f32 %v986_v57, %v8592_v13  ;;  %v8761_v18 = vadd.f32 %v7269_v29, %v8657_v49  ;;  %v2788_v49 = vld [vmem:[#allocation2 + $0x1a9] sm:$0xff] }
 0x148   : > { %v7251_v54 = vpop.f32.mrf.mxu1  ;;  %v1187_v25 = vpop.f32.mrf.mxu0  ;;  %v2809_v38 = vpack.c.bf16 %v2789_v41, %v2788_v49 }
 0x149   : > { %v8764_v51 = vadd.f32 %v7251_v54, %v8594_v16  ;;  %v8767_v61 = vadd.f32 %v1187_v25, %v8661_v45  ;;  %v2791_v16 = vld [vmem:[#allocation2 + $0x1d1] sm:$0xff] }
 0x14a   : > { %v8769_v59 = vpop.f32.mrf.mxu1  ;;  %v7272_v10 = vpop.f32.mrf.mxu0  ;;  %7475 = vmatmul.mubr.msk.bf16.gmra.mxu0 %vm339_vm1, %v2807_v63  ;;  %v2810_v22 = vpack.c.bf16 %v2791_v16, %v2790_v19 }
 0x14b   : > { %10653 = vst [vmem:[#allocation4_spill] sm:$0xff] %v8767_v61  ;;  %v8773_v13 = vadd.f32 %v7272_v10, %v8670_v31  ;;  %7478 = vmatprep.mubr.msk.bf16.mxu0 %vm339_vm1, %v2808_v0 }
 0x14c   : > { %v7290_v46 = vpop.f32.mrf.mxu1  ;;  %v1200_v15 = vpop.f32.mrf.mxu0 }
 0x14d   : > { %v8777_v27 = vadd.f32 %v7290_v46, %v8664_v12  ;;  %v8780_v45 = vadd.f32 %v1200_v15, %v8676_v3 }
 0x14e   : > { %v1430_v5 = vpop.f32.mrf.mxu1  ;;  %v7273_v26 = vpop.f32.mrf.mxu0 }
 0x14f   : > { %v8783_v31 = vadd.f32 %v1430_v5, %v8673_v1  ;;  %v8786_v4 = vadd.f32 %v7273_v26, %v8681_v50  ;;  %v2792_v1 = vld [vmem:[#allocation2 + $0x1e9] sm:$0xff]  ;;  %v2793_v50 = vld [vmem:[#allocation2 + $0x1f1] sm:$0xff] }
 0x150   : > { %v7291_v52 = vpop.f32.mrf.mxu1  ;;  %v8788_v8 = vpop.f32.mrf.mxu0  ;;  %v2811_v54 = vpack.c.bf16 %v2793_v50, %v2792_v1 }
 0x151   : > { %v8791_v34 = vadd.f32 %v7291_v52, %v8679_v6 }
 0x152   : > { %v8793_v12 = vpop.f32.mrf.mxu1  ;;  %v7276_v3 = vpop.f32.mrf.mxu0  ;;  %7479 = vmatmul.mubr.msk.bf16.gmra.mxu0 %vm339_vm1, %v2809_v38 }
 0x153   : > { %v8797_v14 = vadd.f32 %v7276_v3, %v8696_v11  ;;  %7482 = vmatprep.mubr.msk.bf16.mxu0 %vm339_vm1, %v2810_v22 }
 0x154   : > { %v7294_v55 = vpop.f32.mrf.mxu1  ;;  %v1216_v57 = vpop.f32.mrf.mxu0 }
 0x155   : > { %v8801_v29 = vadd.f32 %v7294_v55, %v8691_v62  ;;  %v8804_v6 = vadd.f32 %v1216_v57, %v8702_v47  ;;  %v7871_v57 = vld [vmem:[%s10646_s5 + $0x8] sm:$0xff]  }
 0x156   : > { %v1446_v63 = vpop.f32.mrf.mxu1  ;;  %v7277_v0 = vpop.f32.mrf.mxu0  ;;  %7526 = vmatprep.subr.bf16.mxu0 %v7871_v57 }
 0x157   : > { %v8807_v25 = vadd.f32 %v1446_v63, %v8699_v58  ;;  %v8810_v11 = vadd.f32 %v7277_v0, %v8707_v60  ;;  %v2796_v58 = vld [vmem:[#allocation2 + $0x229] sm:$0xff]  ;;  %v2797_v60 = vld [vmem:[#allocation2 + $0x231] sm:$0xff]  ;;  %7527 = vmatpush3.bf16.msra.mxu0 %v7871_v57 }
 0x158   : > { %v7295_v10 = vpop.f32.mrf.mxu1  ;;  %v8812_v49 = vpop.f32.mrf.mxu0  ;;  %v2813_v38 = vpack.c.bf16 %v2797_v60, %v2796_v58 }
 0x159   : > { %10654 = vst [vmem:[#allocation5_spill] sm:$0xff] %v8812_v49  ;;  %v8815_v41 = vadd.f32 %v7295_v10, %v8705_v30 }
 0x15a   : > { %v8817_v62 = vpop.f32.mrf.mxu1  ;;  %v7280_v46 = vpop.f32.mrf.mxu0  ;;  %7483 = vmatmul.mubr.msk.bf16.gmra.mxu0 %vm339_vm1, %v2811_v54 }
 0x15b   : > { %v8821_v47 = vadd.f32 %v7280_v46, %v8723_v42  ;;  %7486 = vmatprep.mubr.msk.bf16.mxu0 %vm339_vm1, %v8579_v35 }
 0x15c   : > { %v7298_v15 = vpop.f32.mrf.mxu1  ;;  %v1232_v19 = vpop.f32.mrf.mxu0 }
 0x15d   : > { %v8826_v16 = vadd.f32 %v7298_v15, %v8717_v28  ;;  %v8829_v30 = vadd.f32 %v1232_v19, %v8731_v44 }
 0x15e   : > { %v1462_v5 = vpop.f32.mrf.mxu1  ;;  %v7281_v26 = vpop.f32.mrf.mxu0 }
 0x15f   : > { %v8832_v22 = vadd.f32 %v1462_v5, %v8726_v33  ;;  %v8835_v42 = vadd.f32 %v7281_v26, %v8737_v48  ;;  %v7870_v33 = vld [vmem:[%s10646_s5 + $0x18] sm:$0xff]  }
 0x160   : > { %v7299_v35 = vpop.f32.mrf.mxu1  ;;  %v8837_v52 = vpop.f32.mrf.mxu0  ;;  %7490 = vmatprep.subr.bf16.mxu1 %v7870_v33 }
 0x161   : > { %10655 = vst [vmem:[#allocation6_spill] sm:$0xff] %v8837_v52  ;;  %v8840_v3 = vadd.f32 %v7299_v35, %v8734_v32  ;;  %7491 = vmatpush3.bf16.msra.mxu1 %v7870_v33 }
 0x162   : > { %v8842_v28 = vpop.f32.mrf.mxu1  ;;  %v7284_v1 = vpop.f32.mrf.mxu0  ;;  %7487 = vmatmul.mubr.msk.bf16.gmra.mxu0 %vm339_vm1, %v2813_v38 }
 0x163   : > { %v8846_v44 = vadd.f32 %v7284_v1, %v8752_v24 }
 0x164   : > { %v7302_v48 = vpop.f32.mrf.mxu1  ;;  %v1248_v50 = vpop.f32.mrf.mxu0 }
 0x165   : > { %v8852_v55 = vadd.f32 %v7302_v48, %v8747_v17  ;;  %v8855_v32 = vadd.f32 %v1248_v50, %v8758_v9 }
 0x166   : > { %v1478_v63 = vpop.f32.mrf.mxu1  ;;  %v7285_v24 = vpop.f32.mrf.mxu0 }
 0x167   : > { %v8861_v0 = vadd.f32 %v1478_v63, %v8755_v43  ;;  %v8864_v54 = vadd.f32 %v7285_v24, %v8764_v51 }
 0x168   : > { %v7303_v17 = vpop.f32.mrf.mxu1  ;;  %v8866_v10 = vpop.f32.mrf.mxu0 }
 0x169   : > { %10656 = vst [vmem:[#allocation7_spill] sm:$0xff] %v8866_v10  ;;  %v8869_v9 = vadd.f32 %v7303_v17, %v8761_v18 }
 0x16a   : > { %v8871_v46 = vpop.f32.mrf.mxu1  ;;  %v7324_v58 = vpop.f32.mrf.mxu0 }
 0x16b   : > { %10657 = vst [vmem:[#allocation8_spill] sm:$0xff] %v8871_v46  ;;  %v8874_v60 = vadd.f32 %v7324_v58, %v8777_v27 }
 0x16c   : > { %v7306_v15 = vpop.f32.mrf.mxu1  ;;  %v1724_v43 = vpop.f32.mrf.mxu0 }
 0x16d   : > { %v8877_v19 = vadd.f32 %v7306_v15, %v8773_v13  ;;  %v8880_v51 = vadd.f32 %v1724_v43, %v8783_v31 }
 0x16e   : > { %v1494_v5 = vpop.f32.mrf.mxu1  ;;  %v7325_v26 = vpop.f32.mrf.mxu0 }
 0x16f   : > { %v8883_v38 = vadd.f32 %v1494_v5, %v8780_v45  ;;  %v8886_v18 = vadd.f32 %v7325_v26, %v8791_v34 }
 0x170   : > { %v8888_v35 = vpop.f32.mrf.mxu1  ;;  %v8890_v27 = vpop.f32.mrf.mxu0 }
 0x171   : > { %v9038_v13 = vadd.f32 %v8888_v35, %v8786_v4 }
 0x172   : > { %v9040_v45 = vpop.f32.mrf.mxu1  ;;  %v7328_v31 = vpop.f32.mrf.mxu0 }
 0x173   : > { %10658 = vst [vmem:[#allocation9_spill] sm:$0xff] %v9040_v45  ;;  %v9043_v34 = vadd.f32 %v7328_v31, %v8801_v29  ;;  %v3290_v31 = vld [vmem:[#allocation3 + $0x10] sm:$0xff] }
 0x174   : > { %v7310_v1 = vpop.f32.mrf.mxu1  ;;  %v1740_v33 = vpop.f32.mrf.mxu0 }
 0x175   : > { %v9046_v48 = vadd.f32 %v7310_v1, %v8797_v14  ;;  %v9049_v50 = vadd.f32 %v1740_v33, %v8807_v25  ;;  %v3237_v1 = vld [vmem:[#allocation3 + $0x7] sm:$0xff] }
 0x176   : > { %v1510_v57 = vpop.f32.mrf.mxu1  ;;  %v7329_v2 = vpop.f32.mrf.mxu0 }
 0x177   : > { %v9052_v63 = vadd.f32 %v1510_v57, %v8804_v6  ;;  %v9055_v4 = vadd.f32 %v7329_v2, %v8815_v41  ;;  %v7872_v6 = vld [vmem:[%s10646_s5 + $0x10] sm:$0xff]   ;;  %v7873_v41 = vld [vmem:[%s10646_s5] sm:$0xff]  }
 0x178   : > { %v7311_v24 = vpop.f32.mrf.mxu1  ;;  %v9057_v17 = vpop.f32.mrf.mxu0  ;;  %7492 = vmatprep.subr.bf16.mxu1 %v7872_v6  ;;  %7528 = vmatprep.subr.bf16.mxu0 %v7873_v41 }
 0x179   : > { %v1580_v29 = vadd.f32 %v7311_v24, %v8810_v11  ;;  %7493 = vmatpush3.bf16.msra.mxu1 %v7872_v6  ;;  %7529 = vmatpush3.bf16.msra.mxu0 %v7873_v41  ;;  %v3238_v24 = vld [vmem:[#allocation3 + $0xf] sm:$0xff] }
 0x17a   : > { %v9060_v58 = vpop.f32.mrf.mxu1  ;;  %v7332_v14 = vpop.f32.mrf.mxu0 }
 0x17b   : > { %10659 = vst [vmem:[#allocation10_spill] sm:$0xff] %v9060_v58  ;;  %v9063_v15 = vadd.f32 %v7332_v14, %v8826_v16  ;;  %v3289_v16 = vld [vmem:[#allocation3 + $0x8] sm:$0xff] }
 0x17c   : > { %v7314_v25 = vpop.f32.mrf.mxu1  ;;  %v1756_v43 = vpop.f32.mrf.mxu0  ;;  %v3321_v2 = vpack.c.bf16 %v3290_v31, %v3289_v16 }
 0x17d   : > { %v1583_v5 = vadd.f32 %v7314_v25, %v8821_v47  ;;  %v9073_v11 = vadd.f32 %v1756_v43, %v8832_v22  ;;  %v3269_v22 = vpack.c.bf16 %v3238_v24, %v3237_v1 }
 0x17e   : > { %v1526_v26 = vpop.f32.mrf.mxu1  ;;  %v7333_v35 = vpop.f32.mrf.mxu0  ;;  %7494 = vmatprep.mubr.msk.bf16.mxu1 %vm3131_vm2, %v3321_v2 }
 0x17f   : > { %v1581_v33 = vadd.f32 %v1526_v26, %v8829_v30  ;;  %v9077_v57 = vadd.f32 %v7333_v35, %v8840_v3  ;;  %7530 = vmatprep.mubr.msk.bf16.mxu0 %vm3131_vm2, %v3269_v22 }
 0x180   : > { %v7315_v47 = vpop.f32.mrf.mxu1  ;;  %v9079_v14 = vpop.f32.mrf.mxu0 }
 0x181   : > { %10660 = vst [vmem:[#allocation11_spill] sm:$0xff] %v9077_v57  ;;  %v1584_v25 = vadd.f32 %v7315_v47, %v8835_v42 }
 0x182   : > { %v9083_v43 = vpop.f32.mrf.mxu1  ;;  %v7336_v10 = vpop.f32.mrf.mxu0 }
 0x183   : > { %10661 = vst [vmem:[#allocation12_spill] sm:$0xff] %v9083_v43  ;;  %v9087_v30 = vadd.f32 %v7336_v10, %v8852_v55 }
 0x184   : > { %v7318_v3 = vpop.f32.mrf.mxu1  ;;  %v1772_v6 = vpop.f32.mrf.mxu0 }
 0x185   : > { %10662 = vst [vmem:[#allocation13_spill] sm:$0xff] %v9087_v30  ;;  %v1587_v41 = vadd.f32 %v7318_v3, %v8846_v44  ;;  %v9091_v26 = vadd.f32 %v1772_v6, %v8861_v0 }
 0x186   : > { %v1542_v35 = vpop.f32.mrf.mxu1  ;;  %v7337_v16 = vpop.f32.mrf.mxu0 }
 0x187   : > { %10663 = vst [vmem:[#allocation14_spill] sm:$0xff] %v9091_v26  ;;  %v1585_v42 = vadd.f32 %v1542_v35, %v8855_v32  ;;  %v9095_v31 = vadd.f32 %v7337_v16, %v8869_v9 }
 0x188   : > { %v7319_v1 = vpop.f32.mrf.mxu1  ;;  %v9097_v2 = vpop.f32.mrf.mxu0 }
 0x189   : > { %10664 = vst [vmem:[#allocation15_spill] sm:$0xff] %v9095_v31  ;;  %10665 = vst [vmem:[#allocation16_spill] sm:$0xff] %v9097_v2  ;;  %v1588_v55 = vadd.f32 %v7319_v1, %v8864_v54 }
 0x18a   : > { %v9100_v10 = vpop.f32.mrf.mxu1  ;;  %v7340_v24 = vpop.f32.mrf.mxu0 }
 0x18b   : > { %10666 = vst [vmem:[#allocation17_spill] sm:$0xff] %v9100_v10  ;;  %v9103_v44 = vadd.f32 %v7340_v24, %v8877_v19 }
 0x18c   : > { %v9105_v0 = vpop.f32.mrf.mxu1  ;;  %v1788_v47 = vpop.f32.mrf.mxu0 }
 0x18d   : > { %10667 = vst [vmem:[#allocation18_spill] sm:$0xff] %v9103_v44  ;;  %v9108_v22 = vadd.f32 %v1788_v47, %v8883_v38 }
 0x18e   : > { %v9110_v32 = vpop.f32.mrf.mxu1  ;;  %v7341_v9 = vpop.f32.mrf.mxu0 }
 0x18f   : > { %10668 = vst [vmem:[#allocation19_spill] sm:$0xff] %v9108_v22  ;;  %v9113_v3 = vadd.f32 %v7341_v9, %v9038_v13 }
 0x190   : > { %v9115_v6 = vpop.f32.mrf.mxu1  ;;  %v9117_v54 = vpop.f32.mrf.mxu0 }
 0x191   : > { %10669 = vst [vmem:[#allocation20_spill] sm:$0xff] %v9113_v3  ;;  %10670 = vst [vmem:[#allocation21_spill] sm:$0xff] %v9117_v54 }
 0x192   : > { %v9119_v35 = vpop.f32.mrf.mxu1  ;;  %v7344_v19 = vpop.f32.mrf.mxu0 }
 0x193   : > { %v9122_v16 = vadd.f32 %v7344_v19, %v9046_v48 }
 0x194   : > { %v9124_v1 = vpop.f32.mrf.mxu1  ;;  %v1804_v38 = vpop.f32.mrf.mxu0 }
 0x195   : > { %10671 = vst [vmem:[#allocation22_spill] sm:$0xff] %v9122_v16  ;;  %v9127_v24 = vadd.f32 %v1804_v38, %v9052_v63 }
 0x196   : > { %v9129_v47 = vpop.f32.mrf.mxu1  ;;  %v7345_v13 = vpop.f32.mrf.mxu0 }
 0x197   : > { %10672 = vst [vmem:[#allocation23_spill] sm:$0xff] %v9127_v24  ;;  %v9131_v9 = vadd.f32 %v7345_v13, %v1580_v29 }
 0x198   : > { %v9133_v10 = vpop.f32.mrf.mxu1  ;;  %v9135_v43 = vpop.f32.mrf.mxu0 }
 0x199   : > { %10673 = vst [vmem:[#allocation24_spill] sm:$0xff] %v9131_v9  ;;  %10674 = vst [vmem:[#allocation25_spill] sm:$0xff] %v9135_v43 }
 0x19a   : > { %v9137_v52 = vpop.f32.mrf.mxu1  ;;  %v7348_v58 = vpop.f32.mrf.mxu0 }
 0x19b   : > { %v9139_v48 = vadd.f32 %v7348_v58, %v1583_v5 }
 0x19c   : > { %v9141_v19 = vpop.f32.mrf.mxu1  ;;  %v1820_v16 = vpop.f32.mrf.mxu0 }
 0x19d   : > { %10675 = vst [vmem:[#allocation26_spill] sm:$0xff] %v9139_v48  ;;  %v9143_v3 = vadd.f32 %v1820_v16, %v1581_v33 }
 0x19e   : > { %v9145_v63 = vpop.f32.mrf.mxu1  ;;  %v7349_v38 = vpop.f32.mrf.mxu0 }
 0x19f   : > { %10676 = vst [vmem:[#allocation27_spill] sm:$0xff] %v9143_v3  ;;  %v9147_v24 = vadd.f32 %v7349_v38, %v1584_v25  ;;  %v9168_v25 = vld [vmem:[%s10646_s5 + $0x28] sm:$0xff]  }
 0x1a0   : > { %v9149_v29 = vpop.f32.mrf.mxu1  ;;  %v9151_v13 = vpop.f32.mrf.mxu0  ;;  %10686 = vst [vmem:[#allocation37_spill] sm:$0xff] %v9168_v25  ;;  %7562 = vmatprep.subr.bf16.mxu1 %v9168_v25 }
 0x1a1   : > { %10677 = vst [vmem:[#allocation28_spill] sm:$0xff] %v9147_v24  ;;  %10678 = vst [vmem:[#allocation29_spill] sm:$0xff] %v9149_v29 }
 0x1a2   : > { %10679 = vst [vmem:[#allocation30_spill] sm:$0xff] %v9151_v13  ;;  %v9153_v9 = vpop.f32.mrf.mxu1  ;;  %v7352_v43 = vpop.f32.mrf.mxu0 }
 0x1a3   : > { %10680 = vst [vmem:[#allocation31_spill] sm:$0xff] %v9153_v9  ;;  %v9155_v54 = vadd.f32 %v7352_v43, %v1587_v41  ;;  %v9178_v43 = vld [vmem:[%s10646_s5 + $0x38] sm:$0xff]  }
 0x1a4   : > { %v9157_v58 = vpop.f32.mrf.mxu1  ;;  %v1836_v5 = vpop.f32.mrf.mxu0  ;;  %10689 = vst [vmem:[#allocation40_spill] sm:$0xff] %v9178_v43  ;;  %7598 = vmatprep.subr.bf16.mxu0 %v9178_v43 }
 0x1a5   : > { %10681 = vst [vmem:[#allocation32_spill] sm:$0xff] %v9155_v54  ;;  %10682 = vst [vmem:[#allocation33_spill] sm:$0xff] %v9157_v58  ;;  %v9159_v48 = vadd.f32 %v1836_v5, %v1585_v42 }
 0x1a6   : > { %v9161_v33 = vpop.f32.mrf.mxu1  ;;  %v7353_v16 = vpop.f32.mrf.mxu0 }
 0x1a7   : > { %10683 = vst [vmem:[#allocation34_spill] sm:$0xff] %v9159_v48  ;;  %10684 = vst [vmem:[#allocation35_spill] sm:$0xff] %v9161_v33  ;;  %v9163_v3 = vadd.f32 %v7353_v16, %v1588_v55 }
 0x1a8   : > { %v9170_v38 = vpop.f32.mrf.mxu1  ;;  %v9172_v24 = vpop.f32.mrf.mxu0 }
 0x1a9   : > { %10685 = vst [vmem:[#allocation36_spill] sm:$0xff] %v9163_v3  ;;  %10687 = vst [vmem:[#allocation38_spill] sm:$0xff] %v9170_v38 }
 0x1aa   : > { %10688 = vst [vmem:[#allocation39_spill] sm:$0xff] %v9172_v24  ;;  %v9180_v41 = vpop.f32.mrf.mxu1  ;;  %v9182_v42 = vpop.f32.mrf.mxu0 }
 0x1ab   : > { %10690 = vst [vmem:[#allocation41_spill] sm:$0xff] %v9180_v41 }
 0x1ac   : > { %v9185_v55 = vpop.f32.mrf.mxu1  ;;  %v9187_v5 = vpop.f32.mrf.mxu0 }
 0x1ad   : > { %10691 = vst [vmem:[#allocation42_spill] sm:$0xff] %v9185_v55 }
 0x1ae   : > { %v9189_v16 = vpop.f32.mrf.mxu1  ;;  %v9191_v3 = vpop.f32.mrf.mxu0 }
 0x1af   : > { %10692 = vst [vmem:[#allocation43_spill] sm:$0xff] %v9189_v16 }
 0x1b0   : > { %v9193_v48 = vpop.f32.mrf.mxu1  ;;  %v9195_v54 = vpop.f32.mrf.mxu0 }
 0x1b1   : > { %10693 = vst [vmem:[#allocation44_spill] sm:$0xff] %v9193_v48 }
 0x1b2   : > { %v9197_v24 = vpop.f32.mrf.mxu1  ;;  %v9199_v13 = vpop.f32.mrf.mxu0 }
 0x1b3   : > { %10694 = vst [vmem:[#allocation45_spill] sm:$0xff] %v9197_v24 }
 0x1b4   : > { %v9201_v25 = vpop.f32.mrf.mxu1  ;;  %v9203_v22 = vpop.f32.mrf.mxu0 }
 0x1b5   : > { %10695 = vst [vmem:[#allocation46_spill] sm:$0xff] %v9201_v25 }
 0x1b6   : > { %v9205_v43 = vpop.f32.mrf.mxu1  ;;  %v9207_v55 = vpop.f32.mrf.mxu0 }
 0x1b7   : > { %10696 = vst [vmem:[#allocation47_spill] sm:$0xff] %v9205_v43 }
 0x1b8   : > { %v9209_v44 = vpop.f32.mrf.mxu1  ;;  %v9211_v16 = vpop.f32.mrf.mxu0 }
 0x1b9   : > { %10697 = vst [vmem:[#allocation48_spill] sm:$0xff] %v9209_v44 }
 0x1ba   : > { %v9213_v41 = vpop.f32.mrf.mxu1  ;;  %v9215_v48 = vpop.f32.mrf.mxu0 }
 0x1bb   : > { %10698 = vst [vmem:[#allocation49_spill] sm:$0xff] %v9213_v41 }
 0x1bc   : > { %v9217_v38 = vpop.f32.mrf.mxu1  ;;  %v9219_v24 = vpop.f32.mrf.mxu0 }
 0x1bd   : > { %10699 = vst [vmem:[#allocation50_spill] sm:$0xff] %v9217_v38  ;;  %10700 = vst [vmem:[#allocation51_spill] sm:$0xff] %v9219_v24 }
 0x1be   : > { %v9221_v31 = vpop.f32.mrf.mxu1  ;;  %v9223_v25 = vpop.f32.mrf.mxu0 }
 0x1bf   : > { %10701 = vst [vmem:[#allocation52_spill] sm:$0xff] %v9221_v31  ;;  %10702 = vst [vmem:[#allocation53_spill] sm:$0xff] %v9223_v25 }
 0x1c0   : > { %v9225_v2 = vpop.f32.mrf.mxu1  ;;  %v9227_v43 = vpop.f32.mrf.mxu0 }
 0x1c1   : > { %10703 = vst [vmem:[#allocation54_spill] sm:$0xff] %v9225_v2  ;;  %10704 = vst [vmem:[#allocation55_spill] sm:$0xff] %v9227_v43 }
 0x1c2   : > { %v9229_v33 = vpop.f32.mrf.mxu1  ;;  %v9231_v44 = vpop.f32.mrf.mxu0 }
 0x1c3   : > { %10705 = vst [vmem:[#allocation56_spill] sm:$0xff] %v9229_v33  ;;  %10706 = vst [vmem:[#allocation57_spill] sm:$0xff] %v9231_v44 }
 0x1c4   : > { %v9233_v26 = vpop.f32.mrf.mxu1  ;;  %v9235_v41 = vpop.f32.mrf.mxu0 }
 0x1c5   : > { %10707 = vst [vmem:[#allocation58_spill] sm:$0xff] %v9233_v26  ;;  %10708 = vst [vmem:[#allocation59_spill] sm:$0xff] %v9235_v41 }
 0x1c6   : > { %v9237_v58 = vpop.f32.mrf.mxu1  ;;  %v9239_v38 = vpop.f32.mrf.mxu0 }
 0x1c7   : > { %10709 = vst [vmem:[#allocation60_spill] sm:$0xff] %v9237_v58  ;;  %10710 = vst [vmem:[#allocation61_spill] sm:$0xff] %v9239_v38 }
 0x1c8   : > { %v9241_v30 = vpop.f32.mrf.mxu1  ;;  %v9243_v31 = vpop.f32.mrf.mxu0 }
 0x1c9   : > { %10711 = vst [vmem:[#allocation62_spill] sm:$0xff] %v9241_v30  ;;  %10712 = vst [vmem:[#allocation63_spill] sm:$0xff] %v9243_v31 }
 0x1ca   : > { %v9245_v45 = vpop.f32.mrf.mxu1  ;;  %v9247_v2 = vpop.f32.mrf.mxu0 }
 0x1cb   : > { %10713 = vst [vmem:[#allocation64_spill] sm:$0xff] %v9245_v45  ;;  %10714 = vst [vmem:[#allocation65_spill] sm:$0xff] %v9247_v2 }
 0x1cc   : > { %v7426_v43 = vpop.f32.mrf.mxu1  ;;  %v9249_v33 = vpop.f32.mrf.mxu0 }
 0x1cd   : > { %10715 = vst [vmem:[#allocation66_spill] sm:$0xff] %v9249_v33 }
 0x1ce   : > { %v2607_v44 = vpop.f32.mrf.mxu1  ;;  %v9251_v25 = vpop.f32.mrf.mxu0 }
 0x1cf   : > { %10716 = vst [vmem:[#allocation67_spill] sm:$0xff] %v9251_v25 }
 0x1d0   : > { %v7427_v26 = vpop.f32.mrf.mxu1  ;;  %v9253_v41 = vpop.f32.mrf.mxu0 }
 0x1d1   : > { %10717 = vst [vmem:[#allocation68_spill] sm:$0xff] %v9253_v41 }
 0x1d2   : > { %v2610_v58 = vpop.f32.mrf.mxu1  ;;  %v9255_v9 = vpop.f32.mrf.mxu0 }
 0x1d3   : > { %10718 = vst [vmem:[#allocation69_spill] sm:$0xff] %v9255_v9 }
 0x1d4   : > { %v7430_v38 = vpop.f32.mrf.mxu1  ;;  %v9257_v30 = vpop.f32.mrf.mxu0 }
 0x1d5   : > { %10719 = vst [vmem:[#allocation70_spill] sm:$0xff] %v9257_v30 }
 0x1d6   : > { %v9259_v31 = vpop.f32.mrf.mxu1  ;;  %v9261_v45 = vpop.f32.mrf.mxu0 }
 0x1d7   : > { %10720 = vst [vmem:[#allocation71_spill] sm:$0xff] %v9261_v45 }
 0x1d8   : > { %v9263_v2 = vpop.f32.mrf.mxu1  ;;  %v9265_v46 = vpop.f32.mrf.mxu0 }
 0x1d9   : > { %10721 = vst [vmem:[#allocation72_spill] sm:$0xff] %v9265_v46 }
 0x1da   : > { %v9267_v33 = vpop.f32.mrf.mxu1  ;;  %v9269_v25 = vpop.f32.mrf.mxu0 }
 0x1db   : > { %10722 = vst [vmem:[#allocation73_spill] sm:$0xff] %v9269_v25  ;;  %v2147_v25 = vadd.f32 %v9105_v0, %v8874_v60  ;;  %v2148_v60 = vadd.f32 %v9115_v6, %v8886_v18  ;;  %v2151_v18 = vadd.f32 %v9124_v1, %v9043_v34 }
 0x1dc   : > { %v9271_v61 = vpop.f32.mrf.mxu1  ;;  %v9273_v41 = vpop.f32.mrf.mxu0 }
 0x1dd   : > { %10723 = vst [vmem:[#allocation74_spill] sm:$0xff] %v9273_v41 }
 0x1de   : > { %v9275_v9 = vpop.f32.mrf.mxu1  ;;  %v9277_v49 = vpop.f32.mrf.mxu0 }
 0x1df   : > { %10724 = vst [vmem:[#allocation75_spill] sm:$0xff] %v9275_v9  ;;  %10725 = vst [vmem:[#allocation76_spill] sm:$0xff] %v9277_v49  ;;  %v1558_v49 = vadd.f32 %v8793_v12, %v8684_v40  ;;  %v9315_v12 = vld [vmem:[%s10645_s4] ss:$0 sm:$0xff] }
 0x1e0   : > { %v9279_v30 = vpop.f32.mrf.mxu1  ;;  %v9281_v24 = vpop.f32.mrf.mxu0 }
 0x1e1   : > { %10726 = vst [vmem:[#allocation77_spill] sm:$0xff] %v9281_v24  ;;  %v2145_v24 = vadd.f32 %v9110_v32, %v8880_v51  ;;  %v2443_v32 = vadd.f32 %v9191_v3, %v2148_v60  ;;  %v2152_v60 = vadd.f32 %v9133_v10, %v9055_v4 }
 0x1e2   : > { %v9283_v45 = vpop.f32.mrf.mxu1  ;;  %v9285_v29 = vpop.f32.mrf.mxu0 }
 0x1e3   : > { %10727 = vst [vmem:[#allocation78_spill] sm:$0xff] %v9283_v45  ;;  %10728 = vst [vmem:[#allocation79_spill] sm:$0xff] %v9285_v29  ;;  %v2442_v45 = vadd.f32 %v9182_v42, %v2147_v25  ;;  %v2440_v0 = vadd.f32 %v9187_v5, %v2145_v24  ;;  %v2737_v24 = vadd.f32 %v7427_v26, %v2443_v32 }
 0x1e4   : > { %v9287_v46 = vpop.f32.mrf.mxu1  ;;  %v9289_v57 = vpop.f32.mrf.mxu0  ;;  %v1562_v5 = vadd.f32 %v8817_v62, %v8710_v39 }
 0x1e5   : > { %10729 = vst [vmem:[#allocation80_spill] sm:$0xff] %v9287_v46  ;;  %10730 = vst [vmem:[#allocation81_spill] sm:$0xff] %v9289_v57  ;;  %v1852_v57 = vadd.f32 %v8890_v27, %v1558_v49  ;;  %v2734_v25 = vadd.f32 %v2607_v44, %v2440_v0  ;;  %v2446_v44 = vadd.f32 %v9199_v13, %v2151_v18 }
 0x1e6   : > { %v9293_v41 = vpop.f32.mrf.mxu1  ;;  %v9295_v9 = vpop.f32.mrf.mxu0  ;;  %v1856_v26 = vadd.f32 %v9057_v17, %v1562_v5 }
 0x1e7   : > { %10731 = vst [vmem:[#allocation82_spill] sm:$0xff] %v9293_v41  ;;  %10732 = vst [vmem:[#allocation83_spill] sm:$0xff] %v9295_v9  ;;  %v2736_v9 = vadd.f32 %v7426_v43, %v2442_v45  ;;  %v2146_v51 = vadd.f32 %v9119_v35, %v1852_v57  ;;  %v2149_v57 = vadd.f32 %v9129_v47, %v9049_v50 }
 0x1e8   : > { %v9302_v29 = vpop.f32.mrf.mxu1  ;;  %v9304_v46 = vpop.f32.mrf.mxu0  ;;  %v2740_v47 = vadd.f32 %v7430_v38, %v2446_v44  ;;  %v2150_v17 = vadd.f32 %v9137_v52, %v1856_v26  ;;  %v10740_v26 = vld [vmem:[#allocation53_spill] sm:$0xff] }
 0x1e9   : > { %v2441_v6 = vadd.f32 %v9195_v54, %v2146_v51  ;;  %v2444_v39 = vadd.f32 %v9203_v22, %v2149_v57  ;;  %v2447_v51 = vadd.f32 %v9207_v55, %v2152_v60 }
 0x1ea   : > { %v9310_v41 = vpop.f32.mrf.mxu1  ;;  %v7460_v40 = vpop.f32.mrf.mxu0  ;;  %v2445_v52 = vadd.f32 %v9211_v16, %v2150_v17 }
 0x1eb   : > { %v3030_v49 = vadd.f32 %v7460_v40, %v2736_v9  ;;  %v2735_v35 = vadd.f32 %v2610_v58, %v2441_v6  ;;  %v942_v40 = vadd.f32 %v8686_v21, %v8638_v36  ;;  %v2738_v10 = vadd.f32 %v9259_v31, %v2444_v39 }
 0x1ec   : > { %v9321_v27 = vpop.f32.mrf.mxu1  ;;  %v2901_v45 = vpop.f32.mrf.mxu0  ;;  %v9354_v36 = vadd.f32 %v8742_v7, %v8581_v56  ;;  %v2155_v21 = vadd.f32 %v9141_v19, %v9063_v15  ;;  %v2741_v55 = vadd.f32 %v9263_v2, %v2447_v51  ;;  %v1566_v56 = vadd.f32 %v8842_v28, %v8740_v37  ;;  %v10733_v28 = vld [vmem:[#allocation11_spill] sm:$0xff]  ;;  %v10743_v51 = vld [vmem:[#allocation13_spill] sm:$0xff] }
 0x1ed   : > { %v3069_v43 = vadd.f32 %v9315_v12, %v3030_v49  ;;  %v3028_v42 = vadd.f32 %v2901_v45, %v2734_v25  ;;  %v958_v49 = vadd.f32 %v8712_v53, %v8655_v23  ;;  %v9364_v23 = vadd.f32 %v8769_v59, %v8596_v20 }
 0x1ee   : > { %v9330_v3 = vpop.f32.mrf.mxu1  ;;  %v7461_v34 = vpop.f32.mrf.mxu0  ;;  %v2153_v53 = vadd.f32 %v9145_v63, %v9073_v11  ;;  %v2450_v7 = vadd.f32 %v9215_v48, %v2155_v21  ;;  %v2739_v2 = vadd.f32 %v9267_v33, %v2445_v52  ;;  %v1280_v59 = vadd.f32 %v8788_v8, %v942_v40  ;;  %v10735_v63 = vld [vmem:[#allocation51_spill] sm:$0xff]  ;;  %v10737_v8 = vld [vmem:[#allocation4_spill] sm:$0xff]  ;;  %v10742_v40 = vld [vmem:[#allocation9_spill] sm:$0xff] }
 0x1ef   : > { %v3101_v1 = vmax.f32 %v3069_v43, 0.0  ;;  %v3067_v9 = vadd.f32 %v9315_v12, %v3028_v42  ;;  %v3031_v54 = vadd.f32 %v7461_v34, %v2737_v24  ;;  %v1860_v37 = vadd.f32 %v9079_v14, %v1566_v56  ;;  %v10734_v43 = vld [vmem:[#allocation29_spill] sm:$0xff]  ;;  %v10748_v56 = vld [vmem:[#allocation16_spill] sm:$0xff] }
 0x1f0   : > { %v9337_v62 = vpop.f32.mrf.mxu1  ;;  %v2904_v50 = vpop.f32.mrf.mxu0  ;;  %v2156_v11 = vadd.f32 %v10734_v43, %v10733_v28  ;;  %v2448_v48 = vadd.f32 %v10735_v63, %v2153_v53  ;;  %v2744_v33 = vadd.f32 %v9271_v61, %v2450_v7  ;;  %v10736_v34 = vld [vmem:[#allocation5_spill] sm:$0xff]  ;;  %v9397_v17 = vadd.f32 %v10742_v40, %v1280_v59  ;;  %v10749_v7 = vld [vmem:[#allocation15_spill] sm:$0xff] }
 0x1f1   : > { %3207 = vst.msk [vmem:[#allocation3 + $0x48] sm:$0xff] %vm3131_vm2, %v3101_v1  ;;  %v3099_v13 = vmax.f32 %v3067_v9, 0.0  ;;  %v3070_v58 = vadd.f32 %v9315_v12, %v3031_v54  ;;  %v3029_v0 = vadd.f32 %v2904_v50, %v2735_v35  ;;  %v9385_v35 = vadd.f32 %v10736_v34, %v958_v49  ;;  %v10738_v1 = vld [vmem:[#allocation8_spill] sm:$0xff]  ;;  %v10739_v9 = vld [vmem:[#allocation31_spill] sm:$0xff]  ;;  %v10755_v40 = vld [vmem:[#allocation41_spill] sm:$0xff] }
 0x1f2   : > { %v7464_v4 = vpop.f32.mrf.mxu0  ;;  %v9348_v32 = vpop.f32.mrf.mxu1  ;;  %v1570_v14 = vadd.f32 %v10738_v1, %v10737_v8  ;;  %v2154_v54 = vadd.f32 %v10739_v9, %v1860_v37  ;;  %v2451_v60 = vadd.f32 %v10740_v26, %v2156_v11  ;;  %v10741_v50 = vld [vmem:[#allocation75_spill] sm:$0xff]  ;;  %v10753_v11 = vld [vmem:[#allocation78_spill] sm:$0xff]  ;;  %v10754_v8 = vld [vmem:[#allocation80_spill] sm:$0xff] }
 0x1f3   : > { %3205 = vst.msk [vmem:[#allocation3 + $0x28] sm:$0xff] %vm3131_vm2, %v3099_v13  ;;  %v3102_v22 = vmax.f32 %v3070_v58, 0.0  ;;  %v3068_v38 = vadd.f32 %v9315_v12, %v3029_v0  ;;  %v3034_v25 = vadd.f32 %v7464_v4, %v2740_v47  ;;  %v2742_v47 = vadd.f32 %v10741_v50, %v2448_v48  ;;  %v10744_v4 = vld [vmem:[#allocation33_spill] sm:$0xff]  ;;  %v10747_v49 = vld [vmem:[#allocation55_spill] sm:$0xff] }
 0x1f4   : > { %v2917_v31 = vpop.f32.mrf.mxu0  ;;  %v9373_v16 = vpop.f32.mrf.mxu1  ;;  %v2449_v21 = vadd.f32 %v10747_v49, %v2154_v54  ;;  %v1864_v53 = vadd.f32 %v10748_v56, %v1570_v14  ;;  %v10761_v56 = vld [vmem:[#allocation43_spill] sm:$0xff] }
 0x1f5   : > { %3208 = vst.msk [vmem:[#allocation3 + $0x50] sm:$0xff] %vm3131_vm2, %v3102_v22  ;;  %v3100_v18 = vmax.f32 %v3068_v38, 0.0  ;;  %v3073_v45 = vadd.f32 %v9315_v12, %v3034_v25  ;;  %v3032_v6 = vadd.f32 %v2917_v31, %v2738_v10  ;;  %v2159_v10 = vadd.f32 %v10744_v4, %v10743_v51  ;;  %v10745_v22 = vld [vmem:[#allocation14_spill] sm:$0xff]  ;;  %v10746_v38 = vld [vmem:[#allocation35_spill] sm:$0xff] }
 0x1f6   : > { %v7465_v15 = vpop.f32.mrf.mxu0  ;;  %v9393_v61 = vpop.f32.mrf.mxu1  ;;  %v2157_v25 = vadd.f32 %v10746_v38, %v10745_v22  ;;  %v2745_v31 = vadd.f32 %v9279_v30, %v2451_v60  ;;  %v2743_v63 = vadd.f32 %v10753_v11, %v2449_v21  ;;  %v2158_v51 = vadd.f32 %v10755_v40, %v1864_v53  ;;  %v10756_v4 = vld [vmem:[#allocation18_spill] sm:$0xff]  ;;  %v10758_v38 = vld [vmem:[#allocation61_spill] sm:$0xff] }
 0x1f7   : > { %3206 = vst.msk [vmem:[#allocation3 + $0x30] sm:$0xff] %vm3131_vm2, %v3100_v18  ;;  %v3105_v19 = vmax.f32 %v3073_v45, 0.0  ;;  %v3071_v24 = vadd.f32 %v9315_v12, %v3032_v6  ;;  %v3035_v20 = vadd.f32 %v7465_v15, %v2741_v55  ;;  %v10750_v15 = vld [vmem:[#allocation38_spill] sm:$0xff] }
 0x1f8   : > { %v2920_v42 = vpop.f32.mrf.mxu0  ;;  %v9413_v48 = vpop.f32.mrf.mxu1  ;;  %v3293_v34 = vld [vmem:[#allocation3 + $0x48] sm:$0xff]  ;;  %v10759_v21 = vld [vmem:[#allocation82_spill] sm:$0xff] }
 0x1f9   : > { %3211 = vst.msk [vmem:[#allocation3 + $0x88] sm:$0xff] %vm3131_vm2, %v3105_v19  ;;  %v3103_v5 = vmax.f32 %v3071_v24, 0.0  ;;  %v3074_v57 = vadd.f32 %v9315_v12, %v3035_v20  ;;  %v3033_v44 = vadd.f32 %v2920_v42, %v2739_v2  ;;  %v2160_v2 = vadd.f32 %v10750_v15, %v10749_v7  ;;  %v10751_v19 = vld [vmem:[#allocation57_spill] sm:$0xff]  ;;  %v10752_v20 = vld [vmem:[#allocation59_spill] sm:$0xff] }
 0x1fa   : > { %v7468_v39 = vpop.f32.mrf.mxu0  ;;  %v2454_v24 = vadd.f32 %v10751_v19, %v2159_v10  ;;  %v2452_v59 = vadd.f32 %v10752_v20, %v2157_v25  ;;  %v3241_v60 = vld [vmem:[#allocation3 + $0x47] sm:$0xff]  ;;  %v10757_v10 = vld [vmem:[#allocation42_spill] sm:$0xff]  ;;  %v10762_v7 = vld [vmem:[#allocation63_spill] sm:$0xff] }
 0x1fb   : > { %3209 = vst.msk [vmem:[#allocation3 + $0x68] sm:$0xff] %vm3131_vm2, %v3103_v5  ;;  %v3106_v13 = vmax.f32 %v3074_v57, 0.0  ;;  %v3072_v58 = vadd.f32 %v9315_v12, %v3033_v44  ;;  %v3038_v0 = vadd.f32 %v7468_v39, %v2744_v33  ;;  %v3291_v57 = vld [vmem:[#allocation3 + $0x28] sm:$0xff]  ;;  %v2163_v22 = vadd.f32 %v10757_v10, %v10756_v4 }
 0x1fc   : > { %v2933_v52 = vpop.f32.mrf.mxu0  ;;  %v3294_v6 = vld [vmem:[#allocation3 + $0x50] sm:$0xff]  ;;  %v3239_v44 = vld [vmem:[#allocation3 + $0x27] sm:$0xff]  ;;  %v2748_v1 = vadd.f32 %v10754_v8, %v2454_v24  ;;  %v2455_v25 = vadd.f32 %v10758_v38, %v2160_v2  ;;  %v2453_v15 = vadd.f32 %v10762_v7, %v2158_v51 }
 0x1fd   : > { %3212 = vst.msk [vmem:[#allocation3 + $0x90] sm:$0xff] %vm3131_vm2, %v3106_v13  ;;  %v3104_v55 = vmax.f32 %v3072_v58, 0.0  ;;  %v3077_v18 = vadd.f32 %v9315_v12, %v3038_v0  ;;  %v3036_v45 = vadd.f32 %v2933_v52, %v2742_v47  ;;  %v3242_v30 = vld [vmem:[#allocation3 + $0x4f] sm:$0xff]  ;;  %v9422_v26 = vpack.c.bf16 %v3294_v6, %v3293_v34  ;;  %v7876_v58 = vld [vmem:[%s10646_s5 + $0x20] sm:$0xff]   ;;  %v10760_v6 = vld [vmem:[#allocation19_spill] sm:$0xff] }
 0x1fe   : > { %v7469_v37 = vpop.f32.mrf.mxu0  ;;  %v3292_v28 = vld [vmem:[#allocation3 + $0x30] sm:$0xff]  ;;  %v9426_v13 = vpack.c.bf16 %v3242_v30, %v3241_v60  ;;  %v2746_v52 = vadd.f32 %v10759_v21, %v2452_v59  ;;  %v2161_v53 = vadd.f32 %v10761_v56, %v10760_v6  ;;  %v10763_v2 = vld [vmem:[#allocation65_spill] sm:$0xff]  ;;  %v10765_v59 = vld [vmem:[#allocation40_spill] sm:$0xff] }
 0x1ff   : > { %v3240_v43 = vld [vmem:[#allocation3 + $0x2f] sm:$0xff]  ;;  %3210 = vst.msk [vmem:[#allocation3 + $0x70] sm:$0xff] %vm3131_vm2, %v3104_v55  ;;  %v3109_v42 = vmax.f32 %v3077_v18, 0.0  ;;  %v3075_v33 = vadd.f32 %v9315_v12, %v3036_v45  ;;  %v3039_v5 = vadd.f32 %v7469_v37, %v2745_v31  ;;  %v9418_v9 = vpack.c.bf16 %v3292_v28, %v3291_v57  ;;  %v9443_v31 = vpop.f32.mrf.mxu1  ;;  %v10768_v57 = vld [vmem:[#allocation44_spill] sm:$0xff] }
 0x200   : > { %v2936_v14 = vpop.f32.mrf.mxu0  ;;  %v9420_v54 = vpack.c.bf16 %v3240_v43, %v3239_v44  ;;  %v7877_v0 = vld [vmem:[%s10646_s5 + $0x30] sm:$0xff]   ;;  %v2458_v19 = vadd.f32 %v10763_v2, %v2163_v22  ;;  %v10764_v20 = vld [vmem:[#allocation37_spill] sm:$0xff]  ;;  %v2749_v37 = vadd.f32 %v9302_v29, %v2455_v25 }
 0x201   : > { %3215 = vst.msk [vmem:[#allocation3 + $0xc8] sm:$0xff] %vm3131_vm2, %v3109_v42  ;;  %v3107_v39 = vmax.f32 %v3075_v33, 0.0  ;;  %v3078_v50 = vadd.f32 %v9315_v12, %v3039_v5  ;;  %v3037_v47 = vadd.f32 %v2936_v14, %v2743_v63  ;;  %7495 = vmatmul.mubr.msk.bf16.vlgmr.msra.gmra.mxu1 %vm3131_vm2, %v9418_v9  ;;  %v9463_v63 = vld [vmem:[%s10646_s5 + $0x48] sm:$0xff]   ;;  %v9468_v42 = vld [vmem:[%s10646_s5 + $0x58] sm:$0xff]   ;;  %v10767_v5 = vld [vmem:[#allocation20_spill] sm:$0xff]  ;;  %v9477_v40 = vpop.f32.mrf.mxu1 }
 0x202   : > { %7531 = vmatmul.mubr.msk.bf16.vlgmr.msra.gmra.mxu0 %vm3131_vm2, %v9420_v54  ;;  %v7472_v49 = vpop.f32.mrf.mxu0  ;;  %7498 = vmatprep.mubr.msk.bf16.mxu1 %vm3131_vm2, %v9422_v26  ;;  %v10766_v29 = vld [vmem:[#allocation21_spill] sm:$0xff]  ;;  %v2164_v44 = vadd.f32 %v10768_v57, %v10767_v5  ;;  %v10769_v34 = vld [vmem:[#allocation66_spill] sm:$0xff] }
 0x203   : > { %3213 = vst.msk [vmem:[#allocation3 + $0xa8] sm:$0xff] %vm3131_vm2, %v3107_v39  ;;  %v3110_v55 = vmax.f32 %v3078_v50, 0.0  ;;  %v3076_v18 = vadd.f32 %v9315_v12, %v3037_v47  ;;  %v3042_v45 = vadd.f32 %v7472_v49, %v2748_v1  ;;  %7534 = vmatprep.mubr.msk.bf16.mxu0 %vm3131_vm2, %v9426_v13  ;;  %7563 = vmatpush3.bf16.msra.mxu1 %v10764_v20  ;;  %v3295_v10 = vld [vmem:[#allocation3 + $0x68] sm:$0xff]  ;;  %v10770_v6 = vld [vmem:[#allocation10_spill] sm:$0xff] }
 0x204   : > { %v2949_v24 = vpop.f32.mrf.mxu0  ;;  %7599 = vmatpush3.bf16.msra.mxu0 %v10765_v59  ;;  %v3298_v11 = vld [vmem:[#allocation3 + $0x90] sm:$0xff]  ;;  %7564 = vmatprep.subr.bf16.mxu1 %v7876_v58  ;;  %v1868_v33 = vadd.f32 %v10766_v29, %v9397_v17  ;;  %v2456_v8 = vadd.f32 %v10769_v34, %v2161_v53  ;;  %v2747_v1 = vadd.f32 %v9310_v41, %v2453_v15  ;;  %v3243_v22 = vld [vmem:[#allocation3 + $0x67] sm:$0xff]  ;;  %v10772_v15 = vld [vmem:[#allocation67_spill] sm:$0xff] }
 0x205   : > { %3216 = vst.msk [vmem:[#allocation3 + $0xd0] sm:$0xff] %vm3131_vm2, %v3110_v55  ;;  %v3108_v28 = vmax.f32 %v3076_v18, 0.0  ;;  %v3081_v43 = vadd.f32 %v9315_v12, %v3042_v45  ;;  %v3040_v30 = vadd.f32 %v2949_v24, %v2746_v52  ;;  %7600 = vmatprep.subr.bf16.mxu0 %v7877_v0  ;;  %v3246_v50 = vld [vmem:[#allocation3 + $0x8f] sm:$0xff]  ;;  %v2752_v47 = vadd.f32 %v9321_v27, %v2458_v19  ;;  %v3245_v52 = vld [vmem:[#allocation3 + $0x87] sm:$0xff]  ;;  %v9502_v19 = vpop.f32.mrf.mxu1 }
 0x206   : > { %v7473_v14 = vpop.f32.mrf.mxu0  ;;  %v3296_v60 = vld [vmem:[#allocation3 + $0x70] sm:$0xff]  ;;  %v3297_v38 = vld [vmem:[#allocation3 + $0x88] sm:$0xff]  ;;  %v9489_v45 = vpack.c.bf16 %v3246_v50, %v3245_v52  ;;  %v1578_v56 = vadd.f32 %v10770_v6, %v9385_v35  ;;  %v2750_v2 = vadd.f32 %v9330_v3, %v2456_v8  ;;  %v10777_v29 = vld [vmem:[#allocation68_spill] sm:$0xff] }
 0x207   : > { %v3244_v39 = vld [vmem:[#allocation3 + $0x6f] sm:$0xff]  ;;  %3214 = vst.msk [vmem:[#allocation3 + $0xb0] sm:$0xff] %vm3131_vm2, %v3108_v28  ;;  %v3113_v51 = vmax.f32 %v3081_v43, 0.0  ;;  %v3079_v17 = vadd.f32 %v9315_v12, %v3040_v30  ;;  %v3043_v4 = vadd.f32 %v7473_v14, %v2749_v37  ;;  %v9481_v49 = vpack.c.bf16 %v3296_v60, %v3295_v10  ;;  %7565 = vmatpush3.bf16.msra.mxu1 %v7876_v58  ;;  %v10778_v60 = vld [vmem:[#allocation23_spill] sm:$0xff]  ;;  %v10780_v50 = vld [vmem:[#allocation24_spill] sm:$0xff]  ;;  %v9525_v52 = vpop.f32.mrf.mxu1 }
 0x208   : > { %v2952_v25 = vpop.f32.mrf.mxu0  ;;  %v9483_v41 = vpack.c.bf16 %v3244_v39, %v3243_v22  ;;  %v9485_v21 = vpack.c.bf16 %v3298_v11, %v3297_v38  ;;  %7601 = vmatpush3.bf16.msra.mxu0 %v7877_v0  ;;  %7634 = vmatprep.subr.bf16.mxu1 %v9463_v63  ;;  %v10771_v53 = vld [vmem:[#allocation45_spill] sm:$0xff]  ;;  %v2459_v58 = vadd.f32 %v10772_v15, %v2164_v44  ;;  %v10773_v59 = vld [vmem:[#allocation6_spill] sm:$0xff] }
 0x209   : > { %3219 = vst.msk [vmem:[#allocation3 + $0x108] sm:$0xff] %vm3131_vm2, %v3113_v51  ;;  %v3111_v27 = vmax.f32 %v3079_v17, 0.0  ;;  %v3082_v55 = vadd.f32 %v9315_v12, %v3043_v4  ;;  %v3041_v18 = vadd.f32 %v2952_v25, %v2747_v1  ;;  %7670 = vmatprep.subr.bf16.mxu0 %v9468_v42  ;;  %v2162_v7 = vadd.f32 %v10771_v53, %v1868_v33  ;;  %v10774_v28 = vld [vmem:[#allocation25_spill] sm:$0xff]  ;;  %v10775_v3 = vld [vmem:[#allocation22_spill] sm:$0xff] }
 0x20a   : > { %7499 = vmatmul.mubr.msk.bf16.gmra.mxu1 %vm3131_vm2, %v9481_v49  ;;  %7535 = vmatmul.mubr.msk.bf16.gmra.mxu0 %vm3131_vm2, %v9483_v41  ;;  %v7476_v0 = vpop.f32.mrf.mxu0  ;;  %v1288_v37 = vadd.f32 %v10773_v59, %v9354_v36  ;;  %v1872_v43 = vadd.f32 %v10774_v28, %v1578_v56  ;;  %v10776_v30 = vld [vmem:[#allocation46_spill] sm:$0xff]  ;;  %v2753_v57 = vadd.f32 %v9337_v62, %v2459_v58  ;;  %v3299_v1 = vld [vmem:[#allocation3 + $0xa8] sm:$0xff]  ;;  %v10779_v36 = vld [vmem:[#allocation47_spill] sm:$0xff] }
 0x20b   : > { %3217 = vst.msk [vmem:[#allocation3 + $0xe8] sm:$0xff] %vm3131_vm2, %v3111_v27  ;;  %v3114_v24 = vmax.f32 %v3082_v55, 0.0  ;;  %v3080_v35 = vadd.f32 %v9315_v12, %v3041_v18  ;;  %v3046_v20 = vadd.f32 %v7476_v0, %v2752_v47  ;;  %7502 = vmatprep.mubr.msk.bf16.mxu1 %vm3131_vm2, %v9485_v21  ;;  %7538 = vmatprep.mubr.msk.bf16.mxu0 %vm3131_vm2, %v9489_v45  ;;  %v10781_v47 = vld [vmem:[#allocation48_spill] sm:$0xff]  ;;  %v10782_v17 = vld [vmem:[#allocation69_spill] sm:$0xff] }
 0x20c   : > { %v2167_v11 = vadd.f32 %v10776_v30, %v10775_v3  ;;  %v2457_v33 = vadd.f32 %v10777_v29, %v2162_v7  ;;  %v2965_v5 = vpop.f32.mrf.mxu0  ;;  %v3302_v14 = vld [vmem:[#allocation3 + $0xd0] sm:$0xff]  ;;  %v2165_v39 = vadd.f32 %v10779_v36, %v10778_v60  ;;  %v2168_v51 = vadd.f32 %v10781_v47, %v10780_v50  ;;  %v3247_v56 = vld [vmem:[#allocation3 + $0xa7] sm:$0xff] }
 0x20d   : > { %3220 = vst.msk [vmem:[#allocation3 + $0x110] sm:$0xff] %vm3131_vm2, %v3114_v24  ;;  %v3112_v44 = vmax.f32 %v3080_v35, 0.0  ;;  %v3085_v34 = vadd.f32 %v9315_v12, %v3046_v20  ;;  %v3044_v8 = vadd.f32 %v2965_v5, %v2750_v2  ;;  %v3250_v25 = vld [vmem:[#allocation3 + $0xcf] sm:$0xff]  ;;  %v3249_v24 = vld [vmem:[#allocation3 + $0xc7] sm:$0xff] }
 0x20e   : > { %v2462_v4 = vadd.f32 %v10782_v17, %v2167_v11  ;;  %v2751_v10 = vadd.f32 %v9348_v32, %v2457_v33  ;;  %v7477_v22 = vpop.f32.mrf.mxu0  ;;  %v3300_v62 = vld [vmem:[#allocation3 + $0xb0] sm:$0xff]  ;;  %v3301_v53 = vld [vmem:[#allocation3 + $0xc8] sm:$0xff]  ;;  %v9539_v28 = vpack.c.bf16 %v3250_v25, %v3249_v24  ;;  %v10784_v3 = vld [vmem:[#allocation12_spill] sm:$0xff] }
 0x20f   : > { %v3248_v38 = vld [vmem:[#allocation3 + $0xaf] sm:$0xff]  ;;  %3218 = vst.msk [vmem:[#allocation3 + $0xf0] sm:$0xff] %vm3131_vm2, %v3112_v44  ;;  %v3117_v27 = vmax.f32 %v3085_v34, 0.0  ;;  %v3083_v55 = vadd.f32 %v9315_v12, %v3044_v8  ;;  %v3047_v18 = vadd.f32 %v7477_v22, %v2753_v57  ;;  %v9529_v6 = vpack.c.bf16 %v3300_v62, %v3299_v1  ;;  %v10786_v33 = vld [vmem:[#allocation71_spill] sm:$0xff]  ;;  %v9549_v44 = vpop.f32.mrf.mxu1  ;;  %v10791_v50 = vld [vmem:[#allocation72_spill] sm:$0xff] }
 0x210   : > { %v10783_v7 = vld [vmem:[#allocation70_spill] sm:$0xff]  ;;  %v2756_v32 = vadd.f32 %v9373_v16, %v2462_v4  ;;  %v2968_v58 = vpop.f32.mrf.mxu0  ;;  %v9533_v0 = vpack.c.bf16 %v3248_v38, %v3247_v56  ;;  %v9535_v2 = vpack.c.bf16 %v3302_v14, %v3301_v53  ;;  %v1582_v30 = vadd.f32 %v10784_v3, %v1288_v37  ;;  %v10785_v11 = vld [vmem:[#allocation49_spill] sm:$0xff]  ;;  %v10792_v25 = vld [vmem:[#allocation27_spill] sm:$0xff] }
 0x211   : > { %v2460_v15 = vadd.f32 %v10783_v7, %v2165_v39  ;;  %3223 = vst.msk [vmem:[#allocation3 + $0x148] sm:$0xff] %vm3131_vm2, %v3117_v27  ;;  %v3115_v35 = vmax.f32 %v3083_v55, 0.0  ;;  %v3086_v20 = vadd.f32 %v9315_v12, %v3047_v18  ;;  %v3045_v59 = vadd.f32 %v2968_v58, %v2751_v10  ;;  %v10788_v14 = vld [vmem:[#allocation30_spill] sm:$0xff]  ;;  %v10794_v55 = vld [vmem:[#allocation28_spill] sm:$0xff]  ;;  %v10796_v53 = vld [vmem:[#allocation73_spill] sm:$0xff] }
 0x212   : > { %v2166_v29 = vadd.f32 %v10785_v11, %v1872_v43  ;;  %v2463_v16 = vadd.f32 %v10786_v33, %v2168_v51  ;;  %7503 = vmatmul.mubr.msk.bf16.gmra.mxu1 %vm3131_vm2, %v9529_v6  ;;  %7539 = vmatmul.mubr.msk.bf16.gmra.mxu0 %vm3131_vm2, %v9533_v0  ;;  %v7480_v5 = vpop.f32.mrf.mxu0  ;;  %v10787_v43 = vld [vmem:[#allocation7_spill] sm:$0xff]  ;;  %v1876_v60 = vadd.f32 %v10788_v14, %v1582_v30  ;;  %v10790_v36 = vld [vmem:[#allocation50_spill] sm:$0xff]  ;;  %v3303_v62 = vld [vmem:[#allocation3 + $0xe8] sm:$0xff] }
 0x213   : > { %v2754_v57 = vadd.f32 %v9393_v61, %v2460_v15  ;;  %3221 = vst.msk [vmem:[#allocation3 + $0x128] sm:$0xff] %vm3131_vm2, %v3115_v35  ;;  %v3118_v34 = vmax.f32 %v3086_v20, 0.0  ;;  %v3084_v37 = vadd.f32 %v9315_v12, %v3045_v59  ;;  %v3050_v8 = vadd.f32 %v7480_v5, %v2756_v32  ;;  %7506 = vmatprep.mubr.msk.bf16.mxu1 %vm3131_vm2, %v9535_v2  ;;  %v10789_v61 = vld [vmem:[#allocation26_spill] sm:$0xff]  ;;  %v7454_v35 = vpop.f32.mrf.mxu1  ;;  %v3251_v11 = vld [vmem:[#allocation3 + $0xe7] sm:$0xff] }
 0x214   : > { %7542 = vmatprep.mubr.msk.bf16.mxu0 %vm3131_vm2, %v9539_v28  ;;  %v1292_v1 = vadd.f32 %v10787_v43, %v9364_v23  ;;  %v2171_v39 = vadd.f32 %v10790_v36, %v10789_v61  ;;  %v2461_v47 = vadd.f32 %v10791_v50, %v2166_v29  ;;  %v2981_v51 = vpop.f32.mrf.mxu0  ;;  %v2757_v17 = vadd.f32 %v9413_v48, %v2463_v16  ;;  %v3306_v38 = vld [vmem:[#allocation3 + $0x110] sm:$0xff]  ;;  %v10793_v23 = vld [vmem:[#allocation52_spill] sm:$0xff]  ;;  %v3305_v29 = vld [vmem:[#allocation3 + $0x108] sm:$0xff] }
 0x215   : > { %3224 = vst.msk [vmem:[#allocation3 + $0x150] sm:$0xff] %vm3131_vm2, %v3118_v34  ;;  %v3116_v4 = vmax.f32 %v3084_v37, 0.0  ;;  %v3089_v10 = vadd.f32 %v9315_v12, %v3050_v8  ;;  %v3048_v22 = vadd.f32 %v2981_v51, %v2754_v57  ;;  %v2169_v27 = vadd.f32 %v10793_v23, %v10792_v25  ;;  %v10795_v18 = vld [vmem:[#allocation54_spill] sm:$0xff]  ;;  %v3253_v37 = vld [vmem:[#allocation3 + $0x107] sm:$0xff] }
 0x216   : > { %v2172_v56 = vadd.f32 %v10795_v18, %v10794_v55  ;;  %v2466_v7 = vadd.f32 %v10796_v53, %v2171_v39  ;;  %v2755_v15 = vadd.f32 %v9443_v31, %v2461_v47  ;;  %v7481_v32 = vpop.f32.mrf.mxu0  ;;  %v3304_v48 = vld [vmem:[#allocation3 + $0xf0] sm:$0xff]  ;;  %v9580_v34 = vpack.c.bf16 %v3306_v38, %v3305_v29  ;;  %v10798_v36 = vld [vmem:[#allocation17_spill] sm:$0xff]  ;;  %v10799_v50 = vld [vmem:[#allocation56_spill] sm:$0xff] }
 0x217   : > { %v3252_v58 = vld [vmem:[#allocation3 + $0xef] sm:$0xff]  ;;  %3222 = vst.msk [vmem:[#allocation3 + $0x130] sm:$0xff] %vm3131_vm2, %v3116_v4  ;;  %v3121_v20 = vmax.f32 %v3089_v10, 0.0  ;;  %v3087_v59 = vadd.f32 %v9315_v12, %v3048_v22  ;;  %v3051_v3 = vadd.f32 %v7481_v32, %v2757_v17  ;;  %v9574_v30 = vpack.c.bf16 %v3304_v48, %v3303_v62  ;;  %v10800_v51 = vld [vmem:[#allocation76_spill] sm:$0xff]  ;;  %v2719_v10 = vpop.f32.mrf.mxu1  ;;  %v10809_v29 = vld [vmem:[#allocation79_spill] sm:$0xff] }
 0x218   : > { %v3254_v24 = vld [vmem:[#allocation3 + $0x10f] sm:$0xff]  ;;  %v2760_v5 = vadd.f32 %v9477_v40, %v2466_v7  ;;  %v2984_v31 = vpop.f32.mrf.mxu0  ;;  %v9578_v57 = vpack.c.bf16 %v3252_v58, %v3251_v11  ;;  %v1586_v39 = vadd.f32 %v10798_v36, %v1292_v1  ;;  %v2170_v47 = vadd.f32 %v10799_v50, %v1876_v60  ;;  %v10801_v60 = vld [vmem:[#allocation39_spill] sm:$0xff]  ;;  %v10802_v25 = vld [vmem:[#allocation32_spill] sm:$0xff] }
 0x219   : > { %v10797_v33 = vld [vmem:[#allocation74_spill] sm:$0xff]  ;;  %3227 = vst.msk [vmem:[#allocation3 + $0x188] sm:$0xff] %vm3131_vm2, %v3121_v20  ;;  %v3119_v8 = vmax.f32 %v3087_v59, 0.0  ;;  %v3090_v43 = vadd.f32 %v9315_v12, %v3051_v3  ;;  %v3049_v14 = vadd.f32 %v2984_v31, %v2755_v15  ;;  %v9584_v61 = vpack.c.bf16 %v3254_v24, %v3253_v37  ;;  %v10804_v55 = vld [vmem:[#allocation77_spill] sm:$0xff]  ;;  %v10806_v24 = vld [vmem:[#allocation60_spill] sm:$0xff] }
 0x21a   : > { %v2464_v16 = vadd.f32 %v10797_v33, %v2169_v27  ;;  %v2467_v40 = vadd.f32 %v10800_v51, %v2172_v56  ;;  %7507 = vmatmul.mubr.msk.bf16.gmra.mxu1 %vm3131_vm2, %v9574_v30  ;;  %7543 = vmatmul.mubr.msk.bf16.gmra.mxu0 %vm3131_vm2, %v9578_v57  ;;  %v7484_v17 = vpop.f32.mrf.mxu0  ;;  %v1880_v38 = vadd.f32 %v10801_v60, %v1586_v39  ;;  %v10803_v23 = vld [vmem:[#allocation58_spill] sm:$0xff]  ;;  %v3307_v32 = vld [vmem:[#allocation3 + $0x128] sm:$0xff]  ;;  %v10807_v59 = vld [vmem:[#allocation36_spill] sm:$0xff] }
 0x21b   : > { %3225 = vst.msk [vmem:[#allocation3 + $0x168] sm:$0xff] %vm3131_vm2, %v3119_v8  ;;  %v3122_v22 = vmax.f32 %v3090_v43, 0.0  ;;  %v3088_v62 = vadd.f32 %v9315_v12, %v3049_v14  ;;  %v3054_v1 = vadd.f32 %v7484_v17, %v2760_v5  ;;  %7510 = vmatprep.mubr.msk.bf16.mxu1 %vm3131_vm2, %v9580_v34  ;;  %7546 = vmatprep.mubr.msk.bf16.mxu0 %vm3131_vm2, %v9584_v61  ;;  %v10805_v58 = vld [vmem:[#allocation34_spill] sm:$0xff]  ;;  %v7455_v8 = vpop.f32.mrf.mxu1  ;;  %v3255_v50 = vld [vmem:[#allocation3 + $0x127] sm:$0xff] }
 0x21c   : > { %v2758_v4 = vadd.f32 %v9502_v19, %v2464_v16  ;;  %v2175_v27 = vadd.f32 %v10803_v23, %v10802_v25  ;;  %v2465_v19 = vadd.f32 %v10804_v55, %v2170_v47  ;;  %v2997_v18 = vpop.f32.mrf.mxu0  ;;  %v2761_v56 = vadd.f32 %v9525_v52, %v2467_v40  ;;  %v3310_v48 = vld [vmem:[#allocation3 + $0x150] sm:$0xff]  ;;  %v3309_v47 = vld [vmem:[#allocation3 + $0x148] sm:$0xff] }
 0x21d   : > { %3228 = vst.msk [vmem:[#allocation3 + $0x190] sm:$0xff] %vm3131_vm2, %v3122_v22  ;;  %v3120_v53 = vmax.f32 %v3088_v62, 0.0  ;;  %v3093_v7 = vadd.f32 %v9315_v12, %v3054_v1  ;;  %v2173_v20 = vadd.f32 %v10806_v24, %v10805_v58  ;;  %v10808_v3 = vld [vmem:[#allocation62_spill] sm:$0xff]  ;;  %v10810_v51 = vld [vmem:[#allocation81_spill] sm:$0xff]  ;;  %v9620_v22 = vpack.c.bf16 %v3310_v48, %v3309_v47 }
 0x21e   : > { %v3052_v15 = vadd.f32 %v2997_v18, %v2758_v4  ;;  %v2176_v11 = vadd.f32 %v10808_v3, %v10807_v59  ;;  %v2470_v33 = vadd.f32 %v10809_v29, %v2175_v27  ;;  %v2759_v16 = vadd.f32 %v9549_v44, %v2465_v19  ;;  %v7485_v5 = vpop.f32.mrf.mxu0  ;;  %v3308_v52 = vld [vmem:[#allocation3 + $0x130] sm:$0xff]  ;;  %v3257_v62 = vld [vmem:[#allocation3 + $0x147] sm:$0xff]  ;;  %v10812_v19 = vld [vmem:[#allocation83_spill] sm:$0xff] }
 0x21f   : > { %v3256_v31 = vld [vmem:[#allocation3 + $0x12f] sm:$0xff]  ;;  %3226 = vst.msk [vmem:[#allocation3 + $0x170] sm:$0xff] %vm3131_vm2, %v3120_v53  ;;  %v3125_v43 = vmax.f32 %v3093_v7, 0.0  ;;  %v3055_v36 = vadd.f32 %v7485_v5, %v2761_v56  ;;  %v9615_v39 = vpack.c.bf16 %v3308_v52, %v3307_v32  ;;  %v2468_v40 = vadd.f32 %v10810_v51, %v2173_v20  ;;  %v10811_v27 = vld [vmem:[#allocation64_spill] sm:$0xff]  ;;  %v2722_v53 = vpop.f32.mrf.mxu1 }
 0x220   : > { %v3258_v37 = vld [vmem:[#allocation3 + $0x14f] sm:$0xff]  ;;  %v3091_v14 = vadd.f32 %v9315_v12, %v3052_v15  ;;  %v2764_v17 = vadd.f32 %v7454_v35, %v2470_v33  ;;  %v3000_v4 = vpop.f32.mrf.mxu0  ;;  %v9618_v44 = vpack.c.bf16 %v3256_v31, %v3255_v50  ;;  %v2174_v55 = vadd.f32 %v10811_v27, %v1880_v38  ;;  %v3261_v47 = vld [vmem:[#allocation3 + $0x187] sm:$0xff] }
 0x221   : > { %3231 = vst.msk [vmem:[#allocation3 + $0x1c8] sm:$0xff] %vm3131_vm2, %v3125_v43  ;;  %v3094_v60 = vadd.f32 %v9315_v12, %v3055_v36  ;;  %v3053_v25 = vadd.f32 %v3000_v4, %v2759_v16  ;;  %v9624_v23 = vpack.c.bf16 %v3258_v37, %v3257_v62  ;;  %v2471_v18 = vadd.f32 %v10812_v19, %v2176_v11  ;;  %v3313_v43 = vld [vmem:[#allocation3 + $0x188] sm:$0xff] }
 0x222   : > { %v3123_v1 = vmax.f32 %v3091_v14, 0.0  ;;  %7511 = vmatmul.mubr.msk.bf16.gmra.mxu1 %vm3131_vm2, %v9615_v39  ;;  %7547 = vmatmul.mubr.msk.bf16.gmra.mxu0 %vm3131_vm2, %v9618_v44  ;;  %v7488_v35 = vpop.f32.mrf.mxu0  ;;  %v2762_v56 = vadd.f32 %v2719_v10, %v2468_v40  ;;  %v2469_v38 = vadd.f32 %v9304_v46, %v2174_v55  ;;  %v3311_v59 = vld [vmem:[#allocation3 + $0x168] sm:$0xff] }
 0x223   : > { %v3126_v7 = vmax.f32 %v3094_v60, 0.0  ;;  %v3092_v15 = vadd.f32 %v9315_v12, %v3053_v25  ;;  %v3058_v32 = vadd.f32 %v7488_v35, %v2764_v17  ;;  %7514 = vmatprep.mubr.msk.bf16.mxu1 %vm3131_vm2, %v9620_v22  ;;  %7550 = vmatprep.mubr.msk.bf16.mxu0 %vm3131_vm2, %v9624_v23  ;;  %v2765_v58 = vadd.f32 %v7455_v8, %v2471_v18  ;;  %v3259_v8 = vld [vmem:[#allocation3 + $0x167] sm:$0xff] }
 0x224   : > { %3229 = vst.msk [vmem:[#allocation3 + $0x1a8] sm:$0xff] %vm3131_vm2, %v3123_v1  ;;  %v3013_v48 = vpop.f32.mrf.mxu0  ;;  %v3314_v3 = vld [vmem:[#allocation3 + $0x190] sm:$0xff]  ;;  %v2763_v11 = vadd.f32 %v2722_v53, %v2469_v38 }
 0x225   : > { %3232 = vst.msk [vmem:[#allocation3 + $0x1d0] sm:$0xff] %vm3131_vm2, %v3126_v7  ;;  %v3124_v10 = vmax.f32 %v3092_v15, 0.0  ;;  %v3097_v24 = vadd.f32 %v9315_v12, %v3058_v32  ;;  %v3056_v20 = vadd.f32 %v3013_v48, %v2762_v56  ;;  %v3262_v5 = vld [vmem:[#allocation3 + $0x18f] sm:$0xff]  ;;  %v9647_v50 = vpack.c.bf16 %v3314_v3, %v3313_v43 }
 0x226   : > { %v7489_v29 = vpop.f32.mrf.mxu0  ;;  %v3312_v33 = vld [vmem:[#allocation3 + $0x170] sm:$0xff]  ;;  %v9651_v4 = vpack.c.bf16 %v3262_v5, %v3261_v47 }
 0x227   : > { %v3260_v16 = vld [vmem:[#allocation3 + $0x16f] sm:$0xff]  ;;  %3230 = vst.msk [vmem:[#allocation3 + $0x1b0] sm:$0xff] %vm3131_vm2, %v3124_v10  ;;  %v3129_v52 = vmax.f32 %v3097_v24, 0.0  ;;  %v3095_v46 = vadd.f32 %v9315_v12, %v3056_v20  ;;  %v3059_v31 = vadd.f32 %v7489_v29, %v2765_v58  ;;  %v9643_v37 = vpack.c.bf16 %v3312_v33, %v3311_v59 }
 0x228   : > { %v3016_v14 = vpop.f32.mrf.mxu0  ;;  %v9645_v36 = vpack.c.bf16 %v3260_v16, %v3259_v8  ;;  %v3317_v53 = vld [vmem:[#allocation3 + $0x1c8] sm:$0xff]  ;;  %v3785_v48 = vld [vmem:[#allocation3 + $0x11] sm:$0xff] }
 0x229   : > { %3235 = vst.msk [vmem:[#allocation3 + $0x208] sm:$0xff] %vm3131_vm2, %v3129_v52  ;;  %v3127_v51 = vmax.f32 %v3095_v46, 0.0  ;;  %v3098_v40 = vadd.f32 %v9315_v12, %v3059_v31  ;;  %v3057_v17 = vadd.f32 %v3016_v14, %v2763_v11  ;;  %v3265_v7 = vld [vmem:[#allocation3 + $0x1c7] sm:$0xff]  ;;  %v3787_v33 = vld [vmem:[#allocation3 + $0x31] sm:$0xff] }
 0x22a   : > { %7515 = vmatmul.mubr.msk.bf16.gmra.mxu1 %vm3131_vm2, %v9643_v37  ;;  %7551 = vmatmul.mubr.msk.bf16.gmra.mxu0 %vm3131_vm2, %v9645_v36  ;;  %v3784_v38 = vld [vmem:[#allocation3 + $0x9] sm:$0xff]  ;;  %v3789_v5 = vld [vmem:[#allocation3 + $0x51] sm:$0xff]  ;;  %v7880_v31 = vld [vmem:[%s10646_s5 + $0x40] sm:$0xff]  }
 0x22b   : > { %3233 = vst.msk [vmem:[#allocation3 + $0x1e8] sm:$0xff] %vm3131_vm2, %v3127_v51  ;;  %v3130_v62 = vmax.f32 %v3098_v40, 0.0  ;;  %v3096_v1 = vadd.f32 %v9315_v12, %v3057_v17  ;;  %7518 = vmatprep.mubr.msk.bf16.mxu1 %vm3131_vm2, %v9647_v50  ;;  %7554 = vmatprep.mubr.msk.bf16.mxu0 %vm3131_vm2, %v9651_v4  ;;  %v3315_v25 = vld [vmem:[#allocation3 + $0x1a8] sm:$0xff]  ;;  %v3816_v11 = vpack.c.bf16 %v3785_v48, %v3784_v38  ;;  %v7881_v8 = vld [vmem:[%s10646_s5 + $0x50] sm:$0xff]  }
 0x22c   : > { %v3263_v27 = vld [vmem:[#allocation3 + $0x1a7] sm:$0xff]  ;;  %v3318_v55 = vld [vmem:[#allocation3 + $0x1d0] sm:$0xff] }
 0x22d   : > { %3236 = vst.msk [vmem:[#allocation3 + $0x210] sm:$0xff] %vm3131_vm2, %v3130_v62  ;;  %v3128_v60 = vmax.f32 %v3096_v1, 0.0  ;;  %v3266_v35 = vld [vmem:[#allocation3 + $0x1cf] sm:$0xff]  ;;  %v9669_v15 = vpack.c.bf16 %v3318_v55, %v3317_v53 }
 0x22e   : > { %v3316_v19 = vld [vmem:[#allocation3 + $0x1b0] sm:$0xff]  ;;  %v9671_v32 = vpack.c.bf16 %v3266_v35, %v3265_v7  ;;  %v9715_v14 = vld [vmem:[%s10646_s5 + $0x68] sm:$0xff]  }
 0x22f   : > { %v3264_v18 = vld [vmem:[#allocation3 + $0x1af] sm:$0xff]  ;;  %3234 = vst.msk [vmem:[#allocation3 + $0x1f0] sm:$0xff] %vm3131_vm2, %v3128_v60  ;;  %v9665_v56 = vpack.c.bf16 %v3316_v19, %v3315_v25 }
 0x230   : > { %v9667_v12 = vpack.c.bf16 %v3264_v18, %v3263_v27  ;;  %v3786_v29 = vld [vmem:[#allocation3 + $0x29] sm:$0xff]  ;;  %v3791_v43 = vld [vmem:[#allocation3 + $0x71] sm:$0xff] }
 0x231   : > { %v3788_v16 = vld [vmem:[#allocation3 + $0x49] sm:$0xff]  ;;  %v9692_v52 = vpack.c.bf16 %v3787_v33, %v3786_v29  ;;  %v3793_v51 = vld [vmem:[#allocation3 + $0x91] sm:$0xff] }
 0x232   : > { %7519 = vmatmul.mubr.msk.bf16.gmra.mxu1 %vm3131_vm2, %v9665_v56  ;;  %7555 = vmatmul.mubr.msk.bf16.gmra.mxu0 %vm3131_vm2, %v9667_v12  ;;  %v3319_v58 = vld [vmem:[#allocation3 + $0x1e8] sm:$0xff]  ;;  %v9694_v46 = vpack.c.bf16 %v3789_v5, %v3788_v16  ;;  %v3795_v17 = vld [vmem:[#allocation3 + $0xb1] sm:$0xff] }
 0x233   : > { %7522 = vmatprep.mubr.msk.bf16.mxu1 %vm3131_vm2, %v9669_v15  ;;  %7558 = vmatprep.mubr.msk.bf16.mxu0 %vm3131_vm2, %v9671_v32  ;;  %v3267_v24 = vld [vmem:[#allocation3 + $0x1e7] sm:$0xff]  ;;  %v3797_v1 = vld [vmem:[#allocation3 + $0xd1] sm:$0xff] }
 0x234   : > { %v3792_v47 = vld [vmem:[#allocation3 + $0x89] sm:$0xff]  ;;  %v3799_v55 = vld [vmem:[#allocation3 + $0xf1] sm:$0xff] }
 0x235   : > { %v3796_v62 = vld [vmem:[#allocation3 + $0xc9] sm:$0xff]  ;;  %v3801_v18 = vld [vmem:[#allocation3 + $0x111] sm:$0xff] }
 0x236   : > { %v3320_v10 = vld [vmem:[#allocation3 + $0x1f0] sm:$0xff]  ;;  %v9738_v25 = vpack.c.bf16 %v3797_v1, %v3796_v62  ;;  %v4120_v1 = vld [vmem:[#allocation3 + $0x207] sm:$0xff] }
 0x237   : > { %v3268_v20 = vld [vmem:[#allocation3 + $0x1ef] sm:$0xff]  ;;  %v9681_v59 = vpack.c.bf16 %v3320_v10, %v3319_v58 }
 0x238   : > { %v9683_v3 = vpack.c.bf16 %v3268_v20, %v3267_v24  ;;  %v3798_v27 = vld [vmem:[#allocation3 + $0xe9] sm:$0xff]  ;;  %v3803_v38 = vld [vmem:[#allocation3 + $0x131] sm:$0xff] }
 0x239   : > { %v3800_v19 = vld [vmem:[#allocation3 + $0x109] sm:$0xff]  ;;  %v9748_v35 = vpack.c.bf16 %v3799_v55, %v3798_v27  ;;  %v3805_v58 = vld [vmem:[#allocation3 + $0x151] sm:$0xff] }
 0x23a   : > { %7523 = vmatmul.mubr.msk.bf16.gmra.mxu1 %vm3131_vm2, %v9681_v59  ;;  %7559 = vmatmul.mubr.msk.bf16.gmra.mxu0 %vm3131_vm2, %v9683_v3  ;;  %v9750_v53 = vpack.c.bf16 %v3801_v18, %v3800_v19  ;;  %v3802_v7 = vld [vmem:[#allocation3 + $0x129] sm:$0xff]  ;;  %v3809_v33 = vld [vmem:[#allocation3 + $0x191] sm:$0xff]  ;;  %v7884_v19 = vld [vmem:[%s10646_s5 + $0x60] sm:$0xff]  }
 0x23b   : > { %7602 = vmatprep.mubr.msk.bf16.mxu0 %vm3131_vm2, %v9420_v54  ;;  %7566 = vmatprep.mubr.msk.bf16.mxu1 %vm3131_vm2, %v3816_v11  ;;  %v3790_v54 = vld [vmem:[#allocation3 + $0x69] sm:$0xff]  ;;  %v9760_v10 = vpack.c.bf16 %v3803_v38, %v3802_v7  ;;  %v3807_v11 = vld [vmem:[#allocation3 + $0x171] sm:$0xff] }
 0x23c   : > { %v9722_v40 = vpack.c.bf16 %v3791_v43, %v3790_v54  ;;  %v3804_v48 = vld [vmem:[#allocation3 + $0x149] sm:$0xff]  ;;  %v3813_v43 = vld [vmem:[#allocation3 + $0x1d1] sm:$0xff] }
 0x23d   : > { %v9762_v24 = vpack.c.bf16 %v3805_v58, %v3804_v48  ;;  %v3806_v20 = vld [vmem:[#allocation3 + $0x169] sm:$0xff] }
 0x23e   : > { %v3808_v29 = vld [vmem:[#allocation3 + $0x189] sm:$0xff]  ;;  %v3827_v16 = vpack.c.bf16 %v3807_v11, %v3806_v20  ;;  %v7887_v20 = vld [vmem:[%s10646_s5 + $0x80] sm:$0xff]  }
 0x23f   : > { %v3828_v5 = vpack.c.bf16 %v3809_v33, %v3808_v29  ;;  %v3812_v54 = vld [vmem:[#allocation3 + $0x1c9] sm:$0xff] }
 0x240   : > { %v4121_v62 = vld [vmem:[#allocation3 + $0x20f] sm:$0xff] }
 0x241   : > { %v9784_v55 = vpack.c.bf16 %v4121_v62, %v4120_v1  ;;  %v7885_v18 = vld [vmem:[%s10646_s5 + $0x70] sm:$0xff]   ;;  %v5317_v58 = vld [vmem:[#allocation3 + $0x68] sm:$0xff] }
 0x242   : > { %7567 = vmatmul.mubr.msk.bf16.vlgmr.msra.gmra.mxu1 %vm3131_vm2, %v9692_v52  ;;  %7603 = vmatmul.mubr.msk.bf16.vlgmr.msra.gmra.mxu0 %vm3131_vm2, %v9426_v13  ;;  %v9720_v13 = vld [vmem:[%s10646_s5 + $0x78] sm:$0xff]   ;;  %v5318_v48 = vld [vmem:[#allocation3 + $0x70] sm:$0xff] }
 0x243   : > { %7570 = vmatprep.mubr.msk.bf16.mxu1 %vm3131_vm2, %v9694_v46  ;;  %7606 = vmatprep.mubr.msk.bf16.mxu0 %vm3131_vm2, %v9483_v41 }
 0x244   : > { %7635 = vmatpush3.bf16.msra.mxu1 %v9463_v63  ;;  %7671 = vmatpush3.bf16.msra.mxu0 %v9468_v42  ;;  %v9724_v63 = vpack.c.bf16 %v3793_v51, %v3792_v47  ;;  %v3794_v42 = vld [vmem:[#allocation3 + $0xa9] sm:$0xff]  ;;  %v3830_v51 = vpack.c.bf16 %v3813_v43, %v3812_v54 }
 0x245   : > { %7636 = vmatprep.subr.bf16.mxu1 %v7880_v31  ;;  %7672 = vmatprep.subr.bf16.mxu0 %v7881_v8  ;;  %v9736_v60 = vpack.c.bf16 %v3795_v17, %v3794_v42  ;;  %v3814_v42 = vld [vmem:[#allocation3 + $0x1e9] sm:$0xff]  ;;  %v3815_v17 = vld [vmem:[#allocation3 + $0x1f1] sm:$0xff] }
 0x246   : > { %v3831_v27 = vpack.c.bf16 %v3815_v17, %v3814_v42 }
 0x248   : > { %7637 = vmatpush3.bf16.msra.mxu1 %v7880_v31  ;;  %7673 = vmatpush3.bf16.msra.mxu0 %v7881_v8  ;;  %v3810_v31 = vld [vmem:[#allocation3 + $0x1a9] sm:$0xff]  ;;  %v3811_v8 = vld [vmem:[#allocation3 + $0x1b1] sm:$0xff] }
 0x249   : > { %7706 = vmatprep.subr.bf16.mxu1 %v9715_v14  ;;  %7742 = vmatprep.subr.bf16.mxu0 %v9720_v13  ;;  %v3829_v47 = vpack.c.bf16 %v3811_v8, %v3810_v31 }
 0x24a   : > { %7571 = vmatmul.mubr.msk.bf16.gmra.mxu1 %vm3131_vm2, %v9722_v40  ;;  %7607 = vmatmul.mubr.msk.bf16.gmra.mxu0 %vm3131_vm2, %v9489_v45 }
 0x24b   : > { %7574 = vmatprep.mubr.msk.bf16.mxu1 %vm3131_vm2, %v9724_v63  ;;  %7610 = vmatprep.mubr.msk.bf16.mxu0 %vm3131_vm2, %v9533_v0 }
 0x252   : > { %7575 = vmatmul.mubr.msk.bf16.gmra.mxu1 %vm3131_vm2, %v9736_v60  ;;  %7611 = vmatmul.mubr.msk.bf16.gmra.mxu0 %vm3131_vm2, %v9539_v28 }
 0x253   : > { %7578 = vmatprep.mubr.msk.bf16.mxu1 %vm3131_vm2, %v9738_v25  ;;  %7614 = vmatprep.mubr.msk.bf16.mxu0 %vm3131_vm2, %v9578_v57 }
 0x25a   : > { %7579 = vmatmul.mubr.msk.bf16.gmra.mxu1 %vm3131_vm2, %v9748_v35  ;;  %7615 = vmatmul.mubr.msk.bf16.gmra.mxu0 %vm3131_vm2, %v9584_v61 }
 0x25b   : > { %7582 = vmatprep.mubr.msk.bf16.mxu1 %vm3131_vm2, %v9750_v53  ;;  %7618 = vmatprep.mubr.msk.bf16.mxu0 %vm3131_vm2, %v9618_v44 }
 0x262   : > { %7583 = vmatmul.mubr.msk.bf16.gmra.mxu1 %vm3131_vm2, %v9760_v10  ;;  %7619 = vmatmul.mubr.msk.bf16.gmra.mxu0 %vm3131_vm2, %v9624_v23 }
 0x263   : > { %7586 = vmatprep.mubr.msk.bf16.mxu1 %vm3131_vm2, %v9762_v24  ;;  %7622 = vmatprep.mubr.msk.bf16.mxu0 %vm3131_vm2, %v9645_v36 }
 0x26a   : > { %7587 = vmatmul.mubr.msk.bf16.gmra.mxu1 %vm3131_vm2, %v3827_v16  ;;  %7623 = vmatmul.mubr.msk.bf16.gmra.mxu0 %vm3131_vm2, %v9651_v4 }
 0x26b   : > { %7590 = vmatprep.mubr.msk.bf16.mxu1 %vm3131_vm2, %v3828_v5  ;;  %7626 = vmatprep.mubr.msk.bf16.mxu0 %vm3131_vm2, %v9667_v12 }
 0x272   : > { %7591 = vmatmul.mubr.msk.bf16.gmra.mxu1 %vm3131_vm2, %v3829_v47  ;;  %7627 = vmatmul.mubr.msk.bf16.gmra.mxu0 %vm3131_vm2, %v9671_v32 }
 0x273   : > { %7594 = vmatprep.mubr.msk.bf16.mxu1 %vm3131_vm2, %v3830_v51  ;;  %7630 = vmatprep.mubr.msk.bf16.mxu0 %vm3131_vm2, %v9683_v3 }
 0x27a   : > { %7595 = vmatmul.mubr.msk.bf16.gmra.mxu1 %vm3131_vm2, %v3831_v27  ;;  %7631 = vmatmul.mubr.msk.bf16.gmra.mxu0 %vm3131_vm2, %v9784_v55 }
 0x27b   : > { %7638 = vmatprep.mubr.msk.bf16.mxu1 %vm3131_vm2, %v9418_v9  ;;  %7674 = vmatprep.mubr.msk.bf16.mxu0 %vm3131_vm2, %v9692_v52  ;;  %v7886_v9 = vld [vmem:[%s10646_s5 + $0x88] sm:$0xff]  }
 0x27c   : > { %v4732_v52 = vld [vmem:[#allocation3 + $0x209] sm:$0xff] }
 0x282   : > { %7639 = vmatmul.mubr.msk.bf16.vlgmr.msra.gmra.mxu1 %vm3131_vm2, %v9422_v26  ;;  %7675 = vmatmul.mubr.msk.bf16.vlgmr.msra.gmra.mxu0 %vm3131_vm2, %v9694_v46  ;;  %v5982_v26 = vld [vmem:[%s10642_s1] sm:$0x7] }
 0x283   : > { %7642 = vmatprep.mubr.msk.bf16.mxu1 %vm3131_vm2, %v9481_v49  ;;  %7678 = vmatprep.mubr.msk.bf16.mxu0 %vm3131_vm2, %v9722_v40  ;;  %v4427_v49 = vld [vmem:[#allocation3 + $0x210] sm:$0xff] }
 0x284   : > { %7707 = vmatpush3.bf16.msra.mxu1 %v9715_v14  ;;  %7743 = vmatpush3.bf16.msra.mxu0 %v9720_v13  ;;  %v4733_v14 = vld [vmem:[#allocation3 + $0x211] sm:$0xff] }
 0x285   : > { %7708 = vmatprep.subr.bf16.mxu1 %v7884_v19  ;;  %7744 = vmatprep.subr.bf16.mxu0 %v7885_v18  ;;  %v5010_v13 = vld [vmem:[#allocation3 + $0x4f] sm:$0xff] }
 0x286   : > { %v5316_v40 = vld [vmem:[#allocation3 + $0x50] sm:$0xff] }
 0x288   : > { %7709 = vmatpush3.bf16.msra.mxu1 %v7884_v19  ;;  %7745 = vmatpush3.bf16.msra.mxu0 %v7885_v18 }
 0x289   : > { %7778 = vmatprep.subr.bf16.mxu1 %v7886_v9  ;;  %7860 = vmatprep.subr.msk.bf16.mxu0 %vm624_vm0, %v5982_v26 }
 0x28a   : > { %7643 = vmatmul.mubr.msk.bf16.gmra.mxu1 %vm3131_vm2, %v9485_v21  ;;  %7679 = vmatmul.mubr.msk.bf16.gmra.mxu0 %vm3131_vm2, %v9724_v63  ;;  %v4426_v63 = vld [vmem:[#allocation3 + $0x208] sm:$0xff] }
 0x28b   : > { %7646 = vmatprep.mubr.msk.bf16.mxu1 %vm3131_vm2, %v9529_v6  ;;  %7682 = vmatprep.mubr.msk.bf16.mxu0 %vm3131_vm2, %v9736_v60  ;;  %v9859_v60 = vpack.c.bf16 %v4427_v49, %v4426_v63 }
 0x292   : > { %7647 = vmatmul.mubr.msk.bf16.gmra.mxu1 %vm3131_vm2, %v9535_v2  ;;  %7683 = vmatmul.mubr.msk.bf16.gmra.mxu0 %vm3131_vm2, %v9738_v25  ;;  %v9861_v25 = vpack.c.bf16 %v4733_v14, %v4732_v52 }
 0x293   : > { %7650 = vmatprep.mubr.msk.bf16.mxu1 %vm3131_vm2, %v9574_v30  ;;  %7686 = vmatprep.mubr.msk.bf16.mxu0 %vm3131_vm2, %v9748_v35  ;;  %v5009_v35 = vld [vmem:[#allocation3 + $0x47] sm:$0xff] }
 0x294   : > { %v5041_v7 = vpack.c.bf16 %v5010_v13, %v5009_v35 }
 0x29a   : > { %7651 = vmatmul.mubr.msk.bf16.gmra.mxu1 %vm3131_vm2, %v9580_v34  ;;  %7687 = vmatmul.mubr.msk.bf16.gmra.mxu0 %vm3131_vm2, %v9750_v53  ;;  %v5315_v53 = vld [vmem:[#allocation3 + $0x48] sm:$0xff] }
 0x29b   : > { %7654 = vmatprep.mubr.msk.bf16.mxu1 %vm3131_vm2, %v9615_v39  ;;  %7690 = vmatprep.mubr.msk.bf16.mxu0 %vm3131_vm2, %v9760_v10  ;;  %v5347_v38 = vpack.c.bf16 %v5316_v40, %v5315_v53  ;;  %v5348_v10 = vpack.c.bf16 %v5318_v48, %v5317_v58 }
 0x2a2   : > { %7655 = vmatmul.mubr.msk.bf16.gmra.mxu1 %vm3131_vm2, %v9620_v22  ;;  %7691 = vmatmul.mubr.msk.bf16.gmra.mxu0 %vm3131_vm2, %v9762_v24  ;;  %v6039_v24 = vsel %vm624_vm0, %v5982_v26, 0 }
 0x2a3   : > { %7658 = vmatprep.mubr.msk.bf16.mxu1 %vm3131_vm2, %v9643_v37  ;;  %7694 = vmatprep.mubr.msk.bf16.mxu0 %vm3131_vm2, %v3827_v16 }
 0x2aa   : > { %7659 = vmatmul.mubr.msk.bf16.gmra.mxu1 %vm3131_vm2, %v9647_v50  ;;  %7695 = vmatmul.mubr.msk.bf16.gmra.mxu0 %vm3131_vm2, %v3828_v5 }
 0x2ab   : > { %7662 = vmatprep.mubr.msk.bf16.mxu1 %vm3131_vm2, %v9665_v56  ;;  %7698 = vmatprep.mubr.msk.bf16.mxu0 %vm3131_vm2, %v3829_v47 }
 0x2b2   : > { %7663 = vmatmul.mubr.msk.bf16.gmra.mxu1 %vm3131_vm2, %v9669_v15  ;;  %7699 = vmatmul.mubr.msk.bf16.gmra.mxu0 %vm3131_vm2, %v3830_v51 }
 0x2b3   : > { %7666 = vmatprep.mubr.msk.bf16.mxu1 %vm3131_vm2, %v9681_v59  ;;  %7702 = vmatprep.mubr.msk.bf16.mxu0 %vm3131_vm2, %v3831_v27 }
 0x2ba   : > { %7667 = vmatmul.mubr.msk.bf16.gmra.mxu1 %vm3131_vm2, %v9859_v60  ;;  %7703 = vmatmul.mubr.msk.bf16.gmra.mxu0 %vm3131_vm2, %v9861_v25 }
 0x2bb   : > { %7710 = vmatprep.mubr.msk.bf16.mxu1 %vm3131_vm2, %v5041_v7  ;;  %7746 = vmatprep.mubr.msk.bf16.mxu0 %vm3131_vm2, %v5347_v38 }
 0x2c1   : > { %v7496_v11 = vpop.f32.mrf.mxu1 }
 0x2c2   : > { %v7532_v29 = vpop.f32.mrf.mxu0  ;;  %7711 = vmatmul.mubr.msk.bf16.vlgmr.msra.gmra.mxu1 %vm3131_vm2, %v9483_v41  ;;  %7747 = vmatmul.mubr.msk.bf16.vlgmr.msra.gmra.mxu0 %vm3131_vm2, %v5348_v10 }
 0x2c3   : > { %v9876_v33 = vadd.f32 %v7532_v29, %v7496_v11  ;;  %7714 = vmatprep.mubr.msk.bf16.mxu1 %vm3131_vm2, %v9489_v45  ;;  %7750 = vmatprep.mubr.msk.bf16.mxu0 %vm3131_vm2, %v9485_v21  ;;  %v3436_v16 = vpop.f32.mrf.mxu1 }
 0x2c4   : > { %v3657_v5 = vpop.f32.mrf.mxu0  ;;  %7779 = vmatpush3.bf16.msra.mxu1 %v7886_v9  ;;  %7815 = vmatpush3.bf16.msra.mxu0 %v6039_v24 }
 0x2c5   : > { %v9882_v31 = vadd.f32 %v3657_v5, %v3436_v16  ;;  %7780 = vmatprep.subr.bf16.mxu1 %v7887_v20  ;;  %v7497_v8 = vpop.f32.mrf.mxu1 }
 0x2c6   : > { %v7533_v54 = vpop.f32.mrf.mxu0 }
 0x2c7   : > { %v9884_v41 = vadd.f32 %v7533_v54, %v7497_v8  ;;  %v3439_v43 = vpop.f32.mrf.mxu1 }
 0x2c8   : > { %v3660_v47 = vpop.f32.mrf.mxu0  ;;  %7781 = vmatpush3.bf16.msra.mxu1 %v7887_v20 }
 0x2c9   : > { %v9886_v51 = vadd.f32 %v3660_v47, %v3439_v43 }
 0x2ca   : > { %v7500_v45 = vpop.f32.mrf.mxu1  ;;  %v7536_v42 = vpop.f32.mrf.mxu0  ;;  %7715 = vmatmul.mubr.msk.bf16.gmra.mxu1 %vm3131_vm2, %v9533_v0  ;;  %7751 = vmatmul.mubr.msk.bf16.gmra.mxu0 %vm3131_vm2, %v9529_v6 }
 0x2cb   : > { %v9892_v21 = vadd.f32 %v7536_v42, %v7500_v45  ;;  %7718 = vmatprep.mubr.msk.bf16.mxu1 %vm3131_vm2, %v9539_v28  ;;  %7754 = vmatprep.mubr.msk.bf16.mxu0 %vm3131_vm2, %v9535_v2 }
 0x2cc   : > { %v3452_v17 = vpop.f32.mrf.mxu1  ;;  %v3673_v62 = vpop.f32.mrf.mxu0 }
 0x2cd   : > { %v9898_v1 = vadd.f32 %v3673_v62, %v3452_v17 }
 0x2ce   : > { %v7501_v27 = vpop.f32.mrf.mxu1  ;;  %v7537_v19 = vpop.f32.mrf.mxu0 }
 0x2cf   : > { %v9900_v18 = vadd.f32 %v7537_v19, %v7501_v27 }
 0x2d0   : > { %v3455_v0 = vpop.f32.mrf.mxu1  ;;  %v3676_v9 = vpop.f32.mrf.mxu0 }
 0x2d1   : > { %v9902_v26 = vadd.f32 %v3676_v9, %v3455_v0 }
 0x2d2   : > { %v7504_v6 = vpop.f32.mrf.mxu1  ;;  %v7540_v49 = vpop.f32.mrf.mxu0  ;;  %7719 = vmatmul.mubr.msk.bf16.gmra.mxu1 %vm3131_vm2, %v9578_v57  ;;  %7755 = vmatmul.mubr.msk.bf16.gmra.mxu0 %vm3131_vm2, %v9574_v30 }
 0x2d3   : > { %v9908_v2 = vadd.f32 %v7540_v49, %v7504_v6  ;;  %7722 = vmatprep.mubr.msk.bf16.mxu1 %vm3131_vm2, %v9584_v61  ;;  %7758 = vmatprep.mubr.msk.bf16.mxu0 %vm3131_vm2, %v9580_v34 }
 0x2d4   : > { %v3468_v28 = vpop.f32.mrf.mxu1  ;;  %v3689_v52 = vpop.f32.mrf.mxu0 }
 0x2d5   : > { %v9914_v14 = vadd.f32 %v3689_v52, %v3468_v28  ;;  %v5040_v28 = vld [vmem:[#allocation3 + $0x22f] sm:$0xff] }
 0x2d6   : > { %v7505_v13 = vpop.f32.mrf.mxu1  ;;  %v7541_v40 = vpop.f32.mrf.mxu0  ;;  %v5345_v52 = vld [vmem:[#allocation3 + $0x228] sm:$0xff] }
 0x2d7   : > { %v9916_v63 = vadd.f32 %v7541_v40, %v7505_v13  ;;  %v5346_v13 = vld [vmem:[#allocation3 + $0x230] sm:$0xff] }
 0x2d8   : > { %v3471_v57 = vpop.f32.mrf.mxu1  ;;  %v3692_v35 = vpop.f32.mrf.mxu0 }
 0x2d9   : > { %v9918_v53 = vadd.f32 %v3692_v35, %v3471_v57 }
 0x2da   : > { %v7508_v30 = vpop.f32.mrf.mxu1  ;;  %v7544_v7 = vpop.f32.mrf.mxu0  ;;  %7723 = vmatmul.mubr.msk.bf16.gmra.mxu1 %vm3131_vm2, %v9618_v44  ;;  %7759 = vmatmul.mubr.msk.bf16.gmra.mxu0 %vm3131_vm2, %v9615_v39 }
 0x2db   : > { %v9924_v34 = vadd.f32 %v7544_v7, %v7508_v30  ;;  %7726 = vmatprep.mubr.msk.bf16.mxu1 %vm3131_vm2, %v9624_v23  ;;  %7762 = vmatprep.mubr.msk.bf16.mxu0 %vm3131_vm2, %v9620_v22  ;;  %v5362_v7 = vpack.c.bf16 %v5346_v13, %v5345_v52 }
 0x2dc   : > { %v3484_v61 = vpop.f32.mrf.mxu1  ;;  %v3705_v38 = vpop.f32.mrf.mxu0 }
 0x2dd   : > { %v9930_v48 = vadd.f32 %v3705_v38, %v3484_v61  ;;  %v7888_v38 = vld [vmem:[%s8166_s17] sm:$0xff] }
 0x2de   : > { %v7509_v58 = vpop.f32.mrf.mxu1  ;;  %v7545_v10 = vpop.f32.mrf.mxu0 }
 0x2df   : > { %v9932_v24 = vadd.f32 %v7545_v10, %v7509_v58  ;;  %v7889_v58 = vld [vmem:[%s8166_s17 + $0x8] sm:$0xff] }
 0x2e0   : > { %v3487_v44 = vpop.f32.mrf.mxu1  ;;  %v3708_v20 = vpop.f32.mrf.mxu0  ;;  %v5966_v10 = vpack.c.bf16 %v7889_v58, %v7888_v38  ;;  %v5627_v58 = vld [vmem:[#allocation3 + $0xa9] sm:$0xff] }
 0x2e1   : > { %v9934_v11 = vadd.f32 %v3708_v20, %v3487_v44 }
 0x2e2   : > { %v7512_v39 = vpop.f32.mrf.mxu1  ;;  %v7548_v29 = vpop.f32.mrf.mxu0  ;;  %7727 = vmatmul.mubr.msk.bf16.gmra.mxu1 %vm3131_vm2, %v9645_v36  ;;  %7763 = vmatmul.mubr.msk.bf16.gmra.mxu0 %vm3131_vm2, %v9643_v37 }
 0x2e3   : > { %v9940_v22 = vadd.f32 %v7548_v29, %v7512_v39  ;;  %7730 = vmatprep.mubr.msk.bf16.mxu1 %vm3131_vm2, %v9651_v4  ;;  %7766 = vmatprep.mubr.msk.bf16.mxu0 %vm3131_vm2, %v9647_v50 }
 0x2e4   : > { %v3500_v23 = vpop.f32.mrf.mxu1  ;;  %v3721_v16 = vpop.f32.mrf.mxu0 }
 0x2e5   : > { %v9946_v5 = vadd.f32 %v3721_v16, %v3500_v23 }
 0x2e6   : > { %v7513_v8 = vpop.f32.mrf.mxu1  ;;  %v7549_v54 = vpop.f32.mrf.mxu0 }
 0x2e7   : > { %v9948_v43 = vadd.f32 %v7549_v54, %v7513_v8  ;;  %v5623_v54 = vld [vmem:[#allocation3 + $0x69] sm:$0xff] }
 0x2e8   : > { %v3503_v36 = vpop.f32.mrf.mxu1  ;;  %v3724_v47 = vpop.f32.mrf.mxu0 }
 0x2e9   : > { %v9950_v45 = vadd.f32 %v3724_v47, %v3503_v36  ;;  %v5624_v36 = vld [vmem:[#allocation3 + $0x71] sm:$0xff] }
 0x2ea   : > { %v7516_v37 = vpop.f32.mrf.mxu1  ;;  %v7552_v42 = vpop.f32.mrf.mxu0  ;;  %7731 = vmatmul.mubr.msk.bf16.gmra.mxu1 %vm3131_vm2, %v9667_v12  ;;  %7767 = vmatmul.mubr.msk.bf16.gmra.mxu0 %vm3131_vm2, %v9665_v56 }
 0x2eb   : > { %v9956_v50 = vadd.f32 %v7552_v42, %v7516_v37  ;;  %7734 = vmatprep.mubr.msk.bf16.mxu1 %vm3131_vm2, %v9671_v32  ;;  %7770 = vmatprep.mubr.msk.bf16.mxu0 %vm3131_vm2, %v9669_v15  ;;  %v5039_v15 = vld [vmem:[#allocation3 + $0x227] sm:$0xff]  ;;  %v7890_v42 = vld [vmem:[%s8166_s17 + $0x10] sm:$0xff] }
 0x2ec   : > { %v3516_v4 = vpop.f32.mrf.mxu1  ;;  %v3737_v17 = vpop.f32.mrf.mxu0  ;;  %v5056_v30 = vpack.c.bf16 %v5040_v28, %v5039_v15  ;;  %v5654_v28 = vpack.c.bf16 %v5624_v36, %v5623_v54 }
 0x2ed   : > { %v9962_v62 = vadd.f32 %v3737_v17, %v3516_v4  ;;  %v7891_v4 = vld [vmem:[%s8166_s17 + $0x18] sm:$0xff] }
 0x2ee   : > { %v7517_v27 = vpop.f32.mrf.mxu1  ;;  %v7553_v19 = vpop.f32.mrf.mxu0  ;;  %v5967_v17 = vpack.c.bf16 %v7891_v4, %v7890_v42 }
 0x2ef   : > { %v9964_v0 = vadd.f32 %v7553_v19, %v7517_v27  ;;  %v5625_v27 = vld [vmem:[#allocation3 + $0x89] sm:$0xff]  ;;  %v5626_v19 = vld [vmem:[#allocation3 + $0x91] sm:$0xff] }
 0x2f0   : > { %v3519_v12 = vpop.f32.mrf.mxu1  ;;  %v3740_v9 = vpop.f32.mrf.mxu0  ;;  %v5655_v13 = vpack.c.bf16 %v5626_v19, %v5625_v27 }
 0x2f1   : > { %v9966_v6 = vadd.f32 %v3740_v9, %v3519_v12  ;;  %v7892_v9 = vld [vmem:[%s8166_s17 + $0x20] sm:$0xff] }
 0x2f2   : > { %v7520_v56 = vpop.f32.mrf.mxu1  ;;  %v7556_v49 = vpop.f32.mrf.mxu0  ;;  %7735 = vmatmul.mubr.msk.bf16.gmra.mxu1 %vm3131_vm2, %v9683_v3  ;;  %7771 = vmatmul.mubr.msk.bf16.gmra.mxu0 %vm3131_vm2, %v9681_v59 }
 0x2f3   : > { %v9972_v32 = vadd.f32 %v7556_v49, %v7520_v56  ;;  %7738 = vmatprep.mubr.msk.bf16.mxu1 %vm3131_vm2, %v9784_v55  ;;  %7774 = vmatprep.mubr.msk.bf16.mxu0 %vm3131_vm2, %v9859_v60 }
 0x2f4   : > { %v3532_v40 = vpop.f32.mrf.mxu1  ;;  %v3753_v57 = vpop.f32.mrf.mxu0 }
 0x2f5   : > { %v9978_v3 = vadd.f32 %v3753_v57, %v3532_v40 }
 0x2f6   : > { %v7521_v35 = vpop.f32.mrf.mxu1  ;;  %v7557_v59 = vpop.f32.mrf.mxu0 }
 0x2f7   : > { %v9980_v61 = vadd.f32 %v7557_v59, %v7521_v35 }
 0x2f8   : > { %v3535_v55 = vpop.f32.mrf.mxu1  ;;  %v3756_v44 = vpop.f32.mrf.mxu0 }
 0x2f9   : > { %v9984_v60 = vadd.f32 %v3756_v44, %v3535_v55 }
 0x2fa   : > { %v7524_v20 = vpop.f32.mrf.mxu1  ;;  %v7560_v39 = vpop.f32.mrf.mxu0  ;;  %7739 = vmatmul.mubr.msk.bf16.gmra.mxu1 %vm3131_vm2, %v5056_v30  ;;  %7775 = vmatmul.mubr.msk.bf16.gmra.mxu0 %vm3131_vm2, %v5362_v7 }
 0x2fb   : > { %v9988_v29 = vadd.f32 %v7560_v39, %v7524_v20  ;;  %7782 = vmatprep.mubr.msk.bf16.mxu1 %vm3131_vm2, %v9694_v46  ;;  %7816 = vmatprep.mubr.msk.bf16.mxu0 %vm339_vm1, %v5966_v10  ;;  %v7893_v46 = vld [vmem:[%s8166_s17 + $0x28] sm:$0xff]  ;;  %v5628_v10 = vld [vmem:[#allocation3 + $0xb1] sm:$0xff] }
 0x2fc   : > { %v3548_v23 = vpop.f32.mrf.mxu1  ;;  %v3769_v16 = vpop.f32.mrf.mxu0  ;;  %v5968_v56 = vpack.c.bf16 %v7893_v46, %v7892_v9  ;;  %v7894_v20 = vld [vmem:[%s8166_s17 + $0x30] sm:$0xff]  ;;  %v7895_v39 = vld [vmem:[%s8166_s17 + $0x38] sm:$0xff]  ;;  %v5656_v27 = vpack.c.bf16 %v5628_v10, %v5627_v58 }
 0x2fd   : > { %v9993_v8 = vadd.f32 %v3769_v16, %v3548_v23  ;;  %v5969_v23 = vpack.c.bf16 %v7895_v39, %v7894_v20  ;;  %v5630_v16 = vld [vmem:[#allocation3 + $0xd1] sm:$0xff]  ;;  %v7900_v20 = vld [vmem:[%s8166_s17 + $0x60] sm:$0xff]  ;;  %v7901_v39 = vld [vmem:[%s8166_s17 + $0x68] sm:$0xff] }
 0x2fe   : > { %v7525_v47 = vpop.f32.mrf.mxu1  ;;  %v7561_v37 = vpop.f32.mrf.mxu0  ;;  %v5634_v10 = vld [vmem:[#allocation3 + $0x111] sm:$0xff] }
 0x2ff   : > { %v9997_v12 = vadd.f32 %v7561_v37, %v7525_v47  ;;  %v7896_v47 = vld [vmem:[%s8166_s17 + $0x40] sm:$0xff]  ;;  %v7897_v37 = vld [vmem:[%s8166_s17 + $0x48] sm:$0xff] }
 0x300   : > { %v3551_v49 = vpop.f32.mrf.mxu1  ;;  %v3772_v15 = vpop.f32.mrf.mxu0  ;;  %v5970_v42 = vpack.c.bf16 %v7897_v37, %v7896_v47 }
 0x301   : > { %v10001_v52 = vadd.f32 %v3772_v15, %v3551_v49 }
 0x302   : > { %v7568_v40 = vpop.f32.mrf.mxu1  ;;  %v7604_v57 = vpop.f32.mrf.mxu0  ;;  %7783 = vmatmul.mubr.msk.bf16.vlgmr.msra.gmra.mxu1 %vm3131_vm2, %v5654_v28  ;;  %7817 = vmatmul.mubr.msk.bf16.vlgmr.msra.gmra.mxu0 %vm339_vm1, %v5967_v17 }
 0x303   : > { %v4060_v35 = vadd.f32 %v7568_v40, %v9876_v33  ;;  %7786 = vmatprep.mubr.msk.bf16.mxu1 %vm3131_vm2, %v5655_v13  ;;  %7820 = vmatprep.mubr.msk.bf16.mxu0 %vm339_vm1, %v5968_v56  ;;  %v5629_v33 = vld [vmem:[#allocation3 + $0xc9] sm:$0xff] }
 0x304   : > { %v3931_v59 = vpop.f32.mrf.mxu1  ;;  %v4237_v30 = vpop.f32.mrf.mxu0  ;;  %v5657_v9 = vpack.c.bf16 %v5630_v16, %v5629_v33  ;;  %v5631_v40 = vld [vmem:[#allocation3 + $0xe9] sm:$0xff] }
 0x305   : > { %v10008_v7 = vadd.f32 %v7604_v57, %v4060_v35  ;;  %v4058_v38 = vadd.f32 %v3931_v59, %v9882_v31  ;;  %v5632_v57 = vld [vmem:[#allocation3 + $0xf1] sm:$0xff] }
 0x306   : > { %v7569_v55 = vpop.f32.mrf.mxu1  ;;  %v7605_v44 = vpop.f32.mrf.mxu0 }
 0x307   : > { %v10013_v54 = vadd.f32 %v4237_v30, %v4058_v38  ;;  %v4061_v36 = vadd.f32 %v7569_v55, %v9884_v41  ;;  %v7898_v30 = vld [vmem:[%s8166_s17 + $0x50] sm:$0xff]  ;;  %v7899_v38 = vld [vmem:[%s8166_s17 + $0x58] sm:$0xff] }
 0x308   : > { %v3934_v4 = vpop.f32.mrf.mxu1  ;;  %v4240_v17 = vpop.f32.mrf.mxu0  ;;  %v5971_v58 = vpack.c.bf16 %v7899_v38, %v7898_v30  ;;  %v7904_v30 = vld [vmem:[%s8166_s17 + $0x80] sm:$0xff]  ;;  %v7905_v38 = vld [vmem:[%s8166_s17 + $0x88] sm:$0xff] }
 0x309   : > { %v10018_v31 = vadd.f32 %v7605_v44, %v4061_v36  ;;  %v4059_v19 = vadd.f32 %v3934_v4, %v9886_v51  ;;  %v5658_v36 = vpack.c.bf16 %v5632_v57, %v5631_v40  ;;  %v5638_v57 = vld [vmem:[#allocation3 + $0x151] sm:$0xff] }
 0x30a   : > { %v7572_v46 = vpop.f32.mrf.mxu1  ;;  %v7608_v56 = vpop.f32.mrf.mxu0  ;;  %7787 = vmatmul.mubr.msk.bf16.gmra.mxu1 %vm3131_vm2, %v5656_v27  ;;  %7821 = vmatmul.mubr.msk.bf16.gmra.mxu0 %vm339_vm1, %v5969_v23  ;;  %v5972_v23 = vpack.c.bf16 %v7901_v39, %v7900_v20 }
 0x30b   : > { %v10023_v41 = vadd.f32 %v4240_v17, %v4059_v19  ;;  %v4064_v49 = vadd.f32 %v7572_v46, %v9892_v21  ;;  %7790 = vmatprep.mubr.msk.bf16.mxu1 %vm3131_vm2, %v5657_v9  ;;  %7824 = vmatprep.mubr.msk.bf16.mxu0 %vm339_vm1, %v5970_v42  ;;  %v5633_v21 = vld [vmem:[#allocation3 + $0x109] sm:$0xff] }
 0x30c   : > { %v3947_v15 = vpop.f32.mrf.mxu1  ;;  %v4253_v51 = vpop.f32.mrf.mxu0  ;;  %v5659_v37 = vpack.c.bf16 %v5634_v10, %v5633_v21  ;;  %v5635_v46 = vld [vmem:[#allocation3 + $0x129] sm:$0xff] }
 0x30d   : > { %v10028_v28 = vadd.f32 %v7608_v56, %v4064_v49  ;;  %v4062_v13 = vadd.f32 %v3947_v15, %v9898_v1  ;;  %v5636_v56 = vld [vmem:[#allocation3 + $0x131] sm:$0xff] }
 0x30e   : > { %v7573_v35 = vpop.f32.mrf.mxu1  ;;  %v7609_v59 = vpop.f32.mrf.mxu0 }
 0x30f   : > { %v10033_v55 = vadd.f32 %v4253_v51, %v4062_v13  ;;  %v4065_v44 = vadd.f32 %v7573_v35, %v9900_v18  ;;  %v7902_v51 = vld [vmem:[%s8166_s17 + $0x70] sm:$0xff]  ;;  %v7903_v13 = vld [vmem:[%s8166_s17 + $0x78] sm:$0xff] }
 0x310   : > { %v3950_v33 = vpop.f32.mrf.mxu1  ;;  %v4256_v16 = vpop.f32.mrf.mxu0  ;;  %v5973_v40 = vpack.c.bf16 %v7903_v13, %v7902_v51  ;;  %v7908_v51 = vld [vmem:[%s8166_s17 + $0xa0] sm:$0xff]  ;;  %v7909_v13 = vld [vmem:[%s8166_s17 + $0xa8] sm:$0xff] }
 0x311   : > { %v10038_v1 = vadd.f32 %v7609_v59, %v4065_v44  ;;  %v4063_v47 = vadd.f32 %v3950_v33, %v9902_v26  ;;  %v5660_v44 = vpack.c.bf16 %v5636_v56, %v5635_v46  ;;  %v5642_v56 = vld [vmem:[#allocation3 + $0x191] sm:$0xff] }
 0x312   : > { %v7576_v42 = vpop.f32.mrf.mxu1  ;;  %v7612_v4 = vpop.f32.mrf.mxu0  ;;  %7791 = vmatmul.mubr.msk.bf16.gmra.mxu1 %vm3131_vm2, %v5658_v36  ;;  %7825 = vmatmul.mubr.msk.bf16.gmra.mxu0 %vm339_vm1, %v5971_v58  ;;  %v5974_v58 = vpack.c.bf16 %v7905_v38, %v7904_v30 }
 0x313   : > { %v10043_v18 = vadd.f32 %v4256_v16, %v4063_v47  ;;  %v4068_v17 = vadd.f32 %v7576_v42, %v9908_v2  ;;  %7794 = vmatprep.mubr.msk.bf16.mxu1 %vm3131_vm2, %v5659_v37  ;;  %7828 = vmatprep.mubr.msk.bf16.mxu0 %vm339_vm1, %v5972_v23  ;;  %v5637_v2 = vld [vmem:[#allocation3 + $0x149] sm:$0xff] }
 0x314   : > { %v3963_v27 = vpop.f32.mrf.mxu1  ;;  %v4269_v26 = vpop.f32.mrf.mxu0  ;;  %v5661_v39 = vpack.c.bf16 %v5638_v57, %v5637_v2  ;;  %v5639_v42 = vld [vmem:[#allocation3 + $0x169] sm:$0xff] }
 0x315   : > { %v10048_v19 = vadd.f32 %v7612_v4, %v4068_v17  ;;  %v4066_v9 = vadd.f32 %v3963_v27, %v9914_v14  ;;  %v5640_v4 = vld [vmem:[#allocation3 + $0x171] sm:$0xff] }
 0x316   : > { %v7577_v49 = vpop.f32.mrf.mxu1  ;;  %v7613_v15 = vpop.f32.mrf.mxu0 }
 0x317   : > { %v10053_v35 = vadd.f32 %v4269_v26, %v4066_v9  ;;  %v4069_v59 = vadd.f32 %v7577_v49, %v9916_v63  ;;  %v7906_v26 = vld [vmem:[%s8166_s17 + $0x90] sm:$0xff]  ;;  %v7907_v9 = vld [vmem:[%s8166_s17 + $0x98] sm:$0xff] }
 0x318   : > { %v3966_v21 = vpop.f32.mrf.mxu1  ;;  %v4272_v10 = vpop.f32.mrf.mxu0  ;;  %v5975_v46 = vpack.c.bf16 %v7907_v9, %v7906_v26  ;;  %v7912_v26 = vld [vmem:[%s8166_s17 + $0xc0] sm:$0xff]  ;;  %v7913_v9 = vld [vmem:[%s8166_s17 + $0xc8] sm:$0xff] }
 0x319   : > { %v10058_v14 = vadd.f32 %v7613_v15, %v4069_v59  ;;  %v4067_v20 = vadd.f32 %v3966_v21, %v9918_v53  ;;  %v5662_v59 = vpack.c.bf16 %v5640_v4, %v5639_v42  ;;  %v5646_v4 = vld [vmem:[#allocation3 + $0x1d1] sm:$0xff] }
 0x31a   : > { %v7580_v23 = vpop.f32.mrf.mxu1  ;;  %v7616_v33 = vpop.f32.mrf.mxu0  ;;  %7795 = vmatmul.mubr.msk.bf16.gmra.mxu1 %vm3131_vm2, %v5660_v44  ;;  %7829 = vmatmul.mubr.msk.bf16.gmra.mxu0 %vm339_vm1, %v5973_v40  ;;  %v5976_v40 = vpack.c.bf16 %v7909_v13, %v7908_v51 }
 0x31b   : > { %v10063_v63 = vadd.f32 %v4272_v10, %v4067_v20  ;;  %v4072_v16 = vadd.f32 %v7580_v23, %v9924_v34  ;;  %7798 = vmatprep.mubr.msk.bf16.mxu1 %vm3131_vm2, %v5661_v39  ;;  %7832 = vmatprep.mubr.msk.bf16.mxu0 %vm339_vm1, %v5974_v58  ;;  %v5641_v34 = vld [vmem:[#allocation3 + $0x189] sm:$0xff] }
 0x31c   : > { %v3979_v36 = vpop.f32.mrf.mxu1  ;;  %v4285_v53 = vpop.f32.mrf.mxu0  ;;  %v5663_v38 = vpack.c.bf16 %v5642_v56, %v5641_v34  ;;  %v5643_v23 = vld [vmem:[#allocation3 + $0x1a9] sm:$0xff] }
 0x31d   : > { %v10068_v47 = vadd.f32 %v7616_v33, %v4072_v16  ;;  %v4070_v37 = vadd.f32 %v3979_v36, %v9930_v48  ;;  %v5644_v33 = vld [vmem:[#allocation3 + $0x1b1] sm:$0xff] }
 0x31e   : > { %v7581_v17 = vpop.f32.mrf.mxu1  ;;  %v7617_v27 = vpop.f32.mrf.mxu0 }
 0x31f   : > { %v10073_v49 = vadd.f32 %v4285_v53, %v4070_v37  ;;  %v4073_v15 = vadd.f32 %v7581_v17, %v9932_v24  ;;  %v7910_v53 = vld [vmem:[%s8166_s17 + $0xb0] sm:$0xff]  ;;  %v7911_v37 = vld [vmem:[%s8166_s17 + $0xb8] sm:$0xff] }
 0x320   : > { %v3982_v2 = vpop.f32.mrf.mxu1  ;;  %v4288_v57 = vpop.f32.mrf.mxu0  ;;  %v5977_v42 = vpack.c.bf16 %v7911_v37, %v7910_v53 }
 0x321   : > { %v10078_v48 = vadd.f32 %v7617_v27, %v4073_v15  ;;  %v4071_v30 = vadd.f32 %v3982_v2, %v9934_v11  ;;  %v5664_v15 = vpack.c.bf16 %v5644_v33, %v5643_v23 }
 0x322   : > { %v7584_v58 = vpop.f32.mrf.mxu1  ;;  %v7620_v21 = vpop.f32.mrf.mxu0  ;;  %7799 = vmatmul.mubr.msk.bf16.gmra.mxu1 %vm3131_vm2, %v5662_v59  ;;  %7833 = vmatmul.mubr.msk.bf16.gmra.mxu0 %vm339_vm1, %v5975_v46  ;;  %v5978_v46 = vpack.c.bf16 %v7913_v9, %v7912_v26 }
 0x323   : > { %v10083_v24 = vadd.f32 %v4288_v57, %v4071_v30  ;;  %v4076_v10 = vadd.f32 %v7584_v58, %v9940_v22  ;;  %7802 = vmatprep.mubr.msk.bf16.mxu1 %vm3131_vm2, %v5663_v38  ;;  %7836 = vmatprep.mubr.msk.bf16.mxu0 %vm339_vm1, %v5976_v40  ;;  %v5645_v22 = vld [vmem:[#allocation3 + $0x1c9] sm:$0xff] }
 0x324   : > { %v3995_v44 = vpop.f32.mrf.mxu1  ;;  %v4301_v11 = vpop.f32.mrf.mxu0  ;;  %v5665_v13 = vpack.c.bf16 %v5646_v4, %v5645_v22  ;;  %v5647_v58 = vld [vmem:[#allocation3 + $0x1e9] sm:$0xff] }
 0x325   : > { %v10088_v20 = vadd.f32 %v7620_v21, %v4076_v10  ;;  %v4074_v39 = vadd.f32 %v3995_v44, %v9946_v5  ;;  %v5648_v21 = vld [vmem:[#allocation3 + $0x1f1] sm:$0xff] }
 0x326   : > { %v7585_v16 = vpop.f32.mrf.mxu1  ;;  %v7621_v36 = vpop.f32.mrf.mxu0  ;;  %v5666_v22 = vpack.c.bf16 %v5648_v21, %v5647_v58 }
 0x327   : > { %v10093_v17 = vadd.f32 %v4301_v11, %v4074_v39  ;;  %v4077_v27 = vadd.f32 %v7585_v16, %v9948_v43  ;;  %v7914_v11 = vld [vmem:[%s8166_s17 + $0xd0] sm:$0xff]  ;;  %v7915_v39 = vld [vmem:[%s8166_s17 + $0xd8] sm:$0xff]  ;;  %v7916_v16 = vld [vmem:[%s8166_s17 + $0xe0] sm:$0xff] }
 0x328   : > { %v3998_v34 = vpop.f32.mrf.mxu1  ;;  %v4304_v56 = vpop.f32.mrf.mxu0  ;;  %v5979_v23 = vpack.c.bf16 %v7915_v39, %v7914_v11 }
 0x329   : > { %v10098_v5 = vadd.f32 %v7621_v36, %v4077_v27  ;;  %v4075_v51 = vadd.f32 %v3998_v34, %v9950_v45  ;;  %v7917_v36 = vld [vmem:[%s8166_s17 + $0xe8] sm:$0xff]  ;;  %v5652_v34 = vld [vmem:[#allocation3 + $0x231] sm:$0xff] }
 0x32a   : > { %v7588_v40 = vpop.f32.mrf.mxu1  ;;  %v7624_v2 = vpop.f32.mrf.mxu0  ;;  %7803 = vmatmul.mubr.msk.bf16.gmra.mxu1 %vm3131_vm2, %v5664_v15  ;;  %7837 = vmatmul.mubr.msk.bf16.gmra.mxu0 %vm339_vm1, %v5977_v42  ;;  %v5980_v53 = vpack.c.bf16 %v7917_v36, %v7916_v16 }
 0x32b   : > { %v10103_v43 = vadd.f32 %v4304_v56, %v4075_v51  ;;  %v4080_v57 = vadd.f32 %v7588_v40, %v9956_v50  ;;  %7806 = vmatprep.mubr.msk.bf16.mxu1 %vm3131_vm2, %v5665_v13  ;;  %7840 = vmatprep.mubr.msk.bf16.mxu0 %vm339_vm1, %v5978_v46  ;;  %v5651_v46 = vld [vmem:[#allocation3 + $0x229] sm:$0xff] }
 0x32c   : > { %v4011_v45 = vpop.f32.mrf.mxu1  ;;  %v4317_v59 = vpop.f32.mrf.mxu0 }
 0x32d   : > { %v10108_v30 = vadd.f32 %v7624_v2, %v4080_v57  ;;  %v4078_v38 = vadd.f32 %v4011_v45, %v9962_v62  ;;  %v5668_v2 = vpack.c.bf16 %v5652_v34, %v5651_v46  ;;  %v7918_v57 = vld [vmem:[%s8166_s17 + $0xf0] sm:$0xff]  ;;  %v7919_v45 = vld [vmem:[%s8166_s17 + $0xf8] sm:$0xff] }
 0x32e   : > { %v7589_v10 = vpop.f32.mrf.mxu1  ;;  %v7625_v44 = vpop.f32.mrf.mxu0 }
 0x32f   : > { %v10113_v50 = vadd.f32 %v4317_v59, %v4078_v38  ;;  %v4081_v33 = vadd.f32 %v7589_v10, %v9964_v0  ;;  %v5981_v59 = vpack.c.bf16 %v7919_v45, %v7918_v57 }
 0x330   : > { %v4014_v37 = vpop.f32.mrf.mxu1  ;;  %v4320_v42 = vpop.f32.mrf.mxu0 }
 0x331   : > { %v10118_v4 = vadd.f32 %v7625_v44, %v4081_v33  ;;  %v4079_v62 = vadd.f32 %v4014_v37, %v9966_v6 }
 0x332   : > { %v7592_v27 = vpop.f32.mrf.mxu1  ;;  %v7628_v26 = vpop.f32.mrf.mxu0  ;;  %7807 = vmatmul.mubr.msk.bf16.gmra.mxu1 %vm3131_vm2, %v5666_v22  ;;  %7841 = vmatmul.mubr.msk.bf16.gmra.mxu0 %vm339_vm1, %v5979_v23 }
 0x333   : > { %v10123_v9 = vadd.f32 %v4320_v42, %v4079_v62  ;;  %v4084_v0 = vadd.f32 %v7592_v27, %v9972_v32  ;;  %7810 = vmatprep.mubr.msk.bf16.mxu1 %vm3131_vm2, %v9861_v25  ;;  %7844 = vmatprep.mubr.msk.bf16.mxu0 %vm339_vm1, %v5980_v53 }
 0x334   : > { %v4027_v6 = vpop.f32.mrf.mxu1  ;;  %v4333_v56 = vpop.f32.mrf.mxu0 }
 0x335   : > { %v10129_v15 = vadd.f32 %v7628_v26, %v4084_v0  ;;  %v4082_v51 = vadd.f32 %v4027_v6, %v9978_v3 }
 0x336   : > { %v7593_v13 = vpop.f32.mrf.mxu1  ;;  %v7629_v40 = vpop.f32.mrf.mxu0 }
 0x337   : > { %v10134_v32 = vadd.f32 %v4333_v56, %v4082_v51  ;;  %v4085_v25 = vadd.f32 %v7593_v13, %v9980_v61 }
 0x338   : > { %v4030_v38 = vpop.f32.mrf.mxu1  ;;  %v4336_v58 = vpop.f32.mrf.mxu0 }
 0x339   : > { %v10137_v21 = vadd.f32 %v7629_v40, %v4085_v25  ;;  %v4083_v10 = vadd.f32 %v4030_v38, %v9984_v60 }
 0x33a   : > { %v7596_v44 = vpop.f32.mrf.mxu1  ;;  %v7632_v11 = vpop.f32.mrf.mxu0  ;;  %7811 = vmatmul.mubr.msk.bf16.gmra.mxu1 %vm3131_vm2, %v5668_v2  ;;  %7845 = vmatmul.mubr.msk.bf16.gmra.mxu0 %vm339_vm1, %v5981_v59 }
 0x33b   : > { %v10142_v3 = vadd.f32 %v4336_v58, %v4083_v10  ;;  %v4088_v39 = vadd.f32 %v7596_v44, %v9988_v29 }
 0x33c   : > { %v4043_v23 = vpop.f32.mrf.mxu1  ;;  %v4349_v33 = vpop.f32.mrf.mxu0 }
 0x33d   : > { %v10145_v16 = vadd.f32 %v7632_v11, %v4088_v39  ;;  %v4086_v61 = vadd.f32 %v4043_v23, %v9993_v8 }
 0x33e   : > { %v7597_v36 = vpop.f32.mrf.mxu1  ;;  %v7633_v53 = vpop.f32.mrf.mxu0 }
 0x33f   : > { %v10148_v37 = vadd.f32 %v4349_v33, %v4086_v61  ;;  %v4089_v60 = vadd.f32 %v7597_v36, %v9997_v12 }
 0x340   : > { %v4046_v42 = vpop.f32.mrf.mxu1  ;;  %v4352_v22 = vpop.f32.mrf.mxu0 }
 0x341   : > { %v10151_v62 = vadd.f32 %v7633_v53, %v4089_v60  ;;  %v4087_v27 = vadd.f32 %v4046_v42, %v10001_v52 }
 0x342   : > { %v7640_v26 = vpop.f32.mrf.mxu1  ;;  %v7676_v29 = vpop.f32.mrf.mxu0 }
 0x343   : > { %v10154_v0 = vadd.f32 %v4352_v22, %v4087_v27  ;;  %v4672_v46 = vadd.f32 %v7640_v26, %v10008_v7 }
 0x344   : > { %v4543_v34 = vpop.f32.mrf.mxu1  ;;  %v4849_v8 = vpop.f32.mrf.mxu0 }
 0x345   : > { %v10157_v6 = vadd.f32 %v7676_v29, %v4672_v46  ;;  %v4670_v56 = vadd.f32 %v4543_v34, %v10013_v54 }
 0x346   : > { %v7641_v51 = vpop.f32.mrf.mxu1  ;;  %v7677_v12 = vpop.f32.mrf.mxu0 }
 0x347   : > { %v10160_v13 = vadd.f32 %v4849_v8, %v4670_v56  ;;  %v4673_v40 = vadd.f32 %v7641_v51, %v10018_v31 }
 0x348   : > { %v4546_v2 = vpop.f32.mrf.mxu1  ;;  %v4852_v52 = vpop.f32.mrf.mxu0 }
 0x349   : > { %v10163_v57 = vadd.f32 %v7677_v12, %v4673_v40  ;;  %v4671_v45 = vadd.f32 %v4546_v2, %v10023_v41 }
 0x34a   : > { %v7644_v59 = vpop.f32.mrf.mxu1  ;;  %v7680_v7 = vpop.f32.mrf.mxu0 }
 0x34b   : > { %v10166_v25 = vadd.f32 %v4852_v52, %v4671_v45  ;;  %v4676_v38 = vadd.f32 %v7644_v59, %v10028_v28 }
 0x34c   : > { %v4559_v58 = vpop.f32.mrf.mxu1  ;;  %v4865_v54 = vpop.f32.mrf.mxu0 }
 0x34d   : > { %v10169_v10 = vadd.f32 %v7680_v7, %v4676_v38  ;;  %v4674_v44 = vadd.f32 %v4559_v58, %v10033_v55 }
 0x34e   : > { %v7645_v11 = vpop.f32.mrf.mxu1  ;;  %v7681_v31 = vpop.f32.mrf.mxu0 }
 0x34f   : > { %v10172_v39 = vadd.f32 %v4865_v54, %v4674_v44  ;;  %v4677_v23 = vadd.f32 %v7645_v11, %v10038_v1 }
 0x350   : > { %v4562_v33 = vpop.f32.mrf.mxu1  ;;  %v4868_v41 = vpop.f32.mrf.mxu0 }
 0x351   : > { %v10175_v61 = vadd.f32 %v7681_v31, %v4677_v23  ;;  %v4675_v36 = vadd.f32 %v4562_v33, %v10043_v18 }
 0x352   : > { %v7648_v53 = vpop.f32.mrf.mxu1  ;;  %v7684_v28 = vpop.f32.mrf.mxu0 }
 0x353   : > { %v10178_v60 = vadd.f32 %v4868_v41, %v4675_v36  ;;  %v4680_v42 = vadd.f32 %v7648_v53, %v10048_v19 }
 0x354   : > { %v4575_v22 = vpop.f32.mrf.mxu1  ;;  %v4881_v55 = vpop.f32.mrf.mxu0 }
 0x355   : > { %v10181_v27 = vadd.f32 %v7684_v28, %v4680_v42  ;;  %v4678_v26 = vadd.f32 %v4575_v22, %v10053_v35 }
 0x356   : > { %v7649_v29 = vpop.f32.mrf.mxu1  ;;  %v7685_v1 = vpop.f32.mrf.mxu0 }
 0x357   : > { %v10184_v46 = vadd.f32 %v4881_v55, %v4678_v26  ;;  %v4681_v34 = vadd.f32 %v7649_v29, %v10058_v14 }
 0x358   : > { %v4578_v8 = vpop.f32.mrf.mxu1  ;;  %v4884_v18 = vpop.f32.mrf.mxu0 }
 0x359   : > { %v10187_v56 = vadd.f32 %v7685_v1, %v4681_v34  ;;  %v4679_v51 = vadd.f32 %v4578_v8, %v10063_v63 }
 0x35a   : > { %v7652_v12 = vpop.f32.mrf.mxu1  ;;  %v7688_v19 = vpop.f32.mrf.mxu0 }
 0x35b   : > { %v10190_v40 = vadd.f32 %v4884_v18, %v4679_v51  ;;  %v4684_v2 = vadd.f32 %v7652_v12, %v10068_v47 }
 0x35c   : > { %v4591_v52 = vpop.f32.mrf.mxu1  ;;  %v4897_v35 = vpop.f32.mrf.mxu0 }
 0x35d   : > { %v10193_v45 = vadd.f32 %v7688_v19, %v4684_v2  ;;  %v4682_v59 = vadd.f32 %v4591_v52, %v10073_v49 }
 0x35e   : > { %v7653_v7 = vpop.f32.mrf.mxu1  ;;  %v7689_v14 = vpop.f32.mrf.mxu0 }
 0x35f   : > { %v10196_v38 = vadd.f32 %v4897_v35, %v4682_v59  ;;  %v4685_v58 = vadd.f32 %v7653_v7, %v10078_v48 }
 0x360   : > { %v4594_v54 = vpop.f32.mrf.mxu1  ;;  %v4900_v63 = vpop.f32.mrf.mxu0 }
 0x361   : > { %v10199_v44 = vadd.f32 %v7689_v14, %v4685_v58  ;;  %v4683_v11 = vadd.f32 %v4594_v54, %v10083_v24 }
 0x362   : > { %v7656_v31 = vpop.f32.mrf.mxu1  ;;  %v7692_v47 = vpop.f32.mrf.mxu0 }
 0x363   : > { %v10202_v23 = vadd.f32 %v4900_v63, %v4683_v11  ;;  %v4688_v33 = vadd.f32 %v7656_v31, %v10088_v20 }
 0x364   : > { %v4607_v41 = vpop.f32.mrf.mxu1  ;;  %v4913_v49 = vpop.f32.mrf.mxu0 }
 0x365   : > { %v10205_v36 = vadd.f32 %v7692_v47, %v4688_v33  ;;  %v4686_v53 = vadd.f32 %v4607_v41, %v10093_v17 }
 0x366   : > { %v7657_v28 = vpop.f32.mrf.mxu1  ;;  %v7693_v48 = vpop.f32.mrf.mxu0 }
 0x367   : > { %v10208_v42 = vadd.f32 %v4913_v49, %v4686_v53  ;;  %v4689_v22 = vadd.f32 %v7657_v28, %v10098_v5 }
 0x368   : > { %v4610_v55 = vpop.f32.mrf.mxu1  ;;  %v4916_v24 = vpop.f32.mrf.mxu0 }
 0x369   : > { %v10211_v26 = vadd.f32 %v7693_v48, %v4689_v22  ;;  %v4687_v29 = vadd.f32 %v4610_v55, %v10103_v43 }
 0x36a   : > { %v7660_v1 = vpop.f32.mrf.mxu1  ;;  %v7696_v20 = vpop.f32.mrf.mxu0 }
 0x36b   : > { %v10214_v34 = vadd.f32 %v4916_v24, %v4687_v29  ;;  %v4692_v8 = vadd.f32 %v7660_v1, %v10108_v30 }
 0x36c   : > { %v4623_v18 = vpop.f32.mrf.mxu1  ;;  %v4929_v17 = vpop.f32.mrf.mxu0 }
 0x36d   : > { %v10217_v51 = vadd.f32 %v7696_v20, %v4692_v8  ;;  %v4690_v12 = vadd.f32 %v4623_v18, %v10113_v50 }
 0x36e   : > { %v7661_v19 = vpop.f32.mrf.mxu1  ;;  %v7697_v5 = vpop.f32.mrf.mxu0 }
 0x36f   : > { %v10220_v2 = vadd.f32 %v4929_v17, %v4690_v12  ;;  %v4693_v52 = vadd.f32 %v7661_v19, %v10118_v4 }
 0x370   : > { %v4626_v35 = vpop.f32.mrf.mxu1  ;;  %v4932_v43 = vpop.f32.mrf.mxu0 }
 0x371   : > { %v10223_v59 = vadd.f32 %v7697_v5, %v4693_v52  ;;  %v4691_v7 = vadd.f32 %v4626_v35, %v10123_v9 }
 0x372   : > { %v7664_v14 = vpop.f32.mrf.mxu1  ;;  %v7700_v30 = vpop.f32.mrf.mxu0 }
 0x373   : > { %v10226_v58 = vadd.f32 %v4932_v43, %v4691_v7  ;;  %v4696_v54 = vadd.f32 %v7664_v14, %v10129_v15 }
 0x374   : > { %v4639_v63 = vpop.f32.mrf.mxu1  ;;  %v4945_v50 = vpop.f32.mrf.mxu0 }
 0x375   : > { %v10229_v11 = vadd.f32 %v7700_v30, %v4696_v54  ;;  %v4694_v31 = vadd.f32 %v4639_v63, %v10134_v32 }
 0x376   : > { %v7665_v47 = vpop.f32.mrf.mxu1  ;;  %v7701_v4 = vpop.f32.mrf.mxu0 }
 0x377   : > { %v10232_v33 = vadd.f32 %v4945_v50, %v4694_v31  ;;  %v4697_v41 = vadd.f32 %v7665_v47, %v10137_v21 }
 0x378   : > { %v4642_v49 = vpop.f32.mrf.mxu1  ;;  %v4948_v9 = vpop.f32.mrf.mxu0 }
 0x379   : > { %v10235_v53 = vadd.f32 %v7701_v4, %v4697_v41  ;;  %v4695_v28 = vadd.f32 %v4642_v49, %v10142_v3 }
 0x37a   : > { %v7668_v48 = vpop.f32.mrf.mxu1  ;;  %v7704_v15 = vpop.f32.mrf.mxu0 }
 0x37b   : > { %v10238_v22 = vadd.f32 %v4948_v9, %v4695_v28  ;;  %v4700_v55 = vadd.f32 %v7668_v48, %v10145_v16 }
 0x37c   : > { %v4655_v24 = vpop.f32.mrf.mxu1  ;;  %v4961_v32 = vpop.f32.mrf.mxu0 }
 0x37d   : > { %v10241_v29 = vadd.f32 %v7704_v15, %v4700_v55  ;;  %v4698_v1 = vadd.f32 %v4655_v24, %v10148_v37 }
 0x37e   : > { %v7669_v20 = vpop.f32.mrf.mxu1  ;;  %v7705_v21 = vpop.f32.mrf.mxu0 }
 0x37f   : > { %v10244_v8 = vadd.f32 %v4961_v32, %v4698_v1  ;;  %v4701_v18 = vadd.f32 %v7669_v20, %v10151_v62 }
 0x380   : > { %v4658_v17 = vpop.f32.mrf.mxu1  ;;  %v4964_v3 = vpop.f32.mrf.mxu0 }
 0x381   : > { %v10247_v12 = vadd.f32 %v7705_v21, %v4701_v18  ;;  %v4699_v19 = vadd.f32 %v4658_v17, %v10154_v0 }
 0x382   : > { %v7712_v5 = vpop.f32.mrf.mxu1  ;;  %v7748_v16 = vpop.f32.mrf.mxu0 }
 0x383   : > { %v10250_v52 = vadd.f32 %v4964_v3, %v4699_v19  ;;  %v5285_v35 = vadd.f32 %v7712_v5, %v10157_v6 }
 0x384   : > { %v5156_v43 = vpop.f32.mrf.mxu1  ;;  %v5462_v37 = vpop.f32.mrf.mxu0 }
 0x385   : > { %v10253_v7 = vadd.f32 %v7748_v16, %v5285_v35  ;;  %v5283_v14 = vadd.f32 %v5156_v43, %v10160_v13 }
 0x386   : > { %v7713_v30 = vpop.f32.mrf.mxu1  ;;  %v7749_v62 = vpop.f32.mrf.mxu0 }
 0x387   : > { %v10256_v54 = vadd.f32 %v5462_v37, %v5283_v14  ;;  %v5286_v63 = vadd.f32 %v7713_v30, %v10163_v57 }
 0x388   : > { %v5159_v50 = vpop.f32.mrf.mxu1  ;;  %v5465_v0 = vpop.f32.mrf.mxu0 }
 0x389   : > { %v10259_v31 = vadd.f32 %v7749_v62, %v5286_v63  ;;  %v5284_v47 = vadd.f32 %v5159_v50, %v10166_v25 }
 0x38a   : > { %v7716_v4 = vpop.f32.mrf.mxu1  ;;  %v7752_v6 = vpop.f32.mrf.mxu0 }
 0x38b   : > { %v10262_v41 = vadd.f32 %v5465_v0, %v5284_v47  ;;  %v5289_v49 = vadd.f32 %v7716_v4, %v10169_v10 }
 0x38c   : > { %v5172_v9 = vpop.f32.mrf.mxu1  ;;  %v5478_v13 = vpop.f32.mrf.mxu0 }
 0x38d   : > { %v10265_v28 = vadd.f32 %v7752_v6, %v5289_v49  ;;  %v5287_v48 = vadd.f32 %v5172_v9, %v10172_v39 }
 0x38e   : > { %v7717_v15 = vpop.f32.mrf.mxu1  ;;  %v7753_v57 = vpop.f32.mrf.mxu0 }
 0x38f   : > { %v10268_v55 = vadd.f32 %v5478_v13, %v5287_v48  ;;  %v5290_v24 = vadd.f32 %v7717_v15, %v10175_v61 }
 0x390   : > { %v5175_v32 = vpop.f32.mrf.mxu1  ;;  %v5481_v25 = vpop.f32.mrf.mxu0 }
 0x391   : > { %v10271_v1 = vadd.f32 %v7753_v57, %v5290_v24  ;;  %v5288_v20 = vadd.f32 %v5175_v32, %v10178_v60 }
 0x392   : > { %v7720_v21 = vpop.f32.mrf.mxu1  ;;  %v7756_v10 = vpop.f32.mrf.mxu0 }
 0x393   : > { %v10274_v18 = vadd.f32 %v5481_v25, %v5288_v20  ;;  %v5293_v17 = vadd.f32 %v7720_v21, %v10181_v27  ;;  %v6203_v20 = vld [vmem:[%s10648_s7 + $0x8] sm:$0xff] }
 0x394   : > { %v5188_v3 = vpop.f32.mrf.mxu1  ;;  %v5494_v39 = vpop.f32.mrf.mxu0  ;;  %6314 = vmatprep.mubr.f32.mxu1 %v6203_v20 }
 0x395   : > { %v10277_v19 = vadd.f32 %v7756_v10, %v5293_v17  ;;  %v5291_v5 = vadd.f32 %v5188_v3, %v10184_v46 }
 0x396   : > { %v7721_v16 = vpop.f32.mrf.mxu1  ;;  %v7757_v61 = vpop.f32.mrf.mxu0 }
 0x397   : > { %v10280_v35 = vadd.f32 %v5494_v39, %v5291_v5  ;;  %v5294_v43 = vadd.f32 %v7721_v16, %v10187_v56 }
 0x398   : > { %v5191_v37 = vpop.f32.mrf.mxu1  ;;  %v5497_v60 = vpop.f32.mrf.mxu0 }
 0x399   : > { %v10283_v14 = vadd.f32 %v7757_v61, %v5294_v43  ;;  %v5292_v30 = vadd.f32 %v5191_v37, %v10190_v40 }
 0x39a   : > { %v7724_v62 = vpop.f32.mrf.mxu1  ;;  %v7760_v27 = vpop.f32.mrf.mxu0 }
 0x39b   : > { %v10286_v63 = vadd.f32 %v5497_v60, %v5292_v30  ;;  %v5297_v50 = vadd.f32 %v7724_v62, %v10193_v45 }
 0x39c   : > { %v5204_v0 = vpop.f32.mrf.mxu1  ;;  %v5510_v46 = vpop.f32.mrf.mxu0 }
 0x39d   : > { %v10289_v47 = vadd.f32 %v7760_v27, %v5297_v50  ;;  %v5295_v4 = vadd.f32 %v5204_v0, %v10196_v38 }
 0x39e   : > { %v7725_v6 = vpop.f32.mrf.mxu1  ;;  %v7761_v56 = vpop.f32.mrf.mxu0 }
 0x39f   : > { %v10292_v49 = vadd.f32 %v5510_v46, %v5295_v4  ;;  %v5298_v9 = vadd.f32 %v7725_v6, %v10199_v44 }
 0x3a0   : > { %v5207_v13 = vpop.f32.mrf.mxu1  ;;  %v5513_v40 = vpop.f32.mrf.mxu0 }
 0x3a1   : > { %v10295_v48 = vadd.f32 %v7761_v56, %v5298_v9  ;;  %v5296_v15 = vadd.f32 %v5207_v13, %v10202_v23 }
 0x3a2   : > { %v7728_v57 = vpop.f32.mrf.mxu1  ;;  %v7764_v45 = vpop.f32.mrf.mxu0 }
 0x3a3   : > { %v10298_v24 = vadd.f32 %v5513_v40, %v5296_v15  ;;  %v5301_v32 = vadd.f32 %v7728_v57, %v10205_v36 }
 0x3a4   : > { %v5220_v25 = vpop.f32.mrf.mxu1  ;;  %v5526_v38 = vpop.f32.mrf.mxu0 }
 0x3a5   : > { %v10304_v21 = vadd.f32 %v7764_v45, %v5301_v32  ;;  %v5299_v44 = vadd.f32 %v5220_v25, %v10208_v42 }
 0x3a6   : > { %v7729_v10 = vpop.f32.mrf.mxu1  ;;  %v7765_v17 = vpop.f32.mrf.mxu0 }
 0x3a7   : > { %10813 = vst [vmem:[#allocation11_spill] sm:$0xff] %v10304_v21  ;;  %v10307_v23 = vadd.f32 %v5526_v38, %v5299_v44  ;;  %v5302_v3 = vadd.f32 %v7729_v10, %v10211_v26 }
 0x3a8   : > { %v5223_v39 = vpop.f32.mrf.mxu1  ;;  %v5529_v5 = vpop.f32.mrf.mxu0 }
 0x3a9   : > { %10814 = vst [vmem:[#allocation29_spill] sm:$0xff] %v10307_v23  ;;  %v10310_v36 = vadd.f32 %v7765_v17, %v5302_v3  ;;  %v5300_v16 = vadd.f32 %v5223_v39, %v10214_v34 }
 0x3aa   : > { %v7732_v61 = vpop.f32.mrf.mxu1  ;;  %v7768_v43 = vpop.f32.mrf.mxu0 }
 0x3ab   : > { %10815 = vst [vmem:[#allocation51_spill] sm:$0xff] %v10310_v36  ;;  %v10313_v37 = vadd.f32 %v5529_v5, %v5300_v16  ;;  %v5305_v60 = vadd.f32 %v7732_v61, %v10217_v51 }
 0x3ac   : > { %v5236_v42 = vpop.f32.mrf.mxu1  ;;  %v5542_v30 = vpop.f32.mrf.mxu0 }
 0x3ad   : > { %10816 = vst [vmem:[#allocation5_spill] sm:$0xff] %v10313_v37  ;;  %v10316_v62 = vadd.f32 %v7768_v43, %v5305_v60  ;;  %v5303_v27 = vadd.f32 %v5236_v42, %v10220_v2 }
 0x3ae   : > { %v7733_v50 = vpop.f32.mrf.mxu1  ;;  %v7769_v26 = vpop.f32.mrf.mxu0 }
 0x3af   : > { %v10319_v0 = vadd.f32 %v5542_v30, %v5303_v27  ;;  %v5306_v46 = vadd.f32 %v7733_v50, %v10223_v59 }
 0x3b0   : > { %v5239_v4 = vpop.f32.mrf.mxu1  ;;  %v5545_v34 = vpop.f32.mrf.mxu0 }
 0x3b1   : > { %10817 = vst [vmem:[#allocation4_spill] sm:$0xff] %v10319_v0  ;;  %v10322_v6 = vadd.f32 %v7769_v26, %v5306_v46  ;;  %v5304_v56 = vadd.f32 %v5239_v4, %v10226_v58 }
 0x3b2   : > { %v7736_v9 = vpop.f32.mrf.mxu1  ;;  %v7772_v51 = vpop.f32.mrf.mxu0 }
 0x3b3   : > { %v10325_v13 = vadd.f32 %v5545_v34, %v5304_v56  ;;  %v5309_v40 = vadd.f32 %v7736_v9, %v10229_v11 }
 0x3b4   : > { %v5252_v15 = vpop.f32.mrf.mxu1  ;;  %v5558_v2 = vpop.f32.mrf.mxu0 }
 0x3b5   : > { %v10328_v57 = vadd.f32 %v7772_v51, %v5309_v40  ;;  %v5307_v45 = vadd.f32 %v5252_v15, %v10232_v33 }
 0x3b6   : > { %v7737_v32 = vpop.f32.mrf.mxu1  ;;  %v7773_v59 = vpop.f32.mrf.mxu0 }
 0x3b7   : > { %v10331_v25 = vadd.f32 %v5558_v2, %v5307_v45  ;;  %v5310_v38 = vadd.f32 %v7737_v32, %v10235_v53 }
 0x3b8   : > { %v5255_v20 = vpop.f32.mrf.mxu1  ;;  %v5561_v58 = vpop.f32.mrf.mxu0 }
 0x3b9   : > { %v10334_v44 = vadd.f32 %v7773_v59, %v5310_v38  ;;  %v5308_v10 = vadd.f32 %v5255_v20, %v10238_v22 }
 0x3ba   : > { %v7740_v17 = vpop.f32.mrf.mxu1  ;;  %v7776_v11 = vpop.f32.mrf.mxu0 }
 0x3bb   : > { %v10337_v3 = vadd.f32 %v5561_v58, %v5308_v10  ;;  %v5313_v39 = vadd.f32 %v7740_v17, %v10241_v29  ;;  %v10356_v29 = vld [vmem:[%s10643_s2] ss:$0 sm:$0xff] }
 0x3bc   : > { %v5268_v5 = vpop.f32.mrf.mxu1  ;;  %v5574_v33 = vpop.f32.mrf.mxu0 }
 0x3bd   : > { %v10340_v16 = vadd.f32 %v7776_v11, %v5313_v39  ;;  %v5311_v61 = vadd.f32 %v5268_v5, %v10244_v8  ;;  %v10361_v8 = vld [vmem:[%s10647_s6] ss:$0 sm:$0xff] }
 0x3be   : > { %v10343_v43 = vpop.f32.mrf.mxu1  ;;  %v10345_v53 = vpop.f32.mrf.mxu0 }
 0x3bf   : > { %v10347_v60 = vadd.f32 %v5574_v33, %v5311_v61 }
 0x3c0   : > { %v10349_v42 = vpop.f32.mrf.mxu1  ;;  %v10351_v22 = vpop.f32.mrf.mxu0 }
 0x3c2   : > { %v7784_v30 = vpop.f32.mrf.mxu1  ;;  %v7818_v27 = vpop.f32.mrf.mxu0 }
 0x3c3   : > { %v5897_v50 = vadd.f32 %v7784_v30, %v10253_v7  ;;  %v6084_v26 = vadd.f32 %v7818_v27, %v10356_v29 }
 0x3c4   : > { %v5768_v46 = vpop.f32.mrf.mxu1  ;;  %v6075_v4 = vpop.f32.mrf.mxu0 }
 0x3c5   : > { %v5936_v34 = vadd.f32 %v10361_v8, %v5897_v50  ;;  %v5895_v56 = vadd.f32 %v5768_v46, %v10256_v54  ;;  %v6076_v2 = vadd.f32 %v10356_v29, %v6075_v4 }
 0x3c6   : > { %v7785_v9 = vpop.f32.mrf.mxu1  ;;  %v7819_v51 = vpop.f32.mrf.mxu0 }
 0x3c7   : > { %v10367_v40 = vadd.f32 %v6084_v26, %v5936_v34  ;;  %v5934_v15 = vadd.f32 %v10361_v8, %v5895_v56  ;;  %v5898_v45 = vadd.f32 %v7785_v9, %v10259_v31  ;;  %v6087_v20 = vadd.f32 %v7819_v51, %v10356_v29 }
 0x3c8   : > { %v5771_v32 = vpop.f32.mrf.mxu1  ;;  %v6078_v7 = vpop.f32.mrf.mxu0 }
 0x3c9   : > { %10818 = vst [vmem:[#allocation8_spill] sm:$0xff] %v10367_v40  ;;  %v10372_v59 = vadd.f32 %v6076_v2, %v5934_v15  ;;  %v5937_v38 = vadd.f32 %v10361_v8, %v5898_v45  ;;  %v5896_v54 = vadd.f32 %v5771_v32, %v10262_v41  ;;  %v6079_v58 = vadd.f32 %v10356_v29, %v6078_v7 }
 0x3ca   : > { %v7788_v10 = vpop.f32.mrf.mxu1  ;;  %v7822_v17 = vpop.f32.mrf.mxu0 }
 0x3cb   : > { %10819 = vst [vmem:[#allocation31_spill] sm:$0xff] %v10372_v59  ;;  %v10378_v11 = vadd.f32 %v6087_v20, %v5937_v38  ;;  %v5935_v39 = vadd.f32 %v10361_v8, %v5896_v54  ;;  %v5901_v31 = vadd.f32 %v7788_v10, %v10265_v28  ;;  %v6100_v5 = vadd.f32 %v7822_v17, %v10356_v29 }
 0x3cc   : > { %v5784_v33 = vpop.f32.mrf.mxu1  ;;  %v6091_v61 = vpop.f32.mrf.mxu0 }
 0x3cd   : > { %10820 = vst [vmem:[#allocation53_spill] sm:$0xff] %v10378_v11  ;;  %v10383_v30 = vadd.f32 %v6079_v58, %v5935_v39  ;;  %v5940_v27 = vadd.f32 %v10361_v8, %v5901_v31  ;;  %v5899_v41 = vadd.f32 %v5784_v33, %v10268_v55  ;;  %v6092_v34 = vadd.f32 %v10356_v29, %v6091_v61 }
 0x3ce   : > { %v7789_v50 = vpop.f32.mrf.mxu1  ;;  %v7823_v26 = vpop.f32.mrf.mxu0 }
 0x3cf   : > { %10821 = vst [vmem:[#allocation75_spill] sm:$0xff] %v10383_v30  ;;  %v10387_v46 = vadd.f32 %v6100_v5, %v5940_v27  ;;  %v5938_v4 = vadd.f32 %v10361_v8, %v5899_v41  ;;  %v5902_v28 = vadd.f32 %v7789_v50, %v10271_v1  ;;  %v6103_v2 = vadd.f32 %v7823_v26, %v10356_v29 }
 0x3d0   : > { %v5787_v56 = vpop.f32.mrf.mxu1  ;;  %v6094_v9 = vpop.f32.mrf.mxu0 }
 0x3d1   : > { %10822 = vst [vmem:[#allocation9_spill] sm:$0xff] %v10387_v46  ;;  %v10392_v51 = vadd.f32 %v6092_v34, %v5938_v4  ;;  %v5941_v15 = vadd.f32 %v10361_v8, %v5902_v28  ;;  %v5900_v55 = vadd.f32 %v5787_v56, %v10274_v18  ;;  %v6095_v1 = vadd.f32 %v10356_v29, %v6094_v9 }
 0x3d2   : > { %v10397_v45 = vpop.f32.mrf.mxu1  ;;  %v10399_v32 = vpop.f32.mrf.mxu0 }
 0x3d3   : > { %10823 = vst [vmem:[#allocation13_spill] sm:$0xff] %v10392_v51  ;;  %v10401_v7 = vadd.f32 %v6103_v2, %v5941_v15  ;;  %v5939_v38 = vadd.f32 %v10361_v8, %v5900_v55 }
 0x3d4   : > { %v10405_v20 = vpop.f32.mrf.mxu1  ;;  %v10407_v54 = vpop.f32.mrf.mxu0 }
 0x3d5   : > { %10824 = vst [vmem:[#allocation33_spill] sm:$0xff] %v10401_v7  ;;  %10825 = vst [vmem:[#allocation14_spill] sm:$0xff] %v10407_v54  ;;  %v10409_v58 = vadd.f32 %v6095_v1, %v5939_v38 }
 0x3d6   : > { %v7793_v10 = vpop.f32.mrf.mxu1  ;;  %v10411_v17 = vpop.f32.mrf.mxu0 }
 0x3d7   : > { %10826 = vst [vmem:[#allocation35_spill] sm:$0xff] %v10409_v58 }
 0x3d8   : > { %v10413_v18 = vpop.f32.mrf.mxu1  ;;  %v10415_v39 = vpop.f32.mrf.mxu0 }
 0x3da   : > { %v7796_v31 = vpop.f32.mrf.mxu1  ;;  %v7830_v5 = vpop.f32.mrf.mxu0 }
 0x3dc   : > { %v5816_v33 = vpop.f32.mrf.mxu1  ;;  %v10417_v61 = vpop.f32.mrf.mxu0 }
 0x3de   : > { %v7797_v27 = vpop.f32.mrf.mxu1  ;;  %v7831_v41 = vpop.f32.mrf.mxu0 }
 0x3e0   : > { %v5819_v50 = vpop.f32.mrf.mxu1  ;;  %v10419_v26 = vpop.f32.mrf.mxu0 }
 0x3e2   : > { %v10421_v4 = vpop.f32.mrf.mxu1  ;;  %v10423_v34 = vpop.f32.mrf.mxu0 }
 0x3e3   : > { %10827 = vst [vmem:[#allocation55_spill] sm:$0xff] %v10421_v4  ;;  %10828 = vst [vmem:[#allocation16_spill] sm:$0xff] %v10423_v34  ;;  %v5312_v4 = vadd.f32 %v10349_v42, %v10250_v52  ;;  %v5908_v52 = vadd.f32 %v5819_v50, %v10298_v24  ;;  %v6135_v24 = vadd.f32 %v7831_v41, %v10356_v29 }
 0x3e4   : > { %v10425_v28 = vpop.f32.mrf.mxu1  ;;  %v10427_v56 = vpop.f32.mrf.mxu0  ;;  %v5904_v41 = vadd.f32 %v10413_v18, %v10286_v63  ;;  %v6124_v50 = vadd.f32 %v10356_v29, %v10417_v61  ;;  %v5903_v63 = vadd.f32 %v10405_v20, %v10280_v35  ;;  %v6119_v18 = vadd.f32 %v10411_v17, %v10356_v29 }
 0x3e5   : > { %10829 = vst [vmem:[#allocation15_spill] sm:$0xff] %v10425_v28  ;;  %10830 = vst [vmem:[#allocation38_spill] sm:$0xff] %v10427_v56  ;;  %v5618_v54 = vadd.f32 %v10351_v22, %v5312_v4 }
 0x3e6   : > { %v10429_v9 = vpop.f32.mrf.mxu1  ;;  %v10431_v15 = vpop.f32.mrf.mxu0 }
 0x3e7   : > { %10831 = vst [vmem:[#allocation57_spill] sm:$0xff] %v10429_v9  ;;  %10832 = vst [vmem:[#allocation59_spill] sm:$0xff] %v10431_v15 }
 0x3e8   : > { %v10433_v2 = vpop.f32.mrf.mxu1  ;;  %v10435_v55 = vpop.f32.mrf.mxu0 }
 0x3e9   : > { %10833 = vst [vmem:[#allocation78_spill] sm:$0xff] %v10433_v2  ;;  %10834 = vst [vmem:[#allocation80_spill] sm:$0xff] %v10435_v55 }
 0x3ea   : > { %v10437_v38 = vpop.f32.mrf.mxu1  ;;  %v10439_v1 = vpop.f32.mrf.mxu0 }
 0x3eb   : > { %10835 = vst [vmem:[#allocation41_spill] sm:$0xff] %v10439_v1 }
 0x3ec   : > { %v10441_v59 = vpop.f32.mrf.mxu1  ;;  %v10443_v30 = vpop.f32.mrf.mxu0 }
 0x3ed   : > { %10836 = vst [vmem:[#allocation18_spill] sm:$0xff] %v10441_v59  ;;  %10837 = vst [vmem:[#allocation42_spill] sm:$0xff] %v10443_v30  ;;  %v5314_v30 = vadd.f32 %v10343_v43, %v10247_v12  ;;  %v5909_v59 = vadd.f32 %v7796_v31, %v10289_v47  ;;  %v5906_v12 = vadd.f32 %v7793_v10, %v10283_v14 }
 0x3ee   : > { %v10445_v40 = vpop.f32.mrf.mxu1  ;;  %v10447_v11 = vpop.f32.mrf.mxu0  ;;  %v6132_v14 = vadd.f32 %v7830_v5, %v10356_v29 }
 0x3ef   : > { %10838 = vst [vmem:[#allocation61_spill] sm:$0xff] %v10447_v11  ;;  %v5620_v11 = vadd.f32 %v10345_v53, %v5314_v30  ;;  %v5948_v22 = vadd.f32 %v10361_v8, %v5909_v59  ;;  %v5947_v59 = vadd.f32 %v10361_v8, %v5908_v52 }
 0x3f0   : > { %v10449_v56 = vpop.f32.mrf.mxu1  ;;  %v10451_v51 = vpop.f32.mrf.mxu0 }
 0x3f1   : > { %10839 = vst [vmem:[#allocation82_spill] sm:$0xff] %v10451_v51  ;;  %v5910_v51 = vadd.f32 %v7797_v27, %v10295_v48 }
 0x3f2   : > { %v7808_v58 = vpop.f32.mrf.mxu1  ;;  %v7842_v15 = vpop.f32.mrf.mxu0 }
 0x3f3   : > { %v5921_v31 = vadd.f32 %v7808_v58, %v10328_v57 }
 0x3f4   : > { %v10453_v28 = vpop.f32.mrf.mxu1  ;;  %v10455_v55 = vpop.f32.mrf.mxu0 }
 0x3f5   : > { %10840 = vst [vmem:[#allocation19_spill] sm:$0xff] %v10455_v55  ;;  %v5949_v55 = vadd.f32 %v10361_v8, %v5910_v51 }
 0x3f6   : > { %v7809_v23 = vpop.f32.mrf.mxu1  ;;  %v7843_v46 = vpop.f32.mrf.mxu0 }
 0x3f7   : > { %v6233_v10 = vadd.f32 %v6135_v24, %v5949_v55  ;;  %v5919_v55 = vadd.f32 %v10453_v28, %v10331_v25  ;;  %v5943_v28 = vadd.f32 %v10361_v8, %v5904_v41  ;;  %v10856_v41 = vld [vmem:[#allocation16_spill] sm:$0xff] }
 0x3f8   : > { %v5867_v34 = vpop.f32.mrf.mxu1  ;;  %v10457_v2 = vpop.f32.mrf.mxu0 }
 0x3f9   : > { %v5958_v20 = vadd.f32 %v10361_v8, %v5919_v55  ;;  %v6175_v17 = vadd.f32 %v10356_v29, %v10457_v2  ;;  %v10859_v55 = vld [vmem:[#allocation15_spill] sm:$0xff] }
 0x3fa   : > { %v7812_v37 = vpop.f32.mrf.mxu1  ;;  %v7846_v7 = vpop.f32.mrf.mxu0 }
 0x3fb   : > { %v5925_v21 = vadd.f32 %v7812_v37, %v10340_v16  ;;  %v6196_v37 = vadd.f32 %v7846_v7, %v10356_v29 }
 0x3fc   : > { %v5880_v9 = vpop.f32.mrf.mxu1  ;;  %v6187_v36 = vpop.f32.mrf.mxu0 }
 0x3fd   : > { %v5964_v48 = vadd.f32 %v10361_v8, %v5925_v21  ;;  %v5923_v53 = vadd.f32 %v5880_v9, %v10347_v60  ;;  %v5922_v21 = vadd.f32 %v7809_v23, %v10334_v44  ;;  %v5905_v60 = vadd.f32 %v10397_v45, %v10277_v19 }
 0x3fe   : > { %v7813_v0 = vpop.f32.mrf.mxu1  ;;  %v7847_v1 = vpop.f32.mrf.mxu0  ;;  %v5945_v23 = vadd.f32 %v10361_v8, %v5906_v12  ;;  %v6232_v44 = vadd.f32 %v6132_v14, %v5948_v22  ;;  %v6127_v19 = vadd.f32 %v10356_v29, %v10419_v26  ;;  %v6188_v57 = vadd.f32 %v10356_v29, %v6187_v36  ;;  %v10845_v22 = vld [vmem:[#allocation18_spill] sm:$0xff] }
 0x3ff   : > { %v5926_v43 = vadd.f32 %v7813_v0, %v5620_v11  ;;  %v6199_v42 = vadd.f32 %v7847_v1, %v10356_v29  ;;  %v5907_v0 = vadd.f32 %v5816_v33, %v10292_v49  ;;  %v6248_v49 = vadd.f32 %v6196_v37, %v5964_v48 }
 0x400   : > { %v5883_v16 = vpop.f32.mrf.mxu1  ;;  %v6190_v11 = vpop.f32.mrf.mxu0  ;;  %v5962_v5 = vadd.f32 %v10361_v8, %v5923_v53  ;;  %v5961_v45 = vadd.f32 %v10361_v8, %v5922_v21  ;;  %v6231_v4 = vadd.f32 %v6127_v19, %v5947_v59  ;;  %v6180_v9 = vadd.f32 %v7842_v15, %v10356_v29  ;;  %v10848_v21 = vld [vmem:[#allocation57_spill] sm:$0xff]  ;;  %v10854_v19 = vld [vmem:[#allocation78_spill] sm:$0xff] }
 0x401   : > { %v5965_v47 = vadd.f32 %v10361_v8, %v5926_v43  ;;  %v5924_v30 = vadd.f32 %v5883_v16, %v5618_v54  ;;  %v6116_v54 = vadd.f32 %v10399_v32, %v10356_v29  ;;  %v6191_v33 = vadd.f32 %v10356_v29, %v6190_v11  ;;  %v10842_v16 = vld [vmem:[#allocation14_spill] sm:$0xff]  ;;  %v10847_v11 = vld [vmem:[#allocation51_spill] sm:$0xff] }
 0x402   : > { %v5946_v27 = vadd.f32 %v10361_v8, %v5907_v0  ;;  %v5920_v32 = vadd.f32 %v5867_v34, %v10337_v3  ;;  %v5960_v26 = vadd.f32 %v10361_v8, %v5921_v31  ;;  %v6183_v3 = vadd.f32 %v7843_v46, %v10356_v29 }
 0x403   : > { %v6249_v51 = vadd.f32 %v6199_v42, %v5965_v47  ;;  %v5963_v7 = vadd.f32 %v10361_v8, %v5924_v30  ;;  %v6246_v36 = vadd.f32 %v6188_v57, %v5962_v5  ;;  %v5944_v34 = vadd.f32 %v10361_v8, %v5905_v60  ;;  %v10843_v47 = vld [vmem:[#allocation41_spill] sm:$0xff]  ;;  %v10844_v30 = vld [vmem:[#allocation4_spill] sm:$0xff]  ;;  %v10851_v5 = vld [vmem:[#allocation82_spill] sm:$0xff] }
 0x404   : > { %v6230_v61 = vadd.f32 %v6124_v50, %v5946_v27  ;;  %v5918_v15 = vadd.f32 %v10445_v40, %v10322_v6  ;;  %v6245_v1 = vadd.f32 %v6183_v3, %v5961_v45  ;;  %v5959_v25 = vadd.f32 %v10361_v8, %v5920_v32  ;;  %v10853_v27 = vld [vmem:[#allocation5_spill] sm:$0xff]  ;;  %v10855_v32 = vld [vmem:[#allocation42_spill] sm:$0xff] }
 0x405   : > { %7128 = vmatprep.subr.mxu1 %v6249_v51  ;;  %v6247_v58 = vadd.f32 %v6191_v33, %v5963_v7  ;;  %v6229_v46 = vadd.f32 %v6119_v18, %v5945_v23  ;;  %v5917_v12 = vadd.f32 %v10437_v38, %v10316_v62  ;;  %v6244_v35 = vadd.f32 %v6180_v9, %v5960_v26  ;;  %v10841_v62 = vld [vmem:[#allocation19_spill] sm:$0xff]  ;;  %v10852_v23 = vld [vmem:[#allocation33_spill] sm:$0xff] }
 0x406   : > { %7129 = vmatpush3.msra.mxu1 %v6233_v10  ;;  %v6228_v43 = vadd.f32 %v6116_v54, %v5944_v34  ;;  %v5942_v6 = vadd.f32 %v10361_v8, %v5903_v63  ;;  %v6111_v40 = vadd.f32 %v10356_v29, %v10415_v39  ;;  %v5957_v52 = vadd.f32 %v10361_v8, %v5918_v15  ;;  %v10849_v54 = vld [vmem:[#allocation11_spill] sm:$0xff]  ;;  %v10858_v26 = vld [vmem:[#allocation29_spill] sm:$0xff] }
 0x407   : > { %7130 = vmatprep.subr.mxu1 %v6248_v49  ;;  %v5916_v48 = vadd.f32 %v10449_v56, %v10325_v13  ;;  %v6172_v38 = vadd.f32 %v10356_v29, %v10841_v62  ;;  %v6243_v37 = vadd.f32 %v6175_v17, %v5959_v25  ;;  %v6108_v2 = vadd.f32 %v10356_v29, %v10842_v16  ;;  %v10846_v13 = vld [vmem:[#allocation61_spill] sm:$0xff]  ;;  %v10850_v10 = vld [vmem:[#allocation55_spill] sm:$0xff] }
 0x408   : > { %7131 = vmatpush3.msra.mxu1 %v6232_v44  ;;  %v6227_v53 = vadd.f32 %v6111_v40, %v5943_v28  ;;  %v6164_v42 = vadd.f32 %v10843_v47, %v10356_v29  ;;  %v5956_v39 = vadd.f32 %v10361_v8, %v5917_v12  ;;  %v5915_v14 = vadd.f32 %v10845_v22, %v10844_v30  ;;  %v10861_v18 = vld [vmem:[#allocation35_spill] sm:$0xff]  ;;  %v10863_v28 = vld [vmem:[#allocation80_spill] sm:$0xff]  ;;  %v6215_v30 = vld [vmem:[%s10648_s7 + $0x68] sm:$0xff] }
 0x409   : > { %7132 = vmatprep.subr.mxu1 %v6247_v58  ;;  %v6167_v56 = vadd.f32 %v10846_v13, %v10356_v29  ;;  %v6242_v0 = vadd.f32 %v6172_v38, %v5958_v20  ;;  %v6226_v24 = vadd.f32 %v6108_v2, %v5942_v6  ;;  %v5914_v51 = vadd.f32 %v10848_v21, %v10847_v11  ;;  %v10865_v20 = vld [vmem:[#allocation38_spill] sm:$0xff]  ;;  %v10866_v6 = vld [vmem:[#allocation8_spill] sm:$0xff]  ;;  %v10868_v62 = vld [vmem:[#allocation31_spill] sm:$0xff] }
 0x40a   : > { %7133 = vmatpush3.msra.mxu1 %v6231_v4  ;;  %v5955_v60 = vadd.f32 %v10361_v8, %v5916_v48  ;;  %v5913_v59 = vadd.f32 %v10850_v10, %v10849_v54  ;;  %v6240_v31 = vadd.f32 %v6164_v42, %v5956_v39  ;;  %v5954_v49 = vadd.f32 %v10361_v8, %v5915_v14  ;;  %v10857_v4 = vld [vmem:[#allocation9_spill] sm:$0xff]  ;;  %v6205_v48 = vld [vmem:[%s10648_s7 + $0x18] sm:$0xff]  ;;  %v6208_v2 = vld [vmem:[%s10648_s7 + $0x30] sm:$0xff] }
 0x40b   : > { %7134 = vmatprep.subr.mxu1 %v6246_v36  ;;  %v6241_v7 = vadd.f32 %v6167_v56, %v5957_v52  ;;  %v6159_v33 = vadd.f32 %v10356_v29, %v10851_v5  ;;  %v5953_v44 = vadd.f32 %v10361_v8, %v5914_v51  ;;  %v5912_v45 = vadd.f32 %v10854_v19, %v10853_v27  ;;  %v10860_v36 = vld [vmem:[#allocation59_spill] sm:$0xff]  ;;  %v6207_v38 = vld [vmem:[%s10648_s7 + $0x28] sm:$0xff]  ;;  %v6210_v47 = vld [vmem:[%s10648_s7 + $0x40] sm:$0xff] }
 0x40c   : > { %7135 = vmatpush3.msra.mxu1 %v6230_v61  ;;  %v6156_v57 = vadd.f32 %v10356_v29, %v10855_v32  ;;  %v6148_v50 = vadd.f32 %v10856_v41, %v10356_v29  ;;  %v5952_v9 = vadd.f32 %v10361_v8, %v5913_v59  ;;  %v5911_v3 = vadd.f32 %v10859_v55, %v10858_v26  ;;  %v10867_v52 = vld [vmem:[#allocation75_spill] sm:$0xff]  ;;  %v6212_v39 = vld [vmem:[%s10648_s7 + $0x50] sm:$0xff]  ;;  %v6214_v22 = vld [vmem:[%s10648_s7 + $0x60] sm:$0xff] }
 0x40d   : > { %7136 = vmatprep.subr.mxu1 %v6245_v1  ;;  %v6239_v58 = vadd.f32 %v6159_v33, %v5955_v60  ;;  %v6151_v34 = vadd.f32 %v10860_v36, %v10356_v29  ;;  %v5951_v15 = vadd.f32 %v10361_v8, %v5912_v45  ;;  %v10862_v1 = vld [vmem:[#allocation13_spill] sm:$0xff]  ;;  %v6143_v12 = vadd.f32 %v10356_v29, %v10863_v28  ;;  %v6209_v16 = vld [vmem:[%s10648_s7 + $0x38] sm:$0xff]  ;;  %v6216_v13 = vld [vmem:[%s10648_s7 + $0x70] sm:$0xff] }
 0x40e   : > { %7137 = vmatpush3.msra.mxu1 %v6229_v46  ;;  %v6238_v63 = vadd.f32 %v6156_v57, %v5954_v49  ;;  %v6236_v25 = vadd.f32 %v6148_v50, %v5952_v9  ;;  %v5950_v46 = vadd.f32 %v10361_v8, %v5911_v3  ;;  %v6140_v17 = vadd.f32 %v10356_v29, %v10865_v20  ;;  %v6202_v8 = vld [vmem:[%s10648_s7] sm:$0xff]  ;;  %v6204_v29 = vld [vmem:[%s10648_s7 + $0x10] sm:$0xff]  ;;  %v6213_v42 = vld [vmem:[%s10648_s7 + $0x58] sm:$0xff] }
 0x40f   : > { %7138 = vmatprep.subr.mxu1 %v6244_v35  ;;  %v6237_v61 = vadd.f32 %v6151_v34, %v5953_v44  ;;  %v10864_v35 = vld [vmem:[#allocation53_spill] sm:$0xff]  ;;  %v6217_v14 = vld [vmem:[%s10648_s7 + $0x78] sm:$0xff] }
 0x410   : > { %7139 = vmatpush3.msra.mxu1 %v6228_v43  ;;  %v6235_v43 = vadd.f32 %v6143_v12, %v5951_v15  ;;  %v6234_v40 = vadd.f32 %v6140_v17, %v5950_v46 }
 0x411   : > { %7140 = vmatprep.subr.mxu1 %v6243_v37  ;;  %v6206_v37 = vld [vmem:[%s10648_s7 + $0x20] sm:$0xff] }
 0x412   : > { %7141 = vmatpush3.msra.mxu1 %v6227_v53  ;;  %v6211_v53 = vld [vmem:[%s10648_s7 + $0x48] sm:$0xff] }
 0x413   : > { %7142 = vmatprep.subr.mxu1 %v6242_v0 }
 0x414   : > { %7143 = vmatpush3.msra.mxu1 %v6226_v24 }
 0x415   : > { %7144 = vmatprep.subr.mxu1 %v6241_v7 }
 0x416   : > { %7145 = vmatpush3.msra.mxu1 %v10852_v23 }
 0x417   : > { %7146 = vmatprep.subr.mxu1 %v6240_v31 }
 0x418   : > { %7147 = vmatpush3.msra.mxu1 %v10857_v4 }
 0x419   : > { %7148 = vmatprep.subr.mxu1 %v6239_v58 }
 0x41a   : > { %7149 = vmatpush3.msra.mxu1 %v10861_v18 }
 0x41b   : > { %7150 = vmatprep.subr.mxu1 %v6238_v63 }
 0x41c   : > { %7151 = vmatpush3.msra.mxu1 %v10862_v1 }
 0x41d   : > { %7152 = vmatprep.subr.mxu1 %v6237_v61 }
 0x41e   : > { %7153 = vmatpush3.msra.mxu1 %v10864_v35 }
 0x41f   : > { %7154 = vmatprep.subr.mxu1 %v6236_v25 }
 0x420   : > { %7155 = vmatpush3.msra.mxu1 %v10866_v6 }
 0x421   : > { %7156 = vmatprep.subr.mxu1 %v6235_v43 }
 0x422   : > { %7157 = vmatpush3.msra.mxu1 %v10867_v52 }
 0x423   : > { %7158 = vmatprep.subr.mxu1 %v6234_v40 }
 0x424   : > { %7159 = vmatpush3.msra.mxu1 %v10868_v62 }
 0x425   : > { %6315 = vmatmul.mubr.f32.vlgmr.msra.gmra.mxu1 %v6202_v8 }
 0x426   : > { %6319 = vmatprep.mubr.f32.mxu1 %v6205_v48 }
 0x429   : > { %6320 = vmatmul.mubr.f32.gmra.mxu1 %v6204_v29 }
 0x42a   : > { %6324 = vmatprep.mubr.f32.mxu1 %v6207_v38 }
 0x42d   : > { %6325 = vmatmul.mubr.f32.gmra.mxu1 %v6206_v37 }
 0x42e   : > { %6329 = vmatprep.mubr.f32.mxu1 %v6209_v16 }
 0x431   : > { %6330 = vmatmul.mubr.f32.gmra.mxu1 %v6208_v2 }
 0x432   : > { %6334 = vmatprep.mubr.f32.mxu1 %v6211_v53 }
 0x435   : > { %6335 = vmatmul.mubr.f32.gmra.mxu1 %v6210_v47 }
 0x436   : > { %6339 = vmatprep.mubr.f32.mxu1 %v6213_v42 }
 0x439   : > { %6340 = vmatmul.mubr.f32.gmra.mxu1 %v6212_v39 }
 0x43a   : > { %6344 = vmatprep.mubr.f32.mxu1 %v6215_v30 }
 0x43d   : > { %6345 = vmatmul.mubr.f32.gmra.mxu1 %v6214_v22 }
 0x43e   : > { %6349 = vmatprep.mubr.f32.mxu1 %v6217_v14 }
 0x441   : > { %6350 = vmatmul.mubr.f32.gmra.mxu1 %v6216_v13 }
 0x4e5   : > { %v7160_v56 = vpop.f32.mrf.mxu1 }
 0x4e7   : > { %v7161_v0 = vpop.f32.mrf.mxu1 }
 0x4e8   : > { %v7162_v24 = vadd.f32 %v7161_v0, %v7160_v56 }
 0x4e9   : > { %v7163_v11 = vpop.f32.mrf.mxu1 }
 0x4ea   : > { %6355 = vst.msk [vmem:[%s10620_s11] sm:$0xff] %vm3131_vm2, %v7162_v24 }
 0x4eb   : > { %v7164_v21 = vpop.f32.mrf.mxu1 }
 0x4ec   : > { %v7165_v51 = vadd.f32 %v7164_v21, %v7163_v11 }
 0x4ed   : > { %v7166_v7 = vpop.f32.mrf.mxu1 }
 0x4ee   : > { %6356 = vst.msk [vmem:[%s10620_s11 + $0x8] sm:$0xff] %vm3131_vm2, %v7165_v51 }
 0x4ef   : > { %v7167_v60 = vpop.f32.mrf.mxu1 }
 0x4f0   : > { %v7168_v54 = vadd.f32 %v7167_v60, %v7166_v7 }
 0x4f1   : > { %v7169_v10 = vpop.f32.mrf.mxu1 }
 0x4f2   : > { %6357 = vst.msk [vmem:[%s10620_s11 + $0x10] sm:$0xff] %vm3131_vm2, %v7168_v54 }
 0x4f3   : > { %v7170_v59 = vpop.f32.mrf.mxu1 }
 0x4f4   : > { %v7171_v31 = vadd.f32 %v7170_v59, %v7169_v10 }
 0x4f5   : > { %v7172_v49 = vpop.f32.mrf.mxu1 }
 0x4f6   : > { %6358 = vst.msk [vmem:[%s10620_s11 + $0x18] sm:$0xff] %vm3131_vm2, %v7171_v31 }
 0x4f7   : > { %v7173_v5 = vpop.f32.mrf.mxu1 }
 0x4f8   : > { %v7174_v33 = vadd.f32 %v7173_v5, %v7172_v49 }
 0x4f9   : > { %v7175_v23 = vpop.f32.mrf.mxu1 }
 0x4fa   : > { %6359 = vst.msk [vmem:[%s10620_s11 + $0x20] sm:$0xff] %vm3131_vm2, %v7174_v33 }
 0x4fb   : > { %v7176_v44 = vpop.f32.mrf.mxu1 }
 0x4fc   : > { %v7177_v27 = vadd.f32 %v7176_v44, %v7175_v23 }
 0x4fd   : > { %v7178_v19 = vpop.f32.mrf.mxu1 }
 0x4fe   : > { %6360 = vst.msk [vmem:[%s10620_s11 + $0x28] sm:$0xff] %vm3131_vm2, %v7177_v27 }
 0x4ff   : > { %v7179_v45 = vpop.f32.mrf.mxu1 }
 0x500   : > { %v7180_v32 = vadd.f32 %v7179_v45, %v7178_v19 }
 0x501   : > { %v7181_v57 = vpop.f32.mrf.mxu1 }
 0x502   : > { %6361 = vst.msk [vmem:[%s10620_s11 + $0x30] sm:$0xff] %vm3131_vm2, %v7180_v32 }
 0x503   : > { %v7182_v58 = vpop.f32.mrf.mxu1 }
 0x504   : > { %v7183_v41 = vadd.f32 %v7182_v58, %v7181_v57 }
 0x506   : > { %6362 = vst.msk [vmem:[%s10620_s11 + $0x38] sm:$0xff] %vm3131_vm2, %v7183_v41 }
 0x507 PF: > { %s18_s27 = sadd.s32 1, %s7926_s27  }
 0x508   : > { %p15_p4 = scmp.ge.s32.totalorder %s18_s27, 4  }
 0x50a   :  { %17 = sbr.rel (!%p15_p4) target bundleno = 1 (0x1), region = 102 }

</bundles_post_ra>
